<compile_context>
chip_gen: v7x
topology: tpu7x:2x2x1
jax: 0.10.0
libtpu: 0.0.40
codegen_flags: <defaults>
</compile_context>

<pallas_src>
import math

import jax
import jax.numpy as jnp
from jax.experimental import pallas as pl
from jax.experimental.pallas import tpu as pltpu


# bf16 weights for the big matmuls (lin1 / latent): halves the dominant HBM
# weight stream and enables the bf16 MXU path.  Conv weights stay f32 (tiny).
MATMUL_WEIGHT_DTYPE = jnp.bfloat16

_KSIZE = 4
_STRIDE = 2
_PAD = 1
_LANE = 128


def _gelu_exact(y):
    # exact GELU (torch.nn.GELU default): 0.5 * y * (1 + erf(y / sqrt(2)))
    inv_sqrt2 = jnp.float32(1.0 / math.sqrt(2.0))
    return jnp.float32(0.5) * y * (jnp.float32(1.0) + jax.lax.erf(y * inv_sqrt2))


def _round_up(n, m):
    return ((n + m - 1) // m) * m


# ----------------------------------------------------------------------------
# Kernel 1: fused (patches @ W + b) + exact GELU for the conv layers.
# Grid tiles M (= B*Hout*Wout); weight / bias blocks are grid-invariant.
# ----------------------------------------------------------------------------
def _conv_mm_bias_gelu_kernel(x_ref, w_ref, b_ref, o_ref):
    y = jnp.dot(x_ref[...], w_ref[...], preferred_element_type=jnp.float32)
    y = y + b_ref[...]                                  # (1, N) broadcast over M
    o_ref[...] = _gelu_exact(y).astype(o_ref.dtype)


def _pick_tile_m(M, K, N, itemsize=4, budget=4 << 20):
    """Largest multiple-of-8 divisor of M whose double-buffered (in+out)
    blocks stay under `budget` bytes; full M if it already fits."""
    per_row = 2 * (K + N) * itemsize          # double-buffered in + out bytes/row
    if M * per_row <= budget:
        return M
    if M % 8 != 0:
        return M                               # (8,128) rule: must equal full dim
    cap = max(8, budget // per_row)
    tile = 8
    for t in range(8, min(M, cap) + 1, 8):
        if M % t == 0:
            tile = t
    return tile


def conv_matmul_bias_gelu(x, w, b):
    """x: (M, K) patches, w: (K, N), b: (1, N) -> (M, N) f32 with GELU."""
    M, K = x.shape
    K2, N = w.shape
    assert K == K2, (K, K2)
    tile_m = _pick_tile_m(M, K, N)
    grid_m = M // tile_m
    cost = pl.CostEstimate(
        flops=2 * M * K * N + 8 * M * N,
        transcendentals=M * N,
        bytes_accessed=(M * K * x.dtype.itemsize + K * N * w.dtype.itemsize
                        + N * 4 + M * N * 4),
    )
    return pl.pallas_call(
        _conv_mm_bias_gelu_kernel,
        out_shape=jax.ShapeDtypeStruct((M, N), jnp.float32),
        grid=(grid_m,),
        in_specs=[
            pl.BlockSpec((tile_m, K), lambda i: (i, 0)),
            pl.BlockSpec((K, N), lambda i: (0, 0)),
            pl.BlockSpec((1, N), lambda i: (0, 0)),
        ],
        out_specs=pl.BlockSpec((tile_m, N), lambda i: (i, 0)),
        compiler_params=pltpu.CompilerParams(dimension_semantics=("parallel",)),
        cost_estimate=cost,
    )(x, w, b)


# ----------------------------------------------------------------------------
# Kernel 2: fused lin1 (K-tiled, f32 VMEM accumulator) + GELU + latent layer.
# The 2048x1024 bf16 lin1 weight streams in (1024, 1024) blocks (2 MiB), so
# only 2 grid steps are needed and the weight DMA pipelines.  Activations are
# cast to bf16 in-kernel so the dots take the bf16 MXU path; accumulation is
# f32.  The latent GEMM (padded to 128 output lanes) runs on the VMEM-resident
# hidden activations at the last grid step: no extra launch, no HBM round-trip
# for `h`, and an unmasked lane-dense z store.
# ----------------------------------------------------------------------------
def _lin1_latent_kernel(x_ref, w1_ref, b1_ref, wl_ref, bl_ref, z_ref, acc_ref):
    k = pl.program_id(0)

    @pl.when(k == 0)
    def _init():
        acc_ref[...] = jnp.zeros_like(acc_ref)

    xb = x_ref[...].astype(jnp.bfloat16)
    acc_ref[...] += jnp.dot(xb, w1_ref[...], preferred_element_type=jnp.float32)

    @pl.when(k == pl.num_programs(0) - 1)
    def _finalize():
        h = _gelu_exact(acc_ref[...] + b1_ref[...])
        hb = h.astype(jnp.bfloat16)
        z = jnp.dot(hb, wl_ref[...], preferred_element_type=jnp.float32)
        z_ref[...] = (z + bl_ref[...]).astype(z_ref.dtype)


def _pick_tile_k(Kin, max_tile=1024):
    if Kin <= max_tile:
        return Kin
    for t in range(min(max_tile, (Kin // 128) * 128), 127, -128):
        if Kin % t == 0:
            return t
    return Kin


def lin1_latent(x, w1, b1, wl, bl):
    B, Kin = x.shape
    K2, Hdim = w1.shape
    H2, Npad = wl.shape
    assert Kin == K2 and Hdim == H2, (x.shape, w1.shape, wl.shape)
    tile_k = _pick_tile_k(Kin)
    grid_k = Kin // tile_k
    cost = pl.CostEstimate(
        flops=2 * B * Kin * Hdim + 2 * B * Hdim * Npad + 8 * B * Hdim,
        transcendentals=B * Hdim,
        bytes_accessed=(B * Kin * x.dtype.itemsize + Kin * Hdim * w1.dtype.itemsize
                        + Hdim * 4 + Hdim * Npad * wl.dtype.itemsize
                        + Npad * 4 + B * Npad * 4),
    )
    return pl.pallas_call(
        _lin1_latent_kernel,
        out_shape=jax.ShapeDtypeStruct((B, Npad), jnp.float32),
        grid=(grid_k,),
        in_specs=[
            pl.BlockSpec((B, tile_k), lambda k: (0, k)),
            pl.BlockSpec((tile_k, Hdim), lambda k: (k, 0)),
            pl.BlockSpec((1, Hdim), lambda k: (0, 0)),
            pl.BlockSpec((Hdim, Npad), lambda k: (0, 0)),
            pl.BlockSpec((1, Npad), lambda k: (0, 0)),
        ],
        out_specs=pl.BlockSpec((B, Npad), lambda k: (0, 0)),
        scratch_shapes=[pltpu.VMEM((B, Hdim), jnp.float32)],
        compiler_params=pltpu.CompilerParams(
            dimension_semantics=("arbitrary",),
            vmem_limit_bytes=32 * 1024 * 1024),
        cost_estimate=cost,
    )(x, w1, b1, wl, bl)


# ----------------------------------------------------------------------------
# Transpose-free NHWC im2col glue for Conv2d(kernel=4, stride=2, padding=1).
# ----------------------------------------------------------------------------
def _im2col_nhwc(x):
    """x: (B, H, W, C) NHWC -> (B*Hout*Wout, 16*C) patches; element order (kh, kw, c)."""
    B, H, W, C = x.shape
    Hout = (H + 2 * _PAD - _KSIZE) // _STRIDE + 1
    Wout = (W + 2 * _PAD - _KSIZE) // _STRIDE + 1
    xp = jnp.pad(x, ((0, 0), (_PAD, _PAD), (_PAD, _PAD), (0, 0)))
    cols = []
    for kh in range(_KSIZE):
        for kw in range(_KSIZE):
            patch = jax.lax.slice(
                xp,
                (0, kh, kw, 0),
                (B, kh + _STRIDE * (Hout - 1) + 1, kw + _STRIDE * (Wout - 1) + 1, C),
                (1, _STRIDE, _STRIDE, 1),
            )  # (B, Hout, Wout, C)
            cols.append(patch)
    cols = jnp.stack(cols, axis=3)                            # (B, Hout, Wout, 16, C)
    return cols.reshape(B * Hout * Wout, _KSIZE * _KSIZE * C), Hout, Wout


# ----------------------------------------------------------------------------
# Encoder forward (matches the PyTorch module).
# ----------------------------------------------------------------------------
def encoder_forward(x_nchw, prep, *, latent_dim=6):
    """Returns (z, conv1, conv2, conv3, conv4); convs in NCHW like torch."""
    B = x_nchw.shape[0]
    x = jnp.transpose(x_nchw, (0, 2, 3, 1))                   # NHWC once, at the input
    acts_nhwc = []
    for i in (1, 2, 3, 4):
        patches, Hout, Wout = _im2col_nhwc(x)
        wmat = prep[f"conv{i}_w"]
        y = conv_matmul_bias_gelu(patches, wmat, prep[f"conv{i}_b"])
        x = y.reshape(B, Hout, Wout, wmat.shape[1])            # stays NHWC
        acts_nhwc.append(x)
    flat = x.reshape(B, -1)            # NHWC flatten; lin1_w rows were permuted to match
    z_pad = lin1_latent(flat, prep["lin1_w"], prep["lin1_b"],
                        prep["latent_w"], prep["latent_b"])
    z = z_pad[:, :latent_dim]          # drop the lane padding of the latent head
    # Returned activations transposed back to NCHW (torch layout).  Drop these
    # if the downstream content-loss consumer can accept NHWC.
    convs_nchw = tuple(jnp.transpose(a, (0, 3, 1, 2)) for a in acts_nhwc)
    return (z,) + convs_nchw


# ----------------------------------------------------------------------------
# Parameters: torch-convention storage + one-time relayout for the NHWC path.
# ----------------------------------------------------------------------------
def init_params(key, n_channels=1, latent_dim=6, hidden_dim=1024):
    """Synthetic fan-in-scaled weights in the torch layout:
       conv*_w: (Cout, Cin, 4, 4); lin weights stored (in, out) so x @ W + b == torch."""
    ks = jax.random.split(key, 12)

    def w(k, shape, fan_in):
        return jax.random.normal(k, shape, jnp.float32) * jnp.float32(1.0 / math.sqrt(fan_in))

    def b(k, n, fan_in):
        return jax.random.normal(k, (n,), jnp.float32) * jnp.float32(1.0 / math.sqrt(fan_in))

    p = {}
    p["conv1_w"] = w(ks[0], (16, n_channels, _KSIZE, _KSIZE), n_channels * 16)
    p["conv1_b"] = b(ks[1], 16, n_channels * 16)
    p["conv2_w"] = w(ks[2], (32, 16, _KSIZE, _KSIZE), 16 * 16)
    p["conv2_b"] = b(ks[3], 32, 16 * 16)
    p["conv3_w"] = w(ks[4], (64, 32, _KSIZE, _KSIZE), 32 * 16)
    p["conv3_b"] = b(ks[5], 64, 32 * 16)
    p["conv4_w"] = w(ks[6], (128, 64, _KSIZE, _KSIZE), 64 * 16)
    p["conv4_b"] = b(ks[7], 128, 64 * 16)
    flat_dim = 128 * _KSIZE * _KSIZE                           # 2048 (64x64 input)
    p["lin1_w"] = w(ks[8], (flat_dim, hidden_dim), flat_dim)   # rows in NCHW-flatten order
    p["lin1_b"] = b(ks[9], hidden_dim, flat_dim)
    p["latent_w"] = w(ks[10], (hidden_dim, latent_dim), hidden_dim)
    p["latent_b"] = b(ks[11], latent_dim, hidden_dim)
    return p


def prepare_params(params):
    """One-time host-side weight relayout for the NHWC/im2col data path:
      * conv weights -> (kh*kw*Cin, Cout) matrices matching the (kh, kw, c)
        patch ordering of _im2col_nhwc (kept f32; they are tiny),
      * lin1 weight rows permuted from NCHW-flatten order (c, h, w) to the
        NHWC-flatten order (h, w, c) so `flat @ lin1_w` matches torch, then
        cast to bf16 (halves the dominant weight DMA),
      * latent weight/bias zero-padded to 128 output lanes (lane-dense DMA and
        unmasked z store); weight cast to bf16,
      * biases reshaped to (1, N) rows for in-kernel broadcast."""
    prep = {}
    for i in (1, 2, 3, 4):
        w = params[f"conv{i}_w"]                               # (Cout, Cin, kh, kw)
        cout = w.shape[0]
        prep[f"conv{i}_w"] = (
            jnp.transpose(w, (2, 3, 1, 0)).reshape(-1, cout).astype(jnp.float32))
        prep[f"conv{i}_b"] = params[f"conv{i}_b"].reshape(1, -1).astype(jnp.float32)

    c4, hh, ww = 128, _KSIZE, _KSIZE                           # conv4 output = (128, 4, 4)
    w1 = params["lin1_w"]
    hidden = w1.shape[1]
    w1 = w1.reshape(c4, hh, ww, hidden).transpose(1, 2, 0, 3).reshape(c4 * hh * ww, hidden)
    prep["lin1_w"] = w1.astype(MATMUL_WEIGHT_DTYPE)
    prep["lin1_b"] = params["lin1_b"].reshape(1, -1).astype(jnp.float32)

    wl = params["latent_w"]                                    # (hidden, latent_dim)
    bl = params["latent_b"]
    latent_dim = wl.shape[1]
    n_pad = _round_up(latent_dim, _LANE)
    wl_pad = jnp.zeros((hidden, n_pad), jnp.float32).at[:, :latent_dim].set(wl)
    bl_pad = jnp.zeros((1, n_pad), jnp.float32).at[0, :latent_dim].set(bl)
    prep["latent_w"] = wl_pad.astype(MATMUL_WEIGHT_DTYPE)
    prep["latent_b"] = bl_pad
    return prep


# ----------------------------------------------------------------------------
# Plain-JAX NCHW reference (same math as the torch module) for parity checks.
# ----------------------------------------------------------------------------
def _reference_forward(x_nchw, params):
    hi = jax.lax.Precision.HIGHEST

    def conv(x, w, b):
        y = jax.lax.conv_general_dilated(
            x, w, window_strides=(_STRIDE, _STRIDE),
            padding=((_PAD, _PAD), (_PAD, _PAD)),
            dimension_numbers=("NCHW", "OIHW", "NCHW"), precision=hi)
        return _gelu_exact(y + b[None, :, None, None])

    c1 = conv(x_nchw, params["conv1_w"], params["conv1_b"])
    c2 = conv(c1, params["conv2_w"], params["conv2_b"])
    c3 = conv(c2, params["conv3_w"], params["conv3_b"])
    c4 = conv(c3, params["conv4_w"], params["conv4_b"])
    flat = c4.reshape(c4.shape[0], -1)                         # torch .view(B, -1) on NCHW
    h = _gelu_exact(jnp.dot(flat, params["lin1_w"], precision=hi) + params["lin1_b"])
    z = jnp.dot(h, params["latent_w"], precision=hi) + params["latent_b"]
    return z, c1, c2, c3, c4


if __name__ == "__main__":
    key = jax.random.PRNGKey(0)
    k_params, k_x = jax.random.split(key)

    # image_size=(1, 64, 64) is required so conv4 ends up (B, 128, 4, 4) -> flat 2048.
    batch, n_channels, H, W = 2, 1, 64, 64
    latent_dim = 6

    params = init_params(k_params, n_channels=n_channels, latent_dim=latent_dim)
    prep = prepare_params(params)
    x = jax.random.normal(k_x, (batch, n_channels, H, W), jnp.float32)

    fwd = jax.jit(encoder_forward, static_argnames=("latent_dim",))
    z, c1, c2, c3, c4 = fwd(x, prep, latent_dim=latent_dim)
    jax.block_until_ready((z, c1, c2, c3, c4))

    assert z.shape == (batch, latent_dim)
    assert c1.shape == (batch, 16, 32, 32)
    assert c2.shape == (batch, 32, 16, 16)
    assert c3.shape == (batch, 64, 8, 8)
    assert c4.shape == (batch, 128, 4, 4)

    # Numerical parity against the plain-JAX reference of the same module.
    # (lin1/latent use bf16 weights+activations with f32 accumulation: error
    # stays well inside this tolerance; conv path is full f32.)
    refs = jax.jit(_reference_forward)(x, params)
    for got, ref in zip((z, c1, c2, c3, c4), refs):
        assert jnp.allclose(got, ref, atol=5e-2, rtol=5e-2), \
            float(jnp.max(jnp.abs(got - ref)))

    print("KERNEL_OK")
</pallas_src>

<mosaic_0001>
module attributes {stable_mosaic.version = 11 : i64} {
  func.func @_conv_mm_bias_gelu_kernel(%arg0: i32, %arg1: memref<2048x16xf32, #tpu.memory_space<vmem>>, %arg2: memref<16x16xf32, #tpu.memory_space<vmem>>, %arg3: memref<1x16xf32, #tpu.memory_space<vmem>>, %arg4: memref<2048x16xf32, #tpu.memory_space<vmem>>) attributes {dimension_semantics = [#tpu.dimension_semantics<parallel>], iteration_bounds = array<i64: 1>, scalar_prefetch = 0 : i64, scratch_operands = 0 : i64, tpu.core_type = #tpu.core_type<tc>, window_params = [{transform_indices = @transform_0, window_bounds = array<i64: 2048, 16>}, {pipeline_mode = #tpu.pipeline_mode<synchronous>, transform_indices = @transform_1, window_bounds = array<i64: 16, 16>}, {pipeline_mode = #tpu.pipeline_mode<synchronous>, transform_indices = @transform_2, window_bounds = array<i64: 1, 16>}, {transform_indices = @transform_3, window_bounds = array<i64: 2048, 16>}]} {
    %c0 = arith.constant 0 : index
    %c0_0 = arith.constant 0 : index
    %0 = vector.load %arg1[%c0, %c0_0] : memref<2048x16xf32, #tpu.memory_space<vmem>>, vector<2048x16xf32>
    %c0_1 = arith.constant 0 : index
    %c0_2 = arith.constant 0 : index
    %1 = vector.load %arg2[%c0_1, %c0_2] : memref<16x16xf32, #tpu.memory_space<vmem>>, vector<16x16xf32>
    %cst = arith.constant dense<0.000000e+00> : vector<2048x16xf32>
    %2 = tpu.matmul %0, %1, %cst {dimension_numbers = #tpu.dot_dimension_numbers<[1], [0], [0], [1], [0, 0, 1, 1], [], []>} : vector<2048x16xf32>, vector<16x16xf32>, vector<2048x16xf32> -> vector<2048x16xf32>
    %c0_3 = arith.constant 0 : index
    %c0_4 = arith.constant 0 : index
    %3 = vector.load %arg3[%c0_3, %c0_4] : memref<1x16xf32, #tpu.memory_space<vmem>>, vector<1x16xf32>
    %4 = vector.broadcast %3 : vector<1x16xf32> to vector<2048x16xf32>
    %5 = arith.addf %2, %4 : vector<2048x16xf32>
    %cst_5 = arith.constant 5.000000e-01 : f32
    %6 = vector.broadcast %cst_5 : f32 to vector<2048x16xf32>
    %7 = arith.mulf %6, %5 : vector<2048x16xf32>
    %cst_6 = arith.constant 0.707106769 : f32
    %8 = vector.broadcast %cst_6 : f32 to vector<2048x16xf32>
    %9 = arith.mulf %5, %8 : vector<2048x16xf32>
    %10 = math.erf %9 : vector<2048x16xf32>
    %cst_7 = arith.constant 1.000000e+00 : f32
    %11 = vector.broadcast %cst_7 : f32 to vector<2048x16xf32>
    %12 = arith.addf %11, %10 : vector<2048x16xf32>
    %13 = arith.mulf %7, %12 : vector<2048x16xf32>
    %c0_8 = arith.constant 0 : index
    %c0_9 = arith.constant 0 : index
    %14 = vector.load %arg4[%c0_8, %c0_9] : memref<2048x16xf32, #tpu.memory_space<vmem>>, vector<2048x16xf32>
    tpu.vector_store %arg4[%c0_8, %c0_9], %13 {strides = array<i32>} : memref<2048x16xf32, #tpu.memory_space<vmem>>, vector<2048x16xf32>,
    return
  }
  func.func @transform_0(%arg0: i32) -> (i32, i32) {
    %c0_i32 = arith.constant 0 : i32
    %c0_i32_0 = arith.constant 0 : i32
    return %arg0, %c0_i32 : i32, i32
  }
  func.func @transform_1(%arg0: i32) -> (i32, i32) {
    %c0_i32 = arith.constant 0 : i32
    %c0_i32_0 = arith.constant 0 : i32
    %c0_i32_1 = arith.constant 0 : i32
    return %c0_i32, %c0_i32_0 : i32, i32
  }
  func.func @transform_2(%arg0: i32) -> (i32, i32) {
    %c0_i32 = arith.constant 0 : i32
    %c0_i32_0 = arith.constant 0 : i32
    %c0_i32_1 = arith.constant 0 : i32
    return %c0_i32, %c0_i32_0 : i32, i32
  }
  func.func @transform_3(%arg0: i32) -> (i32, i32) {
    %c0_i32 = arith.constant 0 : i32
    %c0_i32_0 = arith.constant 0 : i32
    return %arg0, %c0_i32 : i32, i32
  }
}

module attributes {stable_mosaic.version = 11 : i64} {
  func.func @_conv_mm_bias_gelu_kernel(%arg0: i32, %arg1: memref<512x256xf32, #tpu.memory_space<vmem>>, %arg2: memref<256x32xf32, #tpu.memory_space<vmem>>, %arg3: memref<1x32xf32, #tpu.memory_space<vmem>>, %arg4: memref<512x32xf32, #tpu.memory_space<vmem>>) attributes {dimension_semantics = [#tpu.dimension_semantics<parallel>], iteration_bounds = array<i64: 1>, scalar_prefetch = 0 : i64, scratch_operands = 0 : i64, tpu.core_type = #tpu.core_type<tc>, window_params = [{transform_indices = @transform_0, window_bounds = array<i64: 512, 256>}, {pipeline_mode = #tpu.pipeline_mode<synchronous>, transform_indices = @transform_1, window_bounds = array<i64: 256, 32>}, {pipeline_mode = #tpu.pipeline_mode<synchronous>, transform_indices = @transform_2, window_bounds = array<i64: 1, 32>}, {transform_indices = @transform_3, window_bounds = array<i64: 512, 32>}]} {
    %c0 = arith.constant 0 : index
    %c0_0 = arith.constant 0 : index
    %0 = vector.load %arg1[%c0, %c0_0] : memref<512x256xf32, #tpu.memory_space<vmem>>, vector<512x256xf32>
    %c0_1 = arith.constant 0 : index
    %c0_2 = arith.constant 0 : index
    %1 = vector.load %arg2[%c0_1, %c0_2] : memref<256x32xf32, #tpu.memory_space<vmem>>, vector<256x32xf32>
    %cst = arith.constant dense<0.000000e+00> : vector<512x32xf32>
    %2 = tpu.matmul %0, %1, %cst {dimension_numbers = #tpu.dot_dimension_numbers<[1], [0], [0], [1], [0, 0, 1, 1], [], []>} : vector<512x256xf32>, vector<256x32xf32>, vector<512x32xf32> -> vector<512x32xf32>
    %c0_3 = arith.constant 0 : index
    %c0_4 = arith.constant 0 : index
    %3 = vector.load %arg3[%c0_3, %c0_4] : memref<1x32xf32, #tpu.memory_space<vmem>>, vector<1x32xf32>
    %4 = vector.broadcast %3 : vector<1x32xf32> to vector<512x32xf32>
    %5 = arith.addf %2, %4 : vector<512x32xf32>
    %cst_5 = arith.constant 5.000000e-01 : f32
    %6 = vector.broadcast %cst_5 : f32 to vector<512x32xf32>
    %7 = arith.mulf %6, %5 : vector<512x32xf32>
    %cst_6 = arith.constant 0.707106769 : f32
    %8 = vector.broadcast %cst_6 : f32 to vector<512x32xf32>
    %9 = arith.mulf %5, %8 : vector<512x32xf32>
    %10 = math.erf %9 : vector<512x32xf32>
    %cst_7 = arith.constant 1.000000e+00 : f32
    %11 = vector.broadcast %cst_7 : f32 to vector<512x32xf32>
    %12 = arith.addf %11, %10 : vector<512x32xf32>
    %13 = arith.mulf %7, %12 : vector<512x32xf32>
    %c0_8 = arith.constant 0 : index
    %c0_9 = arith.constant 0 : index
    %14 = vector.load %arg4[%c0_8, %c0_9] : memref<512x32xf32, #tpu.memory_space<vmem>>, vector<512x32xf32>
    tpu.vector_store %arg4[%c0_8, %c0_9], %13 {strides = array<i32>} : memref<512x32xf32, #tpu.memory_space<vmem>>, vector<512x32xf32>,
    return
  }
  func.func @transform_0(%arg0: i32) -> (i32, i32) {
    %c0_i32 = arith.constant 0 : i32
    %c0_i32_0 = arith.constant 0 : i32
    return %arg0, %c0_i32 : i32, i32
  }
  func.func @transform_1(%arg0: i32) -> (i32, i32) {
    %c0_i32 = arith.constant 0 : i32
    %c0_i32_0 = arith.constant 0 : i32
    %c0_i32_1 = arith.constant 0 : i32
    return %c0_i32, %c0_i32_0 : i32, i32
  }
  func.func @transform_2(%arg0: i32) -> (i32, i32) {
    %c0_i32 = arith.constant 0 : i32
    %c0_i32_0 = arith.constant 0 : i32
    %c0_i32_1 = arith.constant 0 : i32
    return %c0_i32, %c0_i32_0 : i32, i32
  }
  func.func @transform_3(%arg0: i32) -> (i32, i32) {
    %c0_i32 = arith.constant 0 : i32
    %c0_i32_0 = arith.constant 0 : i32
    return %arg0, %c0_i32 : i32, i32
  }
}

module attributes {stable_mosaic.version = 11 : i64} {
  func.func @_conv_mm_bias_gelu_kernel(%arg0: i32, %arg1: memref<128x512xf32, #tpu.memory_space<vmem>>, %arg2: memref<512x64xf32, #tpu.memory_space<vmem>>, %arg3: memref<1x64xf32, #tpu.memory_space<vmem>>, %arg4: memref<128x64xf32, #tpu.memory_space<vmem>>) attributes {dimension_semantics = [#tpu.dimension_semantics<parallel>], iteration_bounds = array<i64: 1>, scalar_prefetch = 0 : i64, scratch_operands = 0 : i64, tpu.core_type = #tpu.core_type<tc>, window_params = [{transform_indices = @transform_0, window_bounds = array<i64: 128, 512>}, {pipeline_mode = #tpu.pipeline_mode<synchronous>, transform_indices = @transform_1, window_bounds = array<i64: 512, 64>}, {pipeline_mode = #tpu.pipeline_mode<synchronous>, transform_indices = @transform_2, window_bounds = array<i64: 1, 64>}, {transform_indices = @transform_3, window_bounds = array<i64: 128, 64>}]} {
    %c0 = arith.constant 0 : index
    %c0_0 = arith.constant 0 : index
    %0 = vector.load %arg1[%c0, %c0_0] : memref<128x512xf32, #tpu.memory_space<vmem>>, vector<128x512xf32>
    %c0_1 = arith.constant 0 : index
    %c0_2 = arith.constant 0 : index
    %1 = vector.load %arg2[%c0_1, %c0_2] : memref<512x64xf32, #tpu.memory_space<vmem>>, vector<512x64xf32>
    %cst = arith.constant dense<0.000000e+00> : vector<128x64xf32>
    %2 = tpu.matmul %0, %1, %cst {dimension_numbers = #tpu.dot_dimension_numbers<[1], [0], [0], [1], [0, 0, 1, 1], [], []>} : vector<128x512xf32>, vector<512x64xf32>, vector<128x64xf32> -> vector<128x64xf32>
    %c0_3 = arith.constant 0 : index
    %c0_4 = arith.constant 0 : index
    %3 = vector.load %arg3[%c0_3, %c0_4] : memref<1x64xf32, #tpu.memory_space<vmem>>, vector<1x64xf32>
    %4 = vector.broadcast %3 : vector<1x64xf32> to vector<128x64xf32>
    %5 = arith.addf %2, %4 : vector<128x64xf32>
    %cst_5 = arith.constant 5.000000e-01 : f32
    %6 = vector.broadcast %cst_5 : f32 to vector<128x64xf32>
    %7 = arith.mulf %6, %5 : vector<128x64xf32>
    %cst_6 = arith.constant 0.707106769 : f32
    %8 = vector.broadcast %cst_6 : f32 to vector<128x64xf32>
    %9 = arith.mulf %5, %8 : vector<128x64xf32>
    %10 = math.erf %9 : vector<128x64xf32>
    %cst_7 = arith.constant 1.000000e+00 : f32
    %11 = vector.broadcast %cst_7 : f32 to vector<128x64xf32>
    %12 = arith.addf %11, %10 : vector<128x64xf32>
    %13 = arith.mulf %7, %12 : vector<128x64xf32>
    %c0_8 = arith.constant 0 : index
    %c0_9 = arith.constant 0 : index
    %14 = vector.load %arg4[%c0_8, %c0_9] : memref<128x64xf32, #tpu.memory_space<vmem>>, vector<128x64xf32>
    tpu.vector_store %arg4[%c0_8, %c0_9], %13 {strides = array<i32>} : memref<128x64xf32, #tpu.memory_space<vmem>>, vector<128x64xf32>,
    return
  }
  func.func @transform_0(%arg0: i32) -> (i32, i32) {
    %c0_i32 = arith.constant 0 : i32
    %c0_i32_0 = arith.constant 0 : i32
    return %arg0, %c0_i32 : i32, i32
  }
  func.func @transform_1(%arg0: i32) -> (i32, i32) {
    %c0_i32 = arith.constant 0 : i32
    %c0_i32_0 = arith.constant 0 : i32
    %c0_i32_1 = arith.constant 0 : i32
    return %c0_i32, %c0_i32_0 : i32, i32
  }
  func.func @transform_2(%arg0: i32) -> (i32, i32) {
    %c0_i32 = arith.constant 0 : i32
    %c0_i32_0 = arith.constant 0 : i32
    %c0_i32_1 = arith.constant 0 : i32
    return %c0_i32, %c0_i32_0 : i32, i32
  }
  func.func @transform_3(%arg0: i32) -> (i32, i32) {
    %c0_i32 = arith.constant 0 : i32
    %c0_i32_0 = arith.constant 0 : i32
    return %arg0, %c0_i32 : i32, i32
  }
}

module attributes {stable_mosaic.version = 11 : i64} {
  func.func @_conv_mm_bias_gelu_kernel(%arg0: i32, %arg1: memref<32x1024xf32, #tpu.memory_space<vmem>>, %arg2: memref<1024x128xf32, #tpu.memory_space<vmem>>, %arg3: memref<1x128xf32, #tpu.memory_space<vmem>>, %arg4: memref<32x128xf32, #tpu.memory_space<vmem>>) attributes {dimension_semantics = [#tpu.dimension_semantics<parallel>], iteration_bounds = array<i64: 1>, scalar_prefetch = 0 : i64, scratch_operands = 0 : i64, tpu.core_type = #tpu.core_type<tc>, window_params = [{transform_indices = @transform_0, window_bounds = array<i64: 32, 1024>}, {pipeline_mode = #tpu.pipeline_mode<synchronous>, transform_indices = @transform_1, window_bounds = array<i64: 1024, 128>}, {pipeline_mode = #tpu.pipeline_mode<synchronous>, transform_indices = @transform_2, window_bounds = array<i64: 1, 128>}, {transform_indices = @transform_3, window_bounds = array<i64: 32, 128>}]} {
    %c0 = arith.constant 0 : index
    %c0_0 = arith.constant 0 : index
    %0 = vector.load %arg1[%c0, %c0_0] : memref<32x1024xf32, #tpu.memory_space<vmem>>, vector<32x1024xf32>
    %c0_1 = arith.constant 0 : index
    %c0_2 = arith.constant 0 : index
    %1 = vector.load %arg2[%c0_1, %c0_2] : memref<1024x128xf32, #tpu.memory_space<vmem>>, vector<1024x128xf32>
    %cst = arith.constant dense<0.000000e+00> : vector<32x128xf32>
    %2 = tpu.matmul %0, %1, %cst {dimension_numbers = #tpu.dot_dimension_numbers<[1], [0], [0], [1], [0, 0, 1, 1], [], []>} : vector<32x1024xf32>, vector<1024x128xf32>, vector<32x128xf32> -> vector<32x128xf32>
    %c0_3 = arith.constant 0 : index
    %c0_4 = arith.constant 0 : index
    %3 = vector.load %arg3[%c0_3, %c0_4] : memref<1x128xf32, #tpu.memory_space<vmem>>, vector<1x128xf32>
    %4 = vector.broadcast %3 : vector<1x128xf32> to vector<32x128xf32>
    %5 = arith.addf %2, %4 : vector<32x128xf32>
    %cst_5 = arith.constant 5.000000e-01 : f32
    %6 = vector.broadcast %cst_5 : f32 to vector<32x128xf32>
    %7 = arith.mulf %6, %5 : vector<32x128xf32>
    %cst_6 = arith.constant 0.707106769 : f32
    %8 = vector.broadcast %cst_6 : f32 to vector<32x128xf32>
    %9 = arith.mulf %5, %8 : vector<32x128xf32>
    %10 = math.erf %9 : vector<32x128xf32>
    %cst_7 = arith.constant 1.000000e+00 : f32
    %11 = vector.broadcast %cst_7 : f32 to vector<32x128xf32>
    %12 = arith.addf %11, %10 : vector<32x128xf32>
    %13 = arith.mulf %7, %12 : vector<32x128xf32>
    %c0_8 = arith.constant 0 : index
    %c0_9 = arith.constant 0 : index
    %14 = vector.load %arg4[%c0_8, %c0_9] : memref<32x128xf32, #tpu.memory_space<vmem>>, vector<32x128xf32>
    tpu.vector_store %arg4[%c0_8, %c0_9], %13 {strides = array<i32>} : memref<32x128xf32, #tpu.memory_space<vmem>>, vector<32x128xf32>,
    return
  }
  func.func @transform_0(%arg0: i32) -> (i32, i32) {
    %c0_i32 = arith.constant 0 : i32
    %c0_i32_0 = arith.constant 0 : i32
    return %arg0, %c0_i32 : i32, i32
  }
  func.func @transform_1(%arg0: i32) -> (i32, i32) {
    %c0_i32 = arith.constant 0 : i32
    %c0_i32_0 = arith.constant 0 : i32
    %c0_i32_1 = arith.constant 0 : i32
    return %c0_i32, %c0_i32_0 : i32, i32
  }
  func.func @transform_2(%arg0: i32) -> (i32, i32) {
    %c0_i32 = arith.constant 0 : i32
    %c0_i32_0 = arith.constant 0 : i32
    %c0_i32_1 = arith.constant 0 : i32
    return %c0_i32, %c0_i32_0 : i32, i32
  }
  func.func @transform_3(%arg0: i32) -> (i32, i32) {
    %c0_i32 = arith.constant 0 : i32
    %c0_i32_0 = arith.constant 0 : i32
    return %arg0, %c0_i32 : i32, i32
  }
}

module attributes {stable_mosaic.version = 11 : i64} {
  func.func @_lin1_latent_kernel(%arg0: i32, %arg1: memref<2x1024xf32, #tpu.memory_space<vmem>>, %arg2: memref<1024x1024xbf16, #tpu.memory_space<vmem>>, %arg3: memref<1x1024xf32, #tpu.memory_space<vmem>>, %arg4: memref<1024x128xbf16, #tpu.memory_space<vmem>>, %arg5: memref<1x128xf32, #tpu.memory_space<vmem>>, %arg6: memref<2x128xf32, #tpu.memory_space<vmem>>, %arg7: memref<2x1024xf32, #tpu.memory_space<vmem>>) attributes {dimension_semantics = [#tpu.dimension_semantics<arbitrary>], iteration_bounds = array<i64: 2>, scalar_prefetch = 0 : i64, scratch_operands = 1 : i64, tpu.core_type = #tpu.core_type<tc>, window_params = [{transform_indices = @transform_0, window_bounds = array<i64: 2, 1024>}, {transform_indices = @transform_1, window_bounds = array<i64: 1024, 1024>}, {pipeline_mode = #tpu.pipeline_mode<synchronous>, transform_indices = @transform_2, window_bounds = array<i64: 1, 1024>}, {pipeline_mode = #tpu.pipeline_mode<synchronous>, transform_indices = @transform_3, window_bounds = array<i64: 1024, 128>}, {pipeline_mode = #tpu.pipeline_mode<synchronous>, transform_indices = @transform_4, window_bounds = array<i64: 1, 128>}, {pipeline_mode = #tpu.pipeline_mode<synchronous>, transform_indices = @transform_5, window_bounds = array<i64: 2, 128>}]} {
    %c0_i32 = arith.constant 0 : i32
    %0 = arith.cmpi eq, %arg0, %c0_i32 : i32
    %1 = arith.extui %0 : i1 to i32
    %c0_i32_0 = arith.constant 0 : i32
    %2 = arith.cmpi ne, %1, %c0_i32_0 : i32
    scf.if %2 {
      %cst_9 = arith.constant 0.000000e+00 : f32
      %13 = vector.broadcast %cst_9 : f32 to vector<2x1024xf32>
      %c0_10 = arith.constant 0 : index
      %c0_11 = arith.constant 0 : index
      %14 = vector.load %arg7[%c0_10, %c0_11] : memref<2x1024xf32, #tpu.memory_space<vmem>>, vector<2x1024xf32>
      tpu.vector_store %arg7[%c0_10, %c0_11], %13 {strides = array<i32>} : memref<2x1024xf32, #tpu.memory_space<vmem>>, vector<2x1024xf32>,
    } else {
    }
    %c0 = arith.constant 0 : index
    %c0_1 = arith.constant 0 : index
    %3 = vector.load %arg1[%c0, %c0_1] : memref<2x1024xf32, #tpu.memory_space<vmem>>, vector<2x1024xf32>
    %4 = arith.truncf %3 : vector<2x1024xf32> to vector<2x1024xbf16>
    %c0_2 = arith.constant 0 : index
    %c0_3 = arith.constant 0 : index
    %5 = vector.load %arg7[%c0_2, %c0_3] : memref<2x1024xf32, #tpu.memory_space<vmem>>, vector<2x1024xf32>
    %c0_4 = arith.constant 0 : index
    %c0_5 = arith.constant 0 : index
    %6 = vector.load %arg2[%c0_4, %c0_5] : memref<1024x1024xbf16, #tpu.memory_space<vmem>>, vector<1024x1024xbf16>
    %cst = arith.constant dense<0.000000e+00> : vector<2x1024xf32>
    %7 = tpu.matmul %4, %6, %cst {dimension_numbers = #tpu.dot_dimension_numbers<[1], [0], [0], [1], [0, 0, 1, 1], [], []>} : vector<2x1024xbf16>, vector<1024x1024xbf16>, vector<2x1024xf32> -> vector<2x1024xf32>
    %8 = arith.addf %5, %7 : vector<2x1024xf32>
    %c0_6 = arith.constant 0 : index
    %c0_7 = arith.constant 0 : index
    %9 = vector.load %arg7[%c0_6, %c0_7] : memref<2x1024xf32, #tpu.memory_space<vmem>>, vector<2x1024xf32>
    tpu.vector_store %arg7[%c0_6, %c0_7], %8 {strides = array<i32>} : memref<2x1024xf32, #tpu.memory_space<vmem>>, vector<2x1024xf32>,
    %c1_i32 = arith.constant 1 : i32
    %10 = arith.cmpi eq, %arg0, %c1_i32 : i32
    %11 = arith.extui %10 : i1 to i32
    %c0_i32_8 = arith.constant 0 : i32
    %12 = arith.cmpi ne, %11, %c0_i32_8 : i32
    scf.if %12 {
      %c0_9 = arith.constant 0 : index
      %c0_10 = arith.constant 0 : index
      %13 = vector.load %arg7[%c0_9, %c0_10] : memref<2x1024xf32, #tpu.memory_space<vmem>>, vector<2x1024xf32>
      %c0_11 = arith.constant 0 : index
      %c0_12 = arith.constant 0 : index
      %14 = vector.load %arg3[%c0_11, %c0_12] : memref<1x1024xf32, #tpu.memory_space<vmem>>, vector<1x1024xf32>
      %15 = vector.broadcast %14 : vector<1x1024xf32> to vector<2x1024xf32>
      %16 = arith.addf %13, %15 : vector<2x1024xf32>
      %cst_13 = arith.constant 5.000000e-01 : f32
      %17 = vector.broadcast %cst_13 : f32 to vector<2x1024xf32>
      %18 = arith.mulf %17, %16 : vector<2x1024xf32>
      %cst_14 = arith.constant 0.707106769 : f32
      %19 = vector.broadcast %cst_14 : f32 to vector<2x1024xf32>
      %20 = arith.mulf %16, %19 : vector<2x1024xf32>
      %21 = math.erf %20 : vector<2x1024xf32>
      %cst_15 = arith.constant 1.000000e+00 : f32
      %22 = vector.broadcast %cst_15 : f32 to vector<2x1024xf32>
      %23 = arith.addf %22, %21 : vector<2x1024xf32>
      %24 = arith.mulf %18, %23 : vector<2x1024xf32>
      %25 = arith.truncf %24 : vector<2x1024xf32> to vector<2x1024xbf16>
      %c0_16 = arith.constant 0 : index
      %c0_17 = arith.constant 0 : index
      %26 = vector.load %arg4[%c0_16, %c0_17] : memref<1024x128xbf16, #tpu.memory_space<vmem>>, vector<1024x128xbf16>
      %cst_18 = arith.constant dense<0.000000e+00> : vector<2x128xf32>
      %27 = tpu.matmul %25, %26, %cst_18 {dimension_numbers = #tpu.dot_dimension_numbers<[1], [0], [0], [1], [0, 0, 1, 1], [], []>} : vector<2x1024xbf16>, vector<1024x128xbf16>, vector<2x128xf32> -> vector<2x128xf32>
      %c0_19 = arith.constant 0 : index
      %c0_20 = arith.constant 0 : index
      %28 = vector.load %arg5[%c0_19, %c0_20] : memref<1x128xf32, #tpu.memory_space<vmem>>, vector<1x128xf32>
      %29 = vector.broadcast %28 : vector<1x128xf32> to vector<2x128xf32>
      %30 = arith.addf %27, %29 : vector<2x128xf32>
      %c0_21 = arith.constant 0 : index
      %c0_22 = arith.constant 0 : index
      %31 = vector.load %arg6[%c0_21, %c0_22] : memref<2x128xf32, #tpu.memory_space<vmem>>, vector<2x128xf32>
      tpu.vector_store %arg6[%c0_21, %c0_22], %30 {strides = array<i32>} : memref<2x128xf32, #tpu.memory_space<vmem>>, vector<2x128xf32>,
    } else {
    }
    return
  }
  func.func @transform_0(%arg0: i32) -> (i32, i32) {
    %c0_i32 = arith.constant 0 : i32
    %c0_i32_0 = arith.constant 0 : i32
    return %c0_i32, %arg0 : i32, i32
  }
  func.func @transform_1(%arg0: i32) -> (i32, i32) {
    %c0_i32 = arith.constant 0 : i32
    %c0_i32_0 = arith.constant 0 : i32
    return %arg0, %c0_i32 : i32, i32
  }
  func.func @transform_2(%arg0: i32) -> (i32, i32) {
    %c0_i32 = arith.constant 0 : i32
    %c0_i32_0 = arith.constant 0 : i32
    %c0_i32_1 = arith.constant 0 : i32
    return %c0_i32, %c0_i32_0 : i32, i32
  }
  func.func @transform_3(%arg0: i32) -> (i32, i32) {
    %c0_i32 = arith.constant 0 : i32
    %c0_i32_0 = arith.constant 0 : i32
    %c0_i32_1 = arith.constant 0 : i32
    return %c0_i32, %c0_i32_0 : i32, i32
  }
  func.func @transform_4(%arg0: i32) -> (i32, i32) {
    %c0_i32 = arith.constant 0 : i32
    %c0_i32_0 = arith.constant 0 : i32
    %c0_i32_1 = arith.constant 0 : i32
    return %c0_i32, %c0_i32_0 : i32, i32
  }
  func.func @transform_5(%arg0: i32) -> (i32, i32) {
    %c0_i32 = arith.constant 0 : i32
    %c0_i32_0 = arith.constant 0 : i32
    %c0_i32_1 = arith.constant 0 : i32
    return %c0_i32, %c0_i32_0 : i32, i32
  }
}

</mosaic_0001>

<bundles_post_ra>
// kernel: encoder_forward.5
= control target key start
LH: loop header
LB: loop body
LE: loop exit
PB: predicated region body
PF: predicated region fallthrough
CT: control target
= control target key end

     0   :  { %8 = vsyncpa [#allocation3], 0  ;;  %s9518_s0 = inlined_call_operand.vmem [shape: f32[2048,16], index: 0, kind: input, shape index: {}]   ;;  %s9519_s1 = inlined_call_operand.hbm [shape: f32[16,16], index: 1, kind: input, shape index: {}]   ;;  %s9520_s2 = inlined_call_operand.hbm [shape: f32[1,16], index: 2, kind: input, shape index: {}]   ;;  %s9521_s3 = inlined_call_operand.vmem [shape: f32[2048,16], index: 3, kind: output, shape index: {}]  }
   0x1   :  { %9 = vsyncpa [#allocation5], 0  ;;  %s5438_s12 = smov [#allocation2]   ;;  %s5390_s16 = scalar_lea.hbm %s9519_s1, 256 }
   0x2   :  { %s17_s13 = sshll.u32 %s5438_s12, 4  ;;  %p5391_p0 = scmp.ne.s32.totalorder %s9519_s1, %s5390_s16  ;;  %s18_s13 = int_to_ptr.vmem [resolvable:$true] %s17_s13 }
   0x3   :  { %p5394_p1 = scmp.lt.u32.totalorder %s5390_s16, %s9519_s1 }
   0x5   :  { %p5396_p2 = pnand %p5394_p1, %p5391_p0 }
   0x7   :  { %5399 = shalt.err (!%p5396_p2)
}
   0x8   :  { %s5400_s21 = scalar_lea.vmem %s18_s13, 256  ;;  %p5405_p4 = scmp.lt.s32.totalorder %s18_s13, %s18_s13 }
   0x9   :  { %p5401_p3 = scmp.ne.s32.totalorder %s18_s13, %s5400_s21  ;;  %p5406_p5 = scmp.lt.s32.totalorder %s5400_s21, %s5400_s21 }
   0xb   :  { %p5407_p6 = por %p5406_p5, %p5405_p4 }
   0xd   :  { %p5408_p7 = pnand %p5407_p6, %p5401_p3 }
   0xf   :  { %5411 = shalt.err (!%p5408_p7)
}
  0x10   :  { %s5439_s22 = smov 128   ;;  %s5440_s23 = smov 8  }
  0x11   :  { %23 = dma.hbm_to_vmem [thread:$0]  %s9519_s1, 256, %s18_s13, [#allocation3], %s5439_s22, %s5439_s22, %s5440_s23  }
  0x12   :  { %s5441_s26 = smov [#allocation4]   ;;  %s5412_s30 = scalar_lea.hbm %s9520_s2, 16 }
  0x13   :  { %s30_s27 = sshll.u32 %s5441_s26, 4  ;;  %p5413_p8 = scmp.ne.s32.totalorder %s9520_s2, %s5412_s30  ;;  %s31_s27 = int_to_ptr.vmem [resolvable:$true] %s30_s27 }
  0x14   :  { %p5416_p9 = scmp.lt.u32.totalorder %s5412_s30, %s9520_s2 }
  0x16   :  { %p5418_p10 = pnand %p5416_p9, %p5413_p8 }
  0x18   :  { %5421 = shalt.err (!%p5418_p10)
}
  0x19   :  { %s5422_s8 = scalar_lea.vmem %s31_s27, 16  ;;  %s5426_s1 = scalar_lea.vmem %s31_s27, 32 }
  0x1a   :  { %p5423_p11 = scmp.ne.s32.totalorder %s31_s27, %s5422_s8  ;;  %p5427_p12 = scmp.lt.s32.totalorder %s31_s27, %s31_s27 }
  0x1b   :  { %p5428_p13 = scmp.lt.s32.totalorder %s5426_s1, %s5422_s8 }
  0x1d   :  { %p5429_p0 = por %p5428_p13, %p5427_p12 }
  0x1f   :  { %p5430_p1 = pnand %p5429_p0, %p5423_p11 }
  0x21   :  { %5433 = shalt.err (!%p5430_p1)
}
  0x22   :  { %33 = dma.hbm_to_vmem [thread:$0]  %s9520_s2, 16, %s31_s27, [#allocation5]  }
  0x23   :  { %5434 = dma.done.wait [#allocation3], 256  }
  0x24   :  { %5435 = vsyncadd [#allocation3], 4294967040 }
  0x25   :  { %5436 = dma.done.wait [#allocation5], 16  }
  0x26   :  { %5437 = vsyncadd [#allocation5], 4294967280  ;;  %vm305_vm0 = vcmask 130048   ;;  %v296_v0 = vld [vmem:[#allocation2] sm:$0xff]  ;;  %v297_v1 = vld [vmem:[#allocation2 + $0x8] sm:$0xff] }
  0x27   :  { %v40_v2 = vld [vmem:[%s9518_s0] sm:$0xff]  ;;  %v4864_v3 = vpack.c.bf16 %v297_v1, %v296_v0  ;;  %v41_v5 = vld [vmem:[%s9518_s0 + $0x8] sm:$0xff]  ;;  %v42_v7 = vld [vmem:[%s9518_s0 + $0x10] sm:$0xff] }
  0x28   :  { %4480 = vmatprep.mubr.msk.f32.mxu0 %vm305_vm0, %v40_v2  ;;  %v168_v4 = vld [vmem:[%s9518_s0 + $0x400] sm:$0xff]  ;;  %v169_v6 = vld [vmem:[%s9518_s0 + $0x408] sm:$0xff]  ;;  %v170_v8 = vld [vmem:[%s9518_s0 + $0x410] sm:$0xff] }
  0x29   :  { %4672 = vmatprep.mubr.msk.f32.mxu1 %vm305_vm0, %v168_v4  ;;  %4865 = vmatprep.subr.bf16.mxu0 %v4864_v3  ;;  %v43_v9 = vld [vmem:[%s9518_s0 + $0x18] sm:$0xff]  ;;  %v44_v11 = vld [vmem:[%s9518_s0 + $0x20] sm:$0xff]  ;;  %v45_v13 = vld [vmem:[%s9518_s0 + $0x28] sm:$0xff] }
  0x2a   :  { %4868 = vmatprep.subr.bf16.mxu1 %v4864_v3  ;;  %4867 = vmatpush3.bf16.msra.mxu0 %v4864_v3  ;;  %v171_v10 = vld [vmem:[%s9518_s0 + $0x418] sm:$0xff]  ;;  %v172_v12 = vld [vmem:[%s9518_s0 + $0x420] sm:$0xff]  ;;  %v173_v14 = vld [vmem:[%s9518_s0 + $0x428] sm:$0xff] }
  0x2b   :  { %4869 = vmatpush3.bf16.msra.mxu1 %v4864_v3  ;;  %v46_v15 = vld [vmem:[%s9518_s0 + $0x30] sm:$0xff]  ;;  %v47_v17 = vld [vmem:[%s9518_s0 + $0x38] sm:$0xff]  ;;  %v48_v19 = vld [vmem:[%s9518_s0 + $0x40] sm:$0xff] }
  0x2c   :  { %v174_v16 = vld [vmem:[%s9518_s0 + $0x430] sm:$0xff]  ;;  %v175_v18 = vld [vmem:[%s9518_s0 + $0x438] sm:$0xff]  ;;  %v176_v20 = vld [vmem:[%s9518_s0 + $0x440] sm:$0xff] }
  0x2d   :  { %4481 = vmatmul.mubr.msk.f32.vlgmr.msra.gmra.mrb[0].mxu0 %vm305_vm0, %v41_v5  ;;  %v49_v21 = vld [vmem:[%s9518_s0 + $0x48] sm:$0xff]  ;;  %v50_v23 = vld [vmem:[%s9518_s0 + $0x50] sm:$0xff]  ;;  %v51_v25 = vld [vmem:[%s9518_s0 + $0x58] sm:$0xff] }
  0x2e   :  { %4673 = vmatmul.mubr.msk.f32.vlgmr.msra.gmra.mrb[0].mxu1 %vm305_vm0, %v169_v6  ;;  %4483 = vmatprep.mubr.msk.f32.mxu0 %vm305_vm0, %v42_v7  ;;  %v177_v22 = vld [vmem:[%s9518_s0 + $0x448] sm:$0xff]  ;;  %v178_v24 = vld [vmem:[%s9518_s0 + $0x450] sm:$0xff]  ;;  %v179_v26 = vld [vmem:[%s9518_s0 + $0x458] sm:$0xff] }
  0x2f   :  { %4675 = vmatprep.mubr.msk.f32.mxu1 %vm305_vm0, %v170_v8  ;;  %v52_v27 = vld [vmem:[%s9518_s0 + $0x60] sm:$0xff]  ;;  %v53_v29 = vld [vmem:[%s9518_s0 + $0x68] sm:$0xff]  ;;  %v54_v31 = vld [vmem:[%s9518_s0 + $0x70] sm:$0xff] }
  0x30   :  { %v180_v28 = vld [vmem:[%s9518_s0 + $0x460] sm:$0xff]  ;;  %v181_v30 = vld [vmem:[%s9518_s0 + $0x468] sm:$0xff]  ;;  %v182_v32 = vld [vmem:[%s9518_s0 + $0x470] sm:$0xff] }
  0x31   :  { %4484 = vmatmul.mubr.msk.f32.gmra.mrb[2].mxu0 %vm305_vm0, %v43_v9  ;;  %v55_v33 = vld [vmem:[%s9518_s0 + $0x78] sm:$0xff]  ;;  %v56_v35 = vld [vmem:[%s9518_s0 + $0x80] sm:$0xff]  ;;  %v57_v37 = vld [vmem:[%s9518_s0 + $0x88] sm:$0xff] }
  0x32   :  { %4676 = vmatmul.mubr.msk.f32.gmra.mrb[2].mxu1 %vm305_vm0, %v171_v10  ;;  %4486 = vmatprep.mubr.msk.f32.mxu0 %vm305_vm0, %v44_v11  ;;  %v183_v34 = vld [vmem:[%s9518_s0 + $0x478] sm:$0xff]  ;;  %v184_v36 = vld [vmem:[%s9518_s0 + $0x480] sm:$0xff]  ;;  %v185_v38 = vld [vmem:[%s9518_s0 + $0x488] sm:$0xff] }
  0x33   :  { %4678 = vmatprep.mubr.msk.f32.mxu1 %vm305_vm0, %v172_v12  ;;  %v58_v39 = vld [vmem:[%s9518_s0 + $0x90] sm:$0xff]  ;;  %v59_v41 = vld [vmem:[%s9518_s0 + $0x98] sm:$0xff]  ;;  %v60_v43 = vld [vmem:[%s9518_s0 + $0xa0] sm:$0xff] }
  0x34   :  { %v186_v40 = vld [vmem:[%s9518_s0 + $0x490] sm:$0xff]  ;;  %v187_v42 = vld [vmem:[%s9518_s0 + $0x498] sm:$0xff]  ;;  %v188_v44 = vld [vmem:[%s9518_s0 + $0x4a0] sm:$0xff] }
  0x35   :  { %4487 = vmatmul.mubr.msk.f32.gmra.mrb[4].mxu0 %vm305_vm0, %v45_v13  ;;  %v61_v45 = vld [vmem:[%s9518_s0 + $0xa8] sm:$0xff]  ;;  %v62_v47 = vld [vmem:[%s9518_s0 + $0xb0] sm:$0xff]  ;;  %v63_v49 = vld [vmem:[%s9518_s0 + $0xb8] sm:$0xff] }
  0x36   :  { %4679 = vmatmul.mubr.msk.f32.gmra.mrb[4].mxu1 %vm305_vm0, %v173_v14  ;;  %4489 = vmatprep.mubr.msk.f32.mxu0 %vm305_vm0, %v46_v15  ;;  %v189_v46 = vld [vmem:[%s9518_s0 + $0x4a8] sm:$0xff]  ;;  %v190_v48 = vld [vmem:[%s9518_s0 + $0x4b0] sm:$0xff]  ;;  %v191_v50 = vld [vmem:[%s9518_s0 + $0x4b8] sm:$0xff] }
  0x37   :  { %4681 = vmatprep.mubr.msk.f32.mxu1 %vm305_vm0, %v174_v16  ;;  %v64_v51 = vld [vmem:[%s9518_s0 + $0xc0] sm:$0xff]  ;;  %v65_v53 = vld [vmem:[%s9518_s0 + $0xc8] sm:$0xff]  ;;  %v66_v55 = vld [vmem:[%s9518_s0 + $0xd0] sm:$0xff] }
  0x38   :  { %v192_v52 = vld [vmem:[%s9518_s0 + $0x4c0] sm:$0xff]  ;;  %v193_v54 = vld [vmem:[%s9518_s0 + $0x4c8] sm:$0xff]  ;;  %v194_v56 = vld [vmem:[%s9518_s0 + $0x4d0] sm:$0xff] }
  0x39   :  { %4490 = vmatmul.mubr.msk.f32.gmra.mrb[6].mxu0 %vm305_vm0, %v47_v17  ;;  %v67_v57 = vld [vmem:[%s9518_s0 + $0xd8] sm:$0xff]  ;;  %v68_v59 = vld [vmem:[%s9518_s0 + $0xe0] sm:$0xff]  ;;  %v69_v61 = vld [vmem:[%s9518_s0 + $0xe8] sm:$0xff] }
  0x3a   :  { %4682 = vmatmul.mubr.msk.f32.gmra.mrb[6].mxu1 %vm305_vm0, %v175_v18  ;;  %4492 = vmatprep.mubr.msk.f32.mxu0 %vm305_vm0, %v48_v19  ;;  %v195_v58 = vld [vmem:[%s9518_s0 + $0x4d8] sm:$0xff]  ;;  %v196_v60 = vld [vmem:[%s9518_s0 + $0x4e0] sm:$0xff]  ;;  %v197_v62 = vld [vmem:[%s9518_s0 + $0x4e8] sm:$0xff] }
  0x3b   :  { %4684 = vmatprep.mubr.msk.f32.mxu1 %vm305_vm0, %v176_v20  ;;  %v70_v63 = vld [vmem:[%s9518_s0 + $0xf0] sm:$0xff]  ;;  %v71_v1 = vld [vmem:[%s9518_s0 + $0xf8] sm:$0xff]  ;;  %v72_v3 = vld [vmem:[%s9518_s0 + $0x100] sm:$0xff] }
  0x3c   :  { %v198_v0 = vld [vmem:[%s9518_s0 + $0x4f0] sm:$0xff]  ;;  %v199_v2 = vld [vmem:[%s9518_s0 + $0x4f8] sm:$0xff]  ;;  %v200_v4 = vld [vmem:[%s9518_s0 + $0x500] sm:$0xff] }
  0x3d   :  { %4493 = vmatmul.mubr.msk.f32.gmra.mrb[8].mxu0 %vm305_vm0, %v49_v21  ;;  %v73_v5 = vld [vmem:[%s9518_s0 + $0x108] sm:$0xff]  ;;  %v74_v7 = vld [vmem:[%s9518_s0 + $0x110] sm:$0xff]  ;;  %v75_v9 = vld [vmem:[%s9518_s0 + $0x118] sm:$0xff] }
  0x3e   :  { %4685 = vmatmul.mubr.msk.f32.gmra.mrb[8].mxu1 %vm305_vm0, %v177_v22  ;;  %4495 = vmatprep.mubr.msk.f32.mxu0 %vm305_vm0, %v50_v23  ;;  %v201_v6 = vld [vmem:[%s9518_s0 + $0x508] sm:$0xff]  ;;  %v202_v8 = vld [vmem:[%s9518_s0 + $0x510] sm:$0xff]  ;;  %v203_v10 = vld [vmem:[%s9518_s0 + $0x518] sm:$0xff] }
  0x3f   :  { %4687 = vmatprep.mubr.msk.f32.mxu1 %vm305_vm0, %v178_v24  ;;  %v76_v11 = vld [vmem:[%s9518_s0 + $0x120] sm:$0xff]  ;;  %v77_v13 = vld [vmem:[%s9518_s0 + $0x128] sm:$0xff]  ;;  %v78_v15 = vld [vmem:[%s9518_s0 + $0x130] sm:$0xff] }
  0x40   :  { %v204_v12 = vld [vmem:[%s9518_s0 + $0x520] sm:$0xff]  ;;  %v205_v14 = vld [vmem:[%s9518_s0 + $0x528] sm:$0xff]  ;;  %v206_v16 = vld [vmem:[%s9518_s0 + $0x530] sm:$0xff] }
  0x41   :  { %4496 = vmatmul.mubr.msk.f32.gmra.mrb[10].mxu0 %vm305_vm0, %v51_v25  ;;  %v79_v17 = vld [vmem:[%s9518_s0 + $0x138] sm:$0xff]  ;;  %v80_v19 = vld [vmem:[%s9518_s0 + $0x140] sm:$0xff]  ;;  %v81_v21 = vld [vmem:[%s9518_s0 + $0x148] sm:$0xff] }
  0x42   :  { %4688 = vmatmul.mubr.msk.f32.gmra.mrb[10].mxu1 %vm305_vm0, %v179_v26  ;;  %4498 = vmatprep.mubr.msk.f32.mxu0 %vm305_vm0, %v52_v27  ;;  %v207_v18 = vld [vmem:[%s9518_s0 + $0x538] sm:$0xff]  ;;  %v208_v20 = vld [vmem:[%s9518_s0 + $0x540] sm:$0xff]  ;;  %v209_v22 = vld [vmem:[%s9518_s0 + $0x548] sm:$0xff] }
  0x43   :  { %4690 = vmatprep.mubr.msk.f32.mxu1 %vm305_vm0, %v180_v28  ;;  %v82_v23 = vld [vmem:[%s9518_s0 + $0x150] sm:$0xff]  ;;  %v83_v25 = vld [vmem:[%s9518_s0 + $0x158] sm:$0xff]  ;;  %v84_v27 = vld [vmem:[%s9518_s0 + $0x160] sm:$0xff] }
  0x44   :  { %v210_v24 = vld [vmem:[%s9518_s0 + $0x550] sm:$0xff]  ;;  %v211_v26 = vld [vmem:[%s9518_s0 + $0x558] sm:$0xff]  ;;  %v212_v28 = vld [vmem:[%s9518_s0 + $0x560] sm:$0xff] }
  0x45   :  { %4499 = vmatmul.mubr.msk.f32.gmra.mrb[12].mxu0 %vm305_vm0, %v53_v29  ;;  %v85_v29 = vld [vmem:[%s9518_s0 + $0x168] sm:$0xff] }
  0x46   :  { %4691 = vmatmul.mubr.msk.f32.gmra.mrb[12].mxu1 %vm305_vm0, %v181_v30  ;;  %4501 = vmatprep.mubr.msk.f32.mxu0 %vm305_vm0, %v54_v31  ;;  %v213_v30 = vld [vmem:[%s9518_s0 + $0x568] sm:$0xff]  ;;  %v86_v31 = vld [vmem:[%s9518_s0 + $0x170] sm:$0xff] }
  0x47   :  { %4693 = vmatprep.mubr.msk.f32.mxu1 %vm305_vm0, %v182_v32  ;;  %v214_v32 = vld [vmem:[%s9518_s0 + $0x570] sm:$0xff] }
  0x49   :  { %4502 = vmatmul.mubr.msk.f32.gmra.mrb[14].mxu0 %vm305_vm0, %v55_v33  ;;  %v87_v33 = vld [vmem:[%s9518_s0 + $0x178] sm:$0xff] }
  0x4a   :  { %4694 = vmatmul.mubr.msk.f32.gmra.mrb[14].mxu1 %vm305_vm0, %v183_v34  ;;  %4504 = vmatprep.mubr.msk.f32.mxu0 %vm305_vm0, %v56_v35  ;;  %v215_v34 = vld [vmem:[%s9518_s0 + $0x578] sm:$0xff]  ;;  %v88_v35 = vld [vmem:[%s9518_s0 + $0x180] sm:$0xff] }
  0x4b   :  { %4696 = vmatprep.mubr.msk.f32.mxu1 %vm305_vm0, %v184_v36  ;;  %v216_v36 = vld [vmem:[%s9518_s0 + $0x580] sm:$0xff] }
  0x4d   :  { %4505 = vmatmul.mubr.msk.f32.gmra.mrb[16].mxu0 %vm305_vm0, %v57_v37  ;;  %v89_v37 = vld [vmem:[%s9518_s0 + $0x188] sm:$0xff] }
  0x4e   :  { %4697 = vmatmul.mubr.msk.f32.gmra.mrb[16].mxu1 %vm305_vm0, %v185_v38  ;;  %4507 = vmatprep.mubr.msk.f32.mxu0 %vm305_vm0, %v58_v39  ;;  %v217_v38 = vld [vmem:[%s9518_s0 + $0x588] sm:$0xff]  ;;  %v90_v39 = vld [vmem:[%s9518_s0 + $0x190] sm:$0xff] }
  0x4f   :  { %4699 = vmatprep.mubr.msk.f32.mxu1 %vm305_vm0, %v186_v40  ;;  %v218_v40 = vld [vmem:[%s9518_s0 + $0x590] sm:$0xff] }
  0x51   :  { %4508 = vmatmul.mubr.msk.f32.gmra.mrb[18].mxu0 %vm305_vm0, %v59_v41  ;;  %v91_v41 = vld [vmem:[%s9518_s0 + $0x198] sm:$0xff] }
  0x52   :  { %4700 = vmatmul.mubr.msk.f32.gmra.mrb[18].mxu1 %vm305_vm0, %v187_v42  ;;  %4510 = vmatprep.mubr.msk.f32.mxu0 %vm305_vm0, %v60_v43  ;;  %v219_v42 = vld [vmem:[%s9518_s0 + $0x598] sm:$0xff]  ;;  %v92_v43 = vld [vmem:[%s9518_s0 + $0x1a0] sm:$0xff] }
  0x53   :  { %4702 = vmatprep.mubr.msk.f32.mxu1 %vm305_vm0, %v188_v44  ;;  %v220_v44 = vld [vmem:[%s9518_s0 + $0x5a0] sm:$0xff] }
  0x55   :  { %4511 = vmatmul.mubr.msk.f32.gmra.mrb[20].mxu0 %vm305_vm0, %v61_v45  ;;  %v93_v45 = vld [vmem:[%s9518_s0 + $0x1a8] sm:$0xff] }
  0x56   :  { %4703 = vmatmul.mubr.msk.f32.gmra.mrb[20].mxu1 %vm305_vm0, %v189_v46  ;;  %4513 = vmatprep.mubr.msk.f32.mxu0 %vm305_vm0, %v62_v47  ;;  %v221_v46 = vld [vmem:[%s9518_s0 + $0x5a8] sm:$0xff]  ;;  %v94_v47 = vld [vmem:[%s9518_s0 + $0x1b0] sm:$0xff] }
  0x57   :  { %4705 = vmatprep.mubr.msk.f32.mxu1 %vm305_vm0, %v190_v48  ;;  %v222_v48 = vld [vmem:[%s9518_s0 + $0x5b0] sm:$0xff] }
  0x59   :  { %4514 = vmatmul.mubr.msk.f32.gmra.mrb[22].mxu0 %vm305_vm0, %v63_v49  ;;  %v95_v49 = vld [vmem:[%s9518_s0 + $0x1b8] sm:$0xff] }
  0x5a   :  { %4706 = vmatmul.mubr.msk.f32.gmra.mrb[22].mxu1 %vm305_vm0, %v191_v50  ;;  %4516 = vmatprep.mubr.msk.f32.mxu0 %vm305_vm0, %v64_v51  ;;  %v223_v50 = vld [vmem:[%s9518_s0 + $0x5b8] sm:$0xff]  ;;  %v96_v51 = vld [vmem:[%s9518_s0 + $0x1c0] sm:$0xff] }
  0x5b   :  { %4708 = vmatprep.mubr.msk.f32.mxu1 %vm305_vm0, %v192_v52  ;;  %v224_v52 = vld [vmem:[%s9518_s0 + $0x5c0] sm:$0xff] }
  0x5d   :  { %4517 = vmatmul.mubr.msk.f32.gmra.mrb[24].mxu0 %vm305_vm0, %v65_v53  ;;  %v97_v53 = vld [vmem:[%s9518_s0 + $0x1c8] sm:$0xff] }
  0x5e   :  { %4709 = vmatmul.mubr.msk.f32.gmra.mrb[24].mxu1 %vm305_vm0, %v193_v54  ;;  %4519 = vmatprep.mubr.msk.f32.mxu0 %vm305_vm0, %v66_v55  ;;  %v225_v54 = vld [vmem:[%s9518_s0 + $0x5c8] sm:$0xff]  ;;  %v98_v55 = vld [vmem:[%s9518_s0 + $0x1d0] sm:$0xff] }
  0x5f   :  { %4711 = vmatprep.mubr.msk.f32.mxu1 %vm305_vm0, %v194_v56  ;;  %v226_v56 = vld [vmem:[%s9518_s0 + $0x5d0] sm:$0xff] }
  0x61   :  { %4520 = vmatmul.mubr.msk.f32.gmra.mrb[26].mxu0 %vm305_vm0, %v67_v57  ;;  %v99_v57 = vld [vmem:[%s9518_s0 + $0x1d8] sm:$0xff] }
  0x62   :  { %4712 = vmatmul.mubr.msk.f32.gmra.mrb[26].mxu1 %vm305_vm0, %v195_v58  ;;  %4522 = vmatprep.mubr.msk.f32.mxu0 %vm305_vm0, %v68_v59  ;;  %v227_v58 = vld [vmem:[%s9518_s0 + $0x5d8] sm:$0xff]  ;;  %v100_v59 = vld [vmem:[%s9518_s0 + $0x1e0] sm:$0xff] }
  0x63   :  { %4714 = vmatprep.mubr.msk.f32.mxu1 %vm305_vm0, %v196_v60  ;;  %v228_v60 = vld [vmem:[%s9518_s0 + $0x5e0] sm:$0xff] }
  0x65   :  { %4523 = vmatmul.mubr.msk.f32.gmra.mrb[28].mxu0 %vm305_vm0, %v69_v61  ;;  %v101_v61 = vld [vmem:[%s9518_s0 + $0x1e8] sm:$0xff] }
  0x66   :  { %4715 = vmatmul.mubr.msk.f32.gmra.mrb[28].mxu1 %vm305_vm0, %v197_v62  ;;  %4525 = vmatprep.mubr.msk.f32.mxu0 %vm305_vm0, %v70_v63  ;;  %v229_v62 = vld [vmem:[%s9518_s0 + $0x5e8] sm:$0xff]  ;;  %v102_v63 = vld [vmem:[%s9518_s0 + $0x1f0] sm:$0xff] }
  0x67   :  { %4717 = vmatprep.mubr.msk.f32.mxu1 %vm305_vm0, %v198_v0  ;;  %v230_v0 = vld [vmem:[%s9518_s0 + $0x5f0] sm:$0xff] }
  0x69   :  { %4526 = vmatmul.mubr.msk.f32.gmra.mrb[30].mxu0 %vm305_vm0, %v71_v1  ;;  %v103_v1 = vld [vmem:[%s9518_s0 + $0x1f8] sm:$0xff] }
  0x6a   :  { %4718 = vmatmul.mubr.msk.f32.gmra.mrb[30].mxu1 %vm305_vm0, %v199_v2  ;;  %4528 = vmatprep.mubr.msk.f32.mxu0 %vm305_vm0, %v72_v3  ;;  %v231_v2 = vld [vmem:[%s9518_s0 + $0x5f8] sm:$0xff]  ;;  %v104_v3 = vld [vmem:[%s9518_s0 + $0x200] sm:$0xff] }
  0x6b   :  { %4720 = vmatprep.mubr.msk.f32.mxu1 %vm305_vm0, %v200_v4  ;;  %v232_v4 = vld [vmem:[%s9518_s0 + $0x600] sm:$0xff] }
  0x6d   :  { %4529 = vmatmul.mubr.msk.f32.gmra.mrb[32].mxu0 %vm305_vm0, %v73_v5  ;;  %v105_v5 = vld [vmem:[%s9518_s0 + $0x208] sm:$0xff] }
  0x6e   :  { %4721 = vmatmul.mubr.msk.f32.gmra.mrb[32].mxu1 %vm305_vm0, %v201_v6  ;;  %4531 = vmatprep.mubr.msk.f32.mxu0 %vm305_vm0, %v74_v7  ;;  %v233_v6 = vld [vmem:[%s9518_s0 + $0x608] sm:$0xff]  ;;  %v106_v7 = vld [vmem:[%s9518_s0 + $0x210] sm:$0xff] }
  0x6f   :  { %4723 = vmatprep.mubr.msk.f32.mxu1 %vm305_vm0, %v202_v8  ;;  %v234_v8 = vld [vmem:[%s9518_s0 + $0x610] sm:$0xff] }
  0x71   :  { %4532 = vmatmul.mubr.msk.f32.gmra.mrb[34].mxu0 %vm305_vm0, %v75_v9  ;;  %v107_v9 = vld [vmem:[%s9518_s0 + $0x218] sm:$0xff] }
  0x72   :  { %4724 = vmatmul.mubr.msk.f32.gmra.mrb[34].mxu1 %vm305_vm0, %v203_v10  ;;  %4534 = vmatprep.mubr.msk.f32.mxu0 %vm305_vm0, %v76_v11  ;;  %v235_v10 = vld [vmem:[%s9518_s0 + $0x618] sm:$0xff]  ;;  %v108_v11 = vld [vmem:[%s9518_s0 + $0x220] sm:$0xff] }
  0x73   :  { %4726 = vmatprep.mubr.msk.f32.mxu1 %vm305_vm0, %v204_v12  ;;  %v236_v12 = vld [vmem:[%s9518_s0 + $0x620] sm:$0xff] }
  0x75   :  { %4535 = vmatmul.mubr.msk.f32.gmra.mrb[36].mxu0 %vm305_vm0, %v77_v13  ;;  %v109_v13 = vld [vmem:[%s9518_s0 + $0x228] sm:$0xff] }
  0x76   :  { %4727 = vmatmul.mubr.msk.f32.gmra.mrb[36].mxu1 %vm305_vm0, %v205_v14  ;;  %4537 = vmatprep.mubr.msk.f32.mxu0 %vm305_vm0, %v78_v15  ;;  %v237_v14 = vld [vmem:[%s9518_s0 + $0x628] sm:$0xff]  ;;  %v110_v15 = vld [vmem:[%s9518_s0 + $0x230] sm:$0xff] }
  0x77   :  { %4729 = vmatprep.mubr.msk.f32.mxu1 %vm305_vm0, %v206_v16  ;;  %v238_v16 = vld [vmem:[%s9518_s0 + $0x630] sm:$0xff] }
  0x79   :  { %4538 = vmatmul.mubr.msk.f32.gmra.mrb[38].mxu0 %vm305_vm0, %v79_v17  ;;  %v111_v17 = vld [vmem:[%s9518_s0 + $0x238] sm:$0xff] }
  0x7a   :  { %4730 = vmatmul.mubr.msk.f32.gmra.mrb[38].mxu1 %vm305_vm0, %v207_v18  ;;  %4540 = vmatprep.mubr.msk.f32.mxu0 %vm305_vm0, %v80_v19  ;;  %v239_v18 = vld [vmem:[%s9518_s0 + $0x638] sm:$0xff]  ;;  %v112_v19 = vld [vmem:[%s9518_s0 + $0x240] sm:$0xff] }
  0x7b   :  { %4732 = vmatprep.mubr.msk.f32.mxu1 %vm305_vm0, %v208_v20  ;;  %v240_v20 = vld [vmem:[%s9518_s0 + $0x640] sm:$0xff] }
  0x7d   :  { %4541 = vmatmul.mubr.msk.f32.gmra.mrb[40].mxu0 %vm305_vm0, %v81_v21  ;;  %v113_v21 = vld [vmem:[%s9518_s0 + $0x248] sm:$0xff] }
  0x7e   :  { %4733 = vmatmul.mubr.msk.f32.gmra.mrb[40].mxu1 %vm305_vm0, %v209_v22  ;;  %4543 = vmatprep.mubr.msk.f32.mxu0 %vm305_vm0, %v82_v23  ;;  %v241_v22 = vld [vmem:[%s9518_s0 + $0x648] sm:$0xff]  ;;  %v114_v23 = vld [vmem:[%s9518_s0 + $0x250] sm:$0xff] }
  0x7f   :  { %4735 = vmatprep.mubr.msk.f32.mxu1 %vm305_vm0, %v210_v24  ;;  %v242_v24 = vld [vmem:[%s9518_s0 + $0x650] sm:$0xff] }
  0x81   :  { %4544 = vmatmul.mubr.msk.f32.gmra.mrb[42].mxu0 %vm305_vm0, %v83_v25  ;;  %v115_v25 = vld [vmem:[%s9518_s0 + $0x258] sm:$0xff] }
  0x82   :  { %4736 = vmatmul.mubr.msk.f32.gmra.mrb[42].mxu1 %vm305_vm0, %v211_v26  ;;  %4546 = vmatprep.mubr.msk.f32.mxu0 %vm305_vm0, %v84_v27  ;;  %v243_v26 = vld [vmem:[%s9518_s0 + $0x658] sm:$0xff]  ;;  %v116_v27 = vld [vmem:[%s9518_s0 + $0x260] sm:$0xff] }
  0x83   :  { %4738 = vmatprep.mubr.msk.f32.mxu1 %vm305_vm0, %v212_v28  ;;  %v244_v28 = vld [vmem:[%s9518_s0 + $0x660] sm:$0xff] }
  0x85   :  { %4547 = vmatmul.mubr.msk.f32.gmra.mrb[44].mxu0 %vm305_vm0, %v85_v29  ;;  %v117_v29 = vld [vmem:[%s9518_s0 + $0x268] sm:$0xff] }
  0x86   :  { %4739 = vmatmul.mubr.msk.f32.gmra.mrb[44].mxu1 %vm305_vm0, %v213_v30  ;;  %4549 = vmatprep.mubr.msk.f32.mxu0 %vm305_vm0, %v86_v31  ;;  %v245_v30 = vld [vmem:[%s9518_s0 + $0x668] sm:$0xff]  ;;  %v118_v31 = vld [vmem:[%s9518_s0 + $0x270] sm:$0xff] }
  0x87   :  { %4741 = vmatprep.mubr.msk.f32.mxu1 %vm305_vm0, %v214_v32  ;;  %v246_v32 = vld [vmem:[%s9518_s0 + $0x670] sm:$0xff] }
  0x89   :  { %4550 = vmatmul.mubr.msk.f32.gmra.mrb[46].mxu0 %vm305_vm0, %v87_v33  ;;  %v119_v33 = vld [vmem:[%s9518_s0 + $0x278] sm:$0xff] }
  0x8a   :  { %4742 = vmatmul.mubr.msk.f32.gmra.mrb[46].mxu1 %vm305_vm0, %v215_v34  ;;  %4552 = vmatprep.mubr.msk.f32.mxu0 %vm305_vm0, %v88_v35  ;;  %v247_v34 = vld [vmem:[%s9518_s0 + $0x678] sm:$0xff]  ;;  %v120_v35 = vld [vmem:[%s9518_s0 + $0x280] sm:$0xff] }
  0x8b   :  { %4744 = vmatprep.mubr.msk.f32.mxu1 %vm305_vm0, %v216_v36  ;;  %v248_v36 = vld [vmem:[%s9518_s0 + $0x680] sm:$0xff] }
  0x8d   :  { %4553 = vmatmul.mubr.msk.f32.gmra.mrb[48].mxu0 %vm305_vm0, %v89_v37  ;;  %v121_v37 = vld [vmem:[%s9518_s0 + $0x288] sm:$0xff] }
  0x8e   :  { %4745 = vmatmul.mubr.msk.f32.gmra.mrb[48].mxu1 %vm305_vm0, %v217_v38  ;;  %4555 = vmatprep.mubr.msk.f32.mxu0 %vm305_vm0, %v90_v39  ;;  %v249_v38 = vld [vmem:[%s9518_s0 + $0x688] sm:$0xff]  ;;  %v122_v39 = vld [vmem:[%s9518_s0 + $0x290] sm:$0xff] }
  0x8f   :  { %4747 = vmatprep.mubr.msk.f32.mxu1 %vm305_vm0, %v218_v40  ;;  %v250_v40 = vld [vmem:[%s9518_s0 + $0x690] sm:$0xff] }
  0x91   :  { %4556 = vmatmul.mubr.msk.f32.gmra.mrb[50].mxu0 %vm305_vm0, %v91_v41  ;;  %v123_v41 = vld [vmem:[%s9518_s0 + $0x298] sm:$0xff] }
  0x92   :  { %4748 = vmatmul.mubr.msk.f32.gmra.mrb[50].mxu1 %vm305_vm0, %v219_v42  ;;  %4558 = vmatprep.mubr.msk.f32.mxu0 %vm305_vm0, %v92_v43  ;;  %v251_v42 = vld [vmem:[%s9518_s0 + $0x698] sm:$0xff]  ;;  %v124_v43 = vld [vmem:[%s9518_s0 + $0x2a0] sm:$0xff] }
  0x93   :  { %4750 = vmatprep.mubr.msk.f32.mxu1 %vm305_vm0, %v220_v44  ;;  %v252_v44 = vld [vmem:[%s9518_s0 + $0x6a0] sm:$0xff] }
  0x95   :  { %4559 = vmatmul.mubr.msk.f32.gmra.mrb[52].mxu0 %vm305_vm0, %v93_v45  ;;  %v125_v45 = vld [vmem:[%s9518_s0 + $0x2a8] sm:$0xff] }
  0x96   :  { %4751 = vmatmul.mubr.msk.f32.gmra.mrb[52].mxu1 %vm305_vm0, %v221_v46  ;;  %4561 = vmatprep.mubr.msk.f32.mxu0 %vm305_vm0, %v94_v47  ;;  %v253_v46 = vld [vmem:[%s9518_s0 + $0x6a8] sm:$0xff]  ;;  %v126_v47 = vld [vmem:[%s9518_s0 + $0x2b0] sm:$0xff] }
  0x97   :  { %4753 = vmatprep.mubr.msk.f32.mxu1 %vm305_vm0, %v222_v48  ;;  %v254_v48 = vld [vmem:[%s9518_s0 + $0x6b0] sm:$0xff] }
  0x99   :  { %4562 = vmatmul.mubr.msk.f32.gmra.mrb[54].mxu0 %vm305_vm0, %v95_v49  ;;  %v127_v49 = vld [vmem:[%s9518_s0 + $0x2b8] sm:$0xff] }
  0x9a   :  { %4754 = vmatmul.mubr.msk.f32.gmra.mrb[54].mxu1 %vm305_vm0, %v223_v50  ;;  %4564 = vmatprep.mubr.msk.f32.mxu0 %vm305_vm0, %v96_v51  ;;  %v255_v50 = vld [vmem:[%s9518_s0 + $0x6b8] sm:$0xff]  ;;  %v128_v51 = vld [vmem:[%s9518_s0 + $0x2c0] sm:$0xff] }
  0x9b   :  { %4756 = vmatprep.mubr.msk.f32.mxu1 %vm305_vm0, %v224_v52  ;;  %v256_v52 = vld [vmem:[%s9518_s0 + $0x6c0] sm:$0xff] }
  0x9d   :  { %4565 = vmatmul.mubr.msk.f32.gmra.mrb[56].mxu0 %vm305_vm0, %v97_v53  ;;  %v129_v53 = vld [vmem:[%s9518_s0 + $0x2c8] sm:$0xff] }
  0x9e   :  { %4757 = vmatmul.mubr.msk.f32.gmra.mrb[56].mxu1 %vm305_vm0, %v225_v54  ;;  %4567 = vmatprep.mubr.msk.f32.mxu0 %vm305_vm0, %v98_v55  ;;  %v257_v54 = vld [vmem:[%s9518_s0 + $0x6c8] sm:$0xff]  ;;  %v130_v55 = vld [vmem:[%s9518_s0 + $0x2d0] sm:$0xff] }
  0x9f   :  { %4759 = vmatprep.mubr.msk.f32.mxu1 %vm305_vm0, %v226_v56  ;;  %v258_v56 = vld [vmem:[%s9518_s0 + $0x6d0] sm:$0xff] }
  0xa1   :  { %4568 = vmatmul.mubr.msk.f32.gmra.mrb[58].mxu0 %vm305_vm0, %v99_v57  ;;  %v131_v57 = vld [vmem:[%s9518_s0 + $0x2d8] sm:$0xff] }
  0xa2   :  { %4760 = vmatmul.mubr.msk.f32.gmra.mrb[58].mxu1 %vm305_vm0, %v227_v58  ;;  %4570 = vmatprep.mubr.msk.f32.mxu0 %vm305_vm0, %v100_v59  ;;  %v259_v58 = vld [vmem:[%s9518_s0 + $0x6d8] sm:$0xff]  ;;  %v132_v59 = vld [vmem:[%s9518_s0 + $0x2e0] sm:$0xff] }
  0xa3   :  { %4762 = vmatprep.mubr.msk.f32.mxu1 %vm305_vm0, %v228_v60  ;;  %v260_v60 = vld [vmem:[%s9518_s0 + $0x6e0] sm:$0xff] }
  0xa5   :  { %4571 = vmatmul.mubr.msk.f32.gmra.mrb[60].mxu0 %vm305_vm0, %v101_v61  ;;  %v133_v61 = vld [vmem:[%s9518_s0 + $0x2e8] sm:$0xff] }
  0xa6   :  { %4763 = vmatmul.mubr.msk.f32.gmra.mrb[60].mxu1 %vm305_vm0, %v229_v62  ;;  %4573 = vmatprep.mubr.msk.f32.mxu0 %vm305_vm0, %v102_v63  ;;  %v261_v62 = vld [vmem:[%s9518_s0 + $0x6e8] sm:$0xff]  ;;  %v134_v63 = vld [vmem:[%s9518_s0 + $0x2f0] sm:$0xff] }
  0xa7   :  { %4765 = vmatprep.mubr.msk.f32.mxu1 %vm305_vm0, %v230_v0  ;;  %v262_v0 = vld [vmem:[%s9518_s0 + $0x6f0] sm:$0xff] }
  0xa9   :  { %4574 = vmatmul.mubr.msk.f32.gmra.mrb[62].mxu0 %vm305_vm0, %v103_v1  ;;  %v135_v1 = vld [vmem:[%s9518_s0 + $0x2f8] sm:$0xff] }
  0xaa   :  { %4766 = vmatmul.mubr.msk.f32.gmra.mrb[62].mxu1 %vm305_vm0, %v231_v2  ;;  %4576 = vmatprep.mubr.msk.f32.mxu0 %vm305_vm0, %v104_v3  ;;  %v263_v2 = vld [vmem:[%s9518_s0 + $0x6f8] sm:$0xff]  ;;  %v136_v3 = vld [vmem:[%s9518_s0 + $0x300] sm:$0xff] }
  0xab   :  { %4768 = vmatprep.mubr.msk.f32.mxu1 %vm305_vm0, %v232_v4  ;;  %v264_v4 = vld [vmem:[%s9518_s0 + $0x700] sm:$0xff] }
  0xad   :  { %4577 = vmatmul.mubr.msk.f32.gmra.mrb[64].mxu0 %vm305_vm0, %v105_v5  ;;  %v137_v5 = vld [vmem:[%s9518_s0 + $0x308] sm:$0xff] }
  0xae   :  { %4769 = vmatmul.mubr.msk.f32.gmra.mrb[64].mxu1 %vm305_vm0, %v233_v6  ;;  %4579 = vmatprep.mubr.msk.f32.mxu0 %vm305_vm0, %v106_v7  ;;  %v265_v6 = vld [vmem:[%s9518_s0 + $0x708] sm:$0xff]  ;;  %v138_v7 = vld [vmem:[%s9518_s0 + $0x310] sm:$0xff] }
  0xaf   :  { %4771 = vmatprep.mubr.msk.f32.mxu1 %vm305_vm0, %v234_v8  ;;  %v266_v8 = vld [vmem:[%s9518_s0 + $0x710] sm:$0xff] }
  0xb1   :  { %4580 = vmatmul.mubr.msk.f32.gmra.mrb[66].mxu0 %vm305_vm0, %v107_v9  ;;  %v139_v9 = vld [vmem:[%s9518_s0 + $0x318] sm:$0xff] }
  0xb2   :  { %4772 = vmatmul.mubr.msk.f32.gmra.mrb[66].mxu1 %vm305_vm0, %v235_v10  ;;  %4582 = vmatprep.mubr.msk.f32.mxu0 %vm305_vm0, %v108_v11  ;;  %v267_v10 = vld [vmem:[%s9518_s0 + $0x718] sm:$0xff]  ;;  %v140_v11 = vld [vmem:[%s9518_s0 + $0x320] sm:$0xff] }
  0xb3   :  { %4774 = vmatprep.mubr.msk.f32.mxu1 %vm305_vm0, %v236_v12  ;;  %v268_v12 = vld [vmem:[%s9518_s0 + $0x720] sm:$0xff] }
  0xb5   :  { %4583 = vmatmul.mubr.msk.f32.gmra.mrb[68].mxu0 %vm305_vm0, %v109_v13  ;;  %v141_v13 = vld [vmem:[%s9518_s0 + $0x328] sm:$0xff] }
  0xb6   :  { %4775 = vmatmul.mubr.msk.f32.gmra.mrb[68].mxu1 %vm305_vm0, %v237_v14  ;;  %4585 = vmatprep.mubr.msk.f32.mxu0 %vm305_vm0, %v110_v15  ;;  %v269_v14 = vld [vmem:[%s9518_s0 + $0x728] sm:$0xff]  ;;  %v142_v15 = vld [vmem:[%s9518_s0 + $0x330] sm:$0xff] }
  0xb7   :  { %4777 = vmatprep.mubr.msk.f32.mxu1 %vm305_vm0, %v238_v16  ;;  %v270_v16 = vld [vmem:[%s9518_s0 + $0x730] sm:$0xff] }
  0xb9   :  { %4586 = vmatmul.mubr.msk.f32.gmra.mrb[70].mxu0 %vm305_vm0, %v111_v17  ;;  %v143_v17 = vld [vmem:[%s9518_s0 + $0x338] sm:$0xff] }
  0xba   :  { %4778 = vmatmul.mubr.msk.f32.gmra.mrb[70].mxu1 %vm305_vm0, %v239_v18  ;;  %4588 = vmatprep.mubr.msk.f32.mxu0 %vm305_vm0, %v112_v19  ;;  %v271_v18 = vld [vmem:[%s9518_s0 + $0x738] sm:$0xff]  ;;  %v144_v19 = vld [vmem:[%s9518_s0 + $0x340] sm:$0xff] }
  0xbb   :  { %4780 = vmatprep.mubr.msk.f32.mxu1 %vm305_vm0, %v240_v20  ;;  %v272_v20 = vld [vmem:[%s9518_s0 + $0x740] sm:$0xff] }
  0xbd   :  { %4589 = vmatmul.mubr.msk.f32.gmra.mrb[72].mxu0 %vm305_vm0, %v113_v21  ;;  %v145_v21 = vld [vmem:[%s9518_s0 + $0x348] sm:$0xff] }
  0xbe   :  { %4781 = vmatmul.mubr.msk.f32.gmra.mrb[72].mxu1 %vm305_vm0, %v241_v22  ;;  %4591 = vmatprep.mubr.msk.f32.mxu0 %vm305_vm0, %v114_v23  ;;  %v273_v22 = vld [vmem:[%s9518_s0 + $0x748] sm:$0xff]  ;;  %v146_v23 = vld [vmem:[%s9518_s0 + $0x350] sm:$0xff] }
  0xbf   :  { %4783 = vmatprep.mubr.msk.f32.mxu1 %vm305_vm0, %v242_v24  ;;  %v274_v24 = vld [vmem:[%s9518_s0 + $0x750] sm:$0xff] }
  0xc1   :  { %4592 = vmatmul.mubr.msk.f32.gmra.mrb[74].mxu0 %vm305_vm0, %v115_v25  ;;  %v6340_v25 = vld [vmem:[#allocation4] ss:$0 sm:$0xff] }
  0xc2   :  { %4784 = vmatmul.mubr.msk.f32.gmra.mrb[74].mxu1 %vm305_vm0, %v243_v26  ;;  %4594 = vmatprep.mubr.msk.f32.mxu0 %vm305_vm0, %v116_v27  ;;  %v147_v26 = vld [vmem:[%s9518_s0 + $0x358] sm:$0xff] }
  0xc3   :  { %4786 = vmatprep.mubr.msk.f32.mxu1 %vm305_vm0, %v244_v28  ;;  %v275_v27 = vld [vmem:[%s9518_s0 + $0x758] sm:$0xff]  ;;  %v148_v28 = vld [vmem:[%s9518_s0 + $0x360] sm:$0xff] }
  0xc5   :  { %4595 = vmatmul.mubr.msk.f32.gmra.mrb[76].mxu0 %vm305_vm0, %v117_v29  ;;  %v276_v29 = vld [vmem:[%s9518_s0 + $0x760] sm:$0xff] }
  0xc6   :  { %4787 = vmatmul.mubr.msk.f32.gmra.mrb[76].mxu1 %vm305_vm0, %v245_v30  ;;  %4597 = vmatprep.mubr.msk.f32.mxu0 %vm305_vm0, %v118_v31 }
  0xc7   :  { %4789 = vmatprep.mubr.msk.f32.mxu1 %vm305_vm0, %v246_v32 }
  0xc9   :  { %4598 = vmatmul.mubr.msk.f32.gmra.mrb[78].mxu0 %vm305_vm0, %v119_v33 }
  0xca   :  { %4790 = vmatmul.mubr.msk.f32.gmra.mrb[78].mxu1 %vm305_vm0, %v247_v34  ;;  %4600 = vmatprep.mubr.msk.f32.mxu0 %vm305_vm0, %v120_v35 }
  0xcb   :  { %4792 = vmatprep.mubr.msk.f32.mxu1 %vm305_vm0, %v248_v36 }
  0xcd   :  { %4601 = vmatmul.mubr.msk.f32.gmra.mrb[80].mxu0 %vm305_vm0, %v121_v37 }
  0xce   :  { %4793 = vmatmul.mubr.msk.f32.gmra.mrb[80].mxu1 %vm305_vm0, %v249_v38  ;;  %4603 = vmatprep.mubr.msk.f32.mxu0 %vm305_vm0, %v122_v39  ;;  %v149_v38 = vld [vmem:[%s9518_s0 + $0x368] sm:$0xff] }
  0xcf   :  { %4795 = vmatprep.mubr.msk.f32.mxu1 %vm305_vm0, %v250_v40  ;;  %v277_v39 = vld [vmem:[%s9518_s0 + $0x768] sm:$0xff] }
  0xd1   :  { %4604 = vmatmul.mubr.msk.f32.gmra.mrb[82].mxu0 %vm305_vm0, %v123_v41 }
  0xd2   :  { %4796 = vmatmul.mubr.msk.f32.gmra.mrb[82].mxu1 %vm305_vm0, %v251_v42  ;;  %4606 = vmatprep.mubr.msk.f32.mxu0 %vm305_vm0, %v124_v43  ;;  %v150_v42 = vld [vmem:[%s9518_s0 + $0x370] sm:$0xff] }
  0xd3   :  { %4798 = vmatprep.mubr.msk.f32.mxu1 %vm305_vm0, %v252_v44  ;;  %v278_v43 = vld [vmem:[%s9518_s0 + $0x770] sm:$0xff] }
  0xd5   :  { %4607 = vmatmul.mubr.msk.f32.gmra.mrb[84].mxu0 %vm305_vm0, %v125_v45 }
  0xd6   :  { %4799 = vmatmul.mubr.msk.f32.gmra.mrb[84].mxu1 %vm305_vm0, %v253_v46  ;;  %4609 = vmatprep.mubr.msk.f32.mxu0 %vm305_vm0, %v126_v47 }
  0xd7   :  { %4801 = vmatprep.mubr.msk.f32.mxu1 %vm305_vm0, %v254_v48 }
  0xd9   :  { %4610 = vmatmul.mubr.msk.f32.gmra.mrb[86].mxu0 %vm305_vm0, %v127_v49 }
  0xda   :  { %4802 = vmatmul.mubr.msk.f32.gmra.mrb[86].mxu1 %vm305_vm0, %v255_v50  ;;  %4612 = vmatprep.mubr.msk.f32.mxu0 %vm305_vm0, %v128_v51 }
  0xdb   :  { %4804 = vmatprep.mubr.msk.f32.mxu1 %vm305_vm0, %v256_v52  ;;  %v151_v52 = vld [vmem:[%s9518_s0 + $0x378] sm:$0xff] }
  0xdd   :  { %4613 = vmatmul.mubr.msk.f32.gmra.mrb[88].mxu0 %vm305_vm0, %v129_v53  ;;  %v279_v53 = vld [vmem:[%s9518_s0 + $0x778] sm:$0xff] }
  0xde   :  { %4805 = vmatmul.mubr.msk.f32.gmra.mrb[88].mxu1 %vm305_vm0, %v257_v54  ;;  %4615 = vmatprep.mubr.msk.f32.mxu0 %vm305_vm0, %v130_v55 }
  0xdf   :  { %4807 = vmatprep.mubr.msk.f32.mxu1 %vm305_vm0, %v258_v56  ;;  %v152_v56 = vld [vmem:[%s9518_s0 + $0x380] sm:$0xff] }
  0xe1   :  { %4616 = vmatmul.mubr.msk.f32.gmra.mrb[90].mxu0 %vm305_vm0, %v131_v57  ;;  %v280_v57 = vld [vmem:[%s9518_s0 + $0x780] sm:$0xff] }
  0xe2   :  { %4808 = vmatmul.mubr.msk.f32.gmra.mrb[90].mxu1 %vm305_vm0, %v259_v58  ;;  %4618 = vmatprep.mubr.msk.f32.mxu0 %vm305_vm0, %v132_v59 }
  0xe3   :  { %4810 = vmatprep.mubr.msk.f32.mxu1 %vm305_vm0, %v260_v60 }
  0xe5   :  { %4619 = vmatmul.mubr.msk.f32.gmra.mrb[92].mxu0 %vm305_vm0, %v133_v61 }
  0xe6   :  { %4811 = vmatmul.mubr.msk.f32.gmra.mrb[92].mxu1 %vm305_vm0, %v261_v62  ;;  %4621 = vmatprep.mubr.msk.f32.mxu0 %vm305_vm0, %v134_v63 }
  0xe7   :  { %4813 = vmatprep.mubr.msk.f32.mxu1 %vm305_vm0, %v262_v0 }
  0xe9   :  { %4622 = vmatmul.mubr.msk.f32.gmra.mrb[94].mxu0 %vm305_vm0, %v135_v1 }
  0xea   :  { %4814 = vmatmul.mubr.msk.f32.gmra.mrb[94].mxu1 %vm305_vm0, %v263_v2  ;;  %4624 = vmatprep.mubr.msk.f32.mxu0 %vm305_vm0, %v136_v3 }
  0xeb   :  { %4816 = vmatprep.mubr.msk.f32.mxu1 %vm305_vm0, %v264_v4  ;;  %v153_v4 = vld [vmem:[%s9518_s0 + $0x388] sm:$0xff] }
  0xed   :  { %4625 = vmatmul.mubr.msk.f32.gmra.mrb[96].mxu0 %vm305_vm0, %v137_v5  ;;  %v281_v5 = vld [vmem:[%s9518_s0 + $0x788] sm:$0xff] }
  0xee   :  { %4817 = vmatmul.mubr.msk.f32.gmra.mrb[96].mxu1 %vm305_vm0, %v265_v6  ;;  %4627 = vmatprep.mubr.msk.f32.mxu0 %vm305_vm0, %v138_v7 }
  0xef   :  { %4819 = vmatprep.mubr.msk.f32.mxu1 %vm305_vm0, %v266_v8 }
  0xf1   :  { %4628 = vmatmul.mubr.msk.f32.gmra.mrb[98].mxu0 %vm305_vm0, %v139_v9  ;;  %v154_v9 = vld [vmem:[%s9518_s0 + $0x390] sm:$0xff] }
  0xf2   :  { %4820 = vmatmul.mubr.msk.f32.gmra.mrb[98].mxu1 %vm305_vm0, %v267_v10  ;;  %4630 = vmatprep.mubr.msk.f32.mxu0 %vm305_vm0, %v140_v11  ;;  %v282_v10 = vld [vmem:[%s9518_s0 + $0x790] sm:$0xff] }
  0xf3   :  { %4822 = vmatprep.mubr.msk.f32.mxu1 %vm305_vm0, %v268_v12 }
  0xf5   :  { %4631 = vmatmul.mubr.msk.f32.gmra.mrb[100].mxu0 %vm305_vm0, %v141_v13 }
  0xf6   :  { %4823 = vmatmul.mubr.msk.f32.gmra.mrb[100].mxu1 %vm305_vm0, %v269_v14  ;;  %4633 = vmatprep.mubr.msk.f32.mxu0 %vm305_vm0, %v142_v15 }
  0xf7   :  { %4825 = vmatprep.mubr.msk.f32.mxu1 %vm305_vm0, %v270_v16 }
  0xf9   :  { %4634 = vmatmul.mubr.msk.f32.gmra.mrb[102].mxu0 %vm305_vm0, %v143_v17 }
  0xfa   :  { %4826 = vmatmul.mubr.msk.f32.gmra.mrb[102].mxu1 %vm305_vm0, %v271_v18  ;;  %4636 = vmatprep.mubr.msk.f32.mxu0 %vm305_vm0, %v144_v19 }
  0xfb   :  { %4828 = vmatprep.mubr.msk.f32.mxu1 %vm305_vm0, %v272_v20 }
  0xfd   :  { %4637 = vmatmul.mubr.msk.f32.gmra.mrb[104].mxu0 %vm305_vm0, %v145_v21 }
  0xfe   :  { %4829 = vmatmul.mubr.msk.f32.gmra.mrb[104].mxu1 %vm305_vm0, %v273_v22  ;;  %4639 = vmatprep.mubr.msk.f32.mxu0 %vm305_vm0, %v146_v23 }
  0xff   :  { %4831 = vmatprep.mubr.msk.f32.mxu1 %vm305_vm0, %v274_v24  ;;  %v155_v24 = vld [vmem:[%s9518_s0 + $0x398] sm:$0xff] }
 0x100   :  { %v4482_v30 = vpop.f32.mrb[0].mxu0 }
 0x101   :  { %v4674_v31 = vpop.f32.mrb[0].mxu1  ;;  %v1146_v32 = vadd.f32 %v4482_v30, %v6340_v25  ;;  %v1140_v34 = vpop.f32.mrb[1].mxu0  ;;  %4640 = vmatmul.mubr.msk.f32.gmra.mrb[106].mxu0 %vm305_vm0, %v147_v26  ;;  %v283_v26 = vld [vmem:[%s9518_s0 + $0x798] sm:$0xff] }
 0x102   :  { %v1786_v33 = vadd.f32 %v4674_v31, %v6340_v25  ;;  %v1780_v35 = vpop.f32.mrb[1].mxu1  ;;  %4832 = vmatmul.mubr.msk.f32.gmra.mrb[106].mxu1 %vm305_vm0, %v275_v27  ;;  %v1141_v36 = vadd.f32 %v6340_v25, %v1140_v34  ;;  %4642 = vmatprep.mubr.msk.f32.mxu0 %vm305_vm0, %v148_v28  ;;  %v156_v31 = vld [vmem:[%s9518_s0 + $0x3a0] sm:$0xff] }
 0x103   :  { %v1781_v37 = vadd.f32 %v6340_v25, %v1780_v35  ;;  %4834 = vmatprep.mubr.msk.f32.mxu1 %vm305_vm0, %v276_v29  ;;  %v2676_v40 = vmul.f32 0.70710677, %v1146_v32  ;;  %v2420_v6 = vmul.f32 0.5, %v1146_v32  ;;  %v284_v32 = vld [vmem:[%s9518_s0 + $0x7a0] sm:$0xff] }
 0x104   :  { %v2804_v41 = vmul.f32 0.70710677, %v1786_v33  ;;  %v2675_v44 = vmul.f32 0.70710677, %v1141_v36  ;;  %v4485_v46 = vpop.f32.mrb[2].mxu0  ;;  %v2548_v11 = vmul.f32 0.5, %v1786_v33 }
 0x105   :  { %v2803_v45 = vmul.f32 0.70710677, %v1781_v37  ;;  %4874 = verf.f32 %v2676_v40  ;;  %v4677_v47 = vpop.f32.mrb[2].mxu1  ;;  %4643 = vmatmul.mubr.msk.f32.gmra.mrb[108].mxu0 %vm305_vm0, %v149_v38  ;;  %v1156_v48 = vadd.f32 %v4485_v46, %v6340_v25  ;;  %v1150_v50 = vpop.f32.mrb[3].mxu0  ;;  %v2419_v12 = vmul.f32 0.5, %v1141_v36 }
 0x106   :  { %4835 = vmatmul.mubr.msk.f32.gmra.mrb[108].mxu1 %vm305_vm0, %v277_v39  ;;  %4876 = verf.f32 %v2804_v41  ;;  %v1796_v49 = vadd.f32 %v4677_v47, %v6340_v25  ;;  %v1790_v51 = vpop.f32.mrb[3].mxu1  ;;  %4645 = vmatprep.mubr.msk.f32.mxu0 %vm305_vm0, %v150_v42  ;;  %v6389_v54 = vadd.f32 %v6340_v25, %v1150_v50  ;;  %v6431_v16 = vmul.f32 0.5, %v1781_v37  ;;  %v285_v50 = vld [vmem:[%s9518_s0 + $0x7a8] sm:$0xff] }
 0x107   :  { %4837 = vmatprep.mubr.msk.f32.mxu1 %vm305_vm0, %v278_v43  ;;  %4878 = verf.f32 %v2675_v44  ;;  %v6392_v55 = vadd.f32 %v6340_v25, %v1790_v51  ;;  %v2678_v58 = vmul.f32 0.70710677, %v1156_v48  ;;  %v6437_v20 = vmul.f32 0.5, %v1156_v48 }
 0x108   :  { %4880 = verf.f32 %v2803_v45  ;;  %v4488_v59 = vpop.f32.mrb[4].mxu0  ;;  %v2806_v61 = vmul.f32 0.70710677, %v1796_v49  ;;  %v2677_v62 = vmul.f32 0.70710677, %v6389_v54  ;;  %v6451_v28 = vmul.f32 0.5, %v1796_v49 }
 0x109   :  { %v4680_v60 = vpop.f32.mrb[4].mxu1  ;;  %4646 = vmatmul.mubr.msk.f32.gmra.mrb[110].mxu0 %vm305_vm0, %v151_v52  ;;  %4882 = verf.f32 %v2678_v58  ;;  %v2805_v63 = vmul.f32 0.70710677, %v6392_v55  ;;  %v6405_v0 = vadd.f32 %v4488_v59, %v6340_v25  ;;  %v1160_v2 = vpop.f32.mrb[5].mxu0  ;;  %v6470_v41 = vmul.f32 0.5, %v6389_v54  ;;  %v157_v49 = vld [vmem:[%s9518_s0 + $0x3a8] sm:$0xff] }
 0x10a   :  { %4838 = vmatmul.mubr.msk.f32.gmra.mrb[110].mxu1 %vm305_vm0, %v279_v53  ;;  %v6408_v1 = vadd.f32 %v4680_v60, %v6340_v25  ;;  %v1800_v3 = vpop.f32.mrb[5].mxu1  ;;  %4648 = vmatprep.mubr.msk.f32.mxu0 %vm305_vm0, %v152_v56  ;;  %4884 = verf.f32 %v2806_v61  ;;  %v6419_v7 = vadd.f32 %v6340_v25, %v1160_v2  ;;  %v6478_v48 = vmul.f32 0.5, %v6392_v55  ;;  %v158_v54 = vld [vmem:[%s9518_s0 + $0x3b0] sm:$0xff] }
 0x10b   :  { %4840 = vmatprep.mubr.msk.f32.mxu1 %vm305_vm0, %v280_v57  ;;  %v6422_v8 = vadd.f32 %v6340_v25, %v1800_v3  ;;  %4886 = verf.f32 %v2677_v62  ;;  %v2680_v13 = vmul.f32 0.70710677, %v6405_v0  ;;  %v286_v55 = vld [vmem:[%s9518_s0 + $0x7b0] sm:$0xff]  ;;  %v2424_v58 = vmul.f32 0.5, %v6405_v0 }
 0x10c   :  { %v4491_v14 = vpop.f32.mrb[6].mxu0  ;;  %4888 = verf.f32 %v2805_v63  ;;  %v2808_v17 = vmul.f32 0.70710677, %v6408_v1  ;;  %v2679_v18 = vmul.f32 0.70710677, %v6419_v7 }
 0x10d   :  { %v4683_v15 = vpop.f32.mrb[6].mxu1  ;;  %v1170_v19 = vpop.f32.mrb[7].mxu0  ;;  %4649 = vmatmul.mubr.msk.f32.gmra.mrb[112].mxu0 %vm305_vm0, %v153_v4  ;;  %4890 = verf.f32 %v2680_v13  ;;  %v2807_v21 = vmul.f32 0.70710677, %v6422_v8  ;;  %v6441_v22 = vadd.f32 %v4491_v14, %v6340_v25  ;;  %v287_v13 = vld [vmem:[%s9518_s0 + $0x7b8] sm:$0xff] }
 0x10e   :  { %4841 = vmatmul.mubr.msk.f32.gmra.mrb[112].mxu1 %vm305_vm0, %v281_v5  ;;  %v1810_v23 = vpop.f32.mrb[7].mxu1  ;;  %4651 = vmatprep.mubr.msk.f32.mxu0 %vm305_vm0, %v154_v9  ;;  %4892 = verf.f32 %v2808_v17  ;;  %v6454_v29 = vadd.f32 %v4683_v15, %v6340_v25  ;;  %v6457_v30 = vadd.f32 %v6340_v25, %v1170_v19  ;;  %v288_v19 = vld [vmem:[%s9518_s0 + $0x7c0] sm:$0xff] }
 0x10f   :  { %4843 = vmatprep.mubr.msk.f32.mxu1 %vm305_vm0, %v282_v10  ;;  %v4875_v27 = vpop.eup %4874  ;;  %4894 = verf.f32 %v2679_v18  ;;  %v2682_v35 = vmul.f32 0.70710677, %v6441_v22  ;;  %v6467_v36 = vadd.f32 %v6340_v25, %v1810_v23  ;;  %v2552_v10 = vmul.f32 0.5, %v6408_v1  ;;  %v160_v18 = vld [vmem:[%s9518_s0 + $0x3c0] sm:$0xff] }
 0x110   :  { %v4877_v33 = vpop.eup %4876  ;;  %v3188_v34 = vadd.f32 1.0, %v4875_v27  ;;  %v4494_v37 = vpop.f32.mrb[8].mxu0  ;;  %4896 = verf.f32 %v2807_v21  ;;  %v2810_v42 = vmul.f32 0.70710677, %v6454_v29  ;;  %v2681_v53 = vmul.f32 0.70710677, %v6457_v30 }
 0x111   :  { %v4686_v38 = vpop.f32.mrb[8].mxu1  ;;  %v4879_v39 = vpop.eup %4878  ;;  %v3316_v40 = vadd.f32 1.0, %v4877_v33  ;;  %4652 = vmatmul.mubr.msk.f32.gmra.mrb[114].mxu0 %vm305_vm0, %v155_v24  ;;  %4898 = verf.f32 %v2682_v35  ;;  %v2809_v59 = vmul.f32 0.70710677, %v6467_v36  ;;  %v6502_v60 = vadd.f32 %v4494_v37, %v6340_v25 }
 0x112   :  { %v1180_v43 = vpop.f32.mrb[9].mxu0  ;;  %v6474_v44 = vpop.f32.mrb[9].mxu1  ;;  %4844 = vmatmul.mubr.msk.f32.gmra.mrb[114].mxu1 %vm305_vm0, %v283_v26  ;;  %v3444_v46 = vmul.f32 %v3188_v34, %v2420_v6  ;;  %v3187_v47 = vadd.f32 1.0, %v4879_v39  ;;  %4654 = vmatprep.mubr.msk.f32.mxu0 %vm305_vm0, %v156_v31  ;;  %4900 = verf.f32 %v2810_v42  ;;  %v6514_v0 = vadd.f32 %v4686_v38, %v6340_v25  ;;  %v289_v42 = vld [vmem:[%s9518_s0 + $0x7c8] sm:$0xff] }
 0x113   :  { %v4881_v45 = vpop.eup %4880  ;;  %4846 = vmatprep.mubr.msk.f32.mxu1 %vm305_vm0, %v284_v32  ;;  %v3572_v51 = vmul.f32 %v3316_v40, %v2548_v11  ;;  %4902 = verf.f32 %v2681_v53  ;;  %v2684_v11 = vmul.f32 0.70710677, %v6502_v60  ;;  %v2551_v39 = vmul.f32 0.5, %v6422_v8 }
 0x114   :  { %v3315_v52 = vadd.f32 1.0, %v4881_v45  ;;  %v4883_v56 = vpop.eup %4882  ;;  %3700 = vst.msk [vmem:[%s9521_s3 + $0x8] sm:$0xff] %vm305_vm0, %v3444_v46  ;;  %v3443_v57 = vmul.f32 %v3187_v47, %v2419_v12  ;;  %v6504_v61 = vpop.f32.mrb[10].mxu0  ;;  %4904 = verf.f32 %v2809_v59  ;;  %v159_v12 = vld [vmem:[%s9518_s0 + $0x3b8] sm:$0xff]  ;;  %v2812_v17 = vmul.f32 0.70710677, %v6514_v0 }
 0x115   :  { %v6506_v62 = vpop.f32.mrb[10].mxu1  ;;  %v4885_v63 = vpop.eup %4884  ;;  %3828 = vst.msk [vmem:[%s9521_s3 + $0x408] sm:$0xff] %vm305_vm0, %v3572_v51  ;;  %v3190_v3 = vadd.f32 1.0, %v4883_v56  ;;  %4655 = vmatmul.mubr.msk.f32.gmra.mrb[116].mxu0 %vm305_vm0, %v157_v49  ;;  %4906 = verf.f32 %v2684_v11  ;;  %v2426_v45 = vmul.f32 0.5, %v6441_v22  ;;  %v162_v47 = vld [vmem:[%s9518_s0 + $0x3d0] sm:$0xff]  ;;  %v6605_v22 = vadd.f32 %v6504_v61, %v6340_v25 }
 0x116   :  { %v3571_v2 = vmul.f32 %v3315_v52, %v6431_v16  ;;  %v6516_v4 = vpop.f32.mrb[11].mxu0  ;;  %v6519_v5 = vpop.f32.mrb[11].mxu1  ;;  %4847 = vmatmul.mubr.msk.f32.gmra.mrb[116].mxu1 %vm305_vm0, %v285_v50  ;;  %3699 = vst.msk [vmem:[%s9521_s3] sm:$0xff] %vm305_vm0, %v3443_v57  ;;  %v3318_v9 = vadd.f32 1.0, %v4885_v63  ;;  %4657 = vmatprep.mubr.msk.f32.mxu0 %vm305_vm0, %v158_v54  ;;  %v2423_v16 = vmul.f32 0.5, %v6419_v7  ;;  %4908 = verf.f32 %v2812_v17 }
 0x117   :  { %v4887_v6 = vpop.eup %4886  ;;  %4849 = vmatprep.mubr.msk.f32.mxu1 %vm305_vm0, %v286_v55  ;;  %v3446_v1 = vmul.f32 %v3190_v3, %v6437_v20  ;;  %v6551_v20 = vadd.f32 %v6340_v25, %v1180_v43  ;;  %v6617_v57 = vadd.f32 %v6506_v62, %v6340_v25  ;;  %v2554_v63 = vmul.f32 0.5, %v6454_v29  ;;  %v163_v3 = vld [vmem:[%s9518_s0 + $0x3d8] sm:$0xff] }
 0x118   :  { %v4889_v14 = vpop.eup %4888  ;;  %3827 = vst.msk [vmem:[%s9521_s3 + $0x400] sm:$0xff] %vm305_vm0, %v3571_v2  ;;  %v3189_v15 = vadd.f32 1.0, %v4887_v6  ;;  %v3574_v23 = vmul.f32 %v3318_v9, %v6451_v28  ;;  %v6553_v26 = vpop.f32.mrb[12].mxu0  ;;  %v6564_v28 = vadd.f32 %v6340_v25, %v6474_v44  ;;  %v2686_v62 = vmul.f32 0.70710677, %v6605_v22  ;;  %v291_v6 = vld [vmem:[%s9518_s0 + $0x7d8] sm:$0xff] }
 0x119   :  { %v4891_v21 = vpop.eup %4890  ;;  %v3317_v24 = vadd.f32 1.0, %v4889_v14  ;;  %v6555_v7 = vpop.f32.mrb[12].mxu1  ;;  %3702 = vst.msk [vmem:[%s9521_s3 + $0x18] sm:$0xff] %vm305_vm0, %v3446_v1  ;;  %4658 = vmatmul.mubr.msk.f32.gmra.mrb[118].mxu0 %vm305_vm0, %v159_v12  ;;  %v2683_v40 = vmul.f32 0.70710677, %v6551_v20  ;;  %v6647_v12 = vadd.f32 %v6340_v25, %v6516_v4  ;;  %v292_v14 = vld [vmem:[%s9518_s0 + $0x7e0] sm:$0xff]  ;;  %v6661_v4 = vadd.f32 %v6340_v25, %v6519_v5 }
 0x11a   :  { %v4893_v27 = vpop.eup %4892  ;;  %v3445_v31 = vmul.f32 %v3189_v15, %v6470_v41  ;;  %v3192_v32 = vadd.f32 1.0, %v4891_v21  ;;  %v6566_v33 = vpop.f32.mrb[13].mxu0  ;;  %4850 = vmatmul.mubr.msk.f32.gmra.mrb[118].mxu1 %vm305_vm0, %v287_v13  ;;  %3830 = vst.msk [vmem:[%s9521_s3 + $0x418] sm:$0xff] %vm305_vm0, %v3574_v23  ;;  %4660 = vmatprep.mubr.msk.f32.mxu0 %vm305_vm0, %v160_v18  ;;  %v161_v41 = vld [vmem:[%s9518_s0 + $0x3c8] sm:$0xff]  ;;  %v2811_v46 = vmul.f32 0.70710677, %v6564_v28 }
 0x11b   :  { %v6569_v34 = vpop.f32.mrb[13].mxu1  ;;  %v4895_v35 = vpop.eup %4894  ;;  %v3573_v37 = vmul.f32 %v3317_v24, %v6478_v48  ;;  %v3320_v38 = vadd.f32 1.0, %v4893_v27  ;;  %4852 = vmatprep.mubr.msk.f32.mxu1 %vm305_vm0, %v288_v19  ;;  %v290_v48 = vld [vmem:[%s9518_s0 + $0x7d0] sm:$0xff]  ;;  %4910 = verf.f32 %v2683_v40  ;;  %v2814_v11 = vmul.f32 0.70710677, %v6617_v57  ;;  %v164_v13 = vld [vmem:[%s9518_s0 + $0x3e0] sm:$0xff] }
 0x11c   :  { %v4897_v43 = vpop.eup %4896  ;;  %3701 = vst.msk [vmem:[%s9521_s3 + $0x10] sm:$0xff] %vm305_vm0, %v3445_v31  ;;  %v3448_v8 = vmul.f32 %v3192_v32, %v2424_v58  ;;  %v3191_v44 = vadd.f32 1.0, %v4895_v35  ;;  %v6607_v52 = vpop.f32.mrb[14].mxu0  ;;  %4912 = verf.f32 %v2811_v46  ;;  %v2553_v18 = vmul.f32 0.5, %v6467_v36  ;;  %v165_v35 = vld [vmem:[%s9518_s0 + $0x3e8] sm:$0xff]  ;;  %v166_v40 = vld [vmem:[%s9518_s0 + $0x3f0] sm:$0xff] }
 0x11d   :  { %v4899_v49 = vpop.eup %4898  ;;  %3829 = vst.msk [vmem:[%s9521_s3 + $0x410] sm:$0xff] %vm305_vm0, %v3573_v37  ;;  %v3576_v50 = vmul.f32 %v3320_v38, %v2552_v10  ;;  %v3319_v51 = vadd.f32 1.0, %v4897_v43  ;;  %v6609_v53 = vpop.f32.mrb[14].mxu1  ;;  %4661 = vmatmul.mubr.msk.f32.gmra.mrb[120].mxu0 %vm305_vm0, %v161_v41  ;;  %v2425_v10 = vmul.f32 0.5, %v6457_v30  ;;  %4914 = verf.f32 %v2686_v62  ;;  %v293_v37 = vld [vmem:[%s9518_s0 + $0x7e8] sm:$0xff]  ;;  %v294_v41 = vld [vmem:[%s9518_s0 + $0x7f0] sm:$0xff] }
 0x11e   :  { %v4901_v54 = vpop.eup %4900  ;;  %3704 = vst.msk [vmem:[%s9521_s3 + $0x28] sm:$0xff] %vm305_vm0, %v3448_v8  ;;  %v3447_v55 = vmul.f32 %v3191_v44, %v2423_v16  ;;  %v3194_v56 = vadd.f32 1.0, %v4899_v49  ;;  %v6619_v58 = vpop.f32.mrb[15].mxu0  ;;  %4853 = vmatmul.mubr.msk.f32.gmra.mrb[120].mxu1 %vm305_vm0, %v289_v42  ;;  %4663 = vmatprep.mubr.msk.f32.mxu0 %vm305_vm0, %v162_v47  ;;  %4916 = verf.f32 %v2814_v11  ;;  %v2685_v21 = vmul.f32 0.70710677, %v6647_v12 }
 0x11f   :  { %v6622_v59 = vpop.f32.mrb[15].mxu1  ;;  %3832 = vst.msk [vmem:[%s9521_s3 + $0x428] sm:$0xff] %vm305_vm0, %v3576_v50  ;;  %v3575_v61 = vmul.f32 %v3319_v51, %v2551_v39  ;;  %v3322_v2 = vadd.f32 1.0, %v4901_v54  ;;  %4855 = vmatprep.mubr.msk.f32.mxu1 %vm305_vm0, %v290_v48  ;;  %v4903_v9 = vpop.eup %4902  ;;  %v2428_v36 = vmul.f32 0.5, %v6502_v60  ;;  %v2813_v31 = vmul.f32 0.70710677, %v6661_v4 }
 0x120   :  { %3703 = vst.msk [vmem:[%s9521_s3 + $0x20] sm:$0xff] %vm305_vm0, %v3447_v55  ;;  %v3450_v29 = vmul.f32 %v3194_v56, %v2426_v45  ;;  %v4905_v1 = vpop.eup %4904  ;;  %v3193_v15 = vadd.f32 1.0, %v4903_v9  ;;  %v6663_v16 = vpop.f32.mrb[16].mxu0  ;;  %v6687_v32 = vadd.f32 %v6553_v26, %v6340_v25  ;;  %4918 = verf.f32 %v2685_v21  ;;  %v295_v55 = vld [vmem:[%s9518_s0 + $0x7f8] sm:$0xff] }
 0x121   :  { %3831 = vst.msk [vmem:[%s9521_s3 + $0x420] sm:$0xff] %vm305_vm0, %v3575_v61  ;;  %v3578_v30 = vmul.f32 %v3322_v2, %v2554_v63  ;;  %v6665_v17 = vpop.f32.mrb[16].mxu1  ;;  %v3321_v19 = vadd.f32 1.0, %v4905_v1  ;;  %v6673_v23 = vpop.f32.mrb[17].mxu0  ;;  %4664 = vmatmul.mubr.msk.f32.gmra.mrb[122].mxu0 %vm305_vm0, %v163_v3  ;;  %v6699_v26 = vadd.f32 %v6555_v7, %v6340_v25  ;;  %v2556_v42 = vmul.f32 0.5, %v6514_v0 }
 0x122   :  { %3706 = vst.msk [vmem:[%s9521_s3 + $0x38] sm:$0xff] %vm305_vm0, %v3450_v29  ;;  %v6676_v5 = vpop.f32.mrb[17].mxu1  ;;  %4856 = vmatmul.mubr.msk.f32.gmra.mrb[122].mxu1 %vm305_vm0, %v291_v6  ;;  %v4907_v24 = vpop.eup %4906  ;;  %v3449_v27 = vmul.f32 %v3193_v15, %v2425_v10  ;;  %4666 = vmatprep.mubr.msk.f32.mxu0 %vm305_vm0, %v164_v13  ;;  %4920 = verf.f32 %v2813_v31  ;;  %v2688_v7 = vmul.f32 0.70710677, %v6687_v32  ;;  %v6724_v47 = vadd.f32 %v6340_v25, %v6566_v33  ;;  %v167_v33 = vld [vmem:[%s9518_s0 + $0x3f8] sm:$0xff] }
 0x123   :  { %3834 = vst.msk [vmem:[%s9521_s3 + $0x438] sm:$0xff] %vm305_vm0, %v3578_v30  ;;  %4858 = vmatprep.mubr.msk.f32.mxu1 %vm305_vm0, %v292_v14  ;;  %v4909_v38 = vpop.eup %4908  ;;  %v3577_v60 = vmul.f32 %v3321_v19, %v2553_v18  ;;  %v3196_v39 = vadd.f32 1.0, %v4907_v24  ;;  %v2816_v46 = vmul.f32 0.70710677, %v6699_v26  ;;  %v6734_v51 = vadd.f32 %v6340_v25, %v6569_v34 }
 0x124   :  { %3705 = vst.msk [vmem:[%s9521_s3 + $0x30] sm:$0xff] %vm305_vm0, %v3449_v27  ;;  %v3324_v43 = vadd.f32 1.0, %v4909_v38  ;;  %v6713_v8 = vpop.f32.mrb[18].mxu0  ;;  %4922 = verf.f32 %v2688_v7  ;;  %v6738_v54 = vadd.f32 %v6607_v52, %v6340_v25  ;;  %v2427_v34 = vmul.f32 0.5, %v6551_v20 }
 0x125   :  { %v6715_v44 = vpop.f32.mrb[18].mxu1  ;;  %3833 = vst.msk [vmem:[%s9521_s3 + $0x430] sm:$0xff] %vm305_vm0, %v3577_v60  ;;  %v3452_v45 = vmul.f32 %v3196_v39, %v2428_v36  ;;  %v6726_v0 = vpop.f32.mrb[19].mxu0  ;;  %4667 = vmatmul.mubr.msk.f32.gmra.mrb[124].mxu0 %vm305_vm0, %v165_v35  ;;  %4924 = verf.f32 %v2816_v46  ;;  %v2687_v61 = vmul.f32 0.70710677, %v6724_v47  ;;  %v2555_v63 = vmul.f32 0.5, %v6564_v28 }
 0x126   :  { %v6729_v48 = vpop.f32.mrb[19].mxu1  ;;  %4859 = vmatmul.mubr.msk.f32.gmra.mrb[124].mxu1 %vm305_vm0, %v293_v37  ;;  %v4911_v49 = vpop.eup %4910  ;;  %v3580_v50 = vmul.f32 %v3324_v43, %v2556_v42  ;;  %4669 = vmatprep.mubr.msk.f32.mxu0 %vm305_vm0, %v166_v40  ;;  %v2430_v62 = vmul.f32 0.5, %v6605_v22  ;;  %v2815_v3 = vmul.f32 0.70710677, %v6734_v51  ;;  %v2690_v20 = vmul.f32 0.70710677, %v6738_v54 }
 0x127   :  { %4861 = vmatprep.mubr.msk.f32.mxu1 %vm305_vm0, %v294_v41  ;;  %v4913_v56 = vpop.eup %4912  ;;  %3708 = vst.msk [vmem:[%s9521_s3 + $0x48] sm:$0xff] %vm305_vm0, %v3452_v45  ;;  %v3195_v52 = vadd.f32 1.0, %v4911_v49  ;;  %4926 = verf.f32 %v2687_v61  ;;  %v6766_v29 = vadd.f32 %v6609_v53, %v6340_v25  ;;  %v6776_v13 = vadd.f32 %v6340_v25, %v6619_v58 }
 0x128   :  { %3836 = vst.msk [vmem:[%s9521_s3 + $0x448] sm:$0xff] %vm305_vm0, %v3580_v50  ;;  %v3323_v2 = vadd.f32 1.0, %v4913_v56  ;;  %v6761_v6 = vpop.f32.mrb[20].mxu0  ;;  %v4915_v28 = vpop.eup %4914  ;;  %4928 = verf.f32 %v2815_v3  ;;  %v6780_v14 = vadd.f32 %v6340_v25, %v6622_v59  ;;  %v2558_v15 = vmul.f32 0.5, %v6617_v57 }
 0x129   :  { %v3451_v9 = vmul.f32 %v3195_v52, %v2427_v34  ;;  %v6768_v10 = vpop.f32.mrb[20].mxu1  ;;  %v6770_v11 = vpop.f32.mrb[21].mxu0  ;;  %4670 = vmatmul.mubr.msk.f32.gmra.mrb[126].mxu0 %vm305_vm0, %v167_v33  ;;  %v3198_v30 = vadd.f32 1.0, %v4915_v28  ;;  %4930 = verf.f32 %v2690_v20  ;;  %v2818_v18 = vmul.f32 0.70710677, %v6766_v29 }
 0x12a   :  { %4862 = vmatmul.mubr.msk.f32.gmra.mrb[126].mxu1 %vm305_vm0, %v295_v55  ;;  %v3579_v22 = vmul.f32 %v3323_v2, %v2555_v63  ;;  %v6782_v53 = vpop.f32.mrb[21].mxu1  ;;  %v4917_v1 = vpop.eup %4916  ;;  %v2429_v59 = vmul.f32 0.5, %v6647_v12  ;;  %v2557_v19 = vmul.f32 0.5, %v6661_v4  ;;  %v2689_v21 = vmul.f32 0.70710677, %v6776_v13 }
 0x12b   :  { %3707 = vst.msk [vmem:[%s9521_s3 + $0x40] sm:$0xff] %vm305_vm0, %v3451_v9  ;;  %v3326_v58 = vadd.f32 1.0, %v4917_v1  ;;  %v4919_v27 = vpop.eup %4918  ;;  %v3454_v36 = vmul.f32 %v3198_v30, %v2430_v62  ;;  %4932 = verf.f32 %v2818_v18  ;;  %v2817_v57 = vmul.f32 0.70710677, %v6780_v14 }
 0x12c   :  { %3835 = vst.msk [vmem:[%s9521_s3 + $0x440] sm:$0xff] %vm305_vm0, %v3579_v22  ;;  %v6797_v24 = vpop.f32.mrb[22].mxu0  ;;  %v6802_v31 = vadd.f32 %v6663_v16, %v6340_v25  ;;  %v4921_v12 = vpop.eup %4920  ;;  %v3197_v4 = vadd.f32 1.0, %v4919_v27  ;;  %4934 = verf.f32 %v2689_v21  ;;  %v6810_v60 = vadd.f32 %v6665_v17, %v6340_v25 }
 0x12d   :  { %v6804_v35 = vpop.f32.mrb[22].mxu1  ;;  %v6806_v37 = vpop.f32.mrb[23].mxu0  ;;  %v3582_v38 = vmul.f32 %v3326_v58, %v2558_v15  ;;  %3710 = vst.msk [vmem:[%s9521_s3 + $0x58] sm:$0xff] %vm305_vm0, %v3454_v36  ;;  %v3325_v16 = vadd.f32 1.0, %v4921_v12  ;;  %v2432_v40 = vmul.f32 0.5, %v6687_v32  ;;  %4936 = verf.f32 %v2817_v57 }
 0x12e   :  { %v6812_v39 = vpop.f32.mrb[23].mxu1  ;;  %v2692_v41 = vmul.f32 0.70710677, %v6802_v31  ;;  %v4923_v42 = vpop.eup %4922  ;;  %v3453_v17 = vmul.f32 %v3197_v4, %v2429_v59  ;;  %v2560_v43 = vmul.f32 0.5, %v6699_v26  ;;  %v2820_v7 = vmul.f32 0.70710677, %v6810_v60 }
 0x12f   :  { %3838 = vst.msk [vmem:[%s9521_s3 + $0x458] sm:$0xff] %vm305_vm0, %v3582_v38  ;;  %v6828_v45 = vadd.f32 %v6340_v25, %v6673_v23  ;;  %v4925_v49 = vpop.eup %4924  ;;  %v3581_v50 = vmul.f32 %v3325_v16, %v2557_v19  ;;  %v3200_v33 = vadd.f32 1.0, %v4923_v42  ;;  %v6836_v55 = vadd.f32 %v6340_v25, %v6676_v5 }
 0x130   :  { %v6830_v46 = vpop.f32.mrb[24].mxu0  ;;  %4938 = verf.f32 %v2692_v41  ;;  %3709 = vst.msk [vmem:[%s9521_s3 + $0x50] sm:$0xff] %vm305_vm0, %v3453_v17  ;;  %v3328_v23 = vadd.f32 1.0, %v4925_v49  ;;  %v2431_v34 = vmul.f32 0.5, %v6724_v47  ;;  %v2559_v63 = vmul.f32 0.5, %v6734_v51 }
 0x131   :  { %v6832_v32 = vpop.f32.mrb[24].mxu1  ;;  %v6838_v56 = vpop.f32.mrb[25].mxu0  ;;  %4940 = verf.f32 %v2820_v7  ;;  %v2691_v52 = vmul.f32 0.70710677, %v6828_v45  ;;  %3837 = vst.msk [vmem:[%s9521_s3 + $0x450] sm:$0xff] %vm305_vm0, %v3581_v50  ;;  %v3456_v5 = vmul.f32 %v3200_v33, %v2432_v40  ;;  %v6856_v62 = vadd.f32 %v6713_v8, %v6340_v25 }
 0x132   :  { %v6840_v26 = vpop.f32.mrb[25].mxu1  ;;  %v4927_v61 = vpop.eup %4926  ;;  %v2819_v2 = vmul.f32 0.70710677, %v6836_v55  ;;  %v3584_v47 = vmul.f32 %v3328_v23, %v2560_v43  ;;  %v6860_v20 = vadd.f32 %v6715_v44, %v6340_v25  ;;  %v2434_v51 = vmul.f32 0.5, %v6738_v54 }
 0x133   :  { %v4929_v3 = vpop.eup %4928  ;;  %v3199_v9 = vadd.f32 1.0, %v4927_v61  ;;  %4942 = verf.f32 %v2691_v52  ;;  %3712 = vst.msk [vmem:[%s9521_s3 + $0x68] sm:$0xff] %vm305_vm0, %v3456_v5  ;;  %v2694_v30 = vmul.f32 0.70710677, %v6856_v62  ;;  %v2562_v59 = vmul.f32 0.5, %v6766_v29 }
 0x134   :  { %v6862_v28 = vpop.f32.mrb[26].mxu0  ;;  %v4931_v1 = vpop.eup %4930  ;;  %v3327_v8 = vadd.f32 1.0, %v4929_v3  ;;  %4944 = verf.f32 %v2819_v2  ;;  %3840 = vst.msk [vmem:[%s9521_s3 + $0x468] sm:$0xff] %vm305_vm0, %v3584_v47  ;;  %v2822_v19 = vmul.f32 0.70710677, %v6860_v20  ;;  %v6884_v27 = vadd.f32 %v6340_v25, %v6726_v0 }
 0x135   :  { %v6864_v22 = vpop.f32.mrb[26].mxu1  ;;  %v6872_v15 = vpop.f32.mrb[27].mxu0  ;;  %v3455_v18 = vmul.f32 %v3199_v9, %v2431_v34  ;;  %v3202_v58 = vadd.f32 1.0, %v4931_v1  ;;  %4946 = verf.f32 %v2694_v30  ;;  %v6888_v36 = vadd.f32 %v6340_v25, %v6729_v48 }
 0x136   :  { %v6874_v44 = vpop.f32.mrb[27].mxu1  ;;  %v4933_v21 = vpop.eup %4932  ;;  %v3583_v54 = vmul.f32 %v3327_v8, %v2559_v63  ;;  %4948 = verf.f32 %v2822_v19  ;;  %v6896_v38 = vadd.f32 %v6761_v6, %v6340_v25  ;;  %v2433_v48 = vmul.f32 0.5, %v6776_v13 }
 0x137   :  { %v4935_v57 = vpop.eup %4934  ;;  %3711 = vst.msk [vmem:[%s9521_s3 + $0x60] sm:$0xff] %vm305_vm0, %v3455_v18  ;;  %v3458_v29 = vmul.f32 %v3202_v58, %v2434_v51  ;;  %v3330_v12 = vadd.f32 1.0, %v4933_v21  ;;  %v2561_v41 = vmul.f32 0.5, %v6780_v14  ;;  %v2693_v42 = vmul.f32 0.70710677, %v6884_v27 }
 0x138   :  { %v6898_v4 = vpop.f32.mrb[28].mxu0  ;;  %v4937_v16 = vpop.eup %4936  ;;  %3839 = vst.msk [vmem:[%s9521_s3 + $0x460] sm:$0xff] %vm305_vm0, %v3583_v54  ;;  %v3201_v40 = vadd.f32 1.0, %v4935_v57  ;;  %v2436_v7 = vmul.f32 0.5, %v6802_v31  ;;  %v2821_v49 = vmul.f32 0.70710677, %v6888_v36  ;;  %v6922_v23 = vadd.f32 %v6768_v10, %v6340_v25 }
 0x139   :  { %v6900_v0 = vpop.f32.mrb[28].mxu1  ;;  %v6909_v17 = vpop.f32.mrb[29].mxu0  ;;  %3714 = vst.msk [vmem:[%s9521_s3 + $0x78] sm:$0xff] %vm305_vm0, %v3458_v29  ;;  %v3586_v6 = vmul.f32 %v3330_v12, %v2562_v59  ;;  %v3329_v43 = vadd.f32 1.0, %v4937_v16  ;;  %4950 = verf.f32 %v2693_v42  ;;  %v2696_v14 = vmul.f32 0.70710677, %v6896_v38 }
 0x13a   :  { %v6917_v50 = vpop.f32.mrb[29].mxu1  ;;  %v4939_v13 = vpop.eup %4938  ;;  %v3457_v33 = vmul.f32 %v3201_v40, %v2433_v48  ;;  %4952 = verf.f32 %v2821_v49  ;;  %v6930_v61 = vadd.f32 %v6340_v25, %v6770_v11  ;;  %v2564_v10 = vmul.f32 0.5, %v6810_v60 }
 0x13b   :  { %v4941_v34 = vpop.eup %4940  ;;  %3842 = vst.msk [vmem:[%s9521_s3 + $0x478] sm:$0xff] %vm305_vm0, %v3586_v6  ;;  %v3585_v31 = vmul.f32 %v3329_v43, %v2561_v41  ;;  %v3204_v52 = vadd.f32 1.0, %v4939_v13  ;;  %4954 = verf.f32 %v2696_v14  ;;  %v2824_v3 = vmul.f32 0.70710677, %v6922_v23 }
 0x13c   :  { %v6932_v5 = vpop.f32.mrb[30].mxu0  ;;  %3713 = vst.msk [vmem:[%s9521_s3 + $0x70] sm:$0xff] %vm305_vm0, %v3457_v33  ;;  %v3332_v2 = vadd.f32 1.0, %v4941_v34  ;;  %v2435_v8 = vmul.f32 0.5, %v6828_v45  ;;  %v2695_v51 = vmul.f32 0.70710677, %v6930_v61  ;;  %v6954_v60 = vadd.f32 %v6340_v25, %v6782_v53 }
 0x13d   :  { %v6934_v63 = vpop.f32.mrb[30].mxu1  ;;  %v6942_v47 = vpop.f32.mrb[31].mxu0  ;;  %3841 = vst.msk [vmem:[%s9521_s3 + $0x470] sm:$0xff] %vm305_vm0, %v3585_v31  ;;  %v3460_v1 = vmul.f32 %v3204_v52, %v2436_v7  ;;  %4956 = verf.f32 %v2824_v3  ;;  %v6958_v59 = vadd.f32 %v6797_v24, %v6340_v25  ;;  %v2563_v45 = vmul.f32 0.5, %v6836_v55 }
 0x13e   :  { %v6944_v9 = vpop.f32.mrb[31].mxu1  ;;  %v4943_v11 = vpop.eup %4942  ;;  %v3588_v18 = vmul.f32 %v3332_v2, %v2564_v10  ;;  %4958 = verf.f32 %v2695_v51  ;;  %v2823_v53 = vmul.f32 0.70710677, %v6954_v60  ;;  %v2438_v29 = vmul.f32 0.5, %v6856_v62 }
 0x13f   :  { %v4945_v30 = vpop.eup %4944  ;;  %v3203_v58 = vadd.f32 1.0, %v4943_v11  ;;  %3716 = vst.msk [vmem:[%s9521_s3 + $0x88] sm:$0xff] %vm305_vm0, %v3460_v1  ;;  %v2698_v12 = vmul.f32 0.70710677, %v6958_v59  ;;  %v6978_v55 = vadd.f32 %v6804_v35, %v6340_v25  ;;  %v6986_v6 = vadd.f32 %v6340_v25, %v6806_v37 }
 0x140   :  { %v3331_v19 = vadd.f32 1.0, %v4945_v30  ;;  %v6966_v21 = vpop.f32.mrb[32].mxu0  ;;  %v4947_v57 = vpop.eup %4946  ;;  %3844 = vst.msk [vmem:[%s9521_s3 + $0x488] sm:$0xff] %vm305_vm0, %v3588_v18  ;;  %4960 = verf.f32 %v2823_v53  ;;  %v2566_v35 = vmul.f32 0.5, %v6860_v20  ;;  %v2437_v37 = vmul.f32 0.5, %v6884_v27 }
 0x141   :  { %v6968_v54 = vpop.f32.mrb[32].mxu1  ;;  %v3459_v24 = vmul.f32 %v3203_v58, %v2435_v8  ;;  %v6980_v16 = vpop.f32.mrb[33].mxu0  ;;  %v3206_v42 = vadd.f32 1.0, %v4947_v57  ;;  %4962 = verf.f32 %v2698_v12  ;;  %v2826_v43 = vmul.f32 0.70710677, %v6978_v55 }
 0x142   :  { %v6982_v48 = vpop.f32.mrb[33].mxu1  ;;  %v4949_v40 = vpop.eup %4948  ;;  %v3587_v41 = vmul.f32 %v3331_v19, %v2563_v45  ;;  %v2697_v49 = vmul.f32 0.70710677, %v6986_v6  ;;  %v7002_v13 = vadd.f32 %v6340_v25, %v6812_v39  ;;  %v7010_v31 = vadd.f32 %v6830_v46, %v6340_v25  ;;  %v7038_v53 = vld [vmem:[#allocation4] ss:$0 sm:$0xff] }
 0x143   :  { %3715 = vst.msk [vmem:[%s9521_s3 + $0x80] sm:$0xff] %vm305_vm0, %v3459_v24  ;;  %v3334_v62 = vadd.f32 1.0, %v4949_v40  ;;  %v3462_v7 = vmul.f32 %v3206_v42, %v2438_v29  ;;  %v4951_v14 = vpop.eup %4950  ;;  %4964 = verf.f32 %v2826_v43  ;;  %v7014_v27 = vadd.f32 %v6832_v32, %v6340_v25 }
 0x144   :  { %3843 = vst.msk [vmem:[%s9521_s3 + $0x480] sm:$0xff] %vm305_vm0, %v3587_v41  ;;  %v7004_v33 = vpop.f32.mrb[34].mxu0  ;;  %v4953_v39 = vpop.eup %4952  ;;  %v3205_v2 = vadd.f32 1.0, %v4951_v14  ;;  %v2565_v3 = vmul.f32 0.5, %v6888_v36  ;;  %4966 = verf.f32 %v2697_v49  ;;  %v2825_v46 = vmul.f32 0.70710677, %v7002_v13 }
 0x145   :  { %v7006_v20 = vpop.f32.mrb[34].mxu1  ;;  %v3590_v34 = vmul.f32 %v3334_v62, %v2566_v35  ;;  %v7016_v52 = vpop.f32.mrb[35].mxu0  ;;  %3718 = vst.msk [vmem:[%s9521_s3 + $0x98] sm:$0xff] %vm305_vm0, %v3462_v7  ;;  %v3333_v25 = vadd.f32 1.0, %v4953_v39  ;;  %v2440_v32 = vmul.f32 0.5, %v6896_v38  ;;  %v2568_v1 = vmul.f32 0.5, %v6922_v23 }
 0x146   :  { %v7018_v10 = vpop.f32.mrb[35].mxu1  ;;  %v4955_v11 = vpop.eup %4954  ;;  %v2700_v8 = vmul.f32 0.70710677, %v7010_v31  ;;  %v3461_v51 = vmul.f32 %v3205_v2, %v2437_v37  ;;  %4968 = verf.f32 %v2825_v46  ;;  %v2828_v36 = vmul.f32 0.70710677, %v7014_v27 }
 0x147   :  { %3846 = vst.msk [vmem:[%s9521_s3 + $0x498] sm:$0xff] %vm305_vm0, %v3590_v34  ;;  %v3208_v30 = vadd.f32 1.0, %v4955_v11  ;;  %v4957_v45 = vpop.eup %4956  ;;  %v3589_v19 = vmul.f32 %v3333_v25, %v2565_v3  ;;  %v7042_v38 = vadd.f32 %v7038_v53, %v6838_v56  ;;  %v7046_v23 = vadd.f32 %v7038_v53, %v6840_v26 }
 0x148   :  { %v7034_v18 = vpop.f32.mrb[36].mxu0  ;;  %4970 = verf.f32 %v2700_v8  ;;  %v4959_v29 = vpop.eup %4958  ;;  %3717 = vst.msk [vmem:[%s9521_s3 + $0x90] sm:$0xff] %vm305_vm0, %v3461_v51  ;;  %v3336_v40 = vadd.f32 1.0, %v4957_v45  ;;  %v7058_v56 = vadd.f32 %v7038_v53, %v6862_v28  ;;  %v2439_v26 = vmul.f32 0.5, %v6930_v61 }
 0x149   :  { %v7036_v58 = vpop.f32.mrb[36].mxu1  ;;  %v7048_v57 = vpop.f32.mrb[37].mxu0  ;;  %v3464_v12 = vmul.f32 %v3208_v30, %v2440_v32  ;;  %4972 = verf.f32 %v2828_v36  ;;  %3845 = vst.msk [vmem:[%s9521_s3 + $0x490] sm:$0xff] %vm305_vm0, %v3589_v19  ;;  %v3207_v41 = vadd.f32 1.0, %v4959_v29  ;;  %v2567_v42 = vmul.f32 0.5, %v6954_v60 }
 0x14a   :  { %v7050_v24 = vpop.f32.mrb[37].mxu1  ;;  %v2699_v35 = vmul.f32 0.70710677, %v7042_v38  ;;  %v4961_v62 = vpop.eup %4960  ;;  %v3592_v28 = vmul.f32 %v3336_v40, %v2568_v1  ;;  %v2442_v43 = vmul.f32 0.5, %v6958_v59  ;;  %v2827_v7 = vmul.f32 0.70710677, %v7046_v23 }
 0x14b   :  { %3720 = vst.msk [vmem:[%s9521_s3 + $0xa8] sm:$0xff] %vm305_vm0, %v3464_v12  ;;  %v2702_v37 = vmul.f32 0.70710677, %v7058_v56  ;;  %v4963_v61 = vpop.eup %4962  ;;  %v3463_v14 = vmul.f32 %v3207_v41, %v2439_v26  ;;  %v3335_v60 = vadd.f32 1.0, %v4961_v62  ;;  %v7078_v34 = vadd.f32 %v7038_v53, %v6864_v22 }
 0x14c   :  { %v7074_v49 = vpop.f32.mrb[38].mxu0  ;;  %4974 = verf.f32 %v2699_v35  ;;  %3848 = vst.msk [vmem:[%s9521_s3 + $0x4a8] sm:$0xff] %vm305_vm0, %v3592_v28  ;;  %v3210_v59 = vadd.f32 1.0, %v4963_v61  ;;  %v7090_v3 = vadd.f32 %v7038_v53, %v6872_v15  ;;  %v7094_v46 = vadd.f32 %v7038_v53, %v6874_v44 }
 0x14d   :  { %v7080_v39 = vpop.f32.mrb[38].mxu1  ;;  %v7082_v2 = vpop.f32.mrb[39].mxu0  ;;  %4976 = verf.f32 %v2827_v7  ;;  %3719 = vst.msk [vmem:[%s9521_s3 + $0xa0] sm:$0xff] %vm305_vm0, %v3463_v14  ;;  %v3591_v25 = vmul.f32 %v3335_v60, %v2567_v42  ;;  %v2570_v32 = vmul.f32 0.5, %v6978_v55  ;;  %v2830_v1 = vmul.f32 0.70710677, %v7078_v34 }
 0x14e   :  { %v7096_v22 = vpop.f32.mrb[39].mxu1  ;;  %v4965_v11 = vpop.eup %4964  ;;  %4978 = verf.f32 %v2702_v37  ;;  %v3466_v8 = vmul.f32 %v3210_v59, %v2442_v43  ;;  %v2441_v44 = vmul.f32 0.5, %v6986_v6  ;;  %v2701_v30 = vmul.f32 0.70710677, %v7090_v3 }
 0x14f   :  { %v4967_v15 = vpop.eup %4966  ;;  %v3338_v51 = vadd.f32 1.0, %v4965_v11  ;;  %3847 = vst.msk [vmem:[%s9521_s3 + $0x4a0] sm:$0xff] %vm305_vm0, %v3591_v25  ;;  %v2569_v19 = vmul.f32 0.5, %v7002_v13  ;;  %4980 = verf.f32 %v2830_v1  ;;  %v2829_v29 = vmul.f32 0.70710677, %v7094_v46 }
 0x150   :  { %v7106_v36 = vpop.f32.mrb[40].mxu0  ;;  %v3209_v55 = vadd.f32 1.0, %v4967_v15  ;;  %v4969_v40 = vpop.eup %4968  ;;  %3722 = vst.msk [vmem:[%s9521_s3 + $0xb8] sm:$0xff] %vm305_vm0, %v3466_v8  ;;  %4982 = verf.f32 %v2701_v30  ;;  %v7126_v41 = vadd.f32 %v7038_v53, %v6898_v4  ;;  %v7130_v13 = vadd.f32 %v7038_v53, %v6900_v0 }
 0x151   :  { %v7108_v45 = vpop.f32.mrb[40].mxu1  ;;  %v7116_v12 = vpop.f32.mrb[41].mxu0  ;;  %v3594_v26 = vmul.f32 %v3338_v51, %v2570_v32  ;;  %v3337_v62 = vadd.f32 1.0, %v4969_v40  ;;  %4984 = verf.f32 %v2829_v29  ;;  %v7134_v28 = vadd.f32 %v7038_v53, %v6909_v17 }
 0x152   :  { %v7118_v6 = vpop.f32.mrb[41].mxu1  ;;  %v4971_v42 = vpop.eup %4970  ;;  %v3465_v35 = vmul.f32 %v3209_v55, %v2441_v44  ;;  %v2444_v4 = vmul.f32 0.5, %v7010_v31  ;;  %v2572_v0 = vmul.f32 0.5, %v7014_v27  ;;  %v2704_v37 = vmul.f32 0.70710677, %v7126_v41 }
 0x153   :  { %v4973_v43 = vpop.eup %4972  ;;  %3850 = vst.msk [vmem:[%s9521_s3 + $0x4b8] sm:$0xff] %vm305_vm0, %v3594_v26  ;;  %v3212_v7 = vadd.f32 1.0, %v4971_v42  ;;  %v3593_v17 = vmul.f32 %v3337_v62, %v2569_v19  ;;  %v2443_v60 = vmul.f32 0.5, %v7042_v38  ;;  %v2832_v59 = vmul.f32 0.70710677, %v7130_v13 }
 0x154   :  { %v7143_v61 = vpop.f32.mrb[42].mxu0  ;;  %3721 = vst.msk [vmem:[%s9521_s3 + $0xb0] sm:$0xff] %vm305_vm0, %v3465_v35  ;;  %v3340_v14 = vadd.f32 1.0, %v4973_v43  ;;  %4986 = verf.f32 %v2704_v37  ;;  %v2703_v25 = vmul.f32 0.70710677, %v7134_v28  ;;  %v7158_v32 = vadd.f32 %v7038_v53, %v6917_v50 }
 0x155   :  { %v7151_v11 = vpop.f32.mrb[42].mxu1  ;;  %v7153_v31 = vpop.f32.mrb[43].mxu0  ;;  %v3468_v27 = vmul.f32 %v3212_v7, %v2444_v4  ;;  %3849 = vst.msk [vmem:[%s9521_s3 + $0x4b0] sm:$0xff] %vm305_vm0, %v3593_v17  ;;  %4988 = verf.f32 %v2832_v59  ;;  %v7168_v8 = vadd.f32 %v7038_v53, %v6932_v5  ;;  %v7172_v51 = vadd.f32 %v7038_v53, %v6934_v63 }
 0x156   :  { %v7160_v1 = vpop.f32.mrb[43].mxu1  ;;  %v4975_v15 = vpop.eup %4974  ;;  %v3596_v38 = vmul.f32 %v3340_v14, %v2572_v0  ;;  %v2571_v30 = vmul.f32 0.5, %v7046_v23  ;;  %4990 = verf.f32 %v2703_v25  ;;  %v2831_v55 = vmul.f32 0.70710677, %v7158_v32 }
 0x157   :  { %v4977_v50 = vpop.eup %4976  ;;  %3724 = vst.msk [vmem:[%s9521_s3 + $0xc8] sm:$0xff] %vm305_vm0, %v3468_v27  ;;  %v3211_v44 = vadd.f32 1.0, %v4975_v15  ;;  %v2446_v40 = vmul.f32 0.5, %v7058_v56  ;;  %v2574_v26 = vmul.f32 0.5, %v7078_v34  ;;  %v2706_v23 = vmul.f32 0.70710677, %v7168_v8 }
 0x158   :  { %v7180_v19 = vpop.f32.mrb[44].mxu0  ;;  %v4979_v29 = vpop.eup %4978  ;;  %3852 = vst.msk [vmem:[%s9521_s3 + $0x4c8] sm:$0xff] %vm305_vm0, %v3596_v38  ;;  %v3339_v63 = vadd.f32 1.0, %v4977_v50  ;;  %4992 = verf.f32 %v2831_v55  ;;  %v2834_v43 = vmul.f32 0.70710677, %v7172_v51  ;;  %v7198_v37 = vadd.f32 %v7038_v53, %v6942_v47 }
 0x159   :  { %v7182_v5 = vpop.f32.mrb[44].mxu1  ;;  %v7191_v42 = vpop.f32.mrb[45].mxu0  ;;  %v3467_v35 = vmul.f32 %v3211_v44, %v2443_v60  ;;  %v3214_v62 = vadd.f32 1.0, %v4979_v29  ;;  %4994 = verf.f32 %v2706_v23  ;;  %v7202_v56 = vadd.f32 %v7038_v53, %v6944_v9 }
 0x15a   :  { %v7194_v4 = vpop.f32.mrb[45].mxu1  ;;  %v4981_v7 = vpop.eup %4980  ;;  %v3595_v0 = vmul.f32 %v3339_v63, %v2571_v30  ;;  %4996 = verf.f32 %v2834_v43  ;;  %v7210_v60 = vadd.f32 %v7038_v53, %v6966_v21  ;;  %v2445_v9 = vmul.f32 0.5, %v7090_v3 }
 0x15b   :  { %v4983_v34 = vpop.eup %4982  ;;  %3723 = vst.msk [vmem:[%s9521_s3 + $0xc0] sm:$0xff] %vm305_vm0, %v3467_v35  ;;  %v3470_v17 = vmul.f32 %v3214_v62, %v2446_v40  ;;  %v3342_v14 = vadd.f32 1.0, %v4981_v7  ;;  %v2573_v15 = vmul.f32 0.5, %v7094_v46  ;;  %v2705_v38 = vmul.f32 0.70710677, %v7198_v37 }
 0x15c   :  { %v7212_v59 = vpop.f32.mrb[46].mxu0  ;;  %v4985_v27 = vpop.eup %4984  ;;  %3851 = vst.msk [vmem:[%s9521_s3 + $0x4c0] sm:$0xff] %vm305_vm0, %v3595_v0  ;;  %v3213_v25 = vadd.f32 1.0, %v4983_v34  ;;  %v2448_v30 = vmul.f32 0.5, %v7126_v41  ;;  %v2833_v55 = vmul.f32 0.70710677, %v7202_v56  ;;  %v7236_v63 = vadd.f32 %v7038_v53, %v6968_v54 }
 0x15d   :  { %v7214_v47 = vpop.f32.mrb[46].mxu1  ;;  %v7223_v50 = vpop.f32.mrb[47].mxu0  ;;  %3726 = vst.msk [vmem:[%s9521_s3 + $0xd8] sm:$0xff] %vm305_vm0, %v3470_v17  ;;  %v3598_v21 = vmul.f32 %v3342_v14, %v2574_v26  ;;  %v3341_v44 = vadd.f32 1.0, %v4985_v27  ;;  %4998 = verf.f32 %v2705_v38  ;;  %v2708_v46 = vmul.f32 0.70710677, %v7210_v60 }
 0x15e   :  { %v7231_v29 = vpop.f32.mrb[47].mxu1  ;;  %v3469_v3 = vmul.f32 %v3213_v25, %v2445_v9  ;;  %v4987_v40 = vpop.eup %4986  ;;  %5000 = verf.f32 %v2833_v55  ;;  %v7244_v41 = vadd.f32 %v7038_v53, %v6980_v16  ;;  %v7248_v23 = vadd.f32 %v7038_v53, %v6982_v48 }
 0x15f   :  { %3854 = vst.msk [vmem:[%s9521_s3 + $0x4d8] sm:$0xff] %vm305_vm0, %v3598_v21  ;;  %v3597_v26 = vmul.f32 %v3341_v44, %v2573_v15  ;;  %v4989_v62 = vpop.eup %4988  ;;  %v3216_v43 = vadd.f32 1.0, %v4987_v40  ;;  %v2576_v7 = vmul.f32 0.5, %v7130_v13  ;;  %5002 = verf.f32 %v2708_v46 }
 0x160   :  { %v7250_v35 = vpop.f32.mrb[48].mxu0  ;;  %3725 = vst.msk [vmem:[%s9521_s3 + $0xd0] sm:$0xff] %vm305_vm0, %v3469_v3  ;;  %v2836_v16 = vmul.f32 0.70710677, %v7236_v63  ;;  %v4991_v34 = vpop.eup %4990  ;;  %v3344_v17 = vadd.f32 1.0, %v4989_v62  ;;  %v2447_v14 = vmul.f32 0.5, %v7134_v28  ;;  %v7274_v44 = vadd.f32 %v7038_v53, %v7004_v33 }
 0x161   :  { %v7252_v54 = vpop.f32.mrb[48].mxu1  ;;  %v7260_v0 = vpop.f32.mrb[49].mxu0  ;;  %3853 = vst.msk [vmem:[%s9521_s3 + $0x4d0] sm:$0xff] %vm305_vm0, %v3597_v26  ;;  %v2575_v27 = vmul.f32 0.5, %v7158_v32  ;;  %v2707_v13 = vmul.f32 0.70710677, %v7244_v41  ;;  %v3472_v9 = vmul.f32 %v3216_v43, %v2448_v30  ;;  %v7278_v55 = vadd.f32 %v7038_v53, %v7006_v20 }
 0x162   :  { %v7262_v48 = vpop.f32.mrb[49].mxu1  ;;  %v3215_v25 = vadd.f32 1.0, %v4991_v34  ;;  %5004 = verf.f32 %v2836_v16  ;;  %v2835_v15 = vmul.f32 0.70710677, %v7248_v23  ;;  %v4993_v38 = vpop.eup %4992  ;;  %v3600_v21 = vmul.f32 %v3344_v17, %v2576_v7 }
 0x163   :  { %5006 = verf.f32 %v2707_v13  ;;  %v4995_v30 = vpop.eup %4994  ;;  %3728 = vst.msk [vmem:[%s9521_s3 + $0xe8] sm:$0xff] %vm305_vm0, %v3472_v9  ;;  %v3343_v46 = vadd.f32 1.0, %v4993_v38  ;;  %v7290_v33 = vadd.f32 %v7038_v53, %v7016_v52  ;;  %v2450_v62 = vmul.f32 0.5, %v7168_v8 }
 0x164   :  { %v7280_v28 = vpop.f32.mrb[50].mxu0  ;;  %v3471_v3 = vmul.f32 %v3215_v25, %v2447_v14  ;;  %5008 = verf.f32 %v2835_v15  ;;  %v4997_v26 = vpop.eup %4996  ;;  %3856 = vst.msk [vmem:[%s9521_s3 + $0x4e8] sm:$0xff] %vm305_vm0, %v3600_v21  ;;  %v3218_v43 = vadd.f32 1.0, %v4995_v30  ;;  %v2578_v7 = vmul.f32 0.5, %v7172_v51 }
 0x165   :  { %v7282_v32 = vpop.f32.mrb[50].mxu1  ;;  %v7292_v40 = vpop.f32.mrb[51].mxu0  ;;  %v2710_v16 = vmul.f32 0.70710677, %v7274_v44  ;;  %v3599_v52 = vmul.f32 %v3343_v46, %v2575_v27  ;;  %v3346_v34 = vadd.f32 1.0, %v4997_v26  ;;  %v2449_v17 = vmul.f32 0.5, %v7198_v37 }
 0x166   :  { %v7294_v20 = vpop.f32.mrb[51].mxu1  ;;  %3727 = vst.msk [vmem:[%s9521_s3 + $0xe0] sm:$0xff] %vm305_vm0, %v3471_v3  ;;  %v2838_v14 = vmul.f32 0.70710677, %v7278_v55  ;;  %v3474_v13 = vmul.f32 %v3218_v43, %v2450_v62  ;;  %v2709_v8 = vmul.f32 0.70710677, %v7290_v33  ;;  %v7312_v51 = vadd.f32 %v7038_v53, %v7018_v10 }
 0x167   :  { %5010 = verf.f32 %v2710_v16  ;;  %v4999_v15 = vpop.eup %4998  ;;  %3855 = vst.msk [vmem:[%s9521_s3 + $0x4e0] sm:$0xff] %vm305_vm0, %v3599_v52  ;;  %v3602_v37 = vmul.f32 %v3346_v34, %v2578_v7  ;;  %v7324_v27 = vadd.f32 %v7038_v53, %v7034_v18  ;;  %v7328_v10 = vadd.f32 %v7038_v53, %v7036_v58 }
 0x168   :  { %v7314_v9 = vpop.f32.mrb[52].mxu0  ;;  %5012 = verf.f32 %v2838_v14  ;;  %v5001_v30 = vpop.eup %5000  ;;  %3730 = vst.msk [vmem:[%s9521_s3 + $0xf8] sm:$0xff] %vm305_vm0, %v3474_v13  ;;  %v3217_v3 = vadd.f32 1.0, %v4999_v15  ;;  %v2577_v46 = vmul.f32 0.5, %v7202_v56  ;;  %v2837_v18 = vmul.f32 0.70710677, %v7312_v51 }
 0x169   :  { %v7316_v25 = vpop.f32.mrb[52].mxu1  ;;  %v7330_v38 = vpop.f32.mrb[53].mxu0  ;;  %5014 = verf.f32 %v2709_v8  ;;  %3858 = vst.msk [vmem:[%s9521_s3 + $0x4f8] sm:$0xff] %vm305_vm0, %v3602_v37  ;;  %v3345_v58 = vadd.f32 1.0, %v5001_v30  ;;  %v2452_v62 = vmul.f32 0.5, %v7210_v60  ;;  %v2580_v43 = vmul.f32 0.5, %v7236_v63 }
 0x16a   :  { %v7332_v21 = vpop.f32.mrb[53].mxu1  ;;  %v5003_v26 = vpop.eup %5002  ;;  %v2712_v7 = vmul.f32 0.70710677, %v7324_v27  ;;  %v3473_v16 = vmul.f32 %v3217_v3, %v2449_v17  ;;  %5016 = verf.f32 %v2837_v18  ;;  %v2840_v56 = vmul.f32 0.70710677, %v7328_v10 }
 0x16b   :  { %v3220_v52 = vadd.f32 1.0, %v5003_v26  ;;  %v3601_v8 = vmul.f32 %v3345_v58, %v2577_v46  ;;  %v7354_v15 = vadd.f32 %v7038_v53, %v7048_v57  ;;  %v7358_v60 = vadd.f32 %v7038_v53, %v7050_v24 }
 0x16c   :  { %v7348_v34 = vpop.f32.mrb[54].mxu0  ;;  %v5005_v13 = vpop.eup %5004  ;;  %5018 = verf.f32 %v2712_v7  ;;  %3729 = vst.msk [vmem:[%s9521_s3 + $0xf0] sm:$0xff] %vm305_vm0, %v3473_v16  ;;  %v7370_v57 = vadd.f32 %v7038_v53, %v7074_v49  ;;  %v2451_v24 = vmul.f32 0.5, %v7244_v41  ;;  %v2579_v26 = vmul.f32 0.5, %v7248_v23 }
 0x16d   :  { %v7350_v14 = vpop.f32.mrb[54].mxu1  ;;  %v7360_v63 = vpop.f32.mrb[55].mxu0  ;;  %v3476_v30 = vmul.f32 %v3220_v52, %v2452_v62  ;;  %v3348_v3 = vadd.f32 1.0, %v5005_v13  ;;  %5020 = verf.f32 %v2840_v56  ;;  %3857 = vst.msk [vmem:[%s9521_s3 + $0x4f0] sm:$0xff] %vm305_vm0, %v3601_v8  ;;  %v2711_v58 = vmul.f32 0.70710677, %v7354_v15 }
 0x16e   :  { %v7362_v17 = vpop.f32.mrb[55].mxu1  ;;  %v5007_v37 = vpop.eup %5006  ;;  %v2454_v7 = vmul.f32 0.5, %v7274_v44  ;;  %v2839_v16 = vmul.f32 0.70710677, %v7358_v60  ;;  %v2714_v23 = vmul.f32 0.70710677, %v7370_v57  ;;  %v7392_v13 = vadd.f32 %v7038_v53, %v7080_v39 }
 0x16f   :  { %v5009_v46 = vpop.eup %5008  ;;  %v3219_v18 = vadd.f32 1.0, %v5007_v37  ;;  %3732 = vst.msk [vmem:[%s9521_s3 + $0x108] sm:$0xff] %vm305_vm0, %v3476_v30  ;;  %v3604_v49 = vmul.f32 %v3348_v3, %v2580_v43  ;;  %5022 = verf.f32 %v2711_v58  ;;  %v7404_v30 = vadd.f32 %v7038_v53, %v7082_v2 }
 0x170   :  { %v3347_v62 = vadd.f32 1.0, %v5009_v46  ;;  %v7385_v52 = vpop.f32.mrb[56].mxu0  ;;  %5024 = verf.f32 %v2839_v16  ;;  %v7408_v39 = vadd.f32 %v7038_v53, %v7096_v22  ;;  %v2453_v22 = vmul.f32 0.5, %v7290_v33 }
 0x171   :  { %v7387_v56 = vpop.f32.mrb[56].mxu1  ;;  %v3475_v41 = vmul.f32 %v3219_v18, %v2451_v24  ;;  %v7394_v8 = vpop.f32.mrb[57].mxu0  ;;  %3860 = vst.msk [vmem:[%s9521_s3 + $0x508] sm:$0xff] %vm305_vm0, %v3604_v49  ;;  %v2582_v24 = vmul.f32 0.5, %v7278_v55  ;;  %5026 = verf.f32 %v2714_v23  ;;  %v2842_v18 = vmul.f32 0.70710677, %v7392_v13 }
 0x172   :  { %v7396_v43 = vpop.f32.mrb[57].mxu1  ;;  %v5011_v37 = vpop.eup %5010  ;;  %v3603_v44 = vmul.f32 %v3347_v62, %v2579_v26  ;;  %v2581_v58 = vmul.f32 0.5, %v7312_v51  ;;  %v2713_v49 = vmul.f32 0.70710677, %v7404_v30  ;;  %v7432_v33 = vadd.f32 %v7038_v53, %v7106_v36 }
 0x173   :  { %9522 = vst [vmem:[#allocation8_spill] sm:$0xff] %v7396_v43  ;;  %v5013_v3 = vpop.eup %5012  ;;  %3731 = vst.msk [vmem:[%s9521_s3 + $0x100] sm:$0xff] %vm305_vm0, %v3475_v41  ;;  %v3222_v46 = vadd.f32 1.0, %v5011_v37  ;;  %5028 = verf.f32 %v2842_v18  ;;  %v2841_v41 = vmul.f32 0.70710677, %v7408_v39  ;;  %v7436_v51 = vadd.f32 %v7038_v53, %v7108_v45 }
 0x174   :  { %v5015_v26 = vpop.eup %5014  ;;  %3859 = vst.msk [vmem:[%s9521_s3 + $0x500] sm:$0xff] %vm305_vm0, %v3603_v44  ;;  %v3350_v2 = vadd.f32 1.0, %v5013_v3  ;;  %v7423_v62 = vpop.f32.mrb[58].mxu0  ;;  %5030 = verf.f32 %v2713_v49  ;;  %v2456_v45 = vmul.f32 0.5, %v7324_v27  ;;  %v2716_v49 = vmul.f32 0.70710677, %v7432_v33 }
 0x175   :  { %v3478_v16 = vmul.f32 %v3222_v46, %v2454_v7  ;;  %v3221_v55 = vadd.f32 1.0, %v5015_v26  ;;  %v7426_v23 = vpop.f32.mrb[58].mxu1  ;;  %v7428_v37 = vpop.f32.mrb[59].mxu0  ;;  %5032 = verf.f32 %v2841_v41 }
 0x176   :  { %v5017_v43 = vpop.eup %5016  ;;  %v3606_v44 = vmul.f32 %v3350_v2, %v2582_v24  ;;  %v7438_v7 = vpop.f32.mrb[59].mxu1  ;;  %v7446_v24 = vadd.f32 %v7038_v53, %v7116_v12  ;;  %v2584_v2 = vmul.f32 0.5, %v7328_v10  ;;  %5034 = verf.f32 %v2716_v49 }
 0x177   :  { %v5019_v3 = vpop.eup %5018  ;;  %3734 = vst.msk [vmem:[%s9521_s3 + $0x118] sm:$0xff] %vm305_vm0, %v3478_v16  ;;  %v3477_v46 = vmul.f32 %v3221_v55, %v2453_v22  ;;  %v3349_v18 = vadd.f32 1.0, %v5017_v43  ;;  %v2455_v16 = vmul.f32 0.5, %v7354_v15  ;;  %v2844_v55 = vmul.f32 0.70710677, %v7436_v51 }
 0x178   :  { %v5021_v36 = vpop.eup %5020  ;;  %3862 = vst.msk [vmem:[%s9521_s3 + $0x518] sm:$0xff] %vm305_vm0, %v3606_v44  ;;  %v3224_v26 = vadd.f32 1.0, %v5019_v3  ;;  %v7455_v22 = vpop.f32.mrb[60].mxu0  ;;  %v2715_v44 = vmul.f32 0.70710677, %v7446_v24  ;;  %v7470_v3 = vadd.f32 %v7038_v53, %v7118_v6 }
 0x179   :  { %9523 = vst [vmem:[#allocation9_spill] sm:$0xff] %v7455_v22  ;;  %3733 = vst.msk [vmem:[%s9521_s3 + $0x110] sm:$0xff] %vm305_vm0, %v3477_v46  ;;  %v3605_v12 = vmul.f32 %v3349_v18, %v2581_v58  ;;  %v3352_v43 = vadd.f32 1.0, %v5021_v36  ;;  %v7463_v41 = vpop.f32.mrb[60].mxu1  ;;  %v7465_v27 = vpop.f32.mrb[61].mxu0  ;;  %5036 = verf.f32 %v2844_v55  ;;  %v7480_v46 = vadd.f32 %v7038_v53, %v7143_v61 }
 0x17a   :  { %v3480_v10 = vmul.f32 %v3224_v26, %v2456_v45  ;;  %v7472_v22 = vpop.f32.mrb[61].mxu1  ;;  %v5023_v58 = vpop.eup %5022  ;;  %v7484_v18 = vadd.f32 %v7038_v53, %v7151_v11  ;;  %v2583_v45 = vmul.f32 0.5, %v7358_v60  ;;  %5038 = verf.f32 %v2715_v44 }
 0x17b   :  { %9524 = vst [vmem:[#allocation10_spill] sm:$0xff] %v7472_v22  ;;  %3861 = vst.msk [vmem:[%s9521_s3 + $0x510] sm:$0xff] %vm305_vm0, %v3605_v12  ;;  %v3608_v15 = vmul.f32 %v3352_v43, %v2584_v2  ;;  %v5025_v6 = vpop.eup %5024  ;;  %v3223_v36 = vadd.f32 1.0, %v5023_v58  ;;  %v2843_v26 = vmul.f32 0.70710677, %v7470_v3  ;;  %v2458_v12 = vmul.f32 0.5, %v7370_v57 }
 0x17c   :  { %3736 = vst.msk [vmem:[%s9521_s3 + $0x128] sm:$0xff] %vm305_vm0, %v3480_v10  ;;  %v7492_v2 = vpop.f32.mrb[62].mxu0  ;;  %v5027_v49 = vpop.eup %5026  ;;  %v3351_v11 = vadd.f32 1.0, %v5025_v6  ;;  %v2586_v43 = vmul.f32 0.5, %v7392_v13  ;;  %v2718_v60 = vmul.f32 0.70710677, %v7480_v46  ;;  %v7514_v57 = vadd.f32 %v7038_v53, %v7160_v1 }
 0x17d   :  { %9525 = vst [vmem:[#allocation11_spill] sm:$0xff] %v7492_v2  ;;  %v7494_v61 = vpop.f32.mrb[62].mxu1  ;;  %3864 = vst.msk [vmem:[%s9521_s3 + $0x528] sm:$0xff] %vm305_vm0, %v3608_v15  ;;  %v7503_v55 = vpop.f32.mrb[63].mxu0  ;;  %v3479_v10 = vmul.f32 %v3223_v36, %v2455_v16  ;;  %v3226_v44 = vadd.f32 1.0, %v5027_v49  ;;  %5040 = verf.f32 %v2843_v26  ;;  %v7510_v15 = vadd.f32 %v7038_v53, %v7153_v31 }
 0x17e   :  { %9526 = vst [vmem:[#allocation12_spill] sm:$0xff] %v7494_v61  ;;  %v2846_v58 = vmul.f32 0.70710677, %v7484_v18  ;;  %v7506_v61 = vpop.f32.mrb[63].mxu1  ;;  %v5029_v2 = vpop.eup %5028  ;;  %v3607_v22 = vmul.f32 %v3351_v11, %v2583_v45  ;;  %5042 = verf.f32 %v2718_v60  ;;  %v7522_v36 = vadd.f32 %v7038_v53, %v7180_v19 }
 0x17f   :  { %v5031_v13 = vpop.eup %5030  ;;  %3735 = vst.msk [vmem:[%s9521_s3 + $0x120] sm:$0xff] %vm305_vm0, %v3479_v10  ;;  %v3482_v16 = vmul.f32 %v3226_v44, %v2458_v12  ;;  %v3354_v6 = vadd.f32 1.0, %v5029_v2  ;;  %v2457_v1 = vmul.f32 0.5, %v7404_v30  ;;  %v2585_v2 = vmul.f32 0.5, %v7408_v39 }
 0x180   :  { %5044 = verf.f32 %v2846_v58  ;;  %v7524_v45 = vpop.f32.mrb[64].mxu0  ;;  %v5033_v26 = vpop.eup %5032  ;;  %3863 = vst.msk [vmem:[%s9521_s3 + $0x520] sm:$0xff] %vm305_vm0, %v3607_v22  ;;  %v3225_v49 = vadd.f32 1.0, %v5031_v13  ;;  %v2717_v11 = vmul.f32 0.70710677, %v7510_v15  ;;  %v2460_v10 = vmul.f32 0.5, %v7432_v33 }
 0x181   :  { %v7526_v31 = vpop.f32.mrb[64].mxu1  ;;  %v7535_v12 = vpop.f32.mrb[65].mxu0  ;;  %3738 = vst.msk [vmem:[%s9521_s3 + $0x138] sm:$0xff] %vm305_vm0, %v3482_v16  ;;  %v3610_v19 = vmul.f32 %v3354_v6, %v2586_v43  ;;  %v3353_v60 = vadd.f32 1.0, %v5033_v26  ;;  %v2845_v22 = vmul.f32 0.70710677, %v7514_v57  ;;  %v7548_v58 = vadd.f32 %v7038_v53, %v7182_v5 }
 0x182   :  { %v7543_v44 = vpop.f32.mrb[65].mxu1  ;;  %v3481_v30 = vmul.f32 %v3225_v49, %v2457_v1  ;;  %5046 = verf.f32 %v2717_v11  ;;  %v2720_v39 = vmul.f32 0.70710677, %v7522_v36  ;;  %v5035_v13 = vpop.eup %5034  ;;  %v7556_v33 = vadd.f32 %v7038_v53, %v7191_v42 }
 0x183   :  { %3866 = vst.msk [vmem:[%s9521_s3 + $0x538] sm:$0xff] %vm305_vm0, %v3610_v19  ;;  %v3609_v43 = vmul.f32 %v3353_v60, %v2585_v2  ;;  %5048 = verf.f32 %v2845_v22  ;;  %v7560_v16 = vadd.f32 %v7038_v53, %v7194_v4  ;;  %v5037_v26 = vpop.eup %5036  ;;  %v3228_v1 = vadd.f32 1.0, %v5035_v13 }
 0x184   :  { %v7562_v6 = vpop.f32.mrb[66].mxu0  ;;  %3737 = vst.msk [vmem:[%s9521_s3 + $0x130] sm:$0xff] %vm305_vm0, %v3481_v30  ;;  %v2588_v49 = vmul.f32 0.5, %v7436_v51  ;;  %5050 = verf.f32 %v2720_v39  ;;  %v2848_v42 = vmul.f32 0.70710677, %v7548_v58  ;;  %v5039_v11 = vpop.eup %5038  ;;  %v3356_v19 = vadd.f32 1.0, %v5037_v26 }
 0x185   :  { %v7564_v5 = vpop.f32.mrb[66].mxu1  ;;  %v7572_v2 = vpop.f32.mrb[67].mxu0  ;;  %3865 = vst.msk [vmem:[%s9521_s3 + $0x530] sm:$0xff] %vm305_vm0, %v3609_v43  ;;  %v2459_v60 = vmul.f32 0.5, %v7446_v24  ;;  %v2587_v22 = vmul.f32 0.5, %v7470_v3  ;;  %v3484_v30 = vmul.f32 %v3228_v1, %v2460_v10  ;;  %v3227_v39 = vadd.f32 1.0, %v5039_v11 }
 0x186   :  { %9527 = vst [vmem:[#allocation13_spill] sm:$0xff] %v7564_v5  ;;  %9528 = vst [vmem:[#allocation14_spill] sm:$0xff] %v7572_v2  ;;  %v7574_v4 = vpop.f32.mrb[67].mxu1  ;;  %v2719_v51 = vmul.f32 0.70710677, %v7556_v33  ;;  %5052 = verf.f32 %v2848_v42  ;;  %v7586_v5 = vadd.f32 %v7038_v53, %v7212_v59  ;;  %v7590_v43 = vadd.f32 %v7038_v53, %v7214_v47 }
 0x187   :  { %9529 = vst [vmem:[#allocation15_spill] sm:$0xff] %v7574_v4  ;;  %v2847_v13 = vmul.f32 0.70710677, %v7560_v16  ;;  %v5041_v2 = vpop.eup %5040  ;;  %v3612_v4 = vmul.f32 %v3356_v19, %v2588_v49  ;;  %3740 = vst.msk [vmem:[%s9521_s3 + $0x148] sm:$0xff] %vm305_vm0, %v3484_v30  ;;  %v3483_v26 = vmul.f32 %v3227_v39, %v2459_v60  ;;  %v7602_v59 = vadd.f32 %v7038_v53, %v7223_v50 }
 0x188   :  { %5054 = verf.f32 %v2719_v51  ;;  %v7592_v24 = vpop.f32.mrb[68].mxu0  ;;  %v5043_v10 = vpop.eup %5042  ;;  %v3355_v1 = vadd.f32 1.0, %v5041_v2  ;;  %v2462_v11 = vmul.f32 0.5, %v7480_v46  ;;  %v2590_v2 = vmul.f32 0.5, %v7484_v18 }
 0x189   :  { %v7594_v3 = vpop.f32.mrb[68].mxu1  ;;  %5056 = verf.f32 %v2847_v13  ;;  %v7604_v49 = vpop.f32.mrb[69].mxu0  ;;  %3868 = vst.msk [vmem:[%s9521_s3 + $0x548] sm:$0xff] %vm305_vm0, %v3612_v4  ;;  %v3230_v19 = vadd.f32 1.0, %v5043_v10  ;;  %v2722_v60 = vmul.f32 0.70710677, %v7586_v5  ;;  %v7624_v18 = vadd.f32 %v7038_v53, %v7231_v29 }
 0x18a   :  { %v7606_v47 = vpop.f32.mrb[69].mxu1  ;;  %v5045_v42 = vpop.eup %5044  ;;  %3739 = vst.msk [vmem:[%s9521_s3 + $0x140] sm:$0xff] %vm305_vm0, %v3483_v26  ;;  %v3611_v50 = vmul.f32 %v3355_v1, %v2587_v22  ;;  %v2461_v30 = vmul.f32 0.5, %v7510_v15  ;;  %v2850_v39 = vmul.f32 0.70710677, %v7590_v43  ;;  %v7636_v22 = vadd.f32 %v7038_v53, %v7250_v35 }
 0x18b   :  { %9530 = vst [vmem:[#allocation16_spill] sm:$0xff] %v7606_v47  ;;  %v3358_v51 = vadd.f32 1.0, %v5045_v42  ;;  %v3486_v13 = vmul.f32 %v3230_v19, %v2462_v11  ;;  %5058 = verf.f32 %v2722_v60  ;;  %v2721_v46 = vmul.f32 0.70710677, %v7602_v59 }
 0x18c   :  { %v7626_v4 = vpop.f32.mrb[70].mxu0  ;;  %v5047_v47 = vpop.eup %5046  ;;  %3867 = vst.msk [vmem:[%s9521_s3 + $0x540] sm:$0xff] %vm305_vm0, %v3611_v50  ;;  %5060 = verf.f32 %v2850_v39  ;;  %v7640_v29 = vadd.f32 %v7038_v53, %v7252_v54  ;;  %v2589_v19 = vmul.f32 0.5, %v7514_v57  ;;  %v2849_v35 = vmul.f32 0.70710677, %v7624_v18 }
 0x18d   :  { %v7628_v10 = vpop.f32.mrb[70].mxu1  ;;  %v3614_v15 = vmul.f32 %v3358_v51, %v2590_v2  ;;  %v7642_v26 = vpop.f32.mrb[71].mxu0  ;;  %3742 = vst.msk [vmem:[%s9521_s3 + $0x158] sm:$0xff] %vm305_vm0, %v3486_v13  ;;  %v3229_v11 = vadd.f32 1.0, %v5047_v47  ;;  %5062 = verf.f32 %v2721_v46  ;;  %v2464_v60 = vmul.f32 0.5, %v7522_v36 }
 0x18e   :  { %9531 = vst [vmem:[#allocation17_spill] sm:$0xff] %v7642_v26  ;;  %v7644_v1 = vpop.f32.mrb[71].mxu1  ;;  %v5049_v42 = vpop.eup %5048  ;;  %v2592_v50 = vmul.f32 0.5, %v7548_v58  ;;  %v2724_v51 = vmul.f32 0.70710677, %v7636_v22  ;;  %5064 = verf.f32 %v2849_v35  ;;  %v7670_v36 = vadd.f32 %v7038_v53, %v7262_v48 }
 0x18f   :  { %9532 = vst [vmem:[#allocation18_spill] sm:$0xff] %v7644_v1  ;;  %v5051_v2 = vpop.eup %5050  ;;  %3870 = vst.msk [vmem:[%s9521_s3 + $0x558] sm:$0xff] %vm305_vm0, %v3614_v15  ;;  %v3357_v54 = vadd.f32 1.0, %v5049_v42  ;;  %v3485_v39 = vmul.f32 %v3229_v11, %v2461_v30  ;;  %v2852_v57 = vmul.f32 0.70710677, %v7640_v29  ;;  %v7666_v15 = vadd.f32 %v7038_v53, %v7260_v0 }
 0x190   :  { %v3232_v47 = vadd.f32 1.0, %v5051_v2  ;;  %v7660_v13 = vpop.f32.mrb[72].mxu0  ;;  %v5053_v1 = vpop.eup %5052  ;;  %5066 = verf.f32 %v2724_v51  ;;  %v7682_v0 = vadd.f32 %v7038_v53, %v7280_v28  ;;  %v2463_v48 = vmul.f32 0.5, %v7556_v33 }
 0x191   :  { %v7662_v46 = vpop.f32.mrb[72].mxu1  ;;  %v3613_v26 = vmul.f32 %v3357_v54, %v2589_v19  ;;  %v7672_v58 = vpop.f32.mrb[73].mxu0  ;;  %3741 = vst.msk [vmem:[%s9521_s3 + $0x150] sm:$0xff] %vm305_vm0, %v3485_v39  ;;  %v3360_v19 = vadd.f32 1.0, %v5053_v1  ;;  %5068 = verf.f32 %v2852_v57  ;;  %v2591_v54 = vmul.f32 0.5, %v7560_v16 }
 0x192   :  { %v7674_v30 = vpop.f32.mrb[73].mxu1  ;;  %v5055_v42 = vpop.eup %5054  ;;  %v3488_v11 = vmul.f32 %v3232_v47, %v2464_v60  ;;  %v2723_v51 = vmul.f32 0.70710677, %v7666_v15  ;;  %v2466_v60 = vmul.f32 0.5, %v7586_v5  ;;  %v2851_v39 = vmul.f32 0.70710677, %v7670_v36 }
 0x193   :  { %v5057_v35 = vpop.eup %5056  ;;  %3869 = vst.msk [vmem:[%s9521_s3 + $0x550] sm:$0xff] %vm305_vm0, %v3613_v26  ;;  %v3231_v2 = vadd.f32 1.0, %v5055_v42  ;;  %v3616_v28 = vmul.f32 %v3360_v19, %v2592_v50  ;;  %v2726_v16 = vmul.f32 0.70710677, %v7682_v0  ;;  %v7704_v57 = vadd.f32 %v7038_v53, %v7282_v32 }
 0x194   :  { %3744 = vst.msk [vmem:[%s9521_s3 + $0x168] sm:$0xff] %vm305_vm0, %v3488_v11  ;;  %v3359_v1 = vadd.f32 1.0, %v5057_v35  ;;  %v7697_v47 = vpop.f32.mrb[74].mxu0  ;;  %5070 = verf.f32 %v2723_v51  ;;  %v7716_v19 = vadd.f32 %v7038_v53, %v7292_v40  ;;  %v7720_v32 = vadd.f32 %v7038_v53, %v7294_v20 }
 0x195   :  { %v7699_v26 = vpop.f32.mrb[74].mxu1  ;;  %v3487_v33 = vmul.f32 %v3231_v2, %v2463_v48  ;;  %v7706_v42 = vpop.f32.mrb[75].mxu0  ;;  %3872 = vst.msk [vmem:[%s9521_s3 + $0x568] sm:$0xff] %vm305_vm0, %v3616_v28  ;;  %5072 = verf.f32 %v2851_v39  ;;  %v2594_v2 = vmul.f32 0.5, %v7590_v43  ;;  %v2465_v40 = vmul.f32 0.5, %v7602_v59 }
 0x196   :  { %v7708_v50 = vpop.f32.mrb[75].mxu1  ;;  %v5059_v11 = vpop.eup %5058  ;;  %v3615_v5 = vmul.f32 %v3359_v1, %v2591_v54  ;;  %5074 = verf.f32 %v2726_v16  ;;  %v2854_v54 = vmul.f32 0.70710677, %v7704_v57  ;;  %v2593_v20 = vmul.f32 0.5, %v7624_v18 }
 0x197   :  { %9533 = vst [vmem:[#allocation19_spill] sm:$0xff] %v7708_v50  ;;  %v5061_v35 = vpop.eup %5060  ;;  %3743 = vst.msk [vmem:[%s9521_s3 + $0x160] sm:$0xff] %vm305_vm0, %v3487_v33  ;;  %v3234_v48 = vadd.f32 1.0, %v5059_v11  ;;  %v2725_v28 = vmul.f32 0.70710677, %v7716_v19 }
 0x198   :  { %v5063_v51 = vpop.eup %5062  ;;  %3871 = vst.msk [vmem:[%s9521_s3 + $0x560] sm:$0xff] %vm305_vm0, %v3615_v5  ;;  %v3362_v53 = vadd.f32 1.0, %v5061_v35  ;;  %v7735_v1 = vpop.f32.mrb[76].mxu0  ;;  %5076 = verf.f32 %v2854_v54  ;;  %v2853_v33 = vmul.f32 0.70710677, %v7720_v32 }
 0x199   :  { %v3490_v39 = vmul.f32 %v3234_v48, %v2466_v60  ;;  %v3233_v43 = vadd.f32 1.0, %v5063_v51  ;;  %v7738_v16 = vpop.f32.mrb[76].mxu1  ;;  %v7740_v11 = vpop.f32.mrb[77].mxu0  ;;  %5078 = verf.f32 %v2725_v28  ;;  %v7742_v35 = vld [vmem:[#allocation4] ss:$0 sm:$0xff]  ;;  %v2596_v28 = vmul.f32 0.5, %v7640_v29 }
 0x19a   :  { %v5065_v50 = vpop.eup %5064  ;;  %v3618_v5 = vmul.f32 %v3362_v53, %v2594_v2  ;;  %v7746_v59 = vadd.f32 %v7742_v35, %v7314_v9  ;;  %v7750_v18 = vadd.f32 %v7742_v35, %v7316_v25  ;;  %v7752_v60 = vpop.f32.mrb[77].mxu1  ;;  %5080 = verf.f32 %v2853_v33 }
 0x19b   :  { %9534 = vst [vmem:[#allocation20_spill] sm:$0xff] %v7752_v60  ;;  %v5067_v48 = vpop.eup %5066  ;;  %3746 = vst.msk [vmem:[%s9521_s3 + $0x178] sm:$0xff] %vm305_vm0, %v3490_v39  ;;  %v3489_v2 = vmul.f32 %v3233_v43, %v2465_v40  ;;  %v3361_v54 = vadd.f32 1.0, %v5065_v50  ;;  %v7760_v51 = vadd.f32 %v7742_v35, %v7330_v38  ;;  %v2468_v25 = vmul.f32 0.5, %v7636_v22 }
 0x19c   :  { %v5069_v9 = vpop.eup %5068  ;;  %3874 = vst.msk [vmem:[%s9521_s3 + $0x578] sm:$0xff] %vm305_vm0, %v3618_v5  ;;  %v3236_v53 = vadd.f32 1.0, %v5067_v48  ;;  %v2728_v39 = vmul.f32 0.70710677, %v7746_v59  ;;  %v7769_v40 = vpop.f32.mrb[78].mxu0  ;;  %v2467_v43 = vmul.f32 0.5, %v7666_v15 }
 0x19d   :  { %9535 = vst [vmem:[#allocation21_spill] sm:$0xff] %v7769_v40  ;;  %3745 = vst.msk [vmem:[%s9521_s3 + $0x170] sm:$0xff] %vm305_vm0, %v3489_v2  ;;  %v3617_v38 = vmul.f32 %v3361_v54, %v2593_v20  ;;  %v3364_v50 = vadd.f32 1.0, %v5069_v9  ;;  %v2856_v33 = vmul.f32 0.70710677, %v7750_v18  ;;  %v7777_v5 = vpop.f32.mrb[78].mxu1  ;;  %v7784_v40 = vadd.f32 %v7742_v35, %v7332_v21 }
 0x19e   :  { %v7779_v22 = vpop.f32.mrb[79].mxu0  ;;  %v3492_v29 = vmul.f32 %v3236_v53, %v2468_v25  ;;  %5082 = verf.f32 %v2728_v39  ;;  %v2727_v48 = vmul.f32 0.70710677, %v7760_v51  ;;  %v7786_v60 = vpop.f32.mrb[79].mxu1  ;;  %v7794_v2 = vadd.f32 %v7742_v35, %v7348_v34 }
 0x19f   :  { %9536 = vst [vmem:[#allocation22_spill] sm:$0xff] %v7786_v60  ;;  %v5071_v20 = vpop.eup %5070  ;;  %3873 = vst.msk [vmem:[%s9521_s3 + $0x570] sm:$0xff] %vm305_vm0, %v3617_v38  ;;  %v3620_v15 = vmul.f32 %v3364_v50, %v2596_v28  ;;  %5084 = verf.f32 %v2856_v33  ;;  %v7798_v54 = vadd.f32 %v7742_v35, %v7350_v14  ;;  %v2595_v25 = vmul.f32 0.5, %v7670_v36 }
 0x1a0   :  { %v5073_v21 = vpop.eup %5072  ;;  %3748 = vst.msk [vmem:[%s9521_s3 + $0x188] sm:$0xff] %vm305_vm0, %v3492_v29  ;;  %v3235_v9 = vadd.f32 1.0, %v5071_v20  ;;  %5086 = verf.f32 %v2727_v48  ;;  %v2855_v53 = vmul.f32 0.70710677, %v7784_v40  ;;  %v7806_v28 = vpop.f32.mrb[80].mxu0  ;;  %v2470_v38 = vmul.f32 0.5, %v7682_v0 }
 0x1a1   :  { %9537 = vst [vmem:[#allocation23_spill] sm:$0xff] %v7806_v28  ;;  %v7808_v34 = vpop.f32.mrb[80].mxu1  ;;  %v5075_v39 = vpop.eup %5074  ;;  %3876 = vst.msk [vmem:[%s9521_s3 + $0x588] sm:$0xff] %vm305_vm0, %v3620_v15  ;;  %v3363_v14 = vadd.f32 1.0, %v5073_v21  ;;  %v2598_v50 = vmul.f32 0.5, %v7704_v57  ;;  %v7824_v15 = vadd.f32 %v7742_v35, %v7360_v63  ;;  %v7828_v0 = vadd.f32 %v7742_v35, %v7362_v17 }
 0x1a2   :  { %9538 = vst [vmem:[#allocation24_spill] sm:$0xff] %v7808_v34  ;;  %v2730_v36 = vmul.f32 0.70710677, %v7794_v2  ;;  %v7817_v33 = vpop.f32.mrb[81].mxu0  ;;  %v3491_v29 = vmul.f32 %v3235_v9, %v2467_v43  ;;  %v3238_v48 = vadd.f32 1.0, %v5075_v39  ;;  %5088 = verf.f32 %v2855_v53  ;;  %v7820_v34 = vpop.f32.mrb[81].mxu1 }
 0x1a3   :  { %v2858_v20 = vmul.f32 0.70710677, %v7798_v54  ;;  %v5077_v28 = vpop.eup %5076  ;;  %v3619_v60 = vmul.f32 %v3363_v14, %v2595_v25  ;;  %v7836_v9 = vadd.f32 %v7742_v35, %v7385_v52  ;;  %v2469_v17 = vmul.f32 0.5, %v7716_v19 }
 0x1a4   :  { %5090 = verf.f32 %v2730_v36  ;;  %v5079_v57 = vpop.eup %5078  ;;  %3747 = vst.msk [vmem:[%s9521_s3 + $0x180] sm:$0xff] %vm305_vm0, %v3491_v29  ;;  %v3494_v43 = vmul.f32 %v3238_v48, %v2470_v38  ;;  %v3366_v21 = vadd.f32 1.0, %v5077_v28  ;;  %v7838_v25 = vpop.f32.mrb[82].mxu0  ;;  %v2597_v28 = vmul.f32 0.5, %v7720_v32 }
 0x1a5   :  { %5092 = verf.f32 %v2858_v20  ;;  %v7840_v63 = vpop.f32.mrb[82].mxu1  ;;  %v5081_v53 = vpop.eup %5080  ;;  %3875 = vst.msk [vmem:[%s9521_s3 + $0x580] sm:$0xff] %vm305_vm0, %v3619_v60  ;;  %v3237_v39 = vadd.f32 1.0, %v5079_v57  ;;  %v2729_v14 = vmul.f32 0.70710677, %v7824_v15  ;;  %v2472_v29 = vmul.f32 0.5, %v7746_v59 }
 0x1a6   :  { %v7849_v38 = vpop.f32.mrb[83].mxu0  ;;  %3750 = vst.msk [vmem:[%s9521_s3 + $0x198] sm:$0xff] %vm305_vm0, %v3494_v43  ;;  %v3622_v52 = vmul.f32 %v3366_v21, %v2598_v50  ;;  %v3365_v36 = vadd.f32 1.0, %v5081_v53  ;;  %v2857_v60 = vmul.f32 0.70710677, %v7828_v0  ;;  %v7857_v48 = vpop.f32.mrb[83].mxu1  ;;  %v7862_v20 = vadd.f32 %v7742_v35, %v7387_v56 }
 0x1a7   :  { %v3493_v19 = vmul.f32 %v3237_v39, %v2469_v17  ;;  %5094 = verf.f32 %v2729_v14  ;;  %v2732_v32 = vmul.f32 0.70710677, %v7836_v9  ;;  %v7870_v59 = vadd.f32 %v7742_v35, %v7394_v8  ;;  %v9539_v43 = vld [vmem:[#allocation8_spill] sm:$0xff] }
 0x1a8   :  { %v5083_v57 = vpop.eup %5082  ;;  %3878 = vst.msk [vmem:[%s9521_s3 + $0x598] sm:$0xff] %vm305_vm0, %v3622_v52  ;;  %v3621_v50 = vmul.f32 %v3365_v36, %v2597_v28  ;;  %5096 = verf.f32 %v2857_v60  ;;  %v7874_v21 = vadd.f32 %v7742_v35, %v9539_v43  ;;  %v7876_v53 = vpop.f32.mrb[84].mxu0  ;;  %v2600_v28 = vmul.f32 0.5, %v7750_v18 }
 0x1a9   :  { %9540 = vst [vmem:[#allocation8_spill] sm:$0xff] %v7876_v53  ;;  %v7878_v56 = vpop.f32.mrb[84].mxu1  ;;  %v5085_v17 = vpop.eup %5084  ;;  %3749 = vst.msk [vmem:[%s9521_s3 + $0x190] sm:$0xff] %vm305_vm0, %v3493_v19  ;;  %v3240_v39 = vadd.f32 1.0, %v5083_v57  ;;  %5098 = verf.f32 %v2732_v32  ;;  %v2860_v8 = vmul.f32 0.70710677, %v7862_v20  ;;  %v7900_v53 = vadd.f32 %v7742_v35, %v7423_v62 }
 0x1aa   :  { %9541 = vst [vmem:[#allocation25_spill] sm:$0xff] %v7878_v56  ;;  %v7886_v14 = vpop.f32.mrb[85].mxu0  ;;  %v7888_v52 = vpop.f32.mrb[85].mxu1  ;;  %3877 = vst.msk [vmem:[%s9521_s3 + $0x590] sm:$0xff] %vm305_vm0, %v3621_v50  ;;  %v3368_v60 = vadd.f32 1.0, %v5085_v17  ;;  %v2471_v43 = vmul.f32 0.5, %v7760_v51  ;;  %v7904_v50 = vadd.f32 %v7742_v35, %v7426_v23  ;;  %v7916_v62 = vadd.f32 %v7742_v35, %v7428_v37 }
 0x1ab   :  { %9542 = vst [vmem:[#allocation26_spill] sm:$0xff] %v7886_v14  ;;  %9543 = vst [vmem:[#allocation27_spill] sm:$0xff] %v7888_v52  ;;  %v5087_v36 = vpop.eup %5086  ;;  %v2599_v19 = vmul.f32 0.5, %v7784_v40  ;;  %v2731_v18 = vmul.f32 0.70710677, %v7870_v59  ;;  %v3496_v32 = vmul.f32 %v3240_v39, %v2472_v29  ;;  %5100 = verf.f32 %v2860_v8 }
 0x1ac   :  { %v3239_v57 = vadd.f32 1.0, %v5087_v36  ;;  %v2859_v14 = vmul.f32 0.70710677, %v7874_v21  ;;  %v5089_v56 = vpop.eup %5088  ;;  %v3624_v52 = vmul.f32 %v3368_v60, %v2600_v28  ;;  %v7906_v51 = vpop.f32.mrb[86].mxu0  ;;  %v2474_v36 = vmul.f32 0.5, %v7794_v2 }
 0x1ad   :  { %5102 = verf.f32 %v2731_v18  ;;  %v7908_v40 = vpop.f32.mrb[86].mxu1  ;;  %3752 = vst.msk [vmem:[%s9521_s3 + $0x1a8] sm:$0xff] %vm305_vm0, %v3496_v32  ;;  %v3367_v39 = vadd.f32 1.0, %v5089_v56  ;;  %v7918_v28 = vpop.f32.mrb[87].mxu0  ;;  %v2602_v56 = vmul.f32 0.5, %v7798_v54  ;;  %v2473_v18 = vmul.f32 0.5, %v7824_v15 }
 0x1ae   :  { %v5091_v29 = vpop.eup %5090  ;;  %v3495_v17 = vmul.f32 %v3239_v57, %v2471_v43  ;;  %5104 = verf.f32 %v2859_v14  ;;  %v7920_v23 = vpop.f32.mrb[87].mxu1  ;;  %3880 = vst.msk [vmem:[%s9521_s3 + $0x5a8] sm:$0xff] %vm305_vm0, %v3624_v52  ;;  %v2734_v14 = vmul.f32 0.70710677, %v7900_v53  ;;  %v2862_v32 = vmul.f32 0.70710677, %v7904_v50 }
 0x1af   :  { %9544 = vst [vmem:[#allocation28_spill] sm:$0xff] %v7920_v23  ;;  %v5093_v8 = vpop.eup %5092  ;;  %v3242_v60 = vadd.f32 1.0, %v5091_v29  ;;  %v3623_v37 = vmul.f32 %v3367_v39, %v2599_v19  ;;  %v2733_v2 = vmul.f32 0.70710677, %v7916_v62  ;;  %v7938_v54 = vadd.f32 %v7742_v35, %v7438_v7  ;;  %v9546_v19 = vld [vmem:[#allocation9_spill] sm:$0xff] }
 0x1b0   :  { %3751 = vst.msk [vmem:[%s9521_s3 + $0x1a0] sm:$0xff] %vm305_vm0, %v3495_v17  ;;  %v3370_v43 = vadd.f32 1.0, %v5093_v8  ;;  %5106 = verf.f32 %v2734_v14  ;;  %v7940_v52 = vpop.f32.mrb[88].mxu0  ;;  %v7950_v17 = vadd.f32 %v7742_v35, %v9546_v19  ;;  %v7954_v7 = vadd.f32 %v7742_v35, %v7463_v41 }
 0x1b1   :  { %v3498_v57 = vmul.f32 %v3242_v60, %v2474_v36  ;;  %v7942_v29 = vpop.f32.mrb[88].mxu1  ;;  %v5095_v23 = vpop.eup %5094  ;;  %3879 = vst.msk [vmem:[%s9521_s3 + $0x5a0] sm:$0xff] %vm305_vm0, %v3623_v37  ;;  %5108 = verf.f32 %v2862_v32  ;;  %v2861_v14 = vmul.f32 0.70710677, %v7938_v54  ;;  %v2604_v32 = vmul.f32 0.5, %v7862_v20 }
 0x1b2   :  { %9545 = vst [vmem:[#allocation29_spill] sm:$0xff] %v7942_v29  ;;  %v3626_v15 = vmul.f32 %v3370_v43, %v2602_v56  ;;  %v7956_v39 = vpop.f32.mrb[89].mxu0  ;;  %v7958_v8 = vpop.f32.mrb[89].mxu1  ;;  %v3241_v60 = vadd.f32 1.0, %v5095_v23  ;;  %v2601_v56 = vmul.f32 0.5, %v7828_v0  ;;  %5110 = verf.f32 %v2733_v2 }
 0x1b3   :  { %9547 = vst [vmem:[#allocation9_spill] sm:$0xff] %v7956_v39  ;;  %9548 = vst [vmem:[#allocation30_spill] sm:$0xff] %v7958_v8  ;;  %v5097_v36 = vpop.eup %5096  ;;  %v2476_v43 = vmul.f32 0.5, %v7836_v9  ;;  %v2736_v19 = vmul.f32 0.70710677, %v7950_v17  ;;  %5112 = verf.f32 %v2861_v14  ;;  %v9550_v9 = vld [vmem:[#allocation10_spill] sm:$0xff] }
 0x1b4   :  { %3754 = vst.msk [vmem:[%s9521_s3 + $0x1b8] sm:$0xff] %vm305_vm0, %v3498_v57  ;;  %v5099_v37 = vpop.eup %5098  ;;  %3882 = vst.msk [vmem:[%s9521_s3 + $0x5b8] sm:$0xff] %vm305_vm0, %v3626_v15  ;;  %v3369_v41 = vadd.f32 1.0, %v5097_v36  ;;  %v3497_v57 = vmul.f32 %v3241_v60, %v2473_v18  ;;  %v2864_v0 = vmul.f32 0.70710677, %v7954_v7  ;;  %v7974_v2 = vpop.f32.mrb[90].mxu0  ;;  %v7980_v15 = vadd.f32 %v7742_v35, %v7465_v27 }
 0x1b5   :  { %v3244_v23 = vadd.f32 1.0, %v5099_v37  ;;  %v7976_v8 = vpop.f32.mrb[90].mxu1  ;;  %v5101_v39 = vpop.eup %5100  ;;  %5114 = verf.f32 %v2736_v19  ;;  %v7984_v20 = vadd.f32 %v7742_v35, %v9550_v9  ;;  %v9553_v37 = vld [vmem:[#allocation11_spill] sm:$0xff]  ;;  %v2475_v19 = vmul.f32 0.5, %v7870_v59 }
 0x1b6   :  { %9549 = vst [vmem:[#allocation31_spill] sm:$0xff] %v7976_v8  ;;  %v3625_v29 = vmul.f32 %v3369_v41, %v2601_v56  ;;  %v7986_v18 = vpop.f32.mrb[91].mxu0  ;;  %v7988_v36 = vpop.f32.mrb[91].mxu1  ;;  %3753 = vst.msk [vmem:[%s9521_s3 + $0x1b0] sm:$0xff] %vm305_vm0, %v3497_v57  ;;  %v3372_v14 = vadd.f32 1.0, %v5101_v39  ;;  %5116 = verf.f32 %v2864_v0  ;;  %v7996_v27 = vadd.f32 %v7742_v35, %v9553_v37 }
 0x1b7   :  { %9551 = vst [vmem:[#allocation10_spill] sm:$0xff] %v7986_v18  ;;  %9552 = vst [vmem:[#allocation32_spill] sm:$0xff] %v7988_v36  ;;  %v5103_v60 = vpop.eup %5102  ;;  %v3500_v56 = vmul.f32 %v3244_v23, %v2476_v43  ;;  %v2603_v36 = vmul.f32 0.5, %v7874_v21  ;;  %v2735_v57 = vmul.f32 0.70710677, %v7980_v15  ;;  %v2478_v23 = vmul.f32 0.5, %v7900_v53 }
 0x1b8   :  { %v5105_v41 = vpop.eup %5104  ;;  %3881 = vst.msk [vmem:[%s9521_s3 + $0x5b0] sm:$0xff] %vm305_vm0, %v3625_v29  ;;  %v3243_v9 = vadd.f32 1.0, %v5103_v60  ;;  %v3628_v39 = vmul.f32 %v3372_v14, %v2604_v32  ;;  %v2863_v0 = vmul.f32 0.70710677, %v7984_v20  ;;  %v8011_v37 = vpop.f32.mrb[92].mxu0  ;;  %v9554_v60 = vld [vmem:[#allocation12_spill] sm:$0xff]  ;;  %v8030_v14 = vadd.f32 %v7742_v35, %v7503_v55 }
 0x1b9   :  { %3756 = vst.msk [vmem:[%s9521_s3 + $0x1c8] sm:$0xff] %vm305_vm0, %v3500_v56  ;;  %v3371_v43 = vadd.f32 1.0, %v5105_v41  ;;  %v8013_v29 = vpop.f32.mrb[92].mxu1  ;;  %5118 = verf.f32 %v2735_v57  ;;  %v2738_v21 = vmul.f32 0.70710677, %v7996_v27  ;;  %v8018_v18 = vadd.f32 %v7742_v35, %v9554_v60  ;;  %v8020_v8 = vpop.f32.mrb[93].mxu0 }
 0x1ba   :  { %v3499_v59 = vmul.f32 %v3243_v9, %v2475_v19  ;;  %9555 = vst [vmem:[#allocation11_spill] sm:$0xff] %v8020_v8  ;;  %v8022_v32 = vpop.f32.mrb[93].mxu1  ;;  %v5107_v56 = vpop.eup %5106  ;;  %3884 = vst.msk [vmem:[%s9521_s3 + $0x5c8] sm:$0xff] %vm305_vm0, %v3628_v39  ;;  %5120 = verf.f32 %v2863_v0  ;;  %v8034_v41 = vadd.f32 %v7742_v35, %v7506_v61  ;;  %v2606_v57 = vmul.f32 0.5, %v7904_v50 }
 0x1bb   :  { %9556 = vst [vmem:[#allocation12_spill] sm:$0xff] %v8022_v32  ;;  %v3627_v53 = vmul.f32 %v3371_v43, %v2603_v36  ;;  %v5109_v19 = vpop.eup %5108  ;;  %v3246_v9 = vadd.f32 1.0, %v5107_v56  ;;  %5122 = verf.f32 %v2738_v21  ;;  %v2866_v36 = vmul.f32 0.70710677, %v8018_v18 }
 0x1bc   :  { %3755 = vst.msk [vmem:[%s9521_s3 + $0x1c0] sm:$0xff] %vm305_vm0, %v3499_v59  ;;  %v5111_v39 = vpop.eup %5110  ;;  %v3374_v61 = vadd.f32 1.0, %v5109_v19  ;;  %v2477_v55 = vmul.f32 0.5, %v7916_v62  ;;  %v2605_v43 = vmul.f32 0.5, %v7938_v54  ;;  %v2737_v0 = vmul.f32 0.70710677, %v8030_v14 }
 0x1bd   :  { %3883 = vst.msk [vmem:[%s9521_s3 + $0x5c0] sm:$0xff] %vm305_vm0, %v3627_v53  ;;  %v8049_v59 = vpop.f32.mrb[94].mxu0  ;;  %v3502_v60 = vmul.f32 %v3246_v9, %v2478_v23  ;;  %v3245_v50 = vadd.f32 1.0, %v5111_v39  ;;  %5124 = verf.f32 %v2866_v36  ;;  %v2865_v21 = vmul.f32 0.70710677, %v8034_v41  ;;  %v8052_v56 = vpop.f32.mrb[94].mxu1 }
 0x1be   :  { %v8054_v32 = vpop.f32.mrb[95].mxu0  ;;  %v5113_v8 = vpop.eup %5112  ;;  %v3630_v53 = vmul.f32 %v3374_v61, %v2606_v57  ;;  %5126 = verf.f32 %v2737_v0  ;;  %v8058_v62 = vadd.f32 %v7742_v35, %v7524_v45  ;;  %v8062_v54 = vadd.f32 %v7742_v35, %v7526_v31 }
 0x1bf   :  { %v8064_v23 = vpop.f32.mrb[95].mxu1  ;;  %v5115_v19 = vpop.eup %5114  ;;  %3758 = vst.msk [vmem:[%s9521_s3 + $0x1d8] sm:$0xff] %vm305_vm0, %v3502_v60  ;;  %v3501_v9 = vmul.f32 %v3245_v50, %v2477_v55  ;;  %v3373_v36 = vadd.f32 1.0, %v5113_v8  ;;  %5128 = verf.f32 %v2865_v21  ;;  %v8072_v57 = vadd.f32 %v7742_v35, %v7535_v12 }
 0x1c0   :  { %v5117_v45 = vpop.eup %5116  ;;  %3886 = vst.msk [vmem:[%s9521_s3 + $0x5d8] sm:$0xff] %vm305_vm0, %v3630_v53  ;;  %v2480_v31 = vmul.f32 0.5, %v7950_v17  ;;  %v3248_v39 = vadd.f32 1.0, %v5115_v19  ;;  %v2608_v61 = vmul.f32 0.5, %v7954_v7  ;;  %v2740_v0 = vmul.f32 0.70710677, %v8058_v62 }
 0x1c1   :  { %v8081_v55 = vpop.f32.mrb[96].mxu0  ;;  %3757 = vst.msk [vmem:[%s9521_s3 + $0x1d0] sm:$0xff] %vm305_vm0, %v3501_v9  ;;  %v3629_v12 = vmul.f32 %v3373_v36, %v2605_v43  ;;  %v3376_v8 = vadd.f32 1.0, %v5117_v45  ;;  %v2479_v60 = vmul.f32 0.5, %v7980_v15  ;;  %v2868_v50 = vmul.f32 0.70710677, %v8062_v54 }
 0x1c2   :  { %9557 = vst [vmem:[#allocation33_spill] sm:$0xff] %v8081_v55  ;;  %v8089_v21 = vpop.f32.mrb[96].mxu1  ;;  %v8091_v17 = vpop.f32.mrb[97].mxu0  ;;  %v3504_v7 = vmul.f32 %v3248_v39, %v2480_v31  ;;  %5130 = verf.f32 %v2740_v0  ;;  %v2739_v53 = vmul.f32 0.70710677, %v8072_v57  ;;  %v8096_v19 = vadd.f32 %v7742_v35, %v7543_v44  ;;  %v9561_v36 = vld [vmem:[#allocation13_spill] sm:$0xff] }
 0x1c3   :  { %9558 = vst [vmem:[#allocation34_spill] sm:$0xff] %v8089_v21  ;;  %9559 = vst [vmem:[#allocation35_spill] sm:$0xff] %v8091_v17  ;;  %v8098_v55 = vpop.f32.mrb[97].mxu1  ;;  %v5119_v43 = vpop.eup %5118  ;;  %v3632_v15 = vmul.f32 %v3376_v8, %v2608_v61  ;;  %5132 = verf.f32 %v2868_v50  ;;  %v8106_v9 = vadd.f32 %v7742_v35, %v7562_v6  ;;  %v8110_v45 = vadd.f32 %v7742_v35, %v9561_v36 }
 0x1c4   :  { %9560 = vst [vmem:[#allocation36_spill] sm:$0xff] %v8098_v55  ;;  %3885 = vst.msk [vmem:[%s9521_s3 + $0x5d0] sm:$0xff] %vm305_vm0, %v3629_v12  ;;  %v5121_v44 = vpop.eup %5120  ;;  %v3247_v31 = vadd.f32 1.0, %v5119_v43  ;;  %v2607_v39 = vmul.f32 0.5, %v7984_v20  ;;  %5134 = verf.f32 %v2739_v53  ;;  %v2867_v61 = vmul.f32 0.70710677, %v8096_v19 }
 0x1c5   :  { %3760 = vst.msk [vmem:[%s9521_s3 + $0x1e8] sm:$0xff] %vm305_vm0, %v3504_v7  ;;  %v8118_v0 = vpop.f32.mrb[98].mxu0  ;;  %v8120_v6 = vpop.f32.mrb[98].mxu1  ;;  %3888 = vst.msk [vmem:[%s9521_s3 + $0x5e8] sm:$0xff] %vm305_vm0, %v3632_v15  ;;  %v3375_v8 = vadd.f32 1.0, %v5121_v44  ;;  %v2482_v50 = vmul.f32 0.5, %v7996_v27 }
 0x1c6   :  { %9562 = vst [vmem:[#allocation13_spill] sm:$0xff] %v8118_v0  ;;  %9563 = vst [vmem:[#allocation37_spill] sm:$0xff] %v8120_v6  ;;  %v5123_v12 = vpop.eup %5122  ;;  %v2610_v7 = vmul.f32 0.5, %v8018_v18  ;;  %v2742_v20 = vmul.f32 0.70710677, %v8106_v9  ;;  %v8129_v53 = vpop.f32.mrb[99].mxu0  ;;  %v3503_v43 = vmul.f32 %v3247_v31, %v2479_v60  ;;  %5136 = verf.f32 %v2867_v61 }
 0x1c7   :  { %v3250_v36 = vadd.f32 1.0, %v5123_v12  ;;  %v2870_v6 = vmul.f32 0.70710677, %v8110_v45  ;;  %v8132_v0 = vpop.f32.mrb[99].mxu1  ;;  %v5125_v55 = vpop.eup %5124  ;;  %v3631_v17 = vmul.f32 %v3375_v8, %v2607_v39  ;;  %v9564_v15 = vld [vmem:[#allocation14_spill] sm:$0xff]  ;;  %v9565_v27 = vld [vmem:[#allocation15_spill] sm:$0xff]  ;;  %v8148_v39 = vadd.f32 %v7742_v35, %v7592_v24 }
 0x1c8   :  { %5138 = verf.f32 %v2742_v20  ;;  %v8136_v44 = vadd.f32 %v7742_v35, %v9564_v15  ;;  %v8140_v18 = vadd.f32 %v7742_v35, %v9565_v27  ;;  %v5127_v21 = vpop.eup %5126  ;;  %3759 = vst.msk [vmem:[%s9521_s3 + $0x1e0] sm:$0xff] %vm305_vm0, %v3503_v43  ;;  %v3378_v31 = vadd.f32 1.0, %v5125_v55  ;;  %v8150_v61 = vpop.f32.mrb[100].mxu0 }
 0x1c9   :  { %v3506_v60 = vmul.f32 %v3250_v36, %v2482_v50  ;;  %5140 = verf.f32 %v2870_v6  ;;  %v8152_v12 = vpop.f32.mrb[100].mxu1  ;;  %v5129_v8 = vpop.eup %5128  ;;  %3887 = vst.msk [vmem:[%s9521_s3 + $0x5e0] sm:$0xff] %vm305_vm0, %v3631_v17  ;;  %v2481_v20 = vmul.f32 0.5, %v8030_v14  ;;  %v3249_v43 = vadd.f32 1.0, %v5127_v21 }
 0x1ca   :  { %v2609_v55 = vmul.f32 0.5, %v8034_v41  ;;  %v2741_v6 = vmul.f32 0.70710677, %v8136_v44  ;;  %v8161_v50 = vpop.f32.mrb[101].mxu0  ;;  %v3634_v24 = vmul.f32 %v3378_v31, %v2610_v7  ;;  %v3377_v36 = vadd.f32 1.0, %v5129_v8  ;;  %v8169_v27 = vpop.f32.mrb[101].mxu1 }
 0x1cb   :  { %9566 = vst [vmem:[#allocation14_spill] sm:$0xff] %v8161_v50  ;;  %3762 = vst.msk [vmem:[%s9521_s3 + $0x1f8] sm:$0xff] %vm305_vm0, %v3506_v60  ;;  %v2484_v15 = vmul.f32 0.5, %v8058_v62  ;;  %v2869_v17 = vmul.f32 0.70710677, %v8140_v18  ;;  %v3505_v14 = vmul.f32 %v3249_v43, %v2481_v20  ;;  %v8174_v21 = vadd.f32 %v7742_v35, %v7594_v3  ;;  %v9567_v60 = vld [vmem:[#allocation16_spill] sm:$0xff] }
 0x1cc   :  { %5142 = verf.f32 %v2741_v6  ;;  %v2744_v41 = vmul.f32 0.70710677, %v8148_v39  ;;  %v5131_v50 = vpop.eup %5130  ;;  %3890 = vst.msk [vmem:[%s9521_s3 + $0x5f8] sm:$0xff] %vm305_vm0, %v3634_v24  ;;  %v3633_v7 = vmul.f32 %v3377_v36, %v2609_v55  ;;  %v8182_v62 = vadd.f32 %v7742_v35, %v7604_v49  ;;  %v8188_v8 = vpop.f32.mrb[102].mxu0 }
 0x1cd   :  { %5144 = verf.f32 %v2869_v17  ;;  %v8186_v31 = vadd.f32 %v7742_v35, %v9567_v60  ;;  %9568 = vst [vmem:[#allocation15_spill] sm:$0xff] %v8188_v8  ;;  %v8190_v3 = vpop.f32.mrb[102].mxu1  ;;  %v5133_v20 = vpop.eup %5132  ;;  %3761 = vst.msk [vmem:[%s9521_s3 + $0x1f0] sm:$0xff] %vm305_vm0, %v3505_v14  ;;  %v3252_v43 = vadd.f32 1.0, %v5131_v50  ;;  %v2612_v55 = vmul.f32 0.5, %v8062_v54 }
 0x1ce   :  { %9569 = vst [vmem:[#allocation16_spill] sm:$0xff] %v8190_v3  ;;  %5146 = verf.f32 %v2744_v41  ;;  %v2872_v49 = vmul.f32 0.70710677, %v8174_v21  ;;  %v8198_v6 = vpop.f32.mrb[103].mxu0  ;;  %v8200_v24 = vpop.f32.mrb[103].mxu1  ;;  %3889 = vst.msk [vmem:[%s9521_s3 + $0x5f0] sm:$0xff] %vm305_vm0, %v3633_v7  ;;  %v8212_v8 = vadd.f32 %v7742_v35, %v7626_v4  ;;  %v8216_v7 = vadd.f32 %v7742_v35, %v7628_v10 }
 0x1cf   :  { %9570 = vst [vmem:[#allocation38_spill] sm:$0xff] %v8198_v6  ;;  %9571 = vst [vmem:[#allocation39_spill] sm:$0xff] %v8200_v24  ;;  %v5135_v36 = vpop.eup %5134  ;;  %v3380_v17 = vadd.f32 1.0, %v5133_v20  ;;  %v2483_v60 = vmul.f32 0.5, %v8072_v57  ;;  %v2611_v50 = vmul.f32 0.5, %v8096_v19  ;;  %v3508_v14 = vmul.f32 %v3252_v43, %v2484_v15 }
 0x1d0   :  { %v2743_v54 = vmul.f32 0.70710677, %v8182_v62  ;;  %v3251_v41 = vadd.f32 1.0, %v5135_v36  ;;  %5148 = verf.f32 %v2872_v49  ;;  %v2871_v6 = vmul.f32 0.70710677, %v8186_v31  ;;  %v5137_v3 = vpop.eup %5136  ;;  %v8218_v57 = vpop.f32.mrb[104].mxu0 }
 0x1d1   :  { %v3636_v24 = vmul.f32 %v3380_v17, %v2612_v55  ;;  %v8220_v19 = vpop.f32.mrb[104].mxu1  ;;  %3764 = vst.msk [vmem:[%s9521_s3 + $0x208] sm:$0xff] %vm305_vm0, %v3508_v14  ;;  %v3379_v43 = vadd.f32 1.0, %v5137_v3  ;;  %v9573_v55 = vld [vmem:[#allocation17_spill] sm:$0xff]  ;;  %v8230_v49 = vpop.f32.mrb[105].mxu0  ;;  %v2486_v17 = vmul.f32 0.5, %v8106_v9 }
 0x1d2   :  { %5150 = verf.f32 %v2743_v54  ;;  %9572 = vst [vmem:[#allocation40_spill] sm:$0xff] %v8220_v19  ;;  %v5139_v15 = vpop.eup %5138  ;;  %v3507_v20 = vmul.f32 %v3251_v41, %v2483_v60  ;;  %v8228_v4 = vadd.f32 %v7742_v35, %v9573_v55  ;;  %9574 = vst [vmem:[#allocation17_spill] sm:$0xff] %v8230_v49  ;;  %v8232_v10 = vpop.f32.mrb[105].mxu1  ;;  %v2614_v3 = vmul.f32 0.5, %v8110_v45 }
 0x1d3   :  { %5152 = verf.f32 %v2871_v6  ;;  %9575 = vst [vmem:[#allocation41_spill] sm:$0xff] %v8232_v10  ;;  %v5141_v36 = vpop.eup %5140  ;;  %3892 = vst.msk [vmem:[%s9521_s3 + $0x608] sm:$0xff] %vm305_vm0, %v3636_v24  ;;  %v3254_v54 = vadd.f32 1.0, %v5139_v15  ;;  %v2746_v6 = vmul.f32 0.70710677, %v8212_v8  ;;  %v3635_v60 = vmul.f32 %v3379_v43, %v2611_v50  ;;  %v9576_v24 = vld [vmem:[#allocation18_spill] sm:$0xff] }
 0x1d4   :  { %3763 = vst.msk [vmem:[%s9521_s3 + $0x200] sm:$0xff] %vm305_vm0, %v3507_v20  ;;  %v3382_v14 = vadd.f32 1.0, %v5141_v36  ;;  %v2485_v41 = vmul.f32 0.5, %v8136_v44  ;;  %v2874_v55 = vmul.f32 0.70710677, %v8216_v7  ;;  %v8250_v45 = vadd.f32 %v7742_v35, %v9576_v24  ;;  %v8252_v15 = vpop.f32.mrb[106].mxu0 }
 0x1d5   :  { %v3510_v10 = vmul.f32 %v3254_v54, %v2486_v17  ;;  %5154 = verf.f32 %v2746_v6  ;;  %v2745_v9 = vmul.f32 0.70710677, %v8228_v4  ;;  %v8254_v49 = vpop.f32.mrb[106].mxu1  ;;  %3891 = vst.msk [vmem:[%s9521_s3 + $0x600] sm:$0xff] %vm305_vm0, %v3635_v60  ;;  %v8262_v50 = vadd.f32 %v7742_v35, %v7660_v13  ;;  %v8268_v43 = vpop.f32.mrb[107].mxu0 }
 0x1d6   :  { %v5143_v19 = vpop.eup %5142  ;;  %v3638_v44 = vmul.f32 %v3382_v14, %v2614_v3  ;;  %5156 = verf.f32 %v2874_v55  ;;  %v8266_v20 = vadd.f32 %v7742_v35, %v7662_v46  ;;  %9577 = vst [vmem:[#allocation18_spill] sm:$0xff] %v8268_v43  ;;  %v8270_v36 = vpop.f32.mrb[107].mxu1  ;;  %v2613_v3 = vmul.f32 0.5, %v8140_v18 }
 0x1d7   :  { %9578 = vst [vmem:[#allocation42_spill] sm:$0xff] %v8270_v36  ;;  %v5145_v17 = vpop.eup %5144  ;;  %3766 = vst.msk [vmem:[%s9521_s3 + $0x218] sm:$0xff] %vm305_vm0, %v3510_v10  ;;  %v3253_v54 = vadd.f32 1.0, %v5143_v19  ;;  %5158 = verf.f32 %v2745_v9  ;;  %v2873_v13 = vmul.f32 0.70710677, %v8250_v45  ;;  %v2488_v60 = vmul.f32 0.5, %v8148_v39 }
 0x1d8   :  { %v5147_v6 = vpop.eup %5146  ;;  %3894 = vst.msk [vmem:[%s9521_s3 + $0x618] sm:$0xff] %vm305_vm0, %v3638_v44  ;;  %v3381_v46 = vadd.f32 1.0, %v5145_v17  ;;  %v2616_v14 = vmul.f32 0.5, %v8174_v21  ;;  %v2748_v55 = vmul.f32 0.70710677, %v8262_v50  ;;  %v8286_v9 = vpop.f32.mrb[108].mxu0  ;;  %v8292_v44 = vadd.f32 %v7742_v35, %v7672_v58 }
 0x1d9   :  { %v3509_v10 = vmul.f32 %v3253_v54, %v2485_v41  ;;  %v3256_v19 = vadd.f32 1.0, %v5147_v6  ;;  %5160 = verf.f32 %v2873_v13  ;;  %v2876_v18 = vmul.f32 0.70710677, %v8266_v20  ;;  %v8288_v24 = vpop.f32.mrb[108].mxu1  ;;  %v8298_v21 = vpop.f32.mrb[109].mxu0 }
 0x1da   :  { %v5149_v36 = vpop.eup %5148  ;;  %v3637_v43 = vmul.f32 %v3381_v46, %v2613_v3  ;;  %5162 = verf.f32 %v2748_v55  ;;  %v8296_v39 = vadd.f32 %v7742_v35, %v7674_v30  ;;  %v8300_v41 = vpop.f32.mrb[109].mxu1  ;;  %v8308_v58 = vadd.f32 %v7742_v35, %v7697_v47 }
 0x1db   :  { %3765 = vst.msk [vmem:[%s9521_s3 + $0x210] sm:$0xff] %vm305_vm0, %v3509_v10  ;;  %v3512_v54 = vmul.f32 %v3256_v19, %v2488_v60  ;;  %v3384_v3 = vadd.f32 1.0, %v5149_v36  ;;  %5164 = verf.f32 %v2876_v18  ;;  %v2487_v30 = vmul.f32 0.5, %v8182_v62 }
 0x1dc   :  { %v5151_v17 = vpop.eup %5150  ;;  %3893 = vst.msk [vmem:[%s9521_s3 + $0x610] sm:$0xff] %vm305_vm0, %v3637_v43  ;;  %v2615_v46 = vmul.f32 0.5, %v8186_v31  ;;  %v2747_v55 = vmul.f32 0.70710677, %v8292_v44  ;;  %v2490_v60 = vmul.f32 0.5, %v8212_v8  ;;  %v8323_v19 = vpop.f32.mrb[110].mxu0  ;;  %v8330_v18 = vadd.f32 %v7742_v35, %v7699_v26 }
 0x1dd   :  { %v5153_v13 = vpop.eup %5152  ;;  %v3255_v6 = vadd.f32 1.0, %v5151_v17  ;;  %3768 = vst.msk [vmem:[%s9521_s3 + $0x228] sm:$0xff] %vm305_vm0, %v3512_v54  ;;  %v3640_v47 = vmul.f32 %v3384_v3, %v2616_v14  ;;  %v2875_v10 = vmul.f32 0.70710677, %v8296_v39  ;;  %v8325_v43 = vpop.f32.mrb[110].mxu1  ;;  %v8342_v3 = vadd.f32 %v7742_v35, %v7706_v42 }
 0x1de   :  { %v3383_v36 = vadd.f32 1.0, %v5153_v13  ;;  %9579 = vst [vmem:[#allocation43_spill] sm:$0xff] %v8325_v43  ;;  %5166 = verf.f32 %v2747_v55  ;;  %v2750_v31 = vmul.f32 0.70710677, %v8308_v58  ;;  %v8332_v17 = vpop.f32.mrb[111].mxu0  ;;  %v8334_v14 = vpop.f32.mrb[111].mxu1 }
 0x1df   :  { %v3511_v62 = vmul.f32 %v3255_v6, %v2487_v30  ;;  %9580 = vst [vmem:[#allocation44_spill] sm:$0xff] %v8332_v17  ;;  %9581 = vst [vmem:[#allocation45_spill] sm:$0xff] %v8334_v14  ;;  %v5155_v54 = vpop.eup %5154  ;;  %5168 = verf.f32 %v2875_v10  ;;  %v9582_v13 = vld [vmem:[#allocation19_spill] sm:$0xff]  ;;  %v2618_v55 = vmul.f32 0.5, %v8216_v7  ;;  %v2617_v10 = vmul.f32 0.5, %v8250_v45 }
 0x1e0   :  { %3896 = vst.msk [vmem:[%s9521_s3 + $0x628] sm:$0xff] %vm305_vm0, %v3640_v47  ;;  %v3639_v8 = vmul.f32 %v3383_v36, %v2615_v46  ;;  %v8346_v26 = vadd.f32 %v7742_v35, %v9582_v13  ;;  %v5157_v30 = vpop.eup %5156  ;;  %v3258_v6 = vadd.f32 1.0, %v5155_v54  ;;  %5170 = verf.f32 %v2750_v31 }
 0x1e1   :  { %3767 = vst.msk [vmem:[%s9521_s3 + $0x220] sm:$0xff] %vm305_vm0, %v3511_v62  ;;  %v2878_v46 = vmul.f32 0.70710677, %v8330_v18  ;;  %v5159_v47 = vpop.eup %5158  ;;  %v3386_v42 = vadd.f32 1.0, %v5157_v30  ;;  %v2489_v36 = vmul.f32 0.5, %v8228_v4  ;;  %v8361_v62 = vpop.f32.mrb[112].mxu0  ;;  %v8370_v4 = vadd.f32 %v7742_v35, %v7735_v1 }
 0x1e2   :  { %3895 = vst.msk [vmem:[%s9521_s3 + $0x620] sm:$0xff] %vm305_vm0, %v3639_v8  ;;  %v2749_v13 = vmul.f32 0.70710677, %v8342_v3  ;;  %v3514_v54 = vmul.f32 %v3258_v6, %v2490_v60  ;;  %v3257_v7 = vadd.f32 1.0, %v5159_v47  ;;  %v2877_v31 = vmul.f32 0.70710677, %v8346_v26 }
 0x1e3   :  { %5172 = verf.f32 %v2878_v46  ;;  %v8364_v14 = vpop.f32.mrb[112].mxu1  ;;  %v8366_v17 = vpop.f32.mrb[113].mxu0  ;;  %v3642_v8 = vmul.f32 %v3386_v42, %v2618_v55  ;;  %v8374_v45 = vadd.f32 %v7742_v35, %v7738_v16  ;;  %v8384_v55 = vadd.f32 %v7742_v35, %v7740_v11 }
 0x1e4   :  { %v5161_v43 = vpop.eup %5160  ;;  %5174 = verf.f32 %v2749_v13  ;;  %v8376_v60 = vpop.f32.mrb[113].mxu1  ;;  %3770 = vst.msk [vmem:[%s9521_s3 + $0x238] sm:$0xff] %vm305_vm0, %v3514_v54  ;;  %v3513_v6 = vmul.f32 %v3257_v7, %v2489_v36  ;;  %v2492_v16 = vmul.f32 0.5, %v8262_v50  ;;  %v2620_v42 = vmul.f32 0.5, %v8266_v20 }
 0x1e5   :  { %9583 = vst [vmem:[#allocation19_spill] sm:$0xff] %v8376_v60  ;;  %v5163_v30 = vpop.eup %5162  ;;  %v3385_v46 = vadd.f32 1.0, %v5161_v43  ;;  %5176 = verf.f32 %v2877_v31  ;;  %3898 = vst.msk [vmem:[%s9521_s3 + $0x638] sm:$0xff] %vm305_vm0, %v3642_v8  ;;  %v2752_v13 = vmul.f32 0.70710677, %v8370_v4  ;;  %v8393_v36 = vpop.f32.mrb[114].mxu0 }
 0x1e6   :  { %v5165_v1 = vpop.eup %5164  ;;  %v3260_v47 = vadd.f32 1.0, %v5163_v30  ;;  %9584 = vst [vmem:[#allocation46_spill] sm:$0xff] %v8393_v36  ;;  %3769 = vst.msk [vmem:[%s9521_s3 + $0x230] sm:$0xff] %vm305_vm0, %v3513_v6  ;;  %v2491_v54 = vmul.f32 0.5, %v8292_v44  ;;  %v2880_v7 = vmul.f32 0.70710677, %v8374_v45 }
 0x1e7   :  { %v3641_v11 = vmul.f32 %v3385_v46, %v2617_v10  ;;  %v3388_v43 = vadd.f32 1.0, %v5165_v1  ;;  %v8401_v31 = vpop.f32.mrb[114].mxu1  ;;  %v8403_v50 = vpop.f32.mrb[115].mxu0  ;;  %5178 = verf.f32 %v2752_v13  ;;  %v2751_v8 = vmul.f32 0.70710677, %v8384_v55  ;;  %v9585_v30 = vld [vmem:[#allocation20_spill] sm:$0xff] }
 0x1e8   :  { %v3516_v20 = vmul.f32 %v3260_v47, %v2492_v16  ;;  %v8408_v36 = vadd.f32 %v7742_v35, %v9585_v30  ;;  %v8410_v60 = vpop.f32.mrb[115].mxu1  ;;  %v5167_v10 = vpop.eup %5166  ;;  %5180 = verf.f32 %v2880_v7  ;;  %v9587_v6 = vld [vmem:[#allocation21_spill] sm:$0xff]  ;;  %v8422_v1 = vadd.f32 %v7742_v35, %v7777_v5 }
 0x1e9   :  { %9586 = vst [vmem:[#allocation20_spill] sm:$0xff] %v8410_v60  ;;  %3897 = vst.msk [vmem:[%s9521_s3 + $0x630] sm:$0xff] %vm305_vm0, %v3641_v11  ;;  %v3644_v44 = vmul.f32 %v3388_v43, %v2620_v42  ;;  %v8418_v46 = vadd.f32 %v7742_v35, %v9587_v6  ;;  %v5169_v16 = vpop.eup %5168  ;;  %v3259_v47 = vadd.f32 1.0, %v5167_v10  ;;  %v2619_v13 = vmul.f32 0.5, %v8296_v39  ;;  %v8430_v11 = vpop.f32.mrb[116].mxu0 }
 0x1ea   :  { %3772 = vst.msk [vmem:[%s9521_s3 + $0x248] sm:$0xff] %vm305_vm0, %v3516_v20  ;;  %5182 = verf.f32 %v2751_v8  ;;  %v2879_v42 = vmul.f32 0.70710677, %v8408_v36  ;;  %9588 = vst [vmem:[#allocation21_spill] sm:$0xff] %v8430_v11  ;;  %v8432_v43 = vpop.f32.mrb[116].mxu1  ;;  %v5171_v7 = vpop.eup %5170  ;;  %v3387_v35 = vadd.f32 1.0, %v5169_v16 }
 0x1eb   :  { %9589 = vst [vmem:[#allocation47_spill] sm:$0xff] %v8432_v43  ;;  %3900 = vst.msk [vmem:[%s9521_s3 + $0x648] sm:$0xff] %vm305_vm0, %v3644_v44  ;;  %v2494_v5 = vmul.f32 0.5, %v8308_v58  ;;  %v2622_v20 = vmul.f32 0.5, %v8330_v18  ;;  %v2754_v39 = vmul.f32 0.70710677, %v8418_v46  ;;  %v3515_v30 = vmul.f32 %v3259_v47, %v2491_v54 }
 0x1ec   :  { %v8441_v8 = vpop.f32.mrb[117].mxu0  ;;  %v3262_v10 = vadd.f32 1.0, %v5171_v7  ;;  %5184 = verf.f32 %v2879_v42  ;;  %v2882_v6 = vmul.f32 0.70710677, %v8422_v1  ;;  %v8444_v43 = vpop.f32.mrb[117].mxu1  ;;  %v3643_v60 = vmul.f32 %v3387_v35, %v2619_v13  ;;  %v9591_v18 = vld [vmem:[#allocation22_spill] sm:$0xff] }
 0x1ed   :  { %9590 = vst [vmem:[#allocation48_spill] sm:$0xff] %v8444_v43  ;;  %v5173_v11 = vpop.eup %5172  ;;  %5186 = verf.f32 %v2754_v39  ;;  %v8446_v44 = vld [vmem:[#allocation4] ss:$0 sm:$0xff]  ;;  %3771 = vst.msk [vmem:[%s9521_s3 + $0x240] sm:$0xff] %vm305_vm0, %v3515_v30  ;;  %v8464_v35 = vpop.f32.mrb[118].mxu0 }
 0x1ee   :  { %v8450_v58 = vadd.f32 %v8446_v44, %v7779_v22  ;;  %v8454_v16 = vadd.f32 %v8446_v44, %v9591_v18  ;;  %v5175_v54 = vpop.eup %5174  ;;  %v3518_v47 = vmul.f32 %v3262_v10, %v2494_v5  ;;  %v3390_v42 = vadd.f32 1.0, %v5173_v11  ;;  %v9592_v13 = vld [vmem:[#allocation23_spill] sm:$0xff]  ;;  %9593 = vst [vmem:[#allocation22_spill] sm:$0xff] %v8464_v35  ;;  %v8466_v22 = vpop.f32.mrb[118].mxu1  ;;  %3899 = vst.msk [vmem:[%s9521_s3 + $0x640] sm:$0xff] %vm305_vm0, %v3643_v60 }
 0x1ef   :  { %5188 = verf.f32 %v2882_v6  ;;  %v8462_v7 = vadd.f32 %v8446_v44, %v9592_v13  ;;  %9594 = vst [vmem:[#allocation23_spill] sm:$0xff] %v8466_v22  ;;  %v5177_v39 = vpop.eup %5176  ;;  %v2493_v18 = vmul.f32 0.5, %v8342_v3  ;;  %v3261_v30 = vadd.f32 1.0, %v5175_v54  ;;  %v8475_v10 = vpop.f32.mrb[119].mxu0  ;;  %v9596_v54 = vld [vmem:[#allocation24_spill] sm:$0xff] }
 0x1f0   :  { %v2621_v11 = vmul.f32 0.5, %v8346_v26  ;;  %v2753_v5 = vmul.f32 0.70710677, %v8450_v58  ;;  %9595 = vst [vmem:[#allocation49_spill] sm:$0xff] %v8475_v10  ;;  %3774 = vst.msk [vmem:[%s9521_s3 + $0x258] sm:$0xff] %vm305_vm0, %v3518_v47  ;;  %v3646_v6 = vmul.f32 %v3390_v42, %v2622_v20  ;;  %v3389_v13 = vadd.f32 1.0, %v5177_v39 }
 0x1f1   :  { %v2496_v22 = vmul.f32 0.5, %v8370_v4  ;;  %v2881_v60 = vmul.f32 0.70710677, %v8454_v16  ;;  %v8483_v35 = vpop.f32.mrb[119].mxu1  ;;  %v3517_v3 = vmul.f32 %v3261_v30, %v2493_v18  ;;  %v2756_v26 = vmul.f32 0.70710677, %v8462_v7  ;;  %v5179_v43 = vpop.eup %5178 }
 0x1f2   :  { %5190 = verf.f32 %v2753_v5  ;;  %v8488_v10 = vadd.f32 %v8446_v44, %v9596_v54  ;;  %3902 = vst.msk [vmem:[%s9521_s3 + $0x658] sm:$0xff] %vm305_vm0, %v3646_v6  ;;  %v3645_v20 = vmul.f32 %v3389_v13, %v2621_v11  ;;  %v8496_v4 = vadd.f32 %v8446_v44, %v7817_v33  ;;  %v8502_v42 = vpop.f32.mrb[120].mxu0  ;;  %v8504_v39 = vpop.f32.mrb[120].mxu1 }
 0x1f3   :  { %5192 = verf.f32 %v2881_v60  ;;  %v8500_v47 = vadd.f32 %v8446_v44, %v7820_v34  ;;  %9597 = vst [vmem:[#allocation24_spill] sm:$0xff] %v8504_v39  ;;  %v5181_v18 = vpop.eup %5180  ;;  %3773 = vst.msk [vmem:[%s9521_s3 + $0x250] sm:$0xff] %vm305_vm0, %v3517_v3  ;;  %v3264_v30 = vadd.f32 1.0, %v5179_v43  ;;  %v2624_v11 = vmul.f32 0.5, %v8374_v45  ;;  %v8512_v5 = vpop.f32.mrb[121].mxu0 }
 0x1f4   :  { %5194 = verf.f32 %v2756_v26  ;;  %v2884_v33 = vmul.f32 0.70710677, %v8488_v10  ;;  %9598 = vst [vmem:[#allocation50_spill] sm:$0xff] %v8512_v5  ;;  %v8514_v34 = vpop.f32.mrb[121].mxu1  ;;  %v5183_v6 = vpop.eup %5182  ;;  %3901 = vst.msk [vmem:[%s9521_s3 + $0x650] sm:$0xff] %vm305_vm0, %v3645_v20  ;;  %v3392_v13 = vadd.f32 1.0, %v5181_v18  ;;  %v8526_v39 = vadd.f32 %v8446_v44, %v7838_v25 }
 0x1f5   :  { %9599 = vst [vmem:[#allocation51_spill] sm:$0xff] %v8514_v34  ;;  %v2495_v60 = vmul.f32 0.5, %v8384_v55  ;;  %v2623_v43 = vmul.f32 0.5, %v8408_v36  ;;  %v2755_v45 = vmul.f32 0.70710677, %v8496_v4  ;;  %v3520_v3 = vmul.f32 %v3264_v30, %v2496_v22  ;;  %v8532_v55 = vpop.f32.mrb[122].mxu0 }
 0x1f6   :  { %v3263_v26 = vadd.f32 1.0, %v5183_v6  ;;  %5196 = verf.f32 %v2884_v33  ;;  %v2883_v54 = vmul.f32 0.70710677, %v8500_v47  ;;  %v5185_v5 = vpop.eup %5184  ;;  %v3648_v34 = vmul.f32 %v3392_v13, %v2624_v11  ;;  %v8534_v36 = vpop.f32.mrb[122].mxu1 }
 0x1f7   :  { %5198 = verf.f32 %v2755_v45  ;;  %v8530_v20 = vadd.f32 %v8446_v44, %v7840_v63  ;;  %v5187_v22 = vpop.eup %5186  ;;  %3776 = vst.msk [vmem:[%s9521_s3 + $0x268] sm:$0xff] %vm305_vm0, %v3520_v3  ;;  %v3391_v30 = vadd.f32 1.0, %v5185_v5  ;;  %v8542_v25 = vadd.f32 %v8446_v44, %v7849_v38  ;;  %v8544_v11 = vpop.f32.mrb[123].mxu0 }
 0x1f8   :  { %v3519_v18 = vmul.f32 %v3263_v26, %v2495_v60  ;;  %5200 = verf.f32 %v2883_v54  ;;  %v8546_v63 = vpop.f32.mrb[123].mxu1  ;;  %3904 = vst.msk [vmem:[%s9521_s3 + $0x668] sm:$0xff] %vm305_vm0, %v3648_v34  ;;  %v2498_v6 = vmul.f32 0.5, %v8418_v46  ;;  %v3266_v13 = vadd.f32 1.0, %v5187_v22  ;;  %v8566_v34 = vpop.f32.mrb[124].mxu0 }
 0x1f9   :  { %9600 = vst [vmem:[#allocation52_spill] sm:$0xff] %v8546_v63  ;;  %v5189_v33 = vpop.eup %5188  ;;  %v2626_v5 = vmul.f32 0.5, %v8422_v1  ;;  %v2758_v60 = vmul.f32 0.70710677, %v8526_v39  ;;  %v3647_v38 = vmul.f32 %v3391_v30, %v2623_v43  ;;  %v2497_v3 = vmul.f32 0.5, %v8450_v58  ;;  %9601 = vst [vmem:[#allocation53_spill] sm:$0xff] %v8566_v34 }
 0x1fa   :  { %3775 = vst.msk [vmem:[%s9521_s3 + $0x260] sm:$0xff] %vm305_vm0, %v3519_v18  ;;  %v3394_v45 = vadd.f32 1.0, %v5189_v33  ;;  %v2886_v26 = vmul.f32 0.70710677, %v8530_v20  ;;  %v3522_v54 = vmul.f32 %v3266_v13, %v2498_v6  ;;  %v2757_v46 = vmul.f32 0.70710677, %v8542_v25 }
 0x1fb   :  { %5202 = verf.f32 %v2758_v60  ;;  %v8564_v1 = vadd.f32 %v8446_v44, %v7857_v48  ;;  %v8568_v22 = vpop.f32.mrb[124].mxu1  ;;  %3903 = vst.msk [vmem:[%s9521_s3 + $0x660] sm:$0xff] %vm305_vm0, %v3647_v38  ;;  %v9603_v43 = vld [vmem:[#allocation8_spill] sm:$0xff]  ;;  %v9604_v30 = vld [vmem:[#allocation25_spill] sm:$0xff]  ;;  %v8582_v33 = vpop.f32.mrb[125].mxu0  ;;  %v2625_v60 = vmul.f32 0.5, %v8454_v16 }
 0x1fc   :  { %9602 = vst [vmem:[#allocation54_spill] sm:$0xff] %v8568_v22  ;;  %v5191_v63 = vpop.eup %5190  ;;  %v3650_v58 = vmul.f32 %v3394_v45, %v2626_v5  ;;  %5204 = verf.f32 %v2886_v26  ;;  %v8576_v18 = vadd.f32 %v8446_v44, %v9603_v43  ;;  %v8580_v48 = vadd.f32 %v8446_v44, %v9604_v30  ;;  %9605 = vst [vmem:[#allocation8_spill] sm:$0xff] %v8582_v33  ;;  %v8584_v6 = vpop.f32.mrb[125].mxu1 }
 0x1fd   :  { %9606 = vst [vmem:[#allocation25_spill] sm:$0xff] %v8584_v6  ;;  %v5193_v13 = vpop.eup %5192  ;;  %3778 = vst.msk [vmem:[%s9521_s3 + $0x278] sm:$0xff] %vm305_vm0, %v3522_v54  ;;  %v3265_v5 = vadd.f32 1.0, %v5191_v63  ;;  %5206 = verf.f32 %v2757_v46  ;;  %v2885_v38 = vmul.f32 0.70710677, %v8564_v1  ;;  %v2500_v43 = vmul.f32 0.5, %v8462_v7 }
 0x1fe   :  { %v5195_v45 = vpop.eup %5194  ;;  %3906 = vst.msk [vmem:[%s9521_s3 + $0x678] sm:$0xff] %vm305_vm0, %v3650_v58  ;;  %v3393_v26 = vadd.f32 1.0, %v5193_v13  ;;  %v2628_v30 = vmul.f32 0.5, %v8488_v10  ;;  %v2760_v6 = vmul.f32 0.70710677, %v8576_v18  ;;  %v8600_v46 = vpop.f32.mrb[126].mxu0 }
 0x1ff   :  { %v3521_v54 = vmul.f32 %v3265_v5, %v2497_v3  ;;  %v3268_v63 = vadd.f32 1.0, %v5195_v45  ;;  %5208 = verf.f32 %v2885_v38  ;;  %v2888_v16 = vmul.f32 0.70710677, %v8580_v48  ;;  %v8602_v33 = vpop.f32.mrb[126].mxu1  ;;  %v9607_v58 = vld [vmem:[#allocation26_spill] sm:$0xff]  ;;  %v9608_v7 = vld [vmem:[#allocation27_spill] sm:$0xff] }
 0x200   :  { %v5197_v22 = vpop.eup %5196  ;;  %v3649_v34 = vmul.f32 %v3393_v26, %v2625_v60  ;;  %5210 = verf.f32 %v2760_v6  ;;  %v8606_v13 = vadd.f32 %v8446_v44, %v9607_v58  ;;  %v8610_v10 = vadd.f32 %v8446_v44, %v9608_v7  ;;  %v8612_v3 = vpop.f32.mrb[127].mxu0 }
 0x201   :  { %v8614_v5 = vpop.f32.mrb[127].mxu1  ;;  %v5199_v38 = vpop.eup %5198  ;;  %3777 = vst.msk [vmem:[%s9521_s3 + $0x270] sm:$0xff] %vm305_vm0, %v3521_v54  ;;  %v3524_v60 = vmul.f32 %v3268_v63, %v2500_v43  ;;  %v3396_v6 = vadd.f32 1.0, %v5197_v22  ;;  %5212 = verf.f32 %v2888_v16  ;;  %v8622_v45 = vadd.f32 %v8446_v44, %v7906_v51 }
 0x202   :  { %9609 = vst [vmem:[#allocation26_spill] sm:$0xff] %v8614_v5  ;;  %v5201_v26 = vpop.eup %5200  ;;  %3905 = vst.msk [vmem:[%s9521_s3 + $0x670] sm:$0xff] %vm305_vm0, %v3649_v34  ;;  %v2499_v58 = vmul.f32 0.5, %v8496_v4  ;;  %v3267_v7 = vadd.f32 1.0, %v5199_v38  ;;  %v2627_v5 = vmul.f32 0.5, %v8500_v47  ;;  %v2502_v43 = vmul.f32 0.5, %v8526_v39 }
 0x203   :  { %v2759_v54 = vmul.f32 0.70710677, %v8606_v13  ;;  %3780 = vst.msk [vmem:[%s9521_s3 + $0x288] sm:$0xff] %vm305_vm0, %v3524_v60  ;;  %v3652_v51 = vmul.f32 %v3396_v6, %v2628_v30  ;;  %v3395_v22 = vadd.f32 1.0, %v5201_v26  ;;  %v2887_v63 = vmul.f32 0.70710677, %v8610_v10 }
 0x204   :  { %v3523_v16 = vmul.f32 %v3267_v7, %v2499_v58  ;;  %v2762_v4 = vmul.f32 0.70710677, %v8622_v45  ;;  %v8640_v47 = vadd.f32 %v8446_v44, %v7908_v40  ;;  %v8648_v39 = vadd.f32 %v8446_v44, %v7918_v28  ;;  %v9610_v38 = vld [vmem:[#allocation28_spill] sm:$0xff] }
 0x205   :  { %5214 = verf.f32 %v2759_v54  ;;  %v5203_v34 = vpop.eup %5202  ;;  %3908 = vst.msk [vmem:[%s9521_s3 + $0x688] sm:$0xff] %vm305_vm0, %v3652_v51  ;;  %v3651_v30 = vmul.f32 %v3395_v22, %v2627_v5  ;;  %v8652_v60 = vadd.f32 %v8446_v44, %v9610_v38  ;;  %v2630_v26 = vmul.f32 0.5, %v8530_v20 }
 0x206   :  { %5216 = verf.f32 %v2887_v63  ;;  %v5205_v6 = vpop.eup %5204  ;;  %3779 = vst.msk [vmem:[%s9521_s3 + $0x280] sm:$0xff] %vm305_vm0, %v3523_v16  ;;  %v3270_v40 = vadd.f32 1.0, %v5203_v34  ;;  %v2890_v5 = vmul.f32 0.70710677, %v8640_v47  ;;  %v2501_v7 = vmul.f32 0.5, %v8542_v25 }
 0x207   :  { %5218 = verf.f32 %v2762_v4  ;;  %v5207_v58 = vpop.eup %5206  ;;  %3907 = vst.msk [vmem:[%s9521_s3 + $0x680] sm:$0xff] %vm305_vm0, %v3651_v30  ;;  %v3398_v28 = vadd.f32 1.0, %v5205_v6  ;;  %v2629_v54 = vmul.f32 0.5, %v8564_v1  ;;  %v2761_v51 = vmul.f32 0.70710677, %v8648_v39  ;;  %v9611_v30 = vld [vmem:[#allocation29_spill] sm:$0xff] }
 0x208   :  { %v3526_v22 = vmul.f32 %v3270_v40, %v2502_v43  ;;  %v3269_v63 = vadd.f32 1.0, %v5207_v58  ;;  %5220 = verf.f32 %v2890_v5  ;;  %v2889_v20 = vmul.f32 0.70710677, %v8652_v60  ;;  %v9612_v6 = vld [vmem:[#allocation9_spill] sm:$0xff] }
 0x209   :  { %v5209_v16 = vpop.eup %5208  ;;  %v3654_v4 = vmul.f32 %v3398_v28, %v2630_v26  ;;  %5222 = verf.f32 %v2761_v51  ;;  %v8670_v34 = vadd.f32 %v8446_v44, %v7940_v52  ;;  %v8674_v38 = vadd.f32 %v8446_v44, %v9611_v30  ;;  %v9614_v30 = vld [vmem:[#allocation31_spill] sm:$0xff] }
 0x20a   :  { %v5211_v25 = vpop.eup %5210  ;;  %3782 = vst.msk [vmem:[%s9521_s3 + $0x298] sm:$0xff] %vm305_vm0, %v3526_v22  ;;  %v3525_v1 = vmul.f32 %v3269_v63, %v2501_v7  ;;  %v3397_v43 = vadd.f32 1.0, %v5209_v16  ;;  %5224 = verf.f32 %v2889_v20  ;;  %v8682_v40 = vadd.f32 %v8446_v44, %v9612_v6  ;;  %v9613_v16 = vld [vmem:[#allocation30_spill] sm:$0xff] }
 0x20b   :  { %v5213_v26 = vpop.eup %5212  ;;  %3910 = vst.msk [vmem:[%s9521_s3 + $0x698] sm:$0xff] %vm305_vm0, %v3654_v4  ;;  %v2504_v52 = vmul.f32 0.5, %v8576_v18  ;;  %v3272_v5 = vadd.f32 1.0, %v5211_v25  ;;  %v2632_v58 = vmul.f32 0.5, %v8580_v48  ;;  %v2764_v28 = vmul.f32 0.70710677, %v8670_v34 }
 0x20c   :  { %3781 = vst.msk [vmem:[%s9521_s3 + $0x290] sm:$0xff] %vm305_vm0, %v3525_v1  ;;  %v3653_v7 = vmul.f32 %v3397_v43, %v2629_v54  ;;  %v3400_v51 = vadd.f32 1.0, %v5213_v26  ;;  %v2503_v22 = vmul.f32 0.5, %v8606_v13  ;;  %v2892_v63 = vmul.f32 0.70710677, %v8674_v38 }
 0x20d   :  { %v3528_v20 = vmul.f32 %v3272_v5, %v2504_v52  ;;  %5226 = verf.f32 %v2764_v28  ;;  %v2763_v18 = vmul.f32 0.70710677, %v8682_v40  ;;  %v8700_v48 = vadd.f32 %v8446_v44, %v9613_v16 }
 0x20e   :  { %3909 = vst.msk [vmem:[%s9521_s3 + $0x690] sm:$0xff] %vm305_vm0, %v3653_v7  ;;  %v3656_v54 = vmul.f32 %v3400_v51, %v2632_v58  ;;  %5228 = verf.f32 %v2892_v63  ;;  %v8708_v13 = vadd.f32 %v8446_v44, %v7974_v2  ;;  %v8712_v25 = vadd.f32 %v8446_v44, %v9614_v30 }
 0x20f   :  { %v5215_v4 = vpop.eup %5214  ;;  %3784 = vst.msk [vmem:[%s9521_s3 + $0x2a8] sm:$0xff] %vm305_vm0, %v3528_v20  ;;  %v2631_v6 = vmul.f32 0.5, %v8610_v10  ;;  %5230 = verf.f32 %v2763_v18  ;;  %v2891_v26 = vmul.f32 0.70710677, %v8700_v48  ;;  %v2506_v5 = vmul.f32 0.5, %v8622_v45  ;;  %v9615_v18 = vld [vmem:[#allocation10_spill] sm:$0xff] }
 0x210   :  { %v5217_v1 = vpop.eup %5216  ;;  %v3271_v43 = vadd.f32 1.0, %v5215_v4  ;;  %3912 = vst.msk [vmem:[%s9521_s3 + $0x6a8] sm:$0xff] %vm305_vm0, %v3656_v54  ;;  %v2634_v58 = vmul.f32 0.5, %v8640_v47  ;;  %v2766_v28 = vmul.f32 0.70710677, %v8708_v13  ;;  %v8730_v16 = vadd.f32 %v8446_v44, %v9615_v18  ;;  %v9616_v4 = vld [vmem:[#allocation32_spill] sm:$0xff] }
 0x211   :  { %v5219_v52 = vpop.eup %5218  ;;  %v3399_v2 = vadd.f32 1.0, %v5217_v1  ;;  %5232 = verf.f32 %v2891_v26  ;;  %v2894_v10 = vmul.f32 0.70710677, %v8712_v25  ;;  %v8734_v54 = vadd.f32 %v8446_v44, %v9616_v4 }
 0x212   :  { %v3527_v7 = vmul.f32 %v3271_v43, %v2503_v22  ;;  %v3274_v51 = vadd.f32 1.0, %v5219_v52  ;;  %v5221_v63 = vpop.eup %5220  ;;  %5234 = verf.f32 %v2766_v28  ;;  %v8742_v30 = vadd.f32 %v8446_v44, %v8011_v37 }
 0x213   :  { %v3655_v20 = vmul.f32 %v3399_v2, %v2631_v6  ;;  %v5223_v45 = vpop.eup %5222  ;;  %v3402_v22 = vadd.f32 1.0, %v5221_v63  ;;  %5236 = verf.f32 %v2894_v10  ;;  %v2505_v43 = vmul.f32 0.5, %v8648_v39  ;;  %v9617_v10 = vld [vmem:[#allocation11_spill] sm:$0xff]  ;;  %v9618_v63 = vld [vmem:[#allocation12_spill] sm:$0xff] }
 0x214   :  { %3783 = vst.msk [vmem:[%s9521_s3 + $0x2a0] sm:$0xff] %vm305_vm0, %v3527_v7  ;;  %v3530_v47 = vmul.f32 %v3274_v51, %v2506_v5  ;;  %v5225_v1 = vpop.eup %5224  ;;  %v3273_v6 = vadd.f32 1.0, %v5223_v45  ;;  %v2633_v26 = vmul.f32 0.5, %v8652_v60  ;;  %v2765_v52 = vmul.f32 0.70710677, %v8730_v16 }
 0x215   :  { %3911 = vst.msk [vmem:[%s9521_s3 + $0x6a0] sm:$0xff] %vm305_vm0, %v3655_v20  ;;  %v3658_v37 = vmul.f32 %v3402_v22, %v2634_v58  ;;  %v3401_v2 = vadd.f32 1.0, %v5225_v1  ;;  %v2508_v5 = vmul.f32 0.5, %v8670_v34  ;;  %v2893_v28 = vmul.f32 0.70710677, %v8734_v54 }
 0x216   :  { %3786 = vst.msk [vmem:[%s9521_s3 + $0x2b8] sm:$0xff] %vm305_vm0, %v3530_v47  ;;  %v3529_v7 = vmul.f32 %v3273_v6, %v2505_v43  ;;  %5238 = verf.f32 %v2765_v52  ;;  %v2768_v39 = vmul.f32 0.70710677, %v8742_v30  ;;  %v8760_v60 = vadd.f32 %v8446_v44, %v8013_v29 }
 0x217   :  { %v5227_v51 = vpop.eup %5226  ;;  %3914 = vst.msk [vmem:[%s9521_s3 + $0x6b8] sm:$0xff] %vm305_vm0, %v3658_v37  ;;  %v3657_v58 = vmul.f32 %v3401_v2, %v2633_v26  ;;  %5240 = verf.f32 %v2893_v28  ;;  %v8768_v34 = vadd.f32 %v8446_v44, %v9617_v10  ;;  %v8772_v20 = vadd.f32 %v8446_v44, %v9618_v63 }
 0x218   :  { %v5229_v18 = vpop.eup %5228  ;;  %3785 = vst.msk [vmem:[%s9521_s3 + $0x2b0] sm:$0xff] %vm305_vm0, %v3529_v7  ;;  %v3276_v29 = vadd.f32 1.0, %v5227_v51  ;;  %v2636_v4 = vmul.f32 0.5, %v8674_v38  ;;  %5242 = verf.f32 %v2768_v39  ;;  %v2896_v45 = vmul.f32 0.70710677, %v8760_v60 }
 0x219   :  { %v5231_v47 = vpop.eup %5230  ;;  %3913 = vst.msk [vmem:[%s9521_s3 + $0x6b0] sm:$0xff] %vm305_vm0, %v3657_v58  ;;  %v3404_v22 = vadd.f32 1.0, %v5229_v18  ;;  %v2507_v1 = vmul.f32 0.5, %v8682_v40  ;;  %v2635_v43 = vmul.f32 0.5, %v8700_v48  ;;  %v2767_v6 = vmul.f32 0.70710677, %v8768_v34 }
 0x21a   :  { %v3532_v26 = vmul.f32 %v3276_v29, %v2508_v5  ;;  %v3275_v52 = vadd.f32 1.0, %v5231_v47  ;;  %5244 = verf.f32 %v2896_v45  ;;  %v2895_v38 = vmul.f32 0.70710677, %v8772_v20 }
 0x21b   :  { %v5233_v37 = vpop.eup %5232  ;;  %v3660_v2 = vmul.f32 %v3404_v22, %v2636_v4  ;;  %5246 = verf.f32 %v2767_v6  ;;  %v8790_v28 = vadd.f32 %v8446_v44, %v8049_v59  ;;  %v8794_v7 = vadd.f32 %v8446_v44, %v8052_v56  ;;  %v9619_v22 = vld [vmem:[#allocation33_spill] sm:$0xff] }
 0x21c   :  { %v5235_v40 = vpop.eup %5234  ;;  %3788 = vst.msk [vmem:[%s9521_s3 + $0x2c8] sm:$0xff] %vm305_vm0, %v3532_v26  ;;  %v3531_v48 = vmul.f32 %v3275_v52, %v2507_v1  ;;  %v3403_v5 = vadd.f32 1.0, %v5233_v37  ;;  %5248 = verf.f32 %v2895_v38  ;;  %v8802_v39 = vadd.f32 %v8446_v44, %v8054_v32  ;;  %v9620_v1 = vld [vmem:[#allocation34_spill] sm:$0xff] }
 0x21d   :  { %v5237_v51 = vpop.eup %5236  ;;  %3916 = vst.msk [vmem:[%s9521_s3 + $0x6c8] sm:$0xff] %vm305_vm0, %v3660_v2  ;;  %v2510_v59 = vmul.f32 0.5, %v8708_v13  ;;  %v3278_v56 = vadd.f32 1.0, %v5235_v40  ;;  %v2638_v58 = vmul.f32 0.5, %v8712_v25  ;;  %v2770_v10 = vmul.f32 0.70710677, %v8790_v28 }
 0x21e   :  { %3787 = vst.msk [vmem:[%s9521_s3 + $0x2c0] sm:$0xff] %vm305_vm0, %v3531_v48  ;;  %v3659_v32 = vmul.f32 %v3403_v5, %v2635_v43  ;;  %v3406_v63 = vadd.f32 1.0, %v5237_v51  ;;  %v2509_v18 = vmul.f32 0.5, %v8730_v16  ;;  %v2898_v29 = vmul.f32 0.70710677, %v8794_v7 }
 0x21f   :  { %v3534_v4 = vmul.f32 %v3278_v56, %v2510_v59  ;;  %5250 = verf.f32 %v2770_v10  ;;  %v2769_v13 = vmul.f32 0.70710677, %v8802_v39  ;;  %v8820_v25 = vadd.f32 %v8446_v44, %v8064_v23 }
 0x220   :  { %v5239_v45 = vpop.eup %5238  ;;  %3915 = vst.msk [vmem:[%s9521_s3 + $0x6c0] sm:$0xff] %vm305_vm0, %v3659_v32  ;;  %v3662_v47 = vmul.f32 %v3406_v63, %v2638_v58  ;;  %5252 = verf.f32 %v2898_v29  ;;  %v8828_v16 = vadd.f32 %v8446_v44, %v9619_v22  ;;  %v8832_v43 = vadd.f32 %v8446_v44, %v9620_v1  ;;  %v9621_v58 = vld [vmem:[#allocation35_spill] sm:$0xff]  ;;  %v9622_v32 = vld [vmem:[#allocation36_spill] sm:$0xff]  ;;  %v9623_v29 = vld [vmem:[#allocation13_spill] sm:$0xff] }
 0x221   :  { %v5241_v6 = vpop.eup %5240  ;;  %3790 = vst.msk [vmem:[%s9521_s3 + $0x2d8] sm:$0xff] %vm305_vm0, %v3534_v4  ;;  %v3277_v23 = vadd.f32 1.0, %v5239_v45  ;;  %v2637_v26 = vmul.f32 0.5, %v8734_v54  ;;  %5254 = verf.f32 %v2769_v13  ;;  %v2897_v52 = vmul.f32 0.70710677, %v8820_v25 }
 0x222   :  { %v5243_v38 = vpop.eup %5242  ;;  %3918 = vst.msk [vmem:[%s9521_s3 + $0x6d8] sm:$0xff] %vm305_vm0, %v3662_v47  ;;  %v3405_v37 = vadd.f32 1.0, %v5241_v6  ;;  %v2512_v2 = vmul.f32 0.5, %v8742_v30  ;;  %v2640_v40 = vmul.f32 0.5, %v8760_v60  ;;  %v2772_v48 = vmul.f32 0.70710677, %v8828_v16 }
 0x223   :  { %v3533_v5 = vmul.f32 %v3277_v23, %v2509_v18  ;;  %v3280_v51 = vadd.f32 1.0, %v5243_v38  ;;  %5256 = verf.f32 %v2897_v52  ;;  %v2900_v54 = vmul.f32 0.70710677, %v8832_v43 }
 0x224   :  { %v5245_v59 = vpop.eup %5244  ;;  %v3661_v56 = vmul.f32 %v3405_v37, %v2637_v26  ;;  %5258 = verf.f32 %v2772_v48  ;;  %v8850_v10 = vadd.f32 %v8446_v44, %v9621_v58  ;;  %v8854_v63 = vadd.f32 %v8446_v44, %v9622_v32  ;;  %v9624_v37 = vld [vmem:[#allocation37_spill] sm:$0xff] }
 0x225   :  { %v5247_v30 = vpop.eup %5246  ;;  %3789 = vst.msk [vmem:[%s9521_s3 + $0x2d0] sm:$0xff] %vm305_vm0, %v3533_v5  ;;  %v3536_v60 = vmul.f32 %v3280_v51, %v2512_v2  ;;  %v3408_v18 = vadd.f32 1.0, %v5245_v59  ;;  %5260 = verf.f32 %v2900_v54  ;;  %v8862_v4 = vadd.f32 %v8446_v44, %v9623_v29 }
 0x226   :  { %v5249_v13 = vpop.eup %5248  ;;  %3917 = vst.msk [vmem:[%s9521_s3 + $0x6d0] sm:$0xff] %vm305_vm0, %v3661_v56  ;;  %v2511_v45 = vmul.f32 0.5, %v8768_v34  ;;  %v3279_v47 = vadd.f32 1.0, %v5247_v30  ;;  %v2639_v22 = vmul.f32 0.5, %v8772_v20  ;;  %v2771_v1 = vmul.f32 0.70710677, %v8850_v10 }
 0x227   :  { %3792 = vst.msk [vmem:[%s9521_s3 + $0x2e8] sm:$0xff] %vm305_vm0, %v3536_v60  ;;  %v3664_v6 = vmul.f32 %v3408_v18, %v2640_v40  ;;  %v3407_v23 = vadd.f32 1.0, %v5249_v13  ;;  %v2514_v26 = vmul.f32 0.5, %v8790_v28  ;;  %v2899_v52 = vmul.f32 0.70710677, %v8854_v63 }
 0x228   :  { %v3535_v38 = vmul.f32 %v3279_v47, %v2511_v45  ;;  %5262 = verf.f32 %v2771_v1  ;;  %v2774_v34 = vmul.f32 0.70710677, %v8862_v4  ;;  %v8880_v20 = vadd.f32 %v8446_v44, %v9624_v37 }
 0x229   :  { %v5251_v2 = vpop.eup %5250  ;;  %3920 = vst.msk [vmem:[%s9521_s3 + $0x6e8] sm:$0xff] %vm305_vm0, %v3664_v6  ;;  %v3663_v40 = vmul.f32 %v3407_v23, %v2639_v22  ;;  %5264 = verf.f32 %v2899_v52  ;;  %v8888_v28 = vadd.f32 %v8446_v44, %v8129_v53  ;;  %v8892_v48 = vadd.f32 %v8446_v44, %v8132_v0  ;;  %v9625_v22 = vld [vmem:[#allocation14_spill] sm:$0xff] }
 0x22a   :  { %v5253_v5 = vpop.eup %5252  ;;  %3791 = vst.msk [vmem:[%s9521_s3 + $0x2e0] sm:$0xff] %vm305_vm0, %v3535_v38  ;;  %v3282_v51 = vadd.f32 1.0, %v5251_v2  ;;  %v2642_v54 = vmul.f32 0.5, %v8794_v7  ;;  %5266 = verf.f32 %v2774_v34  ;;  %v2902_v59 = vmul.f32 0.70710677, %v8880_v20 }
 0x22b   :  { %v5255_v56 = vpop.eup %5254  ;;  %3919 = vst.msk [vmem:[%s9521_s3 + $0x6e0] sm:$0xff] %vm305_vm0, %v3663_v40  ;;  %v3410_v0 = vadd.f32 1.0, %v5253_v5  ;;  %v2513_v53 = vmul.f32 0.5, %v8802_v39  ;;  %v2641_v58 = vmul.f32 0.5, %v8820_v25  ;;  %v2773_v32 = vmul.f32 0.70710677, %v8888_v28 }
 0x22c   :  { %v3538_v30 = vmul.f32 %v3282_v51, %v2514_v26  ;;  %v3281_v60 = vadd.f32 1.0, %v5255_v56  ;;  %5268 = verf.f32 %v2902_v59  ;;  %v2901_v7 = vmul.f32 0.70710677, %v8892_v48  ;;  %v9626_v51 = vld [vmem:[#allocation15_spill] sm:$0xff] }
 0x22d   :  { %v5257_v18 = vpop.eup %5256  ;;  %v3666_v29 = vmul.f32 %v3410_v0, %v2642_v54  ;;  %5270 = verf.f32 %v2773_v32  ;;  %v8910_v13 = vadd.f32 %v8446_v44, %v8150_v61  ;;  %v8914_v45 = vadd.f32 %v8446_v44, %v8152_v12  ;;  %v9627_v54 = vld [vmem:[#allocation16_spill] sm:$0xff] }
 0x22e   :  { %v5259_v39 = vpop.eup %5258  ;;  %3794 = vst.msk [vmem:[%s9521_s3 + $0x2f8] sm:$0xff] %vm305_vm0, %v3538_v30  ;;  %v3537_v25 = vmul.f32 %v3281_v60, %v2513_v53  ;;  %v3409_v47 = vadd.f32 1.0, %v5257_v18  ;;  %5272 = verf.f32 %v2901_v7  ;;  %v8922_v1 = vadd.f32 %v8446_v44, %v9625_v22 }
 0x22f   :  { %v5261_v6 = vpop.eup %5260  ;;  %3922 = vst.msk [vmem:[%s9521_s3 + $0x6f8] sm:$0xff] %vm305_vm0, %v3666_v29  ;;  %v2516_v61 = vmul.f32 0.5, %v8828_v16  ;;  %v3284_v12 = vadd.f32 1.0, %v5259_v39  ;;  %v2644_v23 = vmul.f32 0.5, %v8832_v43  ;;  %v2776_v26 = vmul.f32 0.70710677, %v8910_v13 }
 0x230   :  { %3793 = vst.msk [vmem:[%s9521_s3 + $0x2f0] sm:$0xff] %vm305_vm0, %v3537_v25  ;;  %v3665_v52 = vmul.f32 %v3409_v47, %v2641_v58  ;;  %v3412_v38 = vadd.f32 1.0, %v5261_v6  ;;  %v2515_v34 = vmul.f32 0.5, %v8850_v10  ;;  %v2904_v37 = vmul.f32 0.70710677, %v8914_v45  ;;  %v9628_v47 = vld [vmem:[#allocation38_spill] sm:$0xff] }
 0x231   :  { %v3540_v2 = vmul.f32 %v3284_v12, %v2516_v61  ;;  %5274 = verf.f32 %v2776_v26  ;;  %v2775_v16 = vmul.f32 0.70710677, %v8922_v1  ;;  %v8940_v43 = vadd.f32 %v8446_v44, %v8169_v27  ;;  %v9629_v6 = vld [vmem:[#allocation39_spill] sm:$0xff] }
 0x232   :  { %v5263_v40 = vpop.eup %5262  ;;  %3921 = vst.msk [vmem:[%s9521_s3 + $0x6f0] sm:$0xff] %vm305_vm0, %v3665_v52  ;;  %v3668_v5 = vmul.f32 %v3412_v38, %v2644_v23  ;;  %5276 = verf.f32 %v2904_v37  ;;  %v8948_v10 = vadd.f32 %v8446_v44, %v9626_v51  ;;  %v8952_v59 = vadd.f32 %v8446_v44, %v9627_v54  ;;  %v9630_v51 = vld [vmem:[#allocation40_spill] sm:$0xff] }
 0x233   :  { %v5265_v56 = vpop.eup %5264  ;;  %3796 = vst.msk [vmem:[%s9521_s3 + $0x308] sm:$0xff] %vm305_vm0, %v3540_v2  ;;  %v3283_v27 = vadd.f32 1.0, %v5263_v40  ;;  %v2643_v0 = vmul.f32 0.5, %v8854_v63  ;;  %5278 = verf.f32 %v2775_v16  ;;  %v2903_v53 = vmul.f32 0.70710677, %v8940_v43 }
 0x234   :  { %v5267_v58 = vpop.eup %5266  ;;  %3924 = vst.msk [vmem:[%s9521_s3 + $0x708] sm:$0xff] %vm305_vm0, %v3668_v5  ;;  %v3411_v32 = vadd.f32 1.0, %v5265_v56  ;;  %v2518_v30 = vmul.f32 0.5, %v8862_v4  ;;  %v2646_v60 = vmul.f32 0.5, %v8880_v20  ;;  %v2778_v7 = vmul.f32 0.70710677, %v8948_v10 }
 0x235   :  { %v3539_v18 = vmul.f32 %v3283_v27, %v2515_v34  ;;  %v3286_v29 = vadd.f32 1.0, %v5267_v58  ;;  %5280 = verf.f32 %v2903_v53  ;;  %v2906_v63 = vmul.f32 0.70710677, %v8952_v59  ;;  %v9631_v27 = vld [vmem:[#allocation17_spill] sm:$0xff] }
 0x236   :  { %v5269_v39 = vpop.eup %5268  ;;  %v3667_v25 = vmul.f32 %v3411_v32, %v2643_v0  ;;  %5282 = verf.f32 %v2778_v7  ;;  %v8970_v22 = vadd.f32 %v8446_v44, %v9628_v47  ;;  %v8974_v61 = vadd.f32 %v8446_v44, %v9629_v6  ;;  %v9632_v0 = vld [vmem:[#allocation41_spill] sm:$0xff] }
 0x237   :  { %v5271_v4 = vpop.eup %5270  ;;  %3795 = vst.msk [vmem:[%s9521_s3 + $0x300] sm:$0xff] %vm305_vm0, %v3539_v18  ;;  %v3542_v20 = vmul.f32 %v3286_v29, %v2518_v30  ;;  %v3414_v12 = vadd.f32 1.0, %v5269_v39  ;;  %5284 = verf.f32 %v2906_v63  ;;  %v8982_v23 = vadd.f32 %v8446_v44, %v8218_v57 }
 0x238   :  { %v5273_v26 = vpop.eup %5272  ;;  %3923 = vst.msk [vmem:[%s9521_s3 + $0x700] sm:$0xff] %vm305_vm0, %v3667_v25  ;;  %v2517_v52 = vmul.f32 0.5, %v8888_v28  ;;  %v3285_v38 = vadd.f32 1.0, %v5271_v4  ;;  %v2645_v34 = vmul.f32 0.5, %v8892_v48  ;;  %v2777_v37 = vmul.f32 0.70710677, %v8970_v22 }
 0x239   :  { %3798 = vst.msk [vmem:[%s9521_s3 + $0x318] sm:$0xff] %vm305_vm0, %v3542_v20  ;;  %v3670_v57 = vmul.f32 %v3414_v12, %v2646_v60  ;;  %v3413_v2 = vadd.f32 1.0, %v5273_v26  ;;  %v2520_v16 = vmul.f32 0.5, %v8910_v13  ;;  %v2905_v40 = vmul.f32 0.70710677, %v8974_v61 }
 0x23a   :  { %v3541_v5 = vmul.f32 %v3285_v38, %v2517_v52  ;;  %5286 = verf.f32 %v2777_v37  ;;  %v2780_v28 = vmul.f32 0.70710677, %v8982_v23  ;;  %v9000_v48 = vadd.f32 %v8446_v44, %v9630_v51  ;;  %v9633_v52 = vld [vmem:[#allocation18_spill] sm:$0xff] }
 0x23b   :  { %v5275_v54 = vpop.eup %5274  ;;  %3926 = vst.msk [vmem:[%s9521_s3 + $0x718] sm:$0xff] %vm305_vm0, %v3670_v57  ;;  %v3669_v56 = vmul.f32 %v3413_v2, %v2645_v34  ;;  %5288 = verf.f32 %v2905_v40  ;;  %v9008_v13 = vadd.f32 %v8446_v44, %v9631_v27  ;;  %v9012_v53 = vadd.f32 %v8446_v44, %v9632_v0  ;;  %v9634_v51 = vld [vmem:[#allocation42_spill] sm:$0xff] }
 0x23c   :  { %v5277_v58 = vpop.eup %5276  ;;  %3797 = vst.msk [vmem:[%s9521_s3 + $0x310] sm:$0xff] %vm305_vm0, %v3541_v5  ;;  %v3288_v32 = vadd.f32 1.0, %v5275_v54  ;;  %v2648_v30 = vmul.f32 0.5, %v8914_v45  ;;  %5290 = verf.f32 %v2780_v28  ;;  %v2908_v60 = vmul.f32 0.70710677, %v9000_v48 }
 0x23d   :  { %v5279_v7 = vpop.eup %5278  ;;  %3925 = vst.msk [vmem:[%s9521_s3 + $0x710] sm:$0xff] %vm305_vm0, %v3669_v56  ;;  %v3416_v18 = vadd.f32 1.0, %v5277_v58  ;;  %v2519_v29 = vmul.f32 0.5, %v8922_v1  ;;  %v2647_v63 = vmul.f32 0.5, %v8940_v43  ;;  %v2779_v39 = vmul.f32 0.70710677, %v9008_v13 }
 0x23e   :  { %v3544_v25 = vmul.f32 %v3288_v32, %v2520_v16  ;;  %v3287_v47 = vadd.f32 1.0, %v5279_v7  ;;  %5292 = verf.f32 %v2908_v60  ;;  %v2907_v45 = vmul.f32 0.70710677, %v9012_v53 }
 0x23f   :  { %v5281_v6 = vpop.eup %5280  ;;  %v3672_v4 = vmul.f32 %v3416_v18, %v2648_v30  ;;  %5294 = verf.f32 %v2779_v39  ;;  %v9030_v20 = vadd.f32 %v8446_v44, %v8252_v15  ;;  %v9034_v12 = vadd.f32 %v8446_v44, %v8254_v49 }
 0x240   :  { %v5283_v1 = vpop.eup %5282  ;;  %3800 = vst.msk [vmem:[%s9521_s3 + $0x328] sm:$0xff] %vm305_vm0, %v3544_v25  ;;  %v3543_v43 = vmul.f32 %v3287_v47, %v2519_v29  ;;  %v3415_v26 = vadd.f32 1.0, %v5281_v6  ;;  %5296 = verf.f32 %v2907_v45  ;;  %v9042_v38 = vadd.f32 %v8446_v44, %v9633_v52 }
 0x241   :  { %v5285_v34 = vpop.eup %5284  ;;  %3928 = vst.msk [vmem:[%s9521_s3 + $0x728] sm:$0xff] %vm305_vm0, %v3672_v4  ;;  %v2522_v49 = vmul.f32 0.5, %v8948_v10  ;;  %v3290_v15 = vadd.f32 1.0, %v5283_v1  ;;  %v2650_v37 = vmul.f32 0.5, %v8952_v59  ;;  %v2782_v57 = vmul.f32 0.70710677, %v9030_v20 }
 0x242   :  { %3799 = vst.msk [vmem:[%s9521_s3 + $0x320] sm:$0xff] %vm305_vm0, %v3543_v43  ;;  %v3671_v2 = vmul.f32 %v3415_v26, %v2647_v63  ;;  %v3418_v16 = vadd.f32 1.0, %v5285_v34  ;;  %v2521_v40 = vmul.f32 0.5, %v8970_v22  ;;  %v2910_v5 = vmul.f32 0.70710677, %v9034_v12 }
 0x243   :  { %v3546_v28 = vmul.f32 %v3290_v15, %v2522_v49  ;;  %5298 = verf.f32 %v2782_v57  ;;  %v2781_v10 = vmul.f32 0.70710677, %v9042_v38  ;;  %v9060_v59 = vadd.f32 %v8446_v44, %v9634_v51  ;;  %v9118_v15 = vld [vmem:[#allocation4] ss:$0 sm:$0xff] }
 0x244   :  { %v5287_v54 = vpop.eup %5286  ;;  %3927 = vst.msk [vmem:[%s9521_s3 + $0x720] sm:$0xff] %vm305_vm0, %v3671_v2  ;;  %v3674_v56 = vmul.f32 %v3418_v16, %v2650_v37  ;;  %5300 = verf.f32 %v2910_v5  ;;  %v9068_v22 = vadd.f32 %v8446_v44, %v8286_v9  ;;  %v9072_v27 = vadd.f32 %v8446_v44, %v8288_v24 }
 0x245   :  { %v5289_v0 = vpop.eup %5288  ;;  %3802 = vst.msk [vmem:[%s9521_s3 + $0x338] sm:$0xff] %vm305_vm0, %v3546_v28  ;;  %v3289_v58 = vadd.f32 1.0, %v5287_v54  ;;  %v2649_v32 = vmul.f32 0.5, %v8974_v61  ;;  %5302 = verf.f32 %v2781_v10  ;;  %v2909_v30 = vmul.f32 0.70710677, %v9060_v59 }
 0x246   :  { %v5291_v60 = vpop.eup %5290  ;;  %3930 = vst.msk [vmem:[%s9521_s3 + $0x738] sm:$0xff] %vm305_vm0, %v3674_v56  ;;  %v3417_v9 = vadd.f32 1.0, %v5289_v0  ;;  %v2524_v24 = vmul.f32 0.5, %v8982_v23  ;;  %v2652_v7 = vmul.f32 0.5, %v9000_v48  ;;  %v2784_v18 = vmul.f32 0.70710677, %v9068_v22 }
 0x247   :  { %v3545_v29 = vmul.f32 %v3289_v58, %v2521_v40  ;;  %v3292_v63 = vadd.f32 1.0, %v5291_v60  ;;  %5304 = verf.f32 %v2909_v30  ;;  %v2912_v61 = vmul.f32 0.70710677, %v9072_v27  ;;  %v9637_v40 = vld [vmem:[#allocation45_spill] sm:$0xff] }
 0x248   :  { %v5293_v39 = vpop.eup %5292  ;;  %v3673_v25 = vmul.f32 %v3417_v9, %v2649_v32  ;;  %5306 = verf.f32 %v2784_v18  ;;  %v9090_v47 = vadd.f32 %v8446_v44, %v8298_v21  ;;  %v9094_v45 = vadd.f32 %v8446_v44, %v8300_v41 }
 0x249   :  { %v5295_v23 = vpop.eup %5294  ;;  %3801 = vst.msk [vmem:[%s9521_s3 + $0x330] sm:$0xff] %vm305_vm0, %v3545_v29  ;;  %v3548_v48 = vmul.f32 %v3292_v63, %v2524_v24  ;;  %v3420_v6 = vadd.f32 1.0, %v5293_v39  ;;  %5308 = verf.f32 %v2912_v61  ;;  %v9102_v4 = vadd.f32 %v8446_v44, %v8323_v19 }
 0x24a   :  { %v5297_v1 = vpop.eup %5296  ;;  %3929 = vst.msk [vmem:[%s9521_s3 + $0x730] sm:$0xff] %vm305_vm0, %v3673_v25  ;;  %v2523_v21 = vmul.f32 0.5, %v9008_v13  ;;  %v3291_v41 = vadd.f32 1.0, %v5295_v23  ;;  %v2651_v43 = vmul.f32 0.5, %v9012_v53  ;;  %v2783_v26 = vmul.f32 0.70710677, %v9090_v47 }
 0x24b   :  { %3804 = vst.msk [vmem:[%s9521_s3 + $0x348] sm:$0xff] %vm305_vm0, %v3548_v48  ;;  %v3676_v19 = vmul.f32 %v3420_v6, %v2652_v7  ;;  %v3419_v44 = vadd.f32 1.0, %v5297_v1  ;;  %v2526_v52 = vmul.f32 0.5, %v9030_v20  ;;  %v2911_v34 = vmul.f32 0.70710677, %v9094_v45  ;;  %v9635_v53 = vld [vmem:[#allocation43_spill] sm:$0xff] }
 0x24c   :  { %v3547_v49 = vmul.f32 %v3291_v41, %v2523_v21  ;;  %5310 = verf.f32 %v2783_v26  ;;  %v2786_v13 = vmul.f32 0.70710677, %v9102_v4  ;;  %v9122_v37 = vadd.f32 %v9118_v15, %v9635_v53  ;;  %v9636_v20 = vld [vmem:[#allocation44_spill] sm:$0xff]  ;;  %v9638_v41 = vld [vmem:[#allocation19_spill] sm:$0xff] }
 0x24d   :  { %v5299_v57 = vpop.eup %5298  ;;  %3932 = vst.msk [vmem:[%s9521_s3 + $0x748] sm:$0xff] %vm305_vm0, %v3676_v19  ;;  %v3675_v2 = vmul.f32 %v3419_v44, %v2651_v43  ;;  %5312 = verf.f32 %v2911_v34  ;;  %v9130_v16 = vadd.f32 %v9118_v15, %v9636_v20  ;;  %v9134_v5 = vadd.f32 %v9118_v15, %v9637_v40  ;;  %v9639_v19 = vld [vmem:[#allocation46_spill] sm:$0xff] }
 0x24e   :  { %v5301_v28 = vpop.eup %5300  ;;  %3803 = vst.msk [vmem:[%s9521_s3 + $0x340] sm:$0xff] %vm305_vm0, %v3547_v49  ;;  %v3294_v10 = vadd.f32 1.0, %v5299_v57  ;;  %v2654_v51 = vmul.f32 0.5, %v9034_v12  ;;  %5314 = verf.f32 %v2786_v13  ;;  %v2914_v54 = vmul.f32 0.70710677, %v9122_v37 }
 0x24f   :  { %v5303_v56 = vpop.eup %5302  ;;  %3931 = vst.msk [vmem:[%s9521_s3 + $0x740] sm:$0xff] %vm305_vm0, %v3675_v2  ;;  %v3422_v0 = vadd.f32 1.0, %v5301_v28  ;;  %v2525_v58 = vmul.f32 0.5, %v9042_v38  ;;  %v2653_v32 = vmul.f32 0.5, %v9060_v59  ;;  %v2785_v30 = vmul.f32 0.70710677, %v9130_v16 }
 0x250   :  { %v3550_v60 = vmul.f32 %v3294_v10, %v2526_v52  ;;  %v3293_v9 = vadd.f32 1.0, %v5303_v56  ;;  %5316 = verf.f32 %v2914_v54  ;;  %v2913_v12 = vmul.f32 0.70710677, %v9134_v5  ;;  %v9640_v56 = vld [vmem:[#allocation20_spill] sm:$0xff] }
 0x251   :  { %v5305_v24 = vpop.eup %5304  ;;  %v3678_v7 = vmul.f32 %v3422_v0, %v2654_v51  ;;  %5318 = verf.f32 %v2785_v30  ;;  %v9152_v18 = vadd.f32 %v9118_v15, %v8361_v62  ;;  %v9156_v29 = vadd.f32 %v9118_v15, %v8364_v14 }
 0x252   :  { %v5307_v38 = vpop.eup %5306  ;;  %3806 = vst.msk [vmem:[%s9521_s3 + $0x358] sm:$0xff] %vm305_vm0, %v3550_v60  ;;  %v3549_v59 = vmul.f32 %v3293_v9, %v2525_v58  ;;  %v3421_v63 = vadd.f32 1.0, %v5305_v24  ;;  %5320 = verf.f32 %v2913_v12  ;;  %v9164_v61 = vadd.f32 %v9118_v15, %v8366_v17 }
 0x253   :  { %v5309_v39 = vpop.eup %5308  ;;  %3934 = vst.msk [vmem:[%s9521_s3 + $0x758] sm:$0xff] %vm305_vm0, %v3678_v7  ;;  %v2528_v14 = vmul.f32 0.5, %v9068_v22  ;;  %v3296_v62 = vadd.f32 1.0, %v5307_v38  ;;  %v2656_v25 = vmul.f32 0.5, %v9072_v27  ;;  %v2788_v23 = vmul.f32 0.70710677, %v9152_v18 }
 0x254   :  { %3805 = vst.msk [vmem:[%s9521_s3 + $0x350] sm:$0xff] %vm305_vm0, %v3549_v59  ;;  %v3677_v17 = vmul.f32 %v3421_v63, %v2653_v32  ;;  %v3424_v48 = vadd.f32 1.0, %v5309_v39  ;;  %v2527_v6 = vmul.f32 0.5, %v9090_v47  ;;  %v2916_v1 = vmul.f32 0.70710677, %v9156_v29  ;;  %v9641_v32 = vld [vmem:[#allocation21_spill] sm:$0xff] }
 0x255   :  { %v3552_v21 = vmul.f32 %v3296_v62, %v2528_v14  ;;  %5322 = verf.f32 %v2788_v23  ;;  %v2787_v22 = vmul.f32 0.70710677, %v9164_v61  ;;  %v9182_v27 = vadd.f32 %v9118_v15, %v9638_v41  ;;  %v9642_v14 = vld [vmem:[#allocation47_spill] sm:$0xff]  ;;  %v9643_v23 = vld [vmem:[#allocation48_spill] sm:$0xff] }
 0x256   :  { %v5311_v43 = vpop.eup %5310  ;;  %3933 = vst.msk [vmem:[%s9521_s3 + $0x750] sm:$0xff] %vm305_vm0, %v3677_v17  ;;  %v3680_v26 = vmul.f32 %v3424_v48, %v2656_v25  ;;  %5324 = verf.f32 %v2916_v1  ;;  %v9190_v47 = vadd.f32 %v9118_v15, %v9639_v19  ;;  %v9194_v44 = vadd.f32 %v9118_v15, %v8401_v31 }
 0x257   :  { %v5313_v52 = vpop.eup %5312  ;;  %3808 = vst.msk [vmem:[%s9521_s3 + $0x368] sm:$0xff] %vm305_vm0, %v3552_v21  ;;  %v3295_v34 = vadd.f32 1.0, %v5311_v43  ;;  %v2655_v49 = vmul.f32 0.5, %v9094_v45  ;;  %5326 = verf.f32 %v2787_v22  ;;  %v2915_v13 = vmul.f32 0.70710677, %v9182_v27 }
 0x258   :  { %v5315_v53 = vpop.eup %5314  ;;  %3936 = vst.msk [vmem:[%s9521_s3 + $0x768] sm:$0xff] %vm305_vm0, %v3680_v26  ;;  %v3423_v31 = vadd.f32 1.0, %v5313_v52  ;;  %v2530_v57 = vmul.f32 0.5, %v9102_v4  ;;  %v2658_v2 = vmul.f32 0.5, %v9122_v37  ;;  %v2790_v20 = vmul.f32 0.70710677, %v9190_v47 }
 0x259   :  { %v3551_v40 = vmul.f32 %v3295_v34, %v2527_v6  ;;  %v3298_v28 = vadd.f32 1.0, %v5315_v53  ;;  %5328 = verf.f32 %v2915_v13  ;;  %v2918_v45 = vmul.f32 0.70710677, %v9194_v44  ;;  %v9644_v13 = vld [vmem:[#allocation22_spill] sm:$0xff] }
 0x25a   :  { %v5317_v10 = vpop.eup %5316  ;;  %v3679_v51 = vmul.f32 %v3423_v31, %v2655_v49  ;;  %5330 = verf.f32 %v2790_v20  ;;  %v9212_v54 = vadd.f32 %v9118_v15, %v8403_v50  ;;  %v9216_v0 = vadd.f32 %v9118_v15, %v9640_v56  ;;  %v9645_v31 = vld [vmem:[#allocation23_spill] sm:$0xff]  ;;  %v9646_v20 = vld [vmem:[#allocation49_spill] sm:$0xff] }
 0x25b   :  { %v5319_v4 = vpop.eup %5318  ;;  %3807 = vst.msk [vmem:[%s9521_s3 + $0x360] sm:$0xff] %vm305_vm0, %v3551_v40  ;;  %v3554_v37 = vmul.f32 %v3298_v28, %v2530_v57  ;;  %v3426_v58 = vadd.f32 1.0, %v5317_v10  ;;  %5332 = verf.f32 %v2918_v45  ;;  %v9224_v30 = vadd.f32 %v9118_v15, %v9641_v32 }
 0x25c   :  { %v5321_v60 = vpop.eup %5320  ;;  %3935 = vst.msk [vmem:[%s9521_s3 + $0x760] sm:$0xff] %vm305_vm0, %v3679_v51  ;;  %v2529_v50 = vmul.f32 0.5, %v9130_v16  ;;  %v3297_v9 = vadd.f32 1.0, %v5319_v4  ;;  %v2657_v12 = vmul.f32 0.5, %v9134_v5  ;;  %v2789_v24 = vmul.f32 0.70710677, %v9212_v54 }
 0x25d   :  { %3810 = vst.msk [vmem:[%s9521_s3 + $0x378] sm:$0xff] %vm305_vm0, %v3554_v37  ;;  %v3682_v7 = vmul.f32 %v3426_v58, %v2658_v2  ;;  %v3425_v38 = vadd.f32 1.0, %v5321_v60  ;;  %v2532_v59 = vmul.f32 0.5, %v9152_v18  ;;  %v2917_v63 = vmul.f32 0.70710677, %v9216_v0 }
 0x25e   :  { %v3553_v39 = vmul.f32 %v3297_v9, %v2529_v50  ;;  %5334 = verf.f32 %v2789_v24  ;;  %v2792_v16 = vmul.f32 0.70710677, %v9224_v30  ;;  %v9242_v5 = vadd.f32 %v9118_v15, %v9642_v14 }
 0x25f   :  { %v5323_v62 = vpop.eup %5322  ;;  %3938 = vst.msk [vmem:[%s9521_s3 + $0x778] sm:$0xff] %vm305_vm0, %v3682_v7  ;;  %v3681_v25 = vmul.f32 %v3425_v38, %v2657_v12  ;;  %5336 = verf.f32 %v2917_v63  ;;  %v9250_v18 = vadd.f32 %v9118_v15, %v8441_v8  ;;  %v9254_v17 = vadd.f32 %v9118_v15, %v9643_v23  ;;  %v9647_v12 = vld [vmem:[#allocation24_spill] sm:$0xff] }
 0x260   :  { %v5325_v48 = vpop.eup %5324  ;;  %3809 = vst.msk [vmem:[%s9521_s3 + $0x370] sm:$0xff] %vm305_vm0, %v3553_v39  ;;  %v3300_v6 = vadd.f32 1.0, %v5323_v62  ;;  %v2660_v1 = vmul.f32 0.5, %v9156_v29  ;;  %5338 = verf.f32 %v2792_v16  ;;  %v2920_v21 = vmul.f32 0.70710677, %v9242_v5 }
 0x261   :  { %v5327_v22 = vpop.eup %5326  ;;  %3937 = vst.msk [vmem:[%s9521_s3 + $0x770] sm:$0xff] %vm305_vm0, %v3681_v25  ;;  %v3428_v8 = vadd.f32 1.0, %v5325_v48  ;;  %v2531_v41 = vmul.f32 0.5, %v9164_v61  ;;  %v2659_v43 = vmul.f32 0.5, %v9182_v27  ;;  %v2791_v26 = vmul.f32 0.70710677, %v9250_v18 }
 0x262   :  { %v3556_v19 = vmul.f32 %v3300_v6, %v2532_v59  ;;  %v3299_v52 = vadd.f32 1.0, %v5327_v22  ;;  %5340 = verf.f32 %v2920_v21  ;;  %v2919_v29 = vmul.f32 0.70710677, %v9254_v17  ;;  %v9648_v6 = vld [vmem:[#allocation50_spill] sm:$0xff]  ;;  %v9649_v21 = vld [vmem:[#allocation51_spill] sm:$0xff] }
 0x263   :  { %v5329_v34 = vpop.eup %5328  ;;  %v3684_v49 = vmul.f32 %v3428_v8, %v2660_v1  ;;  %5342 = verf.f32 %v2791_v26  ;;  %v9272_v53 = vadd.f32 %v9118_v15, %v9644_v13  ;;  %v9276_v57 = vadd.f32 %v9118_v15, %v9645_v31 }
 0x264   :  { %v5331_v61 = vpop.eup %5330  ;;  %3812 = vst.msk [vmem:[%s9521_s3 + $0x388] sm:$0xff] %vm305_vm0, %v3556_v19  ;;  %v3555_v27 = vmul.f32 %v3299_v52, %v2531_v41  ;;  %v3427_v2 = vadd.f32 1.0, %v5329_v34  ;;  %5344 = verf.f32 %v2919_v29  ;;  %v9284_v40 = vadd.f32 %v9118_v15, %v9646_v20 }
 0x265   :  { %v5333_v28 = vpop.eup %5332  ;;  %3940 = vst.msk [vmem:[%s9521_s3 + $0x788] sm:$0xff] %vm305_vm0, %v3684_v49  ;;  %v2534_v45 = vmul.f32 0.5, %v9190_v47  ;;  %v3302_v10 = vadd.f32 1.0, %v5331_v61  ;;  %v2662_v51 = vmul.f32 0.5, %v9194_v44  ;;  %v2794_v56 = vmul.f32 0.70710677, %v9272_v53 }
 0x266   :  { %3811 = vst.msk [vmem:[%s9521_s3 + $0x380] sm:$0xff] %vm305_vm0, %v3555_v27  ;;  %v3683_v4 = vmul.f32 %v3427_v2, %v2659_v43  ;;  %v3430_v37 = vadd.f32 1.0, %v5333_v28  ;;  %v2533_v58 = vmul.f32 0.5, %v9212_v54  ;;  %v2922_v32 = vmul.f32 0.70710677, %v9276_v57  ;;  %v9650_v2 = vld [vmem:[#allocation52_spill] sm:$0xff] }
 0x267   :  { %v3558_v60 = vmul.f32 %v3302_v10, %v2534_v45  ;;  %5346 = verf.f32 %v2794_v56  ;;  %v2793_v47 = vmul.f32 0.70710677, %v9284_v40  ;;  %v9302_v44 = vadd.f32 %v9118_v15, %v8483_v35 }
 0x268   :  { %v5335_v50 = vpop.eup %5334  ;;  %3939 = vst.msk [vmem:[%s9521_s3 + $0x780] sm:$0xff] %vm305_vm0, %v3683_v4  ;;  %v3686_v9 = vmul.f32 %v3430_v37, %v2662_v51  ;;  %5348 = verf.f32 %v2922_v32  ;;  %v9310_v54 = vadd.f32 %v9118_v15, %v8502_v42  ;;  %v9314_v24 = vadd.f32 %v9118_v15, %v9647_v12  ;;  %v9652_v12 = vld [vmem:[#allocation54_spill] sm:$0xff] }
 0x269   :  { %v5337_v7 = vpop.eup %5336  ;;  %3814 = vst.msk [vmem:[%s9521_s3 + $0x398] sm:$0xff] %vm305_vm0, %v3558_v60  ;;  %v3301_v35 = vadd.f32 1.0, %v5335_v50  ;;  %v2661_v38 = vmul.f32 0.5, %v9216_v0  ;;  %5350 = verf.f32 %v2793_v47  ;;  %v2921_v59 = vmul.f32 0.70710677, %v9302_v44  ;;  %v9651_v50 = vld [vmem:[#allocation53_spill] sm:$0xff] }
 0x26a   :  { %v5339_v63 = vpop.eup %5338  ;;  %3942 = vst.msk [vmem:[%s9521_s3 + $0x798] sm:$0xff] %vm305_vm0, %v3686_v9  ;;  %v3429_v42 = vadd.f32 1.0, %v5337_v7  ;;  %v2536_v39 = vmul.f32 0.5, %v9224_v30  ;;  %v2664_v16 = vmul.f32 0.5, %v9242_v5  ;;  %v2796_v14 = vmul.f32 0.70710677, %v9310_v54 }
 0x26b   :  { %v3557_v62 = vmul.f32 %v3301_v35, %v2533_v58  ;;  %v3304_v25 = vadd.f32 1.0, %v5339_v63  ;;  %5352 = verf.f32 %v2921_v59  ;;  %v2924_v0 = vmul.f32 0.70710677, %v9314_v24 }
 0x26c   :  { %v5341_v23 = vpop.eup %5340  ;;  %v3685_v48 = vmul.f32 %v3429_v42, %v2661_v38  ;;  %5354 = verf.f32 %v2796_v14  ;;  %v9332_v1 = vadd.f32 %v9118_v15, %v9648_v6  ;;  %v9336_v22 = vadd.f32 %v9118_v15, %v9649_v21  ;;  %v9653_v38 = vld [vmem:[#allocation8_spill] sm:$0xff]  ;;  %v9654_v6 = vld [vmem:[#allocation25_spill] sm:$0xff] }
 0x26d   :  { %v5343_v30 = vpop.eup %5342  ;;  %3813 = vst.msk [vmem:[%s9521_s3 + $0x390] sm:$0xff] %vm305_vm0, %v3557_v62  ;;  %v3560_v5 = vmul.f32 %v3304_v25, %v2536_v39  ;;  %v3432_v8 = vadd.f32 1.0, %v5341_v23  ;;  %5356 = verf.f32 %v2924_v0  ;;  %v9344_v41 = vadd.f32 %v9118_v15, %v8532_v55 }
 0x26e   :  { %v5345_v43 = vpop.eup %5344  ;;  %3941 = vst.msk [vmem:[%s9521_s3 + $0x790] sm:$0xff] %vm305_vm0, %v3685_v48  ;;  %v2535_v26 = vmul.f32 0.5, %v9250_v18  ;;  %v3303_v19 = vadd.f32 1.0, %v5343_v30  ;;  %v2663_v52 = vmul.f32 0.5, %v9254_v17  ;;  %v2795_v29 = vmul.f32 0.70710677, %v9332_v1 }
 0x26f   :  { %3816 = vst.msk [vmem:[%s9521_s3 + $0x3a8] sm:$0xff] %vm305_vm0, %v3560_v5  ;;  %v3688_v55 = vmul.f32 %v3432_v8, %v2664_v16  ;;  %v3431_v34 = vadd.f32 1.0, %v5345_v43  ;;  %v2538_v49 = vmul.f32 0.5, %v9272_v53  ;;  %v2923_v13 = vmul.f32 0.70710677, %v9336_v22 }
 0x270   :  { %v3559_v31 = vmul.f32 %v3303_v19, %v2535_v26  ;;  %5358 = verf.f32 %v2795_v29  ;;  %v2798_v18 = vmul.f32 0.70710677, %v9344_v41  ;;  %v9362_v17 = vadd.f32 %v9118_v15, %v8534_v36 }
 0x271   :  { %v5347_v61 = vpop.eup %5346  ;;  %3944 = vst.msk [vmem:[%s9521_s3 + $0x7a8] sm:$0xff] %vm305_vm0, %v3688_v55  ;;  %v3687_v27 = vmul.f32 %v3431_v34, %v2663_v52  ;;  %5360 = verf.f32 %v2923_v13  ;;  %v9370_v53 = vadd.f32 %v9118_v15, %v8544_v11  ;;  %v9374_v20 = vadd.f32 %v9118_v15, %v9650_v2 }
 0x272   :  { %v5349_v28 = vpop.eup %5348  ;;  %3815 = vst.msk [vmem:[%s9521_s3 + $0x3a0] sm:$0xff] %vm305_vm0, %v3559_v31  ;;  %v3306_v36 = vadd.f32 1.0, %v5347_v61  ;;  %v2666_v45 = vmul.f32 0.5, %v9276_v57  ;;  %5362 = verf.f32 %v2798_v18  ;;  %v2926_v10 = vmul.f32 0.70710677, %v9362_v17  ;;  %v9655_v61 = vld [vmem:[#allocation26_spill] sm:$0xff] }
 0x273   :  { %v5351_v51 = vpop.eup %5350  ;;  %3943 = vst.msk [vmem:[%s9521_s3 + $0x7a0] sm:$0xff] %vm305_vm0, %v3687_v27  ;;  %v3434_v11 = vadd.f32 1.0, %v5349_v28  ;;  %v2537_v56 = vmul.f32 0.5, %v9284_v40  ;;  %v2665_v4 = vmul.f32 0.5, %v9302_v44  ;;  %v2797_v37 = vmul.f32 0.70710677, %v9370_v53 }
 0x274   :  { %v3562_v58 = vmul.f32 %v3306_v36, %v2538_v49  ;;  %v3305_v32 = vadd.f32 1.0, %v5351_v51  ;;  %5364 = verf.f32 %v2926_v10  ;;  %v2925_v57 = vmul.f32 0.70710677, %v9374_v20 }
 0x275   :  { %v5353_v60 = vpop.eup %5352  ;;  %v3690_v47 = vmul.f32 %v3434_v11, %v2666_v45  ;;  %5366 = verf.f32 %v2797_v37  ;;  %v9392_v9 = vadd.f32 %v9118_v15, %v9651_v50  ;;  %v9396_v7 = vadd.f32 %v9118_v15, %v9652_v12 }
 0x276   :  { %v5355_v40 = vpop.eup %5354  ;;  %3818 = vst.msk [vmem:[%s9521_s3 + $0x3b8] sm:$0xff] %vm305_vm0, %v3562_v58  ;;  %v3561_v44 = vmul.f32 %v3305_v32, %v2537_v56  ;;  %v3433_v35 = vadd.f32 1.0, %v5353_v60  ;;  %5368 = verf.f32 %v2925_v57  ;;  %v9404_v59 = vadd.f32 %v9118_v15, %v9653_v38 }
 0x277   :  { %v5357_v63 = vpop.eup %5356  ;;  %3946 = vst.msk [vmem:[%s9521_s3 + $0x7b8] sm:$0xff] %vm305_vm0, %v3690_v47  ;;  %v2540_v42 = vmul.f32 0.5, %v9310_v54  ;;  %v3308_v39 = vadd.f32 1.0, %v5355_v40  ;;  %v2800_v16 = vmul.f32 0.70710677, %v9392_v9  ;;  %v2668_v62 = vmul.f32 0.5, %v9314_v24 }
 0x278   :  { %3817 = vst.msk [vmem:[%s9521_s3 + $0x3b0] sm:$0xff] %vm305_vm0, %v3561_v44  ;;  %v3689_v14 = vmul.f32 %v3433_v35, %v2665_v4  ;;  %v3436_v25 = vadd.f32 1.0, %v5357_v63  ;;  %v2928_v0 = vmul.f32 0.70710677, %v9396_v7  ;;  %v2799_v48 = vmul.f32 0.70710677, %v9404_v59 }
 0x279   :  { %v3564_v23 = vmul.f32 %v3308_v39, %v2540_v42  ;;  %5370 = verf.f32 %v2800_v16  ;;  %v9421_v54 = vadd.f32 %v9118_v15, %v9654_v6  ;;  %v9429_v24 = vadd.f32 %v9118_v15, %v8600_v46 }
 0x27a   :  { %v5359_v21 = vpop.eup %5358  ;;  %3945 = vst.msk [vmem:[%s9521_s3 + $0x7b0] sm:$0xff] %vm305_vm0, %v3689_v14  ;;  %v3692_v30 = vmul.f32 %v3436_v25, %v2668_v62  ;;  %5372 = verf.f32 %v2928_v0  ;;  %v9433_v5 = vadd.f32 %v9118_v15, %v8602_v33  ;;  %v2539_v43 = vmul.f32 0.5, %v9332_v1 }
 0x27b   :  { %v5361_v8 = vpop.eup %5360  ;;  %3820 = vst.msk [vmem:[%s9521_s3 + $0x3c8] sm:$0xff] %vm305_vm0, %v3564_v23  ;;  %v3307_v26 = vadd.f32 1.0, %v5359_v21  ;;  %5374 = verf.f32 %v2799_v48  ;;  %v2927_v19 = vmul.f32 0.70710677, %v9421_v54  ;;  %v2667_v33 = vmul.f32 0.5, %v9336_v22 }
 0x27c   :  { %v5363_v52 = vpop.eup %5362  ;;  %3948 = vst.msk [vmem:[%s9521_s3 + $0x7c8] sm:$0xff] %vm305_vm0, %v3692_v30  ;;  %v3435_v46 = vadd.f32 1.0, %v5361_v8  ;;  %v2542_v29 = vmul.f32 0.5, %v9344_v41  ;;  %v2802_v55 = vmul.f32 0.70710677, %v9429_v24  ;;  %v1771_v18 = vadd.f32 %v9118_v15, %v8612_v3 }
 0x27d   :  { %v3563_v34 = vmul.f32 %v3307_v26, %v2539_v43  ;;  %v3310_v49 = vadd.f32 1.0, %v5363_v52  ;;  %5376 = verf.f32 %v2927_v19  ;;  %v2930_v1 = vmul.f32 0.70710677, %v9433_v5 }
 0x27e   :  { %v5365_v13 = vpop.eup %5364  ;;  %v3691_v31 = vmul.f32 %v3435_v46, %v2667_v33  ;;  %5378 = verf.f32 %v2802_v55  ;;  %v2411_v27 = vadd.f32 %v9118_v15, %v9655_v61  ;;  %v2670_v2 = vmul.f32 0.5, %v9362_v17 }
 0x27f   :  { %v5367_v22 = vpop.eup %5366  ;;  %3819 = vst.msk [vmem:[%s9521_s3 + $0x3c0] sm:$0xff] %vm305_vm0, %v3563_v34  ;;  %v3566_v41 = vmul.f32 %v3310_v49, %v2542_v29  ;;  %v3438_v28 = vadd.f32 1.0, %v5365_v13  ;;  %5380 = verf.f32 %v2930_v1  ;;  %v2541_v3 = vmul.f32 0.5, %v9370_v53 }
 0x280   :  { %v5369_v36 = vpop.eup %5368  ;;  %3947 = vst.msk [vmem:[%s9521_s3 + $0x7c0] sm:$0xff] %vm305_vm0, %v3691_v31  ;;  %v3309_v15 = vadd.f32 1.0, %v5367_v22  ;;  %v2801_v45 = vmul.f32 0.70710677, %v1771_v18  ;;  %v2669_v17 = vmul.f32 0.5, %v9374_v20  ;;  %v2544_v20 = vmul.f32 0.5, %v9392_v9 }
 0x281   :  { %3822 = vst.msk [vmem:[%s9521_s3 + $0x3d8] sm:$0xff] %vm305_vm0, %v3566_v41  ;;  %v3694_v10 = vmul.f32 %v3438_v28, %v2670_v2  ;;  %v3437_v51 = vadd.f32 1.0, %v5369_v36  ;;  %v2929_v11 = vmul.f32 0.70710677, %v2411_v27  ;;  %v2672_v57 = vmul.f32 0.5, %v9396_v7 }
 0x282   :  { %v3565_v56 = vmul.f32 %v3309_v15, %v2541_v3  ;;  %5382 = verf.f32 %v2801_v45  ;;  %v2543_v50 = vmul.f32 0.5, %v9404_v59  ;;  %v2671_v38 = vmul.f32 0.5, %v9421_v54 }
 0x283   :  { %v5371_v4 = vpop.eup %5370  ;;  %3950 = vst.msk [vmem:[%s9521_s3 + $0x7d8] sm:$0xff] %vm305_vm0, %v3694_v10  ;;  %v3693_v53 = vmul.f32 %v3437_v51, %v2669_v17  ;;  %5384 = verf.f32 %v2929_v11  ;;  %v2546_v7 = vmul.f32 0.5, %v9429_v24  ;;  %v2674_v16 = vmul.f32 0.5, %v9433_v5 }
 0x284   :  { %v5373_v37 = vpop.eup %5372  ;;  %3821 = vst.msk [vmem:[%s9521_s3 + $0x3d0] sm:$0xff] %vm305_vm0, %v3565_v56  ;;  %v3312_v58 = vadd.f32 1.0, %v5371_v4  ;;  %v2545_v48 = vmul.f32 0.5, %v1771_v18  ;;  %v2673_v54 = vmul.f32 0.5, %v2411_v27 }
 0x285   :  { %v5375_v32 = vpop.eup %5374  ;;  %3949 = vst.msk [vmem:[%s9521_s3 + $0x7d0] sm:$0xff] %vm305_vm0, %v3693_v53  ;;  %v3440_v60 = vadd.f32 1.0, %v5373_v37 }
 0x286   :  { %v3568_v47 = vmul.f32 %v3312_v58, %v2544_v20  ;;  %v3311_v12 = vadd.f32 1.0, %v5375_v32 }
 0x287   :  { %v5377_v40 = vpop.eup %5376  ;;  %v3696_v44 = vmul.f32 %v3440_v60, %v2672_v57 }
 0x288   :  { %v5379_v35 = vpop.eup %5378  ;;  %3824 = vst.msk [vmem:[%s9521_s3 + $0x3e8] sm:$0xff] %vm305_vm0, %v3568_v47  ;;  %v3567_v9 = vmul.f32 %v3311_v12, %v2543_v50  ;;  %v3439_v63 = vadd.f32 1.0, %v5377_v40 }
 0x289   :  { %v5381_v42 = vpop.eup %5380  ;;  %3952 = vst.msk [vmem:[%s9521_s3 + $0x7e8] sm:$0xff] %vm305_vm0, %v3696_v44  ;;  %v3314_v59 = vadd.f32 1.0, %v5379_v35 }
 0x28a   :  { %3823 = vst.msk [vmem:[%s9521_s3 + $0x3e0] sm:$0xff] %vm305_vm0, %v3567_v9  ;;  %v3695_v39 = vmul.f32 %v3439_v63, %v2671_v38  ;;  %v3442_v14 = vadd.f32 1.0, %v5381_v42 }
 0x28b   :  { %v3570_v62 = vmul.f32 %v3314_v59, %v2546_v7 }
 0x28c   :  { %v5383_v25 = vpop.eup %5382  ;;  %3951 = vst.msk [vmem:[%s9521_s3 + $0x7e0] sm:$0xff] %vm305_vm0, %v3695_v39  ;;  %v3698_v0 = vmul.f32 %v3442_v14, %v2674_v16 }
 0x28d   :  { %v5385_v23 = vpop.eup %5384  ;;  %3826 = vst.msk [vmem:[%s9521_s3 + $0x3f8] sm:$0xff] %vm305_vm0, %v3570_v62  ;;  %v3313_v6 = vadd.f32 1.0, %v5383_v25 }
 0x28e   :  { %3954 = vst.msk [vmem:[%s9521_s3 + $0x7f8] sm:$0xff] %vm305_vm0, %v3698_v0  ;;  %v3441_v21 = vadd.f32 1.0, %v5385_v23 }
 0x28f   :  { %v3569_v30 = vmul.f32 %v3313_v6, %v2545_v48 }
 0x290   :  { %v3697_v24 = vmul.f32 %v3441_v21, %v2673_v54 }
 0x291   :  { %3825 = vst.msk [vmem:[%s9521_s3 + $0x3f0] sm:$0xff] %vm305_vm0, %v3569_v30 }
 0x292   :  { %3953 = vst.msk [vmem:[%s9521_s3 + $0x7f0] sm:$0xff] %vm305_vm0, %v3697_v24 }
 0x293   :  { %3959 = vsyncpa [#allocation3], 1 }
 0x294   :  { %3960 = vsyncpa [#allocation5], 1 }

// kernel: encoder_forward.6
= control target key start
LH: loop header
LB: loop body
LE: loop exit
PB: predicated region body
PF: predicated region fallthrough
CT: control target
= control target key end

     0   :  { %v1166_v0 = vmov 0.0|0.0   ;;  %vm886_vm0 = vcmask 261120   ;;  %s2235_s1 = inlined_call_operand.vmem [shape: f32[256,32], index: 1, kind: input, shape index: {}]   ;;  %s2236_s0 = inlined_call_operand.vmem [shape: f32[512,256], index: 0, kind: input, shape index: {}]   ;;  %s2237_s2 = inlined_call_operand.vmem [shape: f32[1,32], index: 2, kind: input, shape index: {}]   ;;  %s2238_s3 = inlined_call_operand.vmem [shape: f32[512,32], index: 3, kind: output, shape index: {}]  }
   0x1   :  { %956 = vmatprep.subr.bf16.mxu0 %v1166_v0  ;;  %1004 = vmatprep.subr.bf16.mxu1 %v1166_v0  ;;  %v142_v1 = vld [vmem:[%s2235_s1] sm:$0xff]  ;;  %v143_v2 = vld [vmem:[%s2235_s1 + $0x8] sm:$0xff]  ;;  %v144_v3 = vld [vmem:[%s2235_s1 + $0x10] sm:$0xff] }
   0x2   :  { %v957_v4 = vpack.c.bf16 %v143_v2, %v142_v1  ;;  %v145_v5 = vld [vmem:[%s2235_s1 + $0x18] sm:$0xff]  ;;  %v146_v7 = vld [vmem:[%s2235_s1 + $0x20] sm:$0xff]  ;;  %v147_v8 = vld [vmem:[%s2235_s1 + $0x28] sm:$0xff] }
   0x3   :  { %v960_v6 = vpack.c.bf16 %v145_v5, %v144_v3  ;;  %v963_v9 = vpack.c.bf16 %v147_v8, %v146_v7  ;;  %v148_v10 = vld [vmem:[%s2235_s1 + $0x30] sm:$0xff]  ;;  %v149_v11 = vld [vmem:[%s2235_s1 + $0x38] sm:$0xff]  ;;  %v15_v12 = vld [vmem:[%s2236_s0 + $0x8] sm:$0xff] }
   0x4   :  { %958 = vmatpush1.bf16.msra.mxu0 %v957_v4  ;;  %1020 = vmatpush1.bf16.msra.mxu1 %v957_v4  ;;  %v966_v13 = vpack.c.bf16 %v149_v11, %v148_v10  ;;  %v79_v14 = vld [vmem:[%s2236_s0 + $0x208] sm:$0xff]  ;;  %v150_v15 = vld [vmem:[%s2235_s1 + $0x40] sm:$0xff]  ;;  %v152_v18 = vld [vmem:[%s2235_s1 + $0x50] sm:$0xff] }
   0x5   :  { %959 = vmatprep.subr.bf16.mxu0 %v1166_v0  ;;  %1005 = vmatprep.subr.bf16.mxu1 %v1166_v0  ;;  %v151_v16 = vld [vmem:[%s2235_s1 + $0x48] sm:$0xff]  ;;  %v153_v19 = vld [vmem:[%s2235_s1 + $0x58] sm:$0xff]  ;;  %v154_v21 = vld [vmem:[%s2235_s1 + $0x60] sm:$0xff] }
   0x6   :  { %245 = vmatprep.mubr.f32.mxu0 %v15_v12  ;;  %405 = vmatprep.mubr.f32.mxu1 %v79_v14  ;;  %v969_v17 = vpack.c.bf16 %v151_v16, %v150_v15  ;;  %v972_v20 = vpack.c.bf16 %v153_v19, %v152_v18  ;;  %v155_v22 = vld [vmem:[%s2235_s1 + $0x68] sm:$0xff]  ;;  %v156_v24 = vld [vmem:[%s2235_s1 + $0x70] sm:$0xff]  ;;  %v157_v25 = vld [vmem:[%s2235_s1 + $0x78] sm:$0xff] }
   0x7   :  { %v975_v23 = vpack.c.bf16 %v155_v22, %v154_v21  ;;  %v978_v26 = vpack.c.bf16 %v157_v25, %v156_v24  ;;  %v158_v27 = vld [vmem:[%s2235_s1 + $0x80] sm:$0xff]  ;;  %v159_v28 = vld [vmem:[%s2235_s1 + $0x88] sm:$0xff]  ;;  %v160_v30 = vld [vmem:[%s2235_s1 + $0x90] sm:$0xff] }
   0x8   :  { %961 = vmatpush1.bf16.msra.mxu0 %v960_v6  ;;  %1021 = vmatpush1.bf16.msra.mxu1 %v960_v6  ;;  %v981_v29 = vpack.c.bf16 %v159_v28, %v158_v27  ;;  %v161_v31 = vld [vmem:[%s2235_s1 + $0x98] sm:$0xff]  ;;  %v162_v33 = vld [vmem:[%s2235_s1 + $0xa0] sm:$0xff]  ;;  %v163_v34 = vld [vmem:[%s2235_s1 + $0xa8] sm:$0xff] }
   0x9   :  { %962 = vmatprep.subr.bf16.mxu0 %v1166_v0  ;;  %1006 = vmatprep.subr.bf16.mxu1 %v1166_v0  ;;  %v984_v32 = vpack.c.bf16 %v161_v31, %v160_v30  ;;  %v987_v35 = vpack.c.bf16 %v163_v34, %v162_v33  ;;  %v164_v36 = vld [vmem:[%s2235_s1 + $0xb0] sm:$0xff]  ;;  %v165_v37 = vld [vmem:[%s2235_s1 + $0xb8] sm:$0xff]  ;;  %v166_v39 = vld [vmem:[%s2235_s1 + $0xc0] sm:$0xff] }
   0xa   :  { %v990_v38 = vpack.c.bf16 %v165_v37, %v164_v36  ;;  %v167_v40 = vld [vmem:[%s2235_s1 + $0xc8] sm:$0xff]  ;;  %v168_v42 = vld [vmem:[%s2235_s1 + $0xd0] sm:$0xff]  ;;  %v169_v43 = vld [vmem:[%s2235_s1 + $0xd8] sm:$0xff] }
   0xb   :  { %v993_v41 = vpack.c.bf16 %v167_v40, %v166_v39  ;;  %v996_v44 = vpack.c.bf16 %v169_v43, %v168_v42  ;;  %v170_v45 = vld [vmem:[%s2235_s1 + $0xe0] sm:$0xff]  ;;  %v171_v46 = vld [vmem:[%s2235_s1 + $0xe8] sm:$0xff]  ;;  %v172_v48 = vld [vmem:[%s2235_s1 + $0xf0] sm:$0xff] }
   0xc   :  { %964 = vmatpush1.bf16.msra.mxu0 %v963_v9  ;;  %1022 = vmatpush1.bf16.msra.mxu1 %v963_v9  ;;  %v999_v47 = vpack.c.bf16 %v171_v46, %v170_v45  ;;  %v173_v49 = vld [vmem:[%s2235_s1 + $0xf8] sm:$0xff]  ;;  %v14_v51 = vld [vmem:[%s2236_s0] sm:$0xff]  ;;  %v16_v55 = vld [vmem:[%s2236_s0 + $0x10] sm:$0xff] }
   0xd   :  { %965 = vmatprep.subr.bf16.mxu0 %v1166_v0  ;;  %1007 = vmatprep.subr.bf16.mxu1 %v1166_v0  ;;  %v1002_v50 = vpack.c.bf16 %v173_v49, %v172_v48  ;;  %v78_v52 = vld [vmem:[%s2236_s0 + $0x200] sm:$0xff]  ;;  %v17_v53 = vld [vmem:[%s2236_s0 + $0x18] sm:$0xff]  ;;  %v80_v56 = vld [vmem:[%s2236_s0 + $0x210] sm:$0xff] }
   0xe   :  { %v81_v54 = vld [vmem:[%s2236_s0 + $0x218] sm:$0xff]  ;;  %v19_v57 = vld [vmem:[%s2236_s0 + $0x28] sm:$0xff]  ;;  %v18_v59 = vld [vmem:[%s2236_s0 + $0x20] sm:$0xff] }
   0xf   :  { %v83_v58 = vld [vmem:[%s2236_s0 + $0x228] sm:$0xff]  ;;  %v82_v60 = vld [vmem:[%s2236_s0 + $0x220] sm:$0xff]  ;;  %v21_v61 = vld [vmem:[%s2236_s0 + $0x38] sm:$0xff] }
  0x10   :  { %967 = vmatpush1.bf16.msra.mxu0 %v966_v13  ;;  %1023 = vmatpush1.bf16.msra.mxu1 %v966_v13  ;;  %v85_v62 = vld [vmem:[%s2236_s0 + $0x238] sm:$0xff]  ;;  %v20_v63 = vld [vmem:[%s2236_s0 + $0x30] sm:$0xff]  ;;  %v23_v1 = vld [vmem:[%s2236_s0 + $0x48] sm:$0xff] }
  0x11   :  { %968 = vmatprep.subr.bf16.mxu0 %v1166_v0  ;;  %1008 = vmatprep.subr.bf16.mxu1 %v1166_v0  ;;  %v87_v2 = vld [vmem:[%s2236_s0 + $0x248] sm:$0xff]  ;;  %v22_v3 = vld [vmem:[%s2236_s0 + $0x40] sm:$0xff]  ;;  %v25_v5 = vld [vmem:[%s2236_s0 + $0x58] sm:$0xff] }
  0x12   :  { %v86_v4 = vld [vmem:[%s2236_s0 + $0x240] sm:$0xff]  ;;  %v89_v6 = vld [vmem:[%s2236_s0 + $0x258] sm:$0xff]  ;;  %v24_v7 = vld [vmem:[%s2236_s0 + $0x50] sm:$0xff] }
  0x13   :  { %v88_v8 = vld [vmem:[%s2236_s0 + $0x250] sm:$0xff]  ;;  %v27_v9 = vld [vmem:[%s2236_s0 + $0x68] sm:$0xff]  ;;  %v26_v11 = vld [vmem:[%s2236_s0 + $0x60] sm:$0xff] }
  0x14   :  { %970 = vmatpush1.bf16.msra.mxu0 %v969_v17  ;;  %1024 = vmatpush1.bf16.msra.mxu1 %v969_v17  ;;  %v91_v10 = vld [vmem:[%s2236_s0 + $0x268] sm:$0xff]  ;;  %v90_v12 = vld [vmem:[%s2236_s0 + $0x260] sm:$0xff]  ;;  %v29_v13 = vld [vmem:[%s2236_s0 + $0x78] sm:$0xff] }
  0x15   :  { %971 = vmatprep.subr.bf16.mxu0 %v1166_v0  ;;  %1009 = vmatprep.subr.bf16.mxu1 %v1166_v0  ;;  %v93_v14 = vld [vmem:[%s2236_s0 + $0x278] sm:$0xff]  ;;  %v28_v15 = vld [vmem:[%s2236_s0 + $0x70] sm:$0xff]  ;;  %v31_v17 = vld [vmem:[%s2236_s0 + $0x88] sm:$0xff] }
  0x16   :  { %v92_v16 = vld [vmem:[%s2236_s0 + $0x270] sm:$0xff]  ;;  %v95_v18 = vld [vmem:[%s2236_s0 + $0x288] sm:$0xff]  ;;  %v30_v19 = vld [vmem:[%s2236_s0 + $0x80] sm:$0xff] }
  0x17   :  { %v33_v21 = vld [vmem:[%s2236_s0 + $0x98] sm:$0xff]  ;;  %v96_v24 = vld [vmem:[%s2236_s0 + $0x290] sm:$0xff]  ;;  %v35_v25 = vld [vmem:[%s2236_s0 + $0xa8] sm:$0xff] }
  0x18   :  { %973 = vmatpush1.bf16.msra.mxu0 %v972_v20  ;;  %1025 = vmatpush1.bf16.msra.mxu1 %v972_v20  ;;  %v94_v20 = vld [vmem:[%s2236_s0 + $0x280] sm:$0xff]  ;;  %v97_v22 = vld [vmem:[%s2236_s0 + $0x298] sm:$0xff]  ;;  %v36_v31 = vld [vmem:[%s2236_s0 + $0xb0] sm:$0xff] }
  0x19   :  { %974 = vmatprep.subr.bf16.mxu0 %v1166_v0  ;;  %1010 = vmatprep.subr.bf16.mxu1 %v1166_v0  ;;  %v34_v27 = vld [vmem:[%s2236_s0 + $0xa0] sm:$0xff]  ;;  %v101_v30 = vld [vmem:[%s2236_s0 + $0x2b8] sm:$0xff]  ;;  %v39_v33 = vld [vmem:[%s2236_s0 + $0xc8] sm:$0xff] }
  0x1a   :  { %v98_v28 = vld [vmem:[%s2236_s0 + $0x2a0] sm:$0xff]  ;;  %v103_v34 = vld [vmem:[%s2236_s0 + $0x2c8] sm:$0xff]  ;;  %v41_v37 = vld [vmem:[%s2236_s0 + $0xd8] sm:$0xff] }
  0x1b   :  { %v102_v36 = vld [vmem:[%s2236_s0 + $0x2c0] sm:$0xff]  ;;  %v40_v39 = vld [vmem:[%s2236_s0 + $0xd0] sm:$0xff]  ;;  %v107_v42 = vld [vmem:[%s2236_s0 + $0x2e8] sm:$0xff] }
  0x1c   :  { %976 = vmatpush1.bf16.msra.mxu0 %v975_v23  ;;  %1026 = vmatpush1.bf16.msra.mxu1 %v975_v23  ;;  %v32_v23 = vld [vmem:[%s2236_s0 + $0x90] sm:$0xff]  ;;  %v42_v43 = vld [vmem:[%s2236_s0 + $0xe0] sm:$0xff]  ;;  %v45_v45 = vld [vmem:[%s2236_s0 + $0xf8] sm:$0xff] }
  0x1d   :  { %977 = vmatprep.subr.bf16.mxu0 %v1166_v0  ;;  %1011 = vmatprep.subr.bf16.mxu1 %v1166_v0  ;;  %v104_v40 = vld [vmem:[%s2236_s0 + $0x2d0] sm:$0xff]  ;;  %v109_v46 = vld [vmem:[%s2236_s0 + $0x2f8] sm:$0xff]  ;;  %v47_v49 = vld [vmem:[%s2236_s0 + $0x108] sm:$0xff] }
  0x1e   :  { %v108_v48 = vld [vmem:[%s2236_s0 + $0x2f0] sm:$0xff] }
  0x20   :  { %979 = vmatpush1.bf16.msra.mxu0 %v978_v26  ;;  %1027 = vmatpush1.bf16.msra.mxu1 %v978_v26  ;;  %v99_v26 = vld [vmem:[%s2236_s0 + $0x2a8] sm:$0xff] }
  0x21   :  { %980 = vmatprep.subr.bf16.mxu0 %v1166_v0  ;;  %1012 = vmatprep.subr.bf16.mxu1 %v1166_v0 }
  0x24   :  { %982 = vmatpush1.bf16.msra.mxu0 %v981_v29  ;;  %1028 = vmatpush1.bf16.msra.mxu1 %v981_v29  ;;  %v37_v29 = vld [vmem:[%s2236_s0 + $0xb8] sm:$0xff] }
  0x25   :  { %983 = vmatprep.subr.bf16.mxu0 %v1166_v0  ;;  %1013 = vmatprep.subr.bf16.mxu1 %v1166_v0 }
  0x28   :  { %985 = vmatpush1.bf16.msra.mxu0 %v984_v32  ;;  %1029 = vmatpush1.bf16.msra.mxu1 %v984_v32  ;;  %v100_v32 = vld [vmem:[%s2236_s0 + $0x2b0] sm:$0xff] }
  0x29   :  { %986 = vmatprep.subr.bf16.mxu0 %v1166_v0  ;;  %1014 = vmatprep.subr.bf16.mxu1 %v1166_v0 }
  0x2c   :  { %988 = vmatpush1.bf16.msra.mxu0 %v987_v35  ;;  %1030 = vmatpush1.bf16.msra.mxu1 %v987_v35  ;;  %v38_v35 = vld [vmem:[%s2236_s0 + $0xc0] sm:$0xff] }
  0x2d   :  { %989 = vmatprep.subr.bf16.mxu0 %v1166_v0  ;;  %1015 = vmatprep.subr.bf16.mxu1 %v1166_v0 }
  0x30   :  { %991 = vmatpush1.bf16.msra.mxu0 %v990_v38  ;;  %1031 = vmatpush1.bf16.msra.mxu1 %v990_v38  ;;  %v105_v38 = vld [vmem:[%s2236_s0 + $0x2d8] sm:$0xff] }
  0x31   :  { %992 = vmatprep.subr.bf16.mxu0 %v1166_v0  ;;  %1016 = vmatprep.subr.bf16.mxu1 %v1166_v0 }
  0x34   :  { %994 = vmatpush1.bf16.msra.mxu0 %v993_v41  ;;  %1032 = vmatpush1.bf16.msra.mxu1 %v993_v41  ;;  %v43_v41 = vld [vmem:[%s2236_s0 + $0xe8] sm:$0xff] }
  0x35   :  { %995 = vmatprep.subr.bf16.mxu0 %v1166_v0  ;;  %1017 = vmatprep.subr.bf16.mxu1 %v1166_v0 }
  0x38   :  { %997 = vmatpush1.bf16.msra.mxu0 %v996_v44  ;;  %1033 = vmatpush1.bf16.msra.mxu1 %v996_v44  ;;  %v106_v44 = vld [vmem:[%s2236_s0 + $0x2e0] sm:$0xff] }
  0x39   :  { %998 = vmatprep.subr.bf16.mxu0 %v1166_v0  ;;  %1018 = vmatprep.subr.bf16.mxu1 %v1166_v0 }
  0x3c   :  { %1000 = vmatpush1.bf16.msra.mxu0 %v999_v47  ;;  %1034 = vmatpush1.bf16.msra.mxu1 %v999_v47  ;;  %v44_v47 = vld [vmem:[%s2236_s0 + $0xf0] sm:$0xff] }
  0x3d   :  { %1001 = vmatprep.subr.bf16.mxu0 %v1166_v0  ;;  %1019 = vmatprep.subr.bf16.mxu1 %v1166_v0  ;;  %v84_v0 = vld [vmem:[%s2236_s0 + $0x230] sm:$0xff] }
  0x40   :  { %1003 = vmatpush1.bf16.msra.mxu0 %v1002_v50  ;;  %1035 = vmatpush1.bf16.msra.mxu1 %v1002_v50  ;;  %v111_v50 = vld [vmem:[%s2236_s0 + $0x308] sm:$0xff] }
  0x43   :  { %246 = vmatmul.mubr.f32.vlgmr.msra.gmra.mrb[0].mxu0 %v14_v51  ;;  %406 = vmatmul.mubr.f32.vlgmr.msra.gmra.mrb[0].mxu1 %v78_v52  ;;  %v46_v51 = vld [vmem:[%s2236_s0 + $0x100] sm:$0xff] }
  0x44   :  { %250 = vmatprep.mubr.f32.mxu0 %v17_v53  ;;  %410 = vmatprep.mubr.f32.mxu1 %v81_v54  ;;  %v110_v52 = vld [vmem:[%s2236_s0 + $0x300] sm:$0xff]  ;;  %v49_v53 = vld [vmem:[%s2236_s0 + $0x118] sm:$0xff] }
  0x45   :  { %v113_v54 = vld [vmem:[%s2236_s0 + $0x318] sm:$0xff] }
  0x47   :  { %251 = vmatmul.mubr.f32.gmra.mrb[2].mxu0 %v16_v55  ;;  %411 = vmatmul.mubr.f32.gmra.mrb[2].mxu1 %v80_v56  ;;  %v48_v55 = vld [vmem:[%s2236_s0 + $0x110] sm:$0xff] }
  0x48   :  { %255 = vmatprep.mubr.f32.mxu0 %v19_v57  ;;  %415 = vmatprep.mubr.f32.mxu1 %v83_v58  ;;  %v112_v56 = vld [vmem:[%s2236_s0 + $0x310] sm:$0xff]  ;;  %v51_v57 = vld [vmem:[%s2236_s0 + $0x128] sm:$0xff] }
  0x49   :  { %v115_v58 = vld [vmem:[%s2236_s0 + $0x328] sm:$0xff] }
  0x4b   :  { %256 = vmatmul.mubr.f32.gmra.mrb[4].mxu0 %v18_v59  ;;  %416 = vmatmul.mubr.f32.gmra.mrb[4].mxu1 %v82_v60  ;;  %v50_v59 = vld [vmem:[%s2236_s0 + $0x120] sm:$0xff] }
  0x4c   :  { %260 = vmatprep.mubr.f32.mxu0 %v21_v61  ;;  %420 = vmatprep.mubr.f32.mxu1 %v85_v62  ;;  %v114_v60 = vld [vmem:[%s2236_s0 + $0x320] sm:$0xff]  ;;  %v53_v61 = vld [vmem:[%s2236_s0 + $0x138] sm:$0xff] }
  0x4d   :  { %v117_v62 = vld [vmem:[%s2236_s0 + $0x338] sm:$0xff] }
  0x4f   :  { %261 = vmatmul.mubr.f32.gmra.mrb[6].mxu0 %v20_v63  ;;  %421 = vmatmul.mubr.f32.gmra.mrb[6].mxu1 %v84_v0  ;;  %v52_v63 = vld [vmem:[%s2236_s0 + $0x130] sm:$0xff] }
  0x50   :  { %265 = vmatprep.mubr.f32.mxu0 %v23_v1  ;;  %425 = vmatprep.mubr.f32.mxu1 %v87_v2  ;;  %v116_v0 = vld [vmem:[%s2236_s0 + $0x330] sm:$0xff]  ;;  %v55_v1 = vld [vmem:[%s2236_s0 + $0x148] sm:$0xff] }
  0x51   :  { %v119_v2 = vld [vmem:[%s2236_s0 + $0x348] sm:$0xff] }
  0x53   :  { %266 = vmatmul.mubr.f32.gmra.mrb[8].mxu0 %v22_v3  ;;  %426 = vmatmul.mubr.f32.gmra.mrb[8].mxu1 %v86_v4  ;;  %v54_v3 = vld [vmem:[%s2236_s0 + $0x140] sm:$0xff] }
  0x54   :  { %270 = vmatprep.mubr.f32.mxu0 %v25_v5  ;;  %430 = vmatprep.mubr.f32.mxu1 %v89_v6  ;;  %v118_v4 = vld [vmem:[%s2236_s0 + $0x340] sm:$0xff]  ;;  %v57_v5 = vld [vmem:[%s2236_s0 + $0x158] sm:$0xff] }
  0x55   :  { %v121_v6 = vld [vmem:[%s2236_s0 + $0x358] sm:$0xff] }
  0x57   :  { %271 = vmatmul.mubr.f32.gmra.mrb[10].mxu0 %v24_v7  ;;  %431 = vmatmul.mubr.f32.gmra.mrb[10].mxu1 %v88_v8  ;;  %v56_v7 = vld [vmem:[%s2236_s0 + $0x150] sm:$0xff] }
  0x58   :  { %275 = vmatprep.mubr.f32.mxu0 %v27_v9  ;;  %435 = vmatprep.mubr.f32.mxu1 %v91_v10  ;;  %v120_v8 = vld [vmem:[%s2236_s0 + $0x350] sm:$0xff]  ;;  %v59_v9 = vld [vmem:[%s2236_s0 + $0x168] sm:$0xff] }
  0x59   :  { %v123_v10 = vld [vmem:[%s2236_s0 + $0x368] sm:$0xff] }
  0x5b   :  { %276 = vmatmul.mubr.f32.gmra.mrb[12].mxu0 %v26_v11  ;;  %436 = vmatmul.mubr.f32.gmra.mrb[12].mxu1 %v90_v12  ;;  %v58_v11 = vld [vmem:[%s2236_s0 + $0x160] sm:$0xff] }
  0x5c   :  { %280 = vmatprep.mubr.f32.mxu0 %v29_v13  ;;  %440 = vmatprep.mubr.f32.mxu1 %v93_v14  ;;  %v122_v12 = vld [vmem:[%s2236_s0 + $0x360] sm:$0xff]  ;;  %v61_v13 = vld [vmem:[%s2236_s0 + $0x178] sm:$0xff] }
  0x5d   :  { %v125_v14 = vld [vmem:[%s2236_s0 + $0x378] sm:$0xff] }
  0x5f   :  { %281 = vmatmul.mubr.f32.gmra.mrb[14].mxu0 %v28_v15  ;;  %441 = vmatmul.mubr.f32.gmra.mrb[14].mxu1 %v92_v16  ;;  %v60_v15 = vld [vmem:[%s2236_s0 + $0x170] sm:$0xff] }
  0x60   :  { %285 = vmatprep.mubr.f32.mxu0 %v31_v17  ;;  %445 = vmatprep.mubr.f32.mxu1 %v95_v18  ;;  %v124_v16 = vld [vmem:[%s2236_s0 + $0x370] sm:$0xff]  ;;  %v63_v17 = vld [vmem:[%s2236_s0 + $0x188] sm:$0xff] }
  0x61   :  { %v127_v18 = vld [vmem:[%s2236_s0 + $0x388] sm:$0xff] }
  0x63   :  { %286 = vmatmul.mubr.f32.gmra.mrb[16].mxu0 %v30_v19  ;;  %446 = vmatmul.mubr.f32.gmra.mrb[16].mxu1 %v94_v20  ;;  %v62_v19 = vld [vmem:[%s2236_s0 + $0x180] sm:$0xff] }
  0x64   :  { %290 = vmatprep.mubr.f32.mxu0 %v33_v21  ;;  %450 = vmatprep.mubr.f32.mxu1 %v97_v22  ;;  %v126_v20 = vld [vmem:[%s2236_s0 + $0x380] sm:$0xff]  ;;  %v65_v21 = vld [vmem:[%s2236_s0 + $0x198] sm:$0xff] }
  0x65   :  { %v129_v22 = vld [vmem:[%s2236_s0 + $0x398] sm:$0xff] }
  0x67   :  { %291 = vmatmul.mubr.f32.gmra.mrb[18].mxu0 %v32_v23  ;;  %451 = vmatmul.mubr.f32.gmra.mrb[18].mxu1 %v96_v24  ;;  %v64_v23 = vld [vmem:[%s2236_s0 + $0x190] sm:$0xff] }
  0x68   :  { %295 = vmatprep.mubr.f32.mxu0 %v35_v25  ;;  %455 = vmatprep.mubr.f32.mxu1 %v99_v26  ;;  %v128_v24 = vld [vmem:[%s2236_s0 + $0x390] sm:$0xff]  ;;  %v67_v25 = vld [vmem:[%s2236_s0 + $0x1a8] sm:$0xff] }
  0x69   :  { %v131_v26 = vld [vmem:[%s2236_s0 + $0x3a8] sm:$0xff] }
  0x6b   :  { %296 = vmatmul.mubr.f32.gmra.mrb[20].mxu0 %v34_v27  ;;  %456 = vmatmul.mubr.f32.gmra.mrb[20].mxu1 %v98_v28  ;;  %v66_v27 = vld [vmem:[%s2236_s0 + $0x1a0] sm:$0xff] }
  0x6c   :  { %300 = vmatprep.mubr.f32.mxu0 %v37_v29  ;;  %460 = vmatprep.mubr.f32.mxu1 %v101_v30  ;;  %v130_v28 = vld [vmem:[%s2236_s0 + $0x3a0] sm:$0xff]  ;;  %v69_v29 = vld [vmem:[%s2236_s0 + $0x1b8] sm:$0xff] }
  0x6d   :  { %v133_v30 = vld [vmem:[%s2236_s0 + $0x3b8] sm:$0xff] }
  0x6f   :  { %301 = vmatmul.mubr.f32.gmra.mrb[22].mxu0 %v36_v31  ;;  %461 = vmatmul.mubr.f32.gmra.mrb[22].mxu1 %v100_v32  ;;  %v68_v31 = vld [vmem:[%s2236_s0 + $0x1b0] sm:$0xff] }
  0x70   :  { %305 = vmatprep.mubr.f32.mxu0 %v39_v33  ;;  %465 = vmatprep.mubr.f32.mxu1 %v103_v34  ;;  %v132_v32 = vld [vmem:[%s2236_s0 + $0x3b0] sm:$0xff]  ;;  %v71_v33 = vld [vmem:[%s2236_s0 + $0x1c8] sm:$0xff] }
  0x71   :  { %v135_v34 = vld [vmem:[%s2236_s0 + $0x3c8] sm:$0xff] }
  0x73   :  { %306 = vmatmul.mubr.f32.gmra.mrb[24].mxu0 %v38_v35  ;;  %466 = vmatmul.mubr.f32.gmra.mrb[24].mxu1 %v102_v36  ;;  %v70_v35 = vld [vmem:[%s2236_s0 + $0x1c0] sm:$0xff] }
  0x74   :  { %310 = vmatprep.mubr.f32.mxu0 %v41_v37  ;;  %470 = vmatprep.mubr.f32.mxu1 %v105_v38  ;;  %v134_v36 = vld [vmem:[%s2236_s0 + $0x3c0] sm:$0xff]  ;;  %v73_v37 = vld [vmem:[%s2236_s0 + $0x1d8] sm:$0xff] }
  0x75   :  { %v137_v38 = vld [vmem:[%s2236_s0 + $0x3d8] sm:$0xff] }
  0x77   :  { %311 = vmatmul.mubr.f32.gmra.mrb[26].mxu0 %v40_v39  ;;  %471 = vmatmul.mubr.f32.gmra.mrb[26].mxu1 %v104_v40  ;;  %v72_v39 = vld [vmem:[%s2236_s0 + $0x1d0] sm:$0xff] }
  0x78   :  { %315 = vmatprep.mubr.f32.mxu0 %v43_v41  ;;  %475 = vmatprep.mubr.f32.mxu1 %v107_v42  ;;  %v136_v40 = vld [vmem:[%s2236_s0 + $0x3d0] sm:$0xff]  ;;  %v75_v41 = vld [vmem:[%s2236_s0 + $0x1e8] sm:$0xff] }
  0x79   :  { %v139_v42 = vld [vmem:[%s2236_s0 + $0x3e8] sm:$0xff] }
  0x7b   :  { %316 = vmatmul.mubr.f32.gmra.mrb[28].mxu0 %v42_v43  ;;  %476 = vmatmul.mubr.f32.gmra.mrb[28].mxu1 %v106_v44  ;;  %v74_v43 = vld [vmem:[%s2236_s0 + $0x1e0] sm:$0xff] }
  0x7c   :  { %320 = vmatprep.mubr.f32.mxu0 %v45_v45  ;;  %480 = vmatprep.mubr.f32.mxu1 %v109_v46  ;;  %v138_v44 = vld [vmem:[%s2236_s0 + $0x3e0] sm:$0xff]  ;;  %v77_v45 = vld [vmem:[%s2236_s0 + $0x1f8] sm:$0xff] }
  0x7d   :  { %v141_v46 = vld [vmem:[%s2236_s0 + $0x3f8] sm:$0xff] }
  0x7f   :  { %321 = vmatmul.mubr.f32.gmra.mrb[30].mxu0 %v44_v47  ;;  %481 = vmatmul.mubr.f32.gmra.mrb[30].mxu1 %v108_v48  ;;  %v76_v47 = vld [vmem:[%s2236_s0 + $0x1f0] sm:$0xff] }
  0x80   :  { %325 = vmatprep.mubr.f32.mxu0 %v47_v49  ;;  %485 = vmatprep.mubr.f32.mxu1 %v111_v50  ;;  %v140_v48 = vld [vmem:[%s2236_s0 + $0x3f0] sm:$0xff]  ;;  %v1702_v49 = vld [vmem:[%s2237_s2] ss:$0 sm:$0xff] }
  0x83   :  { %326 = vmatmul.mubr.f32.gmra.mrb[32].mxu0 %v46_v51  ;;  %486 = vmatmul.mubr.f32.gmra.mrb[32].mxu1 %v110_v52 }
  0x84   :  { %330 = vmatprep.mubr.f32.mxu0 %v49_v53  ;;  %490 = vmatprep.mubr.f32.mxu1 %v113_v54 }
  0x87   :  { %331 = vmatmul.mubr.f32.gmra.mrb[34].mxu0 %v48_v55  ;;  %491 = vmatmul.mubr.f32.gmra.mrb[34].mxu1 %v112_v56 }
  0x88   :  { %335 = vmatprep.mubr.f32.mxu0 %v51_v57  ;;  %495 = vmatprep.mubr.f32.mxu1 %v115_v58 }
  0x8b   :  { %336 = vmatmul.mubr.f32.gmra.mrb[36].mxu0 %v50_v59  ;;  %496 = vmatmul.mubr.f32.gmra.mrb[36].mxu1 %v114_v60 }
  0x8c   :  { %340 = vmatprep.mubr.f32.mxu0 %v53_v61  ;;  %500 = vmatprep.mubr.f32.mxu1 %v117_v62 }
  0x8f   :  { %341 = vmatmul.mubr.f32.gmra.mrb[38].mxu0 %v52_v63  ;;  %501 = vmatmul.mubr.f32.gmra.mrb[38].mxu1 %v116_v0 }
  0x90   :  { %345 = vmatprep.mubr.f32.mxu0 %v55_v1  ;;  %505 = vmatprep.mubr.f32.mxu1 %v119_v2 }
  0x93   :  { %346 = vmatmul.mubr.f32.gmra.mrb[40].mxu0 %v54_v3  ;;  %506 = vmatmul.mubr.f32.gmra.mrb[40].mxu1 %v118_v4 }
  0x94   :  { %350 = vmatprep.mubr.f32.mxu0 %v57_v5  ;;  %510 = vmatprep.mubr.f32.mxu1 %v121_v6 }
  0x97   :  { %351 = vmatmul.mubr.f32.gmra.mrb[42].mxu0 %v56_v7  ;;  %511 = vmatmul.mubr.f32.gmra.mrb[42].mxu1 %v120_v8 }
  0x98   :  { %355 = vmatprep.mubr.f32.mxu0 %v59_v9  ;;  %515 = vmatprep.mubr.f32.mxu1 %v123_v10 }
  0x9b   :  { %356 = vmatmul.mubr.f32.gmra.mrb[44].mxu0 %v58_v11  ;;  %516 = vmatmul.mubr.f32.gmra.mrb[44].mxu1 %v122_v12 }
  0x9c   :  { %360 = vmatprep.mubr.f32.mxu0 %v61_v13  ;;  %520 = vmatprep.mubr.f32.mxu1 %v125_v14 }
  0x9f   :  { %361 = vmatmul.mubr.f32.gmra.mrb[46].mxu0 %v60_v15  ;;  %521 = vmatmul.mubr.f32.gmra.mrb[46].mxu1 %v124_v16 }
  0xa0   :  { %365 = vmatprep.mubr.f32.mxu0 %v63_v17  ;;  %525 = vmatprep.mubr.f32.mxu1 %v127_v18 }
  0xa3   :  { %366 = vmatmul.mubr.f32.gmra.mrb[48].mxu0 %v62_v19  ;;  %526 = vmatmul.mubr.f32.gmra.mrb[48].mxu1 %v126_v20 }
  0xa4   :  { %370 = vmatprep.mubr.f32.mxu0 %v65_v21  ;;  %530 = vmatprep.mubr.f32.mxu1 %v129_v22 }
  0xa7   :  { %371 = vmatmul.mubr.f32.gmra.mrb[50].mxu0 %v64_v23  ;;  %531 = vmatmul.mubr.f32.gmra.mrb[50].mxu1 %v128_v24 }
  0xa8   :  { %375 = vmatprep.mubr.f32.mxu0 %v67_v25  ;;  %535 = vmatprep.mubr.f32.mxu1 %v131_v26 }
  0xab   :  { %376 = vmatmul.mubr.f32.gmra.mrb[52].mxu0 %v66_v27  ;;  %536 = vmatmul.mubr.f32.gmra.mrb[52].mxu1 %v130_v28 }
  0xac   :  { %380 = vmatprep.mubr.f32.mxu0 %v69_v29  ;;  %540 = vmatprep.mubr.f32.mxu1 %v133_v30 }
  0xaf   :  { %381 = vmatmul.mubr.f32.gmra.mrb[54].mxu0 %v68_v31  ;;  %541 = vmatmul.mubr.f32.gmra.mrb[54].mxu1 %v132_v32 }
  0xb0   :  { %385 = vmatprep.mubr.f32.mxu0 %v71_v33  ;;  %545 = vmatprep.mubr.f32.mxu1 %v135_v34 }
  0xb3   :  { %386 = vmatmul.mubr.f32.gmra.mrb[56].mxu0 %v70_v35  ;;  %546 = vmatmul.mubr.f32.gmra.mrb[56].mxu1 %v134_v36 }
  0xb4   :  { %390 = vmatprep.mubr.f32.mxu0 %v73_v37  ;;  %550 = vmatprep.mubr.f32.mxu1 %v137_v38 }
  0xb7   :  { %391 = vmatmul.mubr.f32.gmra.mrb[58].mxu0 %v72_v39  ;;  %551 = vmatmul.mubr.f32.gmra.mrb[58].mxu1 %v136_v40 }
  0xb8   :  { %395 = vmatprep.mubr.f32.mxu0 %v75_v41  ;;  %555 = vmatprep.mubr.f32.mxu1 %v139_v42 }
  0xbb   :  { %396 = vmatmul.mubr.f32.gmra.mrb[60].mxu0 %v74_v43  ;;  %556 = vmatmul.mubr.f32.gmra.mrb[60].mxu1 %v138_v44 }
  0xbc   :  { %400 = vmatprep.mubr.f32.mxu0 %v77_v45  ;;  %560 = vmatprep.mubr.f32.mxu1 %v141_v46 }
  0xbf   :  { %401 = vmatmul.mubr.f32.gmra.mrb[62].mxu0 %v76_v47  ;;  %561 = vmatmul.mubr.f32.gmra.mrb[62].mxu1 %v140_v48 }
 0x116   :  { %v247_v50 = vpop.f32.mrb[0].mxu0  ;;  %v407_v51 = vpop.f32.mrb[0].mxu1 }
 0x117   :  { %v248_v52 = vadd.f32 %v1702_v49, %v247_v50  ;;  %v408_v53 = vadd.f32 %v1702_v49, %v407_v51  ;;  %v249_v54 = vpop.f32.mrb[1].mxu0  ;;  %v409_v55 = vpop.f32.mrb[1].mxu1 }
 0x119   :  { %v630_v56 = vmul.f32 0.70710677, %v248_v52  ;;  %v662_v57 = vmul.f32 0.70710677, %v408_v53  ;;  %v566_v20 = vmul.f32 0.5, %v248_v52  ;;  %v598_v22 = vmul.f32 0.5, %v408_v53 }
 0x11a   :  { %v252_v58 = vpop.f32.mrb[2].mxu0  ;;  %v412_v59 = vpop.f32.mrb[2].mxu1 }
 0x11b   :  { %1037 = verf.f32 %v630_v56  ;;  %v253_v60 = vadd.f32 %v1702_v49, %v252_v58  ;;  %v413_v61 = vadd.f32 %v1702_v49, %v412_v59  ;;  %v254_v62 = vpop.f32.mrb[3].mxu0  ;;  %v414_v63 = vpop.f32.mrb[3].mxu1 }
 0x11c   :  { %1039 = verf.f32 %v662_v57 }
 0x11d   :  { %v631_v0 = vmul.f32 0.70710677, %v253_v60  ;;  %v663_v1 = vmul.f32 0.70710677, %v413_v61  ;;  %v567_v33 = vmul.f32 0.5, %v253_v60  ;;  %v599_v37 = vmul.f32 0.5, %v413_v61 }
 0x11e   :  { %v257_v2 = vpop.f32.mrb[4].mxu0  ;;  %v417_v3 = vpop.f32.mrb[4].mxu1 }
 0x11f   :  { %1041 = verf.f32 %v631_v0  ;;  %v258_v4 = vadd.f32 %v1702_v49, %v257_v2  ;;  %v418_v5 = vadd.f32 %v1702_v49, %v417_v3  ;;  %v259_v6 = vpop.f32.mrb[5].mxu0  ;;  %v419_v7 = vpop.f32.mrb[5].mxu1 }
 0x120   :  { %1043 = verf.f32 %v663_v1 }
 0x121   :  { %v632_v8 = vmul.f32 0.70710677, %v258_v4  ;;  %v664_v9 = vmul.f32 0.70710677, %v418_v5  ;;  %v568_v50 = vmul.f32 0.5, %v258_v4  ;;  %v600_v54 = vmul.f32 0.5, %v418_v5 }
 0x122   :  { %v262_v10 = vpop.f32.mrb[6].mxu0  ;;  %v422_v11 = vpop.f32.mrb[6].mxu1 }
 0x123   :  { %1045 = verf.f32 %v632_v8  ;;  %v1711_v12 = vadd.f32 %v1702_v49, %v262_v10  ;;  %v1714_v13 = vadd.f32 %v1702_v49, %v422_v11  ;;  %v264_v14 = vpop.f32.mrb[7].mxu0  ;;  %v424_v15 = vpop.f32.mrb[7].mxu1 }
 0x124   :  { %1047 = verf.f32 %v664_v9 }
 0x125   :  { %v1038_v16 = vpop.eup %1037  ;;  %v633_v17 = vmul.f32 0.70710677, %v1711_v12  ;;  %v665_v18 = vmul.f32 0.70710677, %v1714_v13  ;;  %v569_v2 = vmul.f32 0.5, %v1711_v12  ;;  %v601_v6 = vmul.f32 0.5, %v1714_v13 }
 0x126   :  { %v1040_v19 = vpop.eup %1039  ;;  %v758_v21 = vadd.f32 1.0, %v1038_v16  ;;  %v267_v23 = vpop.f32.mrb[8].mxu0 }
 0x127   :  { %v427_v24 = vpop.f32.mrb[8].mxu1  ;;  %v790_v25 = vadd.f32 1.0, %v1040_v19  ;;  %1049 = verf.f32 %v633_v17  ;;  %v1719_v26 = vadd.f32 %v1702_v49, %v267_v23  ;;  %v269_v28 = vpop.f32.mrb[9].mxu0 }
 0x128   :  { %v1722_v27 = vadd.f32 %v1702_v49, %v427_v24  ;;  %v429_v29 = vpop.f32.mrb[9].mxu1  ;;  %v822_v30 = vmul.f32 %v758_v21, %v566_v20  ;;  %1051 = verf.f32 %v665_v18 }
 0x129   :  { %v1042_v31 = vpop.eup %1041  ;;  %v854_v32 = vmul.f32 %v790_v25, %v598_v22  ;;  %v634_v34 = vmul.f32 0.70710677, %v1719_v26  ;;  %v570_v18 = vmul.f32 0.5, %v1719_v26 }
 0x12a   :  { %v1044_v35 = vpop.eup %1043  ;;  %887 = vst.msk [vmem:[%s2238_s3] sm:$0xff] %vm886_vm0, %v822_v30  ;;  %v759_v36 = vadd.f32 1.0, %v1042_v31  ;;  %v666_v38 = vmul.f32 0.70710677, %v1722_v27  ;;  %v272_v39 = vpop.f32.mrb[10].mxu0  ;;  %v602_v22 = vmul.f32 0.5, %v1722_v27 }
 0x12b   :  { %v432_v40 = vpop.f32.mrb[10].mxu1  ;;  %919 = vst.msk [vmem:[%s2238_s3 + $0x100] sm:$0xff] %vm886_vm0, %v854_v32  ;;  %v791_v41 = vadd.f32 1.0, %v1044_v35  ;;  %1053 = verf.f32 %v634_v34  ;;  %v1735_v42 = vadd.f32 %v1702_v49, %v272_v39  ;;  %v274_v44 = vpop.f32.mrb[11].mxu0 }
 0x12c   :  { %v1738_v43 = vadd.f32 %v1702_v49, %v432_v40  ;;  %v434_v45 = vpop.f32.mrb[11].mxu1  ;;  %v823_v46 = vmul.f32 %v759_v36, %v567_v33  ;;  %1055 = verf.f32 %v666_v38 }
 0x12d   :  { %v1046_v47 = vpop.eup %1045  ;;  %v855_v48 = vmul.f32 %v791_v41, %v599_v37  ;;  %v635_v51 = vmul.f32 0.70710677, %v1735_v42  ;;  %v571_v34 = vmul.f32 0.5, %v1735_v42 }
 0x12e   :  { %v1048_v52 = vpop.eup %1047  ;;  %888 = vst.msk [vmem:[%s2238_s3 + $0x8] sm:$0xff] %vm886_vm0, %v823_v46  ;;  %v760_v53 = vadd.f32 1.0, %v1046_v47  ;;  %v667_v55 = vmul.f32 0.70710677, %v1738_v43  ;;  %v277_v56 = vpop.f32.mrb[12].mxu0  ;;  %v603_v38 = vmul.f32 0.5, %v1738_v43 }
 0x12f   :  { %v437_v57 = vpop.f32.mrb[12].mxu1  ;;  %920 = vst.msk [vmem:[%s2238_s3 + $0x108] sm:$0xff] %vm886_vm0, %v855_v48  ;;  %v792_v58 = vadd.f32 1.0, %v1048_v52  ;;  %1057 = verf.f32 %v635_v51  ;;  %v1751_v59 = vadd.f32 %v1702_v49, %v277_v56  ;;  %v279_v61 = vpop.f32.mrb[13].mxu0 }
 0x130   :  { %v1754_v60 = vadd.f32 %v1702_v49, %v437_v57  ;;  %v439_v62 = vpop.f32.mrb[13].mxu1  ;;  %v824_v63 = vmul.f32 %v760_v53, %v568_v50  ;;  %1059 = verf.f32 %v667_v55 }
 0x131   :  { %v1050_v0 = vpop.eup %1049  ;;  %v856_v1 = vmul.f32 %v792_v58, %v600_v54  ;;  %v636_v3 = vmul.f32 0.70710677, %v1751_v59  ;;  %v572_v51 = vmul.f32 0.5, %v1751_v59 }
 0x132   :  { %v1052_v4 = vpop.eup %1051  ;;  %889 = vst.msk [vmem:[%s2238_s3 + $0x10] sm:$0xff] %vm886_vm0, %v824_v63  ;;  %v761_v5 = vadd.f32 1.0, %v1050_v0  ;;  %v668_v7 = vmul.f32 0.70710677, %v1754_v60  ;;  %v282_v8 = vpop.f32.mrb[14].mxu0  ;;  %v604_v55 = vmul.f32 0.5, %v1754_v60 }
 0x133   :  { %v442_v9 = vpop.f32.mrb[14].mxu1  ;;  %921 = vst.msk [vmem:[%s2238_s3 + $0x110] sm:$0xff] %vm886_vm0, %v856_v1  ;;  %v793_v10 = vadd.f32 1.0, %v1052_v4  ;;  %1061 = verf.f32 %v636_v3  ;;  %v1769_v11 = vadd.f32 %v1702_v49, %v282_v8  ;;  %v284_v14 = vpop.f32.mrb[15].mxu0 }
 0x134   :  { %v1772_v12 = vadd.f32 %v1702_v49, %v442_v9  ;;  %v444_v15 = vpop.f32.mrb[15].mxu1  ;;  %v825_v13 = vmul.f32 %v761_v5, %v569_v2  ;;  %1063 = verf.f32 %v668_v7 }
 0x135   :  { %v1054_v16 = vpop.eup %1053  ;;  %v857_v17 = vmul.f32 %v793_v10, %v601_v6  ;;  %v637_v19 = vmul.f32 0.70710677, %v1769_v11  ;;  %v573_v3 = vmul.f32 0.5, %v1769_v11 }
 0x136   :  { %v1056_v20 = vpop.eup %1055  ;;  %890 = vst.msk [vmem:[%s2238_s3 + $0x18] sm:$0xff] %vm886_vm0, %v825_v13  ;;  %v762_v21 = vadd.f32 1.0, %v1054_v16  ;;  %v669_v23 = vmul.f32 0.70710677, %v1772_v12  ;;  %v287_v24 = vpop.f32.mrb[16].mxu0  ;;  %v605_v7 = vmul.f32 0.5, %v1772_v12 }
 0x137   :  { %v447_v25 = vpop.f32.mrb[16].mxu1  ;;  %922 = vst.msk [vmem:[%s2238_s3 + $0x118] sm:$0xff] %vm886_vm0, %v857_v17  ;;  %v794_v26 = vadd.f32 1.0, %v1056_v20  ;;  %1065 = verf.f32 %v637_v19  ;;  %v1787_v28 = vadd.f32 %v1702_v49, %v287_v24  ;;  %v289_v30 = vpop.f32.mrb[17].mxu0 }
 0x138   :  { %v1790_v29 = vadd.f32 %v1702_v49, %v447_v25  ;;  %v449_v31 = vpop.f32.mrb[17].mxu1  ;;  %v826_v27 = vmul.f32 %v762_v21, %v570_v18  ;;  %1067 = verf.f32 %v669_v23 }
 0x139   :  { %v1058_v32 = vpop.eup %1057  ;;  %v858_v33 = vmul.f32 %v794_v26, %v602_v22  ;;  %v638_v35 = vmul.f32 0.70710677, %v1787_v28  ;;  %v574_v19 = vmul.f32 0.5, %v1787_v28 }
 0x13a   :  { %v1060_v36 = vpop.eup %1059  ;;  %891 = vst.msk [vmem:[%s2238_s3 + $0x20] sm:$0xff] %vm886_vm0, %v826_v27  ;;  %v763_v37 = vadd.f32 1.0, %v1058_v32  ;;  %v670_v39 = vmul.f32 0.70710677, %v1790_v29  ;;  %v292_v40 = vpop.f32.mrb[18].mxu0  ;;  %v606_v23 = vmul.f32 0.5, %v1790_v29 }
 0x13b   :  { %v452_v41 = vpop.f32.mrb[18].mxu1  ;;  %923 = vst.msk [vmem:[%s2238_s3 + $0x120] sm:$0xff] %vm886_vm0, %v858_v33  ;;  %v795_v42 = vadd.f32 1.0, %v1060_v36  ;;  %1069 = verf.f32 %v638_v35  ;;  %v1805_v44 = vadd.f32 %v1702_v49, %v292_v40  ;;  %v294_v46 = vpop.f32.mrb[19].mxu0 }
 0x13c   :  { %v1808_v45 = vadd.f32 %v1702_v49, %v452_v41  ;;  %v454_v47 = vpop.f32.mrb[19].mxu1  ;;  %v827_v43 = vmul.f32 %v763_v37, %v571_v34  ;;  %1071 = verf.f32 %v670_v39 }
 0x13d   :  { %v1062_v48 = vpop.eup %1061  ;;  %v859_v50 = vmul.f32 %v795_v42, %v603_v38  ;;  %v639_v52 = vmul.f32 0.70710677, %v1805_v44  ;;  %v575_v35 = vmul.f32 0.5, %v1805_v44 }
 0x13e   :  { %v1064_v53 = vpop.eup %1063  ;;  %892 = vst.msk [vmem:[%s2238_s3 + $0x28] sm:$0xff] %vm886_vm0, %v827_v43  ;;  %v764_v54 = vadd.f32 1.0, %v1062_v48  ;;  %v671_v56 = vmul.f32 0.70710677, %v1808_v45  ;;  %v297_v57 = vpop.f32.mrb[20].mxu0  ;;  %v607_v39 = vmul.f32 0.5, %v1808_v45 }
 0x13f   :  { %v457_v58 = vpop.f32.mrb[20].mxu1  ;;  %924 = vst.msk [vmem:[%s2238_s3 + $0x128] sm:$0xff] %vm886_vm0, %v859_v50  ;;  %v796_v59 = vadd.f32 1.0, %v1064_v53  ;;  %1073 = verf.f32 %v639_v52  ;;  %v1823_v61 = vadd.f32 %v1702_v49, %v297_v57  ;;  %v299_v63 = vpop.f32.mrb[21].mxu0 }
 0x140   :  { %v1826_v62 = vadd.f32 %v1702_v49, %v457_v58  ;;  %v459_v0 = vpop.f32.mrb[21].mxu1  ;;  %v828_v60 = vmul.f32 %v764_v54, %v572_v51  ;;  %1075 = verf.f32 %v671_v56 }
 0x141   :  { %v1066_v1 = vpop.eup %1065  ;;  %v860_v2 = vmul.f32 %v796_v59, %v604_v55  ;;  %v640_v4 = vmul.f32 0.70710677, %v1823_v61  ;;  %v576_v52 = vmul.f32 0.5, %v1823_v61 }
 0x142   :  { %v1068_v5 = vpop.eup %1067  ;;  %893 = vst.msk [vmem:[%s2238_s3 + $0x30] sm:$0xff] %vm886_vm0, %v828_v60  ;;  %v765_v6 = vadd.f32 1.0, %v1066_v1  ;;  %v672_v8 = vmul.f32 0.70710677, %v1826_v62  ;;  %v302_v9 = vpop.f32.mrb[22].mxu0  ;;  %v608_v56 = vmul.f32 0.5, %v1826_v62 }
 0x143   :  { %v462_v10 = vpop.f32.mrb[22].mxu1  ;;  %925 = vst.msk [vmem:[%s2238_s3 + $0x130] sm:$0xff] %vm886_vm0, %v860_v2  ;;  %v797_v11 = vadd.f32 1.0, %v1068_v5  ;;  %1077 = verf.f32 %v640_v4  ;;  %v1841_v14 = vadd.f32 %v1702_v49, %v302_v9  ;;  %v304_v13 = vpop.f32.mrb[23].mxu0 }
 0x144   :  { %v1844_v15 = vadd.f32 %v1702_v49, %v462_v10  ;;  %v464_v16 = vpop.f32.mrb[23].mxu1  ;;  %v829_v12 = vmul.f32 %v765_v6, %v573_v3  ;;  %1079 = verf.f32 %v672_v8 }
 0x145   :  { %v1070_v17 = vpop.eup %1069  ;;  %v861_v18 = vmul.f32 %v797_v11, %v605_v7  ;;  %v641_v20 = vmul.f32 0.70710677, %v1841_v14  ;;  %v577_v4 = vmul.f32 0.5, %v1841_v14 }
 0x146   :  { %v1072_v21 = vpop.eup %1071  ;;  %894 = vst.msk [vmem:[%s2238_s3 + $0x38] sm:$0xff] %vm886_vm0, %v829_v12  ;;  %v766_v22 = vadd.f32 1.0, %v1070_v17  ;;  %v673_v24 = vmul.f32 0.70710677, %v1844_v15  ;;  %v307_v25 = vpop.f32.mrb[24].mxu0  ;;  %v609_v8 = vmul.f32 0.5, %v1844_v15 }
 0x147   :  { %v467_v26 = vpop.f32.mrb[24].mxu1  ;;  %926 = vst.msk [vmem:[%s2238_s3 + $0x138] sm:$0xff] %vm886_vm0, %v861_v18  ;;  %v798_v28 = vadd.f32 1.0, %v1072_v21  ;;  %1081 = verf.f32 %v641_v20  ;;  %v1859_v30 = vadd.f32 %v1702_v49, %v307_v25  ;;  %v309_v27 = vpop.f32.mrb[25].mxu0 }
 0x148   :  { %v1862_v31 = vadd.f32 %v1702_v49, %v467_v26  ;;  %v469_v32 = vpop.f32.mrb[25].mxu1  ;;  %v830_v29 = vmul.f32 %v766_v22, %v574_v19  ;;  %1083 = verf.f32 %v673_v24 }
 0x149   :  { %v1074_v33 = vpop.eup %1073  ;;  %v862_v34 = vmul.f32 %v798_v28, %v606_v23  ;;  %v642_v36 = vmul.f32 0.70710677, %v1859_v30  ;;  %v578_v20 = vmul.f32 0.5, %v1859_v30 }
 0x14a   :  { %v1076_v37 = vpop.eup %1075  ;;  %895 = vst.msk [vmem:[%s2238_s3 + $0x40] sm:$0xff] %vm886_vm0, %v830_v29  ;;  %v767_v38 = vadd.f32 1.0, %v1074_v33  ;;  %v674_v40 = vmul.f32 0.70710677, %v1862_v31  ;;  %v312_v41 = vpop.f32.mrb[26].mxu0  ;;  %v610_v24 = vmul.f32 0.5, %v1862_v31 }
 0x14b   :  { %v472_v42 = vpop.f32.mrb[26].mxu1  ;;  %927 = vst.msk [vmem:[%s2238_s3 + $0x140] sm:$0xff] %vm886_vm0, %v862_v34  ;;  %v799_v44 = vadd.f32 1.0, %v1076_v37  ;;  %1085 = verf.f32 %v642_v36  ;;  %v1877_v46 = vadd.f32 %v1702_v49, %v312_v41  ;;  %v314_v43 = vpop.f32.mrb[27].mxu0 }
 0x14c   :  { %v1880_v47 = vadd.f32 %v1702_v49, %v472_v42  ;;  %v474_v48 = vpop.f32.mrb[27].mxu1  ;;  %v831_v45 = vmul.f32 %v767_v38, %v575_v35  ;;  %1087 = verf.f32 %v674_v40 }
 0x14d   :  { %v1078_v50 = vpop.eup %1077  ;;  %v863_v51 = vmul.f32 %v799_v44, %v607_v39  ;;  %v643_v53 = vmul.f32 0.70710677, %v1877_v46  ;;  %v579_v36 = vmul.f32 0.5, %v1877_v46 }
 0x14e   :  { %v1080_v54 = vpop.eup %1079  ;;  %896 = vst.msk [vmem:[%s2238_s3 + $0x48] sm:$0xff] %vm886_vm0, %v831_v45  ;;  %v768_v55 = vadd.f32 1.0, %v1078_v50  ;;  %v675_v57 = vmul.f32 0.70710677, %v1880_v47  ;;  %v317_v58 = vpop.f32.mrb[28].mxu0  ;;  %v611_v40 = vmul.f32 0.5, %v1880_v47 }
 0x14f   :  { %v477_v59 = vpop.f32.mrb[28].mxu1  ;;  %928 = vst.msk [vmem:[%s2238_s3 + $0x148] sm:$0xff] %vm886_vm0, %v863_v51  ;;  %v800_v61 = vadd.f32 1.0, %v1080_v54  ;;  %1089 = verf.f32 %v643_v53  ;;  %v1895_v63 = vadd.f32 %v1702_v49, %v317_v58  ;;  %v319_v60 = vpop.f32.mrb[29].mxu0 }
 0x150   :  { %v1898_v0 = vadd.f32 %v1702_v49, %v477_v59  ;;  %v479_v1 = vpop.f32.mrb[29].mxu1  ;;  %v832_v62 = vmul.f32 %v768_v55, %v576_v52  ;;  %1091 = verf.f32 %v675_v57 }
 0x151   :  { %v1082_v2 = vpop.eup %1081  ;;  %v864_v3 = vmul.f32 %v800_v61, %v608_v56  ;;  %v644_v5 = vmul.f32 0.70710677, %v1895_v63  ;;  %v580_v53 = vmul.f32 0.5, %v1895_v63 }
 0x152   :  { %v1084_v6 = vpop.eup %1083  ;;  %897 = vst.msk [vmem:[%s2238_s3 + $0x50] sm:$0xff] %vm886_vm0, %v832_v62  ;;  %v769_v7 = vadd.f32 1.0, %v1082_v2  ;;  %v676_v9 = vmul.f32 0.70710677, %v1898_v0  ;;  %v322_v10 = vpop.f32.mrb[30].mxu0  ;;  %v612_v57 = vmul.f32 0.5, %v1898_v0 }
 0x153   :  { %v482_v11 = vpop.f32.mrb[30].mxu1  ;;  %929 = vst.msk [vmem:[%s2238_s3 + $0x150] sm:$0xff] %vm886_vm0, %v864_v3  ;;  %v801_v14 = vadd.f32 1.0, %v1084_v6  ;;  %1093 = verf.f32 %v644_v5  ;;  %v1913_v13 = vadd.f32 %v1702_v49, %v322_v10  ;;  %v324_v12 = vpop.f32.mrb[31].mxu0 }
 0x154   :  { %v1916_v16 = vadd.f32 %v1702_v49, %v482_v11  ;;  %v484_v17 = vpop.f32.mrb[31].mxu1  ;;  %v833_v15 = vmul.f32 %v769_v7, %v577_v4  ;;  %1095 = verf.f32 %v676_v9 }
 0x155   :  { %v1086_v18 = vpop.eup %1085  ;;  %v865_v19 = vmul.f32 %v801_v14, %v609_v8  ;;  %v645_v21 = vmul.f32 0.70710677, %v1913_v13  ;;  %v581_v5 = vmul.f32 0.5, %v1913_v13 }
 0x156   :  { %v1088_v22 = vpop.eup %1087  ;;  %898 = vst.msk [vmem:[%s2238_s3 + $0x58] sm:$0xff] %vm886_vm0, %v833_v15  ;;  %v770_v23 = vadd.f32 1.0, %v1086_v18  ;;  %v677_v25 = vmul.f32 0.70710677, %v1916_v16  ;;  %v327_v26 = vpop.f32.mrb[32].mxu0  ;;  %v613_v9 = vmul.f32 0.5, %v1916_v16 }
 0x157   :  { %v487_v28 = vpop.f32.mrb[32].mxu1  ;;  %930 = vst.msk [vmem:[%s2238_s3 + $0x158] sm:$0xff] %vm886_vm0, %v865_v19  ;;  %v802_v30 = vadd.f32 1.0, %v1088_v22  ;;  %1097 = verf.f32 %v645_v21  ;;  %v1931_v27 = vadd.f32 %v1702_v49, %v327_v26  ;;  %v329_v29 = vpop.f32.mrb[33].mxu0 }
 0x158   :  { %v1934_v32 = vadd.f32 %v1702_v49, %v487_v28  ;;  %v489_v33 = vpop.f32.mrb[33].mxu1  ;;  %v834_v31 = vmul.f32 %v770_v23, %v578_v20  ;;  %1099 = verf.f32 %v677_v25 }
 0x159   :  { %v1090_v34 = vpop.eup %1089  ;;  %v866_v35 = vmul.f32 %v802_v30, %v610_v24  ;;  %v646_v37 = vmul.f32 0.70710677, %v1931_v27  ;;  %v582_v21 = vmul.f32 0.5, %v1931_v27 }
 0x15a   :  { %v1092_v38 = vpop.eup %1091  ;;  %899 = vst.msk [vmem:[%s2238_s3 + $0x60] sm:$0xff] %vm886_vm0, %v834_v31  ;;  %v771_v39 = vadd.f32 1.0, %v1090_v34  ;;  %v678_v41 = vmul.f32 0.70710677, %v1934_v32  ;;  %v332_v42 = vpop.f32.mrb[34].mxu0  ;;  %v614_v25 = vmul.f32 0.5, %v1934_v32 }
 0x15b   :  { %v492_v44 = vpop.f32.mrb[34].mxu1  ;;  %931 = vst.msk [vmem:[%s2238_s3 + $0x160] sm:$0xff] %vm886_vm0, %v866_v35  ;;  %v803_v46 = vadd.f32 1.0, %v1092_v38  ;;  %1101 = verf.f32 %v646_v37  ;;  %v1949_v43 = vadd.f32 %v1702_v49, %v332_v42  ;;  %v334_v45 = vpop.f32.mrb[35].mxu0 }
 0x15c   :  { %v1952_v48 = vadd.f32 %v1702_v49, %v492_v44  ;;  %v494_v50 = vpop.f32.mrb[35].mxu1  ;;  %v835_v47 = vmul.f32 %v771_v39, %v579_v36  ;;  %1103 = verf.f32 %v678_v41 }
 0x15d   :  { %v1094_v51 = vpop.eup %1093  ;;  %v867_v52 = vmul.f32 %v803_v46, %v611_v40  ;;  %v647_v54 = vmul.f32 0.70710677, %v1949_v43  ;;  %v583_v37 = vmul.f32 0.5, %v1949_v43 }
 0x15e   :  { %v1096_v55 = vpop.eup %1095  ;;  %900 = vst.msk [vmem:[%s2238_s3 + $0x68] sm:$0xff] %vm886_vm0, %v835_v47  ;;  %v772_v56 = vadd.f32 1.0, %v1094_v51  ;;  %v679_v58 = vmul.f32 0.70710677, %v1952_v48  ;;  %v337_v59 = vpop.f32.mrb[36].mxu0  ;;  %v615_v41 = vmul.f32 0.5, %v1952_v48 }
 0x15f   :  { %v497_v61 = vpop.f32.mrb[36].mxu1  ;;  %932 = vst.msk [vmem:[%s2238_s3 + $0x168] sm:$0xff] %vm886_vm0, %v867_v52  ;;  %v804_v63 = vadd.f32 1.0, %v1096_v55  ;;  %1105 = verf.f32 %v647_v54  ;;  %v1967_v60 = vadd.f32 %v1702_v49, %v337_v59  ;;  %v339_v62 = vpop.f32.mrb[37].mxu0 }
 0x160   :  { %v1970_v1 = vadd.f32 %v1702_v49, %v497_v61  ;;  %v499_v2 = vpop.f32.mrb[37].mxu1  ;;  %v836_v0 = vmul.f32 %v772_v56, %v580_v53  ;;  %1107 = verf.f32 %v679_v58 }
 0x161   :  { %v1098_v3 = vpop.eup %1097  ;;  %v868_v4 = vmul.f32 %v804_v63, %v612_v57  ;;  %v648_v6 = vmul.f32 0.70710677, %v1967_v60  ;;  %v584_v54 = vmul.f32 0.5, %v1967_v60 }
 0x162   :  { %v1100_v7 = vpop.eup %1099  ;;  %901 = vst.msk [vmem:[%s2238_s3 + $0x70] sm:$0xff] %vm886_vm0, %v836_v0  ;;  %v773_v8 = vadd.f32 1.0, %v1098_v3  ;;  %v680_v10 = vmul.f32 0.70710677, %v1970_v1  ;;  %v342_v11 = vpop.f32.mrb[38].mxu0  ;;  %v616_v58 = vmul.f32 0.5, %v1970_v1 }
 0x163   :  { %v502_v14 = vpop.f32.mrb[38].mxu1  ;;  %933 = vst.msk [vmem:[%s2238_s3 + $0x170] sm:$0xff] %vm886_vm0, %v868_v4  ;;  %v805_v13 = vadd.f32 1.0, %v1100_v7  ;;  %1109 = verf.f32 %v648_v6  ;;  %v1985_v12 = vadd.f32 %v1702_v49, %v342_v11  ;;  %v344_v15 = vpop.f32.mrb[39].mxu0 }
 0x164   :  { %v1988_v17 = vadd.f32 %v1702_v49, %v502_v14  ;;  %v504_v18 = vpop.f32.mrb[39].mxu1  ;;  %v837_v16 = vmul.f32 %v773_v8, %v581_v5  ;;  %1111 = verf.f32 %v680_v10 }
 0x165   :  { %v1102_v19 = vpop.eup %1101  ;;  %v869_v20 = vmul.f32 %v805_v13, %v613_v9  ;;  %v649_v22 = vmul.f32 0.70710677, %v1985_v12  ;;  %v585_v6 = vmul.f32 0.5, %v1985_v12 }
 0x166   :  { %v1104_v23 = vpop.eup %1103  ;;  %902 = vst.msk [vmem:[%s2238_s3 + $0x78] sm:$0xff] %vm886_vm0, %v837_v16  ;;  %v774_v24 = vadd.f32 1.0, %v1102_v19  ;;  %v681_v26 = vmul.f32 0.70710677, %v1988_v17  ;;  %v347_v28 = vpop.f32.mrb[40].mxu0  ;;  %v617_v10 = vmul.f32 0.5, %v1988_v17 }
 0x167   :  { %v507_v30 = vpop.f32.mrb[40].mxu1  ;;  %934 = vst.msk [vmem:[%s2238_s3 + $0x178] sm:$0xff] %vm886_vm0, %v869_v20  ;;  %v806_v27 = vadd.f32 1.0, %v1104_v23  ;;  %1113 = verf.f32 %v649_v22  ;;  %v2003_v29 = vadd.f32 %v1702_v49, %v347_v28  ;;  %v349_v31 = vpop.f32.mrb[41].mxu0 }
 0x168   :  { %v2006_v33 = vadd.f32 %v1702_v49, %v507_v30  ;;  %v509_v34 = vpop.f32.mrb[41].mxu1  ;;  %v838_v32 = vmul.f32 %v774_v24, %v582_v21  ;;  %1115 = verf.f32 %v681_v26 }
 0x169   :  { %v1106_v35 = vpop.eup %1105  ;;  %v870_v36 = vmul.f32 %v806_v27, %v614_v25  ;;  %v650_v38 = vmul.f32 0.70710677, %v2003_v29  ;;  %v586_v22 = vmul.f32 0.5, %v2003_v29 }
 0x16a   :  { %v1108_v39 = vpop.eup %1107  ;;  %903 = vst.msk [vmem:[%s2238_s3 + $0x80] sm:$0xff] %vm886_vm0, %v838_v32  ;;  %v775_v40 = vadd.f32 1.0, %v1106_v35  ;;  %v682_v42 = vmul.f32 0.70710677, %v2006_v33  ;;  %v352_v44 = vpop.f32.mrb[42].mxu0  ;;  %v618_v26 = vmul.f32 0.5, %v2006_v33 }
 0x16b   :  { %v512_v46 = vpop.f32.mrb[42].mxu1  ;;  %935 = vst.msk [vmem:[%s2238_s3 + $0x180] sm:$0xff] %vm886_vm0, %v870_v36  ;;  %v807_v43 = vadd.f32 1.0, %v1108_v39  ;;  %1117 = verf.f32 %v650_v38  ;;  %v2021_v45 = vadd.f32 %v1702_v49, %v352_v44  ;;  %v354_v47 = vpop.f32.mrb[43].mxu0 }
 0x16c   :  { %v2024_v50 = vadd.f32 %v1702_v49, %v512_v46  ;;  %v514_v51 = vpop.f32.mrb[43].mxu1  ;;  %v839_v48 = vmul.f32 %v775_v40, %v583_v37  ;;  %1119 = verf.f32 %v682_v42 }
 0x16d   :  { %v1110_v52 = vpop.eup %1109  ;;  %v871_v53 = vmul.f32 %v807_v43, %v615_v41  ;;  %v651_v55 = vmul.f32 0.70710677, %v2021_v45  ;;  %v587_v38 = vmul.f32 0.5, %v2021_v45 }
 0x16e   :  { %v1112_v56 = vpop.eup %1111  ;;  %904 = vst.msk [vmem:[%s2238_s3 + $0x88] sm:$0xff] %vm886_vm0, %v839_v48  ;;  %v776_v57 = vadd.f32 1.0, %v1110_v52  ;;  %v683_v59 = vmul.f32 0.70710677, %v2024_v50  ;;  %v357_v61 = vpop.f32.mrb[44].mxu0  ;;  %v619_v42 = vmul.f32 0.5, %v2024_v50 }
 0x16f   :  { %v517_v63 = vpop.f32.mrb[44].mxu1  ;;  %936 = vst.msk [vmem:[%s2238_s3 + $0x188] sm:$0xff] %vm886_vm0, %v871_v53  ;;  %v808_v60 = vadd.f32 1.0, %v1112_v56  ;;  %1121 = verf.f32 %v651_v55  ;;  %v2039_v62 = vadd.f32 %v1702_v49, %v357_v61  ;;  %v359_v0 = vpop.f32.mrb[45].mxu0 }
 0x170   :  { %v2042_v2 = vadd.f32 %v1702_v49, %v517_v63  ;;  %v519_v3 = vpop.f32.mrb[45].mxu1  ;;  %v840_v1 = vmul.f32 %v776_v57, %v584_v54  ;;  %1123 = verf.f32 %v683_v59 }
 0x171   :  { %v1114_v4 = vpop.eup %1113  ;;  %v872_v5 = vmul.f32 %v808_v60, %v616_v58  ;;  %v652_v7 = vmul.f32 0.70710677, %v2039_v62  ;;  %v588_v55 = vmul.f32 0.5, %v2039_v62 }
 0x172   :  { %v1116_v8 = vpop.eup %1115  ;;  %905 = vst.msk [vmem:[%s2238_s3 + $0x90] sm:$0xff] %vm886_vm0, %v840_v1  ;;  %v777_v9 = vadd.f32 1.0, %v1114_v4  ;;  %v684_v11 = vmul.f32 0.70710677, %v2042_v2  ;;  %v362_v14 = vpop.f32.mrb[46].mxu0  ;;  %v620_v59 = vmul.f32 0.5, %v2042_v2 }
 0x173   :  { %v522_v13 = vpop.f32.mrb[46].mxu1  ;;  %937 = vst.msk [vmem:[%s2238_s3 + $0x190] sm:$0xff] %vm886_vm0, %v872_v5  ;;  %v809_v12 = vadd.f32 1.0, %v1116_v8  ;;  %1125 = verf.f32 %v652_v7  ;;  %v2057_v15 = vadd.f32 %v1702_v49, %v362_v14  ;;  %v364_v16 = vpop.f32.mrb[47].mxu0 }
 0x174   :  { %v2060_v18 = vadd.f32 %v1702_v49, %v522_v13  ;;  %v524_v19 = vpop.f32.mrb[47].mxu1  ;;  %v841_v17 = vmul.f32 %v777_v9, %v585_v6  ;;  %1127 = verf.f32 %v684_v11 }
 0x175   :  { %v1118_v20 = vpop.eup %1117  ;;  %v873_v21 = vmul.f32 %v809_v12, %v617_v10  ;;  %v653_v23 = vmul.f32 0.70710677, %v2057_v15  ;;  %v589_v7 = vmul.f32 0.5, %v2057_v15 }
 0x176   :  { %v1120_v24 = vpop.eup %1119  ;;  %906 = vst.msk [vmem:[%s2238_s3 + $0x98] sm:$0xff] %vm886_vm0, %v841_v17  ;;  %v778_v25 = vadd.f32 1.0, %v1118_v20  ;;  %v685_v28 = vmul.f32 0.70710677, %v2060_v18  ;;  %v367_v30 = vpop.f32.mrb[48].mxu0  ;;  %v621_v11 = vmul.f32 0.5, %v2060_v18 }
 0x177   :  { %v527_v27 = vpop.f32.mrb[48].mxu1  ;;  %938 = vst.msk [vmem:[%s2238_s3 + $0x198] sm:$0xff] %vm886_vm0, %v873_v21  ;;  %v810_v29 = vadd.f32 1.0, %v1120_v24  ;;  %1129 = verf.f32 %v653_v23  ;;  %v2075_v31 = vadd.f32 %v1702_v49, %v367_v30  ;;  %v369_v32 = vpop.f32.mrb[49].mxu0 }
 0x178   :  { %v2078_v34 = vadd.f32 %v1702_v49, %v527_v27  ;;  %v529_v35 = vpop.f32.mrb[49].mxu1  ;;  %v842_v33 = vmul.f32 %v778_v25, %v586_v22  ;;  %1131 = verf.f32 %v685_v28 }
 0x179   :  { %v1122_v36 = vpop.eup %1121  ;;  %v874_v37 = vmul.f32 %v810_v29, %v618_v26  ;;  %v654_v39 = vmul.f32 0.70710677, %v2075_v31  ;;  %v590_v23 = vmul.f32 0.5, %v2075_v31  ;;  %v1165_v31 = vld [vmem:[%s2237_s2] ss:$0 sm:$0xff] }
 0x17a   :  { %v1124_v40 = vpop.eup %1123  ;;  %907 = vst.msk [vmem:[%s2238_s3 + $0xa0] sm:$0xff] %vm886_vm0, %v842_v33  ;;  %v779_v41 = vadd.f32 1.0, %v1122_v36  ;;  %v686_v44 = vmul.f32 0.70710677, %v2078_v34  ;;  %v372_v46 = vpop.f32.mrb[50].mxu0 }
 0x17b   :  { %v532_v43 = vpop.f32.mrb[50].mxu1  ;;  %939 = vst.msk [vmem:[%s2238_s3 + $0x1a0] sm:$0xff] %vm886_vm0, %v874_v37  ;;  %v811_v45 = vadd.f32 1.0, %v1124_v40  ;;  %1133 = verf.f32 %v654_v39  ;;  %v2093_v47 = vadd.f32 %v1702_v49, %v372_v46  ;;  %v374_v48 = vpop.f32.mrb[51].mxu0 }
 0x17c   :  { %v2096_v51 = vadd.f32 %v1702_v49, %v532_v43  ;;  %v534_v52 = vpop.f32.mrb[51].mxu1  ;;  %v843_v50 = vmul.f32 %v779_v41, %v587_v38  ;;  %1135 = verf.f32 %v686_v44 }
 0x17d   :  { %v1126_v53 = vpop.eup %1125  ;;  %v875_v54 = vmul.f32 %v811_v45, %v619_v42  ;;  %v655_v56 = vmul.f32 0.70710677, %v2093_v47  ;;  %v591_v39 = vmul.f32 0.5, %v2093_v47 }
 0x17e   :  { %v1128_v57 = vpop.eup %1127  ;;  %908 = vst.msk [vmem:[%s2238_s3 + $0xa8] sm:$0xff] %vm886_vm0, %v843_v50  ;;  %v780_v58 = vadd.f32 1.0, %v1126_v53  ;;  %v687_v61 = vmul.f32 0.70710677, %v2096_v51  ;;  %v377_v63 = vpop.f32.mrb[52].mxu0  ;;  %v623_v44 = vmul.f32 0.5, %v2096_v51 }
 0x17f   :  { %v537_v60 = vpop.f32.mrb[52].mxu1  ;;  %940 = vst.msk [vmem:[%s2238_s3 + $0x1a8] sm:$0xff] %vm886_vm0, %v875_v54  ;;  %v812_v62 = vadd.f32 1.0, %v1128_v57  ;;  %1137 = verf.f32 %v655_v56  ;;  %v2111_v0 = vadd.f32 %v1702_v49, %v377_v63  ;;  %v379_v1 = vpop.f32.mrb[53].mxu0 }
 0x180   :  { %v2114_v3 = vadd.f32 %v1702_v49, %v537_v60  ;;  %v539_v4 = vpop.f32.mrb[53].mxu1  ;;  %v844_v2 = vmul.f32 %v780_v58, %v588_v55  ;;  %1139 = verf.f32 %v687_v61 }
 0x181   :  { %v1130_v5 = vpop.eup %1129  ;;  %v876_v6 = vmul.f32 %v812_v62, %v620_v59  ;;  %v656_v8 = vmul.f32 0.70710677, %v2111_v0  ;;  %v592_v56 = vmul.f32 0.5, %v2111_v0 }
 0x182   :  { %v1132_v9 = vpop.eup %1131  ;;  %909 = vst.msk [vmem:[%s2238_s3 + $0xb0] sm:$0xff] %vm886_vm0, %v844_v2  ;;  %v781_v10 = vadd.f32 1.0, %v1130_v5  ;;  %v688_v14 = vmul.f32 0.70710677, %v2114_v3  ;;  %v382_v13 = vpop.f32.mrb[54].mxu0  ;;  %v624_v61 = vmul.f32 0.5, %v2114_v3 }
 0x183   :  { %v542_v12 = vpop.f32.mrb[54].mxu1  ;;  %941 = vst.msk [vmem:[%s2238_s3 + $0x1b0] sm:$0xff] %vm886_vm0, %v876_v6  ;;  %v813_v15 = vadd.f32 1.0, %v1132_v9  ;;  %1141 = verf.f32 %v656_v8  ;;  %v2129_v16 = vadd.f32 %v1702_v49, %v382_v13  ;;  %v384_v17 = vpop.f32.mrb[55].mxu0 }
 0x184   :  { %v2132_v19 = vadd.f32 %v1702_v49, %v542_v12  ;;  %v544_v20 = vpop.f32.mrb[55].mxu1  ;;  %v845_v18 = vmul.f32 %v781_v10, %v589_v7  ;;  %1143 = verf.f32 %v688_v14  ;;  %v622_v49 = vmul.f32 0.5, %v2078_v34 }
 0x185   :  { %v1134_v21 = vpop.eup %1133  ;;  %v877_v22 = vmul.f32 %v813_v15, %v621_v11  ;;  %v657_v24 = vmul.f32 0.70710677, %v2129_v16  ;;  %v593_v3 = vmul.f32 0.5, %v2129_v16 }
 0x186   :  { %v1136_v25 = vpop.eup %1135  ;;  %910 = vst.msk [vmem:[%s2238_s3 + $0xb8] sm:$0xff] %vm886_vm0, %v845_v18  ;;  %v782_v26 = vadd.f32 1.0, %v1134_v21  ;;  %v689_v28 = vmul.f32 0.70710677, %v2132_v19  ;;  %v387_v30 = vpop.f32.mrb[56].mxu0  ;;  %v625_v14 = vmul.f32 0.5, %v2132_v19 }
 0x187   :  { %v547_v27 = vpop.f32.mrb[56].mxu1  ;;  %942 = vst.msk [vmem:[%s2238_s3 + $0x1b8] sm:$0xff] %vm886_vm0, %v877_v22  ;;  %v814_v29 = vadd.f32 1.0, %v1136_v25  ;;  %1145 = verf.f32 %v657_v24  ;;  %v2149_v32 = vadd.f32 %v1165_v31, %v387_v30  ;;  %v389_v34 = vpop.f32.mrb[57].mxu0 }
 0x188   :  { %v2151_v35 = vadd.f32 %v1165_v31, %v547_v27  ;;  %v549_v33 = vpop.f32.mrb[57].mxu1  ;;  %v846_v36 = vmul.f32 %v782_v26, %v590_v23  ;;  %1147 = verf.f32 %v689_v28 }
 0x189   :  { %v1138_v37 = vpop.eup %1137  ;;  %v878_v38 = vmul.f32 %v814_v29, %v622_v49  ;;  %v658_v40 = vmul.f32 0.70710677, %v2149_v32  ;;  %v594_v26 = vmul.f32 0.5, %v2149_v32 }
 0x18a   :  { %v1140_v41 = vpop.eup %1139  ;;  %911 = vst.msk [vmem:[%s2238_s3 + $0xc0] sm:$0xff] %vm886_vm0, %v846_v36  ;;  %v783_v42 = vadd.f32 1.0, %v1138_v37  ;;  %v690_v46 = vmul.f32 0.70710677, %v2151_v35  ;;  %v392_v43 = vpop.f32.mrb[58].mxu0  ;;  %v626_v30 = vmul.f32 0.5, %v2151_v35 }
 0x18b   :  { %v552_v45 = vpop.f32.mrb[58].mxu1  ;;  %943 = vst.msk [vmem:[%s2238_s3 + $0x1c0] sm:$0xff] %vm886_vm0, %v878_v38  ;;  %v815_v47 = vadd.f32 1.0, %v1140_v41  ;;  %1149 = verf.f32 %v658_v40  ;;  %v2165_v48 = vadd.f32 %v1165_v31, %v392_v43  ;;  %v394_v50 = vpop.f32.mrb[59].mxu0 }
 0x18c   :  { %v2167_v52 = vadd.f32 %v1165_v31, %v552_v45  ;;  %v554_v53 = vpop.f32.mrb[59].mxu1  ;;  %v847_v54 = vmul.f32 %v783_v42, %v591_v39  ;;  %1151 = verf.f32 %v690_v46 }
 0x18d   :  { %v1142_v51 = vpop.eup %1141  ;;  %v879_v55 = vmul.f32 %v815_v47, %v623_v44  ;;  %v659_v57 = vmul.f32 0.70710677, %v2165_v48  ;;  %v595_v32 = vmul.f32 0.5, %v2165_v48 }
 0x18e   :  { %v1144_v58 = vpop.eup %1143  ;;  %912 = vst.msk [vmem:[%s2238_s3 + $0xc8] sm:$0xff] %vm886_vm0, %v847_v54  ;;  %v784_v59 = vadd.f32 1.0, %v1142_v51  ;;  %v691_v63 = vmul.f32 0.70710677, %v2167_v52  ;;  %v397_v60 = vpop.f32.mrb[60].mxu0  ;;  %v627_v35 = vmul.f32 0.5, %v2167_v52 }
 0x18f   :  { %v557_v62 = vpop.f32.mrb[60].mxu1  ;;  %944 = vst.msk [vmem:[%s2238_s3 + $0x1c8] sm:$0xff] %vm886_vm0, %v879_v55  ;;  %v816_v0 = vadd.f32 1.0, %v1144_v58  ;;  %1153 = verf.f32 %v659_v57  ;;  %v398_v1 = vadd.f32 %v1165_v31, %v397_v60  ;;  %v399_v2 = vpop.f32.mrb[61].mxu0 }
 0x190   :  { %v558_v4 = vadd.f32 %v1165_v31, %v557_v62  ;;  %v559_v5 = vpop.f32.mrb[61].mxu1  ;;  %v848_v6 = vmul.f32 %v784_v59, %v592_v56  ;;  %1155 = verf.f32 %v691_v63 }
 0x191   :  { %v1146_v7 = vpop.eup %1145  ;;  %v880_v8 = vmul.f32 %v816_v0, %v624_v61  ;;  %v660_v9 = vmul.f32 0.70710677, %v398_v1  ;;  %v596_v42 = vmul.f32 0.5, %v398_v1 }
 0x192   :  { %v1148_v10 = vpop.eup %1147  ;;  %913 = vst.msk [vmem:[%s2238_s3 + $0xd0] sm:$0xff] %vm886_vm0, %v848_v6  ;;  %v785_v11 = vadd.f32 1.0, %v1146_v7  ;;  %v692_v13 = vmul.f32 0.70710677, %v558_v4  ;;  %v402_v12 = vpop.f32.mrb[62].mxu0  ;;  %v628_v46 = vmul.f32 0.5, %v558_v4 }
 0x193   :  { %v562_v15 = vpop.f32.mrb[62].mxu1  ;;  %945 = vst.msk [vmem:[%s2238_s3 + $0x1d0] sm:$0xff] %vm886_vm0, %v880_v8  ;;  %v817_v17 = vadd.f32 1.0, %v1148_v10  ;;  %1157 = verf.f32 %v660_v9  ;;  %v403_v16 = vadd.f32 %v1165_v31, %v402_v12  ;;  %v404_v18 = vpop.f32.mrb[63].mxu0 }
 0x194   :  { %v563_v20 = vadd.f32 %v1165_v31, %v562_v15  ;;  %v564_v21 = vpop.f32.mrb[63].mxu1  ;;  %v849_v22 = vmul.f32 %v785_v11, %v593_v3  ;;  %1159 = verf.f32 %v692_v13 }
 0x195   :  { %v1150_v23 = vpop.eup %1149  ;;  %v881_v24 = vmul.f32 %v817_v17, %v625_v14  ;;  %v661_v25 = vmul.f32 0.70710677, %v403_v16  ;;  %v597_v50 = vmul.f32 0.5, %v403_v16 }
 0x196   :  { %v1152_v19 = vpop.eup %1151  ;;  %914 = vst.msk [vmem:[%s2238_s3 + $0xd8] sm:$0xff] %vm886_vm0, %v849_v22  ;;  %v786_v49 = vadd.f32 1.0, %v1150_v23  ;;  %v693_v28 = vmul.f32 0.70710677, %v563_v20  ;;  %v629_v54 = vmul.f32 0.5, %v563_v20 }
 0x197   :  { %946 = vst.msk [vmem:[%s2238_s3 + $0x1d8] sm:$0xff] %vm886_vm0, %v881_v24  ;;  %v818_v27 = vadd.f32 1.0, %v1152_v19  ;;  %1161 = verf.f32 %v661_v25 }
 0x198   :  { %v850_v29 = vmul.f32 %v786_v49, %v594_v26  ;;  %1163 = verf.f32 %v693_v28 }
 0x199   :  { %v1154_v31 = vpop.eup %1153  ;;  %v882_v34 = vmul.f32 %v818_v27, %v626_v30 }
 0x19a   :  { %v1156_v33 = vpop.eup %1155  ;;  %915 = vst.msk [vmem:[%s2238_s3 + $0xe0] sm:$0xff] %vm886_vm0, %v850_v29  ;;  %v787_v36 = vadd.f32 1.0, %v1154_v31 }
 0x19b   :  { %947 = vst.msk [vmem:[%s2238_s3 + $0x1e0] sm:$0xff] %vm886_vm0, %v882_v34  ;;  %v819_v37 = vadd.f32 1.0, %v1156_v33 }
 0x19c   :  { %v851_v38 = vmul.f32 %v787_v36, %v595_v32 }
 0x19d   :  { %v1158_v39 = vpop.eup %1157  ;;  %v883_v40 = vmul.f32 %v819_v37, %v627_v35 }
 0x19e   :  { %v1160_v41 = vpop.eup %1159  ;;  %916 = vst.msk [vmem:[%s2238_s3 + $0xe8] sm:$0xff] %vm886_vm0, %v851_v38  ;;  %v788_v44 = vadd.f32 1.0, %v1158_v39 }
 0x19f   :  { %948 = vst.msk [vmem:[%s2238_s3 + $0x1e8] sm:$0xff] %vm886_vm0, %v883_v40  ;;  %v820_v43 = vadd.f32 1.0, %v1160_v41 }
 0x1a0   :  { %v852_v45 = vmul.f32 %v788_v44, %v596_v42 }
 0x1a1   :  { %v1162_v47 = vpop.eup %1161  ;;  %v884_v48 = vmul.f32 %v820_v43, %v628_v46 }
 0x1a2   :  { %v1164_v52 = vpop.eup %1163  ;;  %917 = vst.msk [vmem:[%s2238_s3 + $0xf0] sm:$0xff] %vm886_vm0, %v852_v45  ;;  %v789_v53 = vadd.f32 1.0, %v1162_v47 }
 0x1a3   :  { %949 = vst.msk [vmem:[%s2238_s3 + $0x1f0] sm:$0xff] %vm886_vm0, %v884_v48  ;;  %v821_v51 = vadd.f32 1.0, %v1164_v52 }
 0x1a4   :  { %v853_v55 = vmul.f32 %v789_v53, %v597_v50 }
 0x1a5   :  { %v885_v56 = vmul.f32 %v821_v51, %v629_v54 }
 0x1a6   :  { %918 = vst.msk [vmem:[%s2238_s3 + $0xf8] sm:$0xff] %vm886_vm0, %v853_v55 }
 0x1a7   :  { %950 = vst.msk [vmem:[%s2238_s3 + $0x1f8] sm:$0xff] %vm886_vm0, %v885_v56 }

// kernel: encoder_forward.7
= control target key start
LH: loop header
LB: loop body
LE: loop exit
PB: predicated region body
PF: predicated region fallthrough
CT: control target
= control target key end

     0   :  { %vm519_vm0 = vcmask 523264   ;;  %s1286_s1 = inlined_call_operand.vmem [shape: f32[512,64], index: 1, kind: input, shape index: {}]   ;;  %s1287_s0 = inlined_call_operand.vmem [shape: f32[128,512], index: 0, kind: input, shape index: {}]   ;;  %s1288_s2 = inlined_call_operand.vmem [shape: f32[1,64], index: 2, kind: input, shape index: {}]   ;;  %s1289_s3 = inlined_call_operand.vmem [shape: f32[128,64], index: 3, kind: output, shape index: {}]  }
   0x1   :  { %v94_v0 = vld [vmem:[%s1286_s1 + $0x80] sm:$0xff]  ;;  %v95_v1 = vld [vmem:[%s1286_s1 + $0x88] sm:$0xff]  ;;  %v96_v11 = vld [vmem:[%s1286_s1 + $0x90] sm:$0xff] }
   0x2   :  { %v78_v2 = vld [vmem:[%s1286_s1] sm:$0xff]  ;;  %v701_v3 = vpack.c.bf16 %v95_v1, %v94_v0  ;;  %v79_v4 = vld [vmem:[%s1286_s1 + $0x8] sm:$0xff]  ;;  %v97_v13 = vld [vmem:[%s1286_s1 + $0x98] sm:$0xff] }
   0x3   :  { %v126_v5 = vld [vmem:[%s1286_s1 + $0x180] sm:$0xff]  ;;  %v127_v6 = vld [vmem:[%s1286_s1 + $0x188] sm:$0xff]  ;;  %v703_v7 = vpack.c.bf16 %v79_v4, %v78_v2  ;;  %v80_v14 = vld [vmem:[%s1286_s1 + $0x10] sm:$0xff]  ;;  %v705_v16 = vpack.c.bf16 %v97_v13, %v96_v11 }
   0x4   :  { %v733_v8 = vpack.c.bf16 %v127_v6, %v126_v5  ;;  %v110_v9 = vld [vmem:[%s1286_s1 + $0x100] sm:$0xff]  ;;  %v111_v10 = vld [vmem:[%s1286_s1 + $0x108] sm:$0xff]  ;;  %702 = vmatprep.subr.bf16.mxu0 %v701_v3  ;;  %v81_v15 = vld [vmem:[%s1286_s1 + $0x18] sm:$0xff] }
   0x5   :  { %v735_v12 = vpack.c.bf16 %v111_v10, %v110_v9  ;;  %704 = vmatpush3.bf16.msra.mxu0 %v703_v7  ;;  %v707_v17 = vpack.c.bf16 %v81_v15, %v80_v14  ;;  %v128_v18 = vld [vmem:[%s1286_s1 + $0x190] sm:$0xff]  ;;  %v129_v19 = vld [vmem:[%s1286_s1 + $0x198] sm:$0xff]  ;;  %v98_v23 = vld [vmem:[%s1286_s1 + $0xa0] sm:$0xff] }
   0x6   :  { %734 = vmatprep.subr.bf16.mxu1 %v733_v8  ;;  %v112_v20 = vld [vmem:[%s1286_s1 + $0x110] sm:$0xff]  ;;  %v737_v21 = vpack.c.bf16 %v129_v19, %v128_v18  ;;  %v113_v22 = vld [vmem:[%s1286_s1 + $0x118] sm:$0xff]  ;;  %v99_v24 = vld [vmem:[%s1286_s1 + $0xa8] sm:$0xff]  ;;  %706 = vmatprep.subr.bf16.mxu0 %v705_v16 }
   0x7   :  { %736 = vmatpush3.bf16.msra.mxu1 %v735_v12  ;;  %v739_v25 = vpack.c.bf16 %v113_v22, %v112_v20  ;;  %v709_v26 = vpack.c.bf16 %v99_v24, %v98_v23  ;;  %v82_v27 = vld [vmem:[%s1286_s1 + $0x20] sm:$0xff]  ;;  %v83_v28 = vld [vmem:[%s1286_s1 + $0x28] sm:$0xff]  ;;  %v100_v35 = vld [vmem:[%s1286_s1 + $0xb0] sm:$0xff] }
   0x8   :  { %v130_v29 = vld [vmem:[%s1286_s1 + $0x1a0] sm:$0xff]  ;;  %738 = vmatprep.subr.bf16.mxu1 %v737_v21  ;;  %v131_v30 = vld [vmem:[%s1286_s1 + $0x1a8] sm:$0xff]  ;;  %v711_v33 = vpack.c.bf16 %v83_v28, %v82_v27  ;;  %v101_v36 = vld [vmem:[%s1286_s1 + $0xb8] sm:$0xff] }
   0x9   :  { %v114_v31 = vld [vmem:[%s1286_s1 + $0x120] sm:$0xff]  ;;  %v115_v32 = vld [vmem:[%s1286_s1 + $0x128] sm:$0xff]  ;;  %708 = vmatpush3.bf16.msra.mxu0 %v707_v17  ;;  %v741_v34 = vpack.c.bf16 %v131_v30, %v130_v29  ;;  %v84_v37 = vld [vmem:[%s1286_s1 + $0x30] sm:$0xff]  ;;  %v713_v39 = vpack.c.bf16 %v101_v36, %v100_v35 }
   0xa   :  { %710 = vmatprep.subr.bf16.mxu0 %v709_v26  ;;  %v743_v38 = vpack.c.bf16 %v115_v32, %v114_v31  ;;  %v85_v40 = vld [vmem:[%s1286_s1 + $0x38] sm:$0xff]  ;;  %v132_v41 = vld [vmem:[%s1286_s1 + $0x1b0] sm:$0xff]  ;;  %v102_v46 = vld [vmem:[%s1286_s1 + $0xc0] sm:$0xff] }
   0xb   :  { %740 = vmatpush3.bf16.msra.mxu1 %v739_v25  ;;  %v133_v42 = vld [vmem:[%s1286_s1 + $0x1b8] sm:$0xff]  ;;  %v116_v44 = vld [vmem:[%s1286_s1 + $0x130] sm:$0xff]  ;;  %v103_v47 = vld [vmem:[%s1286_s1 + $0xc8] sm:$0xff]  ;;  %v715_v48 = vpack.c.bf16 %v85_v40, %v84_v37 }
   0xc   :  { %742 = vmatprep.subr.bf16.mxu1 %v741_v34  ;;  %v745_v43 = vpack.c.bf16 %v133_v42, %v132_v41  ;;  %v117_v45 = vld [vmem:[%s1286_s1 + $0x138] sm:$0xff]  ;;  %v134_v49 = vld [vmem:[%s1286_s1 + $0x1c0] sm:$0xff]  ;;  %v135_v50 = vld [vmem:[%s1286_s1 + $0x1c8] sm:$0xff]  ;;  %v717_v52 = vpack.c.bf16 %v103_v47, %v102_v46 }
   0xd   :  { %712 = vmatpush3.bf16.msra.mxu0 %v711_v33  ;;  %v747_v51 = vpack.c.bf16 %v117_v45, %v116_v44  ;;  %v86_v53 = vld [vmem:[%s1286_s1 + $0x40] sm:$0xff]  ;;  %v87_v54 = vld [vmem:[%s1286_s1 + $0x48] sm:$0xff]  ;;  %v749_v56 = vpack.c.bf16 %v135_v50, %v134_v49  ;;  %v104_v58 = vld [vmem:[%s1286_s1 + $0xd0] sm:$0xff] }
   0xe   :  { %714 = vmatprep.subr.bf16.mxu0 %v713_v39  ;;  %v118_v55 = vld [vmem:[%s1286_s1 + $0x140] sm:$0xff]  ;;  %v119_v57 = vld [vmem:[%s1286_s1 + $0x148] sm:$0xff]  ;;  %v105_v59 = vld [vmem:[%s1286_s1 + $0xd8] sm:$0xff]  ;;  %v719_v62 = vpack.c.bf16 %v87_v54, %v86_v53 }
   0xf   :  { %744 = vmatpush3.bf16.msra.mxu1 %v743_v38  ;;  %v136_v60 = vld [vmem:[%s1286_s1 + $0x1d0] sm:$0xff]  ;;  %v137_v61 = vld [vmem:[%s1286_s1 + $0x1d8] sm:$0xff]  ;;  %v751_v63 = vpack.c.bf16 %v119_v57, %v118_v55  ;;  %v721_v0 = vpack.c.bf16 %v105_v59, %v104_v58  ;;  %v106_v6 = vld [vmem:[%s1286_s1 + $0xe0] sm:$0xff] }
  0x10   :  { %746 = vmatprep.subr.bf16.mxu1 %v745_v43  ;;  %v88_v1 = vld [vmem:[%s1286_s1 + $0x50] sm:$0xff]  ;;  %v89_v2 = vld [vmem:[%s1286_s1 + $0x58] sm:$0xff]  ;;  %v753_v4 = vpack.c.bf16 %v137_v61, %v136_v60  ;;  %v107_v7 = vld [vmem:[%s1286_s1 + $0xe8] sm:$0xff] }
  0x11   :  { %716 = vmatpush3.bf16.msra.mxu0 %v715_v48  ;;  %v120_v3 = vld [vmem:[%s1286_s1 + $0x150] sm:$0xff]  ;;  %v121_v5 = vld [vmem:[%s1286_s1 + $0x158] sm:$0xff]  ;;  %v138_v8 = vld [vmem:[%s1286_s1 + $0x1e0] sm:$0xff]  ;;  %v723_v10 = vpack.c.bf16 %v89_v2, %v88_v1  ;;  %v725_v14 = vpack.c.bf16 %v107_v7, %v106_v6 }
  0x12   :  { %718 = vmatprep.subr.bf16.mxu0 %v717_v52  ;;  %v139_v9 = vld [vmem:[%s1286_s1 + $0x1e8] sm:$0xff]  ;;  %v90_v11 = vld [vmem:[%s1286_s1 + $0x60] sm:$0xff]  ;;  %v755_v13 = vpack.c.bf16 %v121_v5, %v120_v3  ;;  %v108_v19 = vld [vmem:[%s1286_s1 + $0xf0] sm:$0xff] }
  0x13   :  { %748 = vmatpush3.bf16.msra.mxu1 %v747_v51  ;;  %v91_v12 = vld [vmem:[%s1286_s1 + $0x68] sm:$0xff]  ;;  %v122_v15 = vld [vmem:[%s1286_s1 + $0x160] sm:$0xff]  ;;  %v757_v18 = vpack.c.bf16 %v139_v9, %v138_v8  ;;  %v109_v20 = vld [vmem:[%s1286_s1 + $0xf8] sm:$0xff] }
  0x14   :  { %750 = vmatprep.subr.bf16.mxu1 %v749_v56  ;;  %v123_v16 = vld [vmem:[%s1286_s1 + $0x168] sm:$0xff]  ;;  %v17_v21 = vld [vmem:[%s1287_s0 + $0x18] sm:$0xff]  ;;  %v140_v22 = vld [vmem:[%s1286_s1 + $0x1f0] sm:$0xff]  ;;  %v727_v24 = vpack.c.bf16 %v91_v12, %v90_v11  ;;  %v729_v26 = vpack.c.bf16 %v109_v20, %v108_v19 }
  0x15   :  { %720 = vmatpush3.bf16.msra.mxu0 %v719_v62  ;;  %v15_v17 = vld [vmem:[%s1287_s0 + $0x8] sm:$0xff]  ;;  %v141_v23 = vld [vmem:[%s1286_s1 + $0x1f8] sm:$0xff]  ;;  %358 = vmatprep.mubr.f32.mxu1 %v17_v21  ;;  %v759_v25 = vpack.c.bf16 %v123_v16, %v122_v15  ;;  %v92_v27 = vld [vmem:[%s1286_s1 + $0x70] sm:$0xff] }
  0x16   :  { %722 = vmatprep.subr.bf16.mxu0 %v721_v0  ;;  %213 = vmatprep.mubr.f32.mxu0 %v15_v17  ;;  %v93_v28 = vld [vmem:[%s1286_s1 + $0x78] sm:$0xff]  ;;  %v761_v29 = vpack.c.bf16 %v141_v23, %v140_v22  ;;  %v124_v30 = vld [vmem:[%s1286_s1 + $0x170] sm:$0xff]  ;;  %v14_v34 = vld [vmem:[%s1287_s0] sm:$0xff] }
  0x17   :  { %752 = vmatpush3.bf16.msra.mxu1 %v751_v63  ;;  %v125_v31 = vld [vmem:[%s1286_s1 + $0x178] sm:$0xff]  ;;  %v731_v32 = vpack.c.bf16 %v93_v28, %v92_v27  ;;  %v16_v35 = vld [vmem:[%s1287_s0 + $0x10] sm:$0xff]  ;;  %v19_v36 = vld [vmem:[%s1287_s0 + $0x28] sm:$0xff] }
  0x18   :  { %754 = vmatprep.subr.bf16.mxu1 %v753_v4  ;;  %v763_v33 = vpack.c.bf16 %v125_v31, %v124_v30  ;;  %v21_v37 = vld [vmem:[%s1287_s0 + $0x38] sm:$0xff]  ;;  %v18_v38 = vld [vmem:[%s1287_s0 + $0x20] sm:$0xff]  ;;  %v20_v39 = vld [vmem:[%s1287_s0 + $0x30] sm:$0xff] }
  0x19   :  { %724 = vmatpush3.bf16.msra.mxu0 %v723_v10  ;;  %v23_v40 = vld [vmem:[%s1287_s0 + $0x48] sm:$0xff]  ;;  %v25_v41 = vld [vmem:[%s1287_s0 + $0x58] sm:$0xff]  ;;  %v22_v42 = vld [vmem:[%s1287_s0 + $0x40] sm:$0xff] }
  0x1a   :  { %726 = vmatprep.subr.bf16.mxu0 %v725_v14  ;;  %v24_v43 = vld [vmem:[%s1287_s0 + $0x50] sm:$0xff]  ;;  %v27_v44 = vld [vmem:[%s1287_s0 + $0x68] sm:$0xff]  ;;  %v29_v45 = vld [vmem:[%s1287_s0 + $0x78] sm:$0xff] }
  0x1b   :  { %756 = vmatpush3.bf16.msra.mxu1 %v755_v13  ;;  %v26_v46 = vld [vmem:[%s1287_s0 + $0x60] sm:$0xff]  ;;  %v28_v47 = vld [vmem:[%s1287_s0 + $0x70] sm:$0xff]  ;;  %v31_v48 = vld [vmem:[%s1287_s0 + $0x88] sm:$0xff] }
  0x1c   :  { %758 = vmatprep.subr.bf16.mxu1 %v757_v18  ;;  %v33_v49 = vld [vmem:[%s1287_s0 + $0x98] sm:$0xff]  ;;  %v30_v50 = vld [vmem:[%s1287_s0 + $0x80] sm:$0xff]  ;;  %v32_v51 = vld [vmem:[%s1287_s0 + $0x90] sm:$0xff] }
  0x1d   :  { %728 = vmatpush3.bf16.msra.mxu0 %v727_v24  ;;  %v35_v52 = vld [vmem:[%s1287_s0 + $0xa8] sm:$0xff]  ;;  %v37_v53 = vld [vmem:[%s1287_s0 + $0xb8] sm:$0xff]  ;;  %v34_v54 = vld [vmem:[%s1287_s0 + $0xa0] sm:$0xff] }
  0x1e   :  { %730 = vmatprep.subr.bf16.mxu0 %v729_v26  ;;  %v36_v55 = vld [vmem:[%s1287_s0 + $0xb0] sm:$0xff]  ;;  %v39_v56 = vld [vmem:[%s1287_s0 + $0xc8] sm:$0xff]  ;;  %v41_v57 = vld [vmem:[%s1287_s0 + $0xd8] sm:$0xff] }
  0x1f   :  { %760 = vmatpush3.bf16.msra.mxu1 %v759_v25  ;;  %v38_v58 = vld [vmem:[%s1287_s0 + $0xc0] sm:$0xff]  ;;  %v40_v59 = vld [vmem:[%s1287_s0 + $0xd0] sm:$0xff]  ;;  %v43_v60 = vld [vmem:[%s1287_s0 + $0xe8] sm:$0xff] }
  0x20   :  { %762 = vmatprep.subr.bf16.mxu1 %v761_v29  ;;  %v45_v61 = vld [vmem:[%s1287_s0 + $0xf8] sm:$0xff]  ;;  %v42_v62 = vld [vmem:[%s1287_s0 + $0xe0] sm:$0xff]  ;;  %v44_v63 = vld [vmem:[%s1287_s0 + $0xf0] sm:$0xff] }
  0x21   :  { %732 = vmatpush3.bf16.msra.mxu0 %v731_v32  ;;  %v47_v0 = vld [vmem:[%s1287_s0 + $0x108] sm:$0xff]  ;;  %v49_v1 = vld [vmem:[%s1287_s0 + $0x118] sm:$0xff]  ;;  %v46_v2 = vld [vmem:[%s1287_s0 + $0x100] sm:$0xff] }
  0x22   :  { %v48_v3 = vld [vmem:[%s1287_s0 + $0x110] sm:$0xff]  ;;  %v51_v4 = vld [vmem:[%s1287_s0 + $0x128] sm:$0xff]  ;;  %v53_v5 = vld [vmem:[%s1287_s0 + $0x138] sm:$0xff] }
  0x23   :  { %764 = vmatpush3.bf16.msra.mxu1 %v763_v33  ;;  %v50_v6 = vld [vmem:[%s1287_s0 + $0x120] sm:$0xff]  ;;  %v52_v7 = vld [vmem:[%s1287_s0 + $0x130] sm:$0xff]  ;;  %v55_v8 = vld [vmem:[%s1287_s0 + $0x148] sm:$0xff] }
  0x24   :  { %214 = vmatmul.mubr.f32.vlgmr.msra.gmra.mrb[0].mxu0 %v14_v34  ;;  %v57_v9 = vld [vmem:[%s1287_s0 + $0x158] sm:$0xff]  ;;  %v54_v10 = vld [vmem:[%s1287_s0 + $0x140] sm:$0xff]  ;;  %v56_v11 = vld [vmem:[%s1287_s0 + $0x150] sm:$0xff] }
  0x25   :  { %218 = vmatprep.mubr.f32.mxu0 %v19_v36  ;;  %v59_v12 = vld [vmem:[%s1287_s0 + $0x168] sm:$0xff]  ;;  %v61_v13 = vld [vmem:[%s1287_s0 + $0x178] sm:$0xff]  ;;  %v58_v14 = vld [vmem:[%s1287_s0 + $0x160] sm:$0xff] }
  0x26   :  { %359 = vmatmul.mubr.f32.vlgmr.msra.gmra.mrb[0].mxu1 %v16_v35  ;;  %v60_v15 = vld [vmem:[%s1287_s0 + $0x170] sm:$0xff]  ;;  %v63_v16 = vld [vmem:[%s1287_s0 + $0x188] sm:$0xff]  ;;  %v65_v17 = vld [vmem:[%s1287_s0 + $0x198] sm:$0xff] }
  0x27   :  { %363 = vmatprep.mubr.f32.mxu1 %v21_v37  ;;  %v62_v18 = vld [vmem:[%s1287_s0 + $0x180] sm:$0xff]  ;;  %v64_v19 = vld [vmem:[%s1287_s0 + $0x190] sm:$0xff]  ;;  %v67_v20 = vld [vmem:[%s1287_s0 + $0x1a8] sm:$0xff] }
  0x28   :  { %219 = vmatmul.mubr.f32.gmra.mrb[2].mxu0 %v18_v38  ;;  %v69_v21 = vld [vmem:[%s1287_s0 + $0x1b8] sm:$0xff]  ;;  %v66_v22 = vld [vmem:[%s1287_s0 + $0x1a0] sm:$0xff]  ;;  %v68_v23 = vld [vmem:[%s1287_s0 + $0x1b0] sm:$0xff] }
  0x29   :  { %223 = vmatprep.mubr.f32.mxu0 %v23_v40  ;;  %v71_v24 = vld [vmem:[%s1287_s0 + $0x1c8] sm:$0xff]  ;;  %v73_v25 = vld [vmem:[%s1287_s0 + $0x1d8] sm:$0xff]  ;;  %v70_v26 = vld [vmem:[%s1287_s0 + $0x1c0] sm:$0xff] }
  0x2a   :  { %364 = vmatmul.mubr.f32.gmra.mrb[2].mxu1 %v20_v39  ;;  %v72_v27 = vld [vmem:[%s1287_s0 + $0x1d0] sm:$0xff]  ;;  %v75_v28 = vld [vmem:[%s1287_s0 + $0x1e8] sm:$0xff]  ;;  %v77_v29 = vld [vmem:[%s1287_s0 + $0x1f8] sm:$0xff] }
  0x2b   :  { %368 = vmatprep.mubr.f32.mxu1 %v25_v41  ;;  %v74_v30 = vld [vmem:[%s1287_s0 + $0x1e0] sm:$0xff]  ;;  %v76_v31 = vld [vmem:[%s1287_s0 + $0x1f0] sm:$0xff] }
  0x2c   :  { %224 = vmatmul.mubr.f32.gmra.mrb[4].mxu0 %v22_v42  ;;  %v1204_v33 = vld [vmem:[%s1288_s2] ss:$0 sm:$0xff] }
  0x2d   :  { %228 = vmatprep.mubr.f32.mxu0 %v27_v44 }
  0x2e   :  { %369 = vmatmul.mubr.f32.gmra.mrb[4].mxu1 %v24_v43 }
  0x2f   :  { %373 = vmatprep.mubr.f32.mxu1 %v29_v45 }
  0x30   :  { %229 = vmatmul.mubr.f32.gmra.mrb[6].mxu0 %v26_v46 }
  0x31   :  { %233 = vmatprep.mubr.f32.mxu0 %v31_v48 }
  0x32   :  { %374 = vmatmul.mubr.f32.gmra.mrb[6].mxu1 %v28_v47 }
  0x33   :  { %378 = vmatprep.mubr.f32.mxu1 %v33_v49 }
  0x34   :  { %234 = vmatmul.mubr.f32.gmra.mrb[8].mxu0 %v30_v50 }
  0x35   :  { %238 = vmatprep.mubr.f32.mxu0 %v35_v52 }
  0x36   :  { %379 = vmatmul.mubr.f32.gmra.mrb[8].mxu1 %v32_v51 }
  0x37   :  { %383 = vmatprep.mubr.f32.mxu1 %v37_v53 }
  0x38   :  { %239 = vmatmul.mubr.f32.gmra.mrb[10].mxu0 %v34_v54 }
  0x39   :  { %243 = vmatprep.mubr.f32.mxu0 %v39_v56 }
  0x3a   :  { %384 = vmatmul.mubr.f32.gmra.mrb[10].mxu1 %v36_v55 }
  0x3b   :  { %388 = vmatprep.mubr.f32.mxu1 %v41_v57 }
  0x3c   :  { %244 = vmatmul.mubr.f32.gmra.mrb[12].mxu0 %v38_v58 }
  0x3d   :  { %248 = vmatprep.mubr.f32.mxu0 %v43_v60 }
  0x3e   :  { %389 = vmatmul.mubr.f32.gmra.mrb[12].mxu1 %v40_v59 }
  0x3f   :  { %393 = vmatprep.mubr.f32.mxu1 %v45_v61 }
  0x40   :  { %249 = vmatmul.mubr.f32.gmra.mrb[14].mxu0 %v42_v62 }
  0x41   :  { %253 = vmatprep.mubr.f32.mxu0 %v47_v0 }
  0x42   :  { %394 = vmatmul.mubr.f32.gmra.mrb[14].mxu1 %v44_v63 }
  0x43   :  { %398 = vmatprep.mubr.f32.mxu1 %v49_v1 }
  0x44   :  { %254 = vmatmul.mubr.f32.gmra.mrb[16].mxu0 %v46_v2 }
  0x45   :  { %258 = vmatprep.mubr.f32.mxu0 %v51_v4 }
  0x46   :  { %399 = vmatmul.mubr.f32.gmra.mrb[16].mxu1 %v48_v3 }
  0x47   :  { %403 = vmatprep.mubr.f32.mxu1 %v53_v5 }
  0x48   :  { %259 = vmatmul.mubr.f32.gmra.mrb[18].mxu0 %v50_v6 }
  0x49   :  { %263 = vmatprep.mubr.f32.mxu0 %v55_v8 }
  0x4a   :  { %404 = vmatmul.mubr.f32.gmra.mrb[18].mxu1 %v52_v7 }
  0x4b   :  { %408 = vmatprep.mubr.f32.mxu1 %v57_v9 }
  0x4c   :  { %264 = vmatmul.mubr.f32.gmra.mrb[20].mxu0 %v54_v10 }
  0x4d   :  { %268 = vmatprep.mubr.f32.mxu0 %v59_v12 }
  0x4e   :  { %409 = vmatmul.mubr.f32.gmra.mrb[20].mxu1 %v56_v11 }
  0x4f   :  { %413 = vmatprep.mubr.f32.mxu1 %v61_v13 }
  0x50   :  { %269 = vmatmul.mubr.f32.gmra.mrb[22].mxu0 %v58_v14 }
  0x51   :  { %273 = vmatprep.mubr.f32.mxu0 %v63_v16 }
  0x52   :  { %414 = vmatmul.mubr.f32.gmra.mrb[22].mxu1 %v60_v15 }
  0x53   :  { %418 = vmatprep.mubr.f32.mxu1 %v65_v17 }
  0x54   :  { %274 = vmatmul.mubr.f32.gmra.mrb[24].mxu0 %v62_v18 }
  0x55   :  { %278 = vmatprep.mubr.f32.mxu0 %v67_v20 }
  0x56   :  { %419 = vmatmul.mubr.f32.gmra.mrb[24].mxu1 %v64_v19 }
  0x57   :  { %423 = vmatprep.mubr.f32.mxu1 %v69_v21 }
  0x58   :  { %279 = vmatmul.mubr.f32.gmra.mrb[26].mxu0 %v66_v22 }
  0x59   :  { %283 = vmatprep.mubr.f32.mxu0 %v71_v24 }
  0x5a   :  { %424 = vmatmul.mubr.f32.gmra.mrb[26].mxu1 %v68_v23 }
  0x5b   :  { %428 = vmatprep.mubr.f32.mxu1 %v73_v25 }
  0x5c   :  { %284 = vmatmul.mubr.f32.gmra.mrb[28].mxu0 %v70_v26 }
  0x5d   :  { %288 = vmatprep.mubr.f32.mxu0 %v75_v28 }
  0x5e   :  { %429 = vmatmul.mubr.f32.gmra.mrb[28].mxu1 %v72_v27 }
  0x5f   :  { %433 = vmatprep.mubr.f32.mxu1 %v77_v29 }
  0x60   :  { %289 = vmatmul.mubr.f32.gmra.mrb[30].mxu0 %v74_v30 }
  0x62   :  { %434 = vmatmul.mubr.f32.gmra.mrb[30].mxu1 %v76_v31 }
  0xf7   :  { %v573_v32 = vpop.f32.mrb[0].mxu0 }
  0xf8   :  { %v574_v34 = vpop.f32.mrb[1].mxu0 }
  0xf9   :  { %v653_v35 = vpop.f32.mrb[0].mxu1  ;;  %v575_v36 = vadd.f32 %v574_v34, %v573_v32 }
  0xfa   :  { %v654_v37 = vpop.f32.mrb[1].mxu1 }
  0xfb   :  { %v655_v38 = vadd.f32 %v654_v37, %v653_v35  ;;  %v216_v39 = vadd.f32 %v575_v36, %v1204_v33  ;;  %v576_v40 = vpop.f32.mrb[2].mxu0 }
  0xfc   :  { %v577_v41 = vpop.f32.mrb[3].mxu0 }
  0xfd   :  { %v656_v42 = vpop.f32.mrb[2].mxu1  ;;  %v361_v43 = vadd.f32 %v655_v38, %v216_v39  ;;  %v578_v44 = vadd.f32 %v577_v41, %v576_v40 }
  0xfe   :  { %v657_v45 = vpop.f32.mrb[3].mxu1 }
  0xff   :  { %v658_v46 = vadd.f32 %v657_v45, %v656_v42  ;;  %v455_v47 = vmul.f32 0.70710677, %v361_v43  ;;  %v221_v48 = vadd.f32 %v578_v44, %v1204_v33  ;;  %v579_v49 = vpop.f32.mrb[4].mxu0  ;;  %v439_v14 = vmul.f32 0.5, %v361_v43 }
 0x100   :  { %v580_v50 = vpop.f32.mrb[5].mxu0 }
 0x101   :  { %v659_v51 = vpop.f32.mrb[4].mxu1  ;;  %765 = verf.f32 %v455_v47  ;;  %v366_v52 = vadd.f32 %v658_v46, %v221_v48  ;;  %v581_v53 = vadd.f32 %v580_v50, %v579_v49 }
 0x102   :  { %v660_v54 = vpop.f32.mrb[5].mxu1 }
 0x103   :  { %v661_v55 = vadd.f32 %v660_v54, %v659_v51  ;;  %v456_v56 = vmul.f32 0.70710677, %v366_v52  ;;  %v226_v57 = vadd.f32 %v581_v53, %v1204_v33  ;;  %v582_v58 = vpop.f32.mrb[6].mxu0  ;;  %v440_v27 = vmul.f32 0.5, %v366_v52 }
 0x104   :  { %v583_v59 = vpop.f32.mrb[7].mxu0 }
 0x105   :  { %v662_v60 = vpop.f32.mrb[6].mxu1  ;;  %767 = verf.f32 %v456_v56  ;;  %v371_v61 = vadd.f32 %v661_v55, %v226_v57  ;;  %v584_v62 = vadd.f32 %v583_v59, %v582_v58 }
 0x106   :  { %v663_v63 = vpop.f32.mrb[7].mxu1 }
 0x107   :  { %v664_v0 = vadd.f32 %v663_v63, %v662_v60  ;;  %v457_v1 = vmul.f32 0.70710677, %v371_v61  ;;  %v231_v2 = vadd.f32 %v584_v62, %v1204_v33  ;;  %v585_v3 = vpop.f32.mrb[8].mxu0  ;;  %v441_v41 = vmul.f32 0.5, %v371_v61 }
 0x108   :  { %v586_v4 = vpop.f32.mrb[9].mxu0 }
 0x109   :  { %v665_v5 = vpop.f32.mrb[8].mxu1  ;;  %769 = verf.f32 %v457_v1  ;;  %v376_v6 = vadd.f32 %v664_v0, %v231_v2  ;;  %v587_v7 = vadd.f32 %v586_v4, %v585_v3 }
 0x10a   :  { %v666_v8 = vpop.f32.mrb[9].mxu1 }
 0x10b   :  { %v667_v9 = vadd.f32 %v666_v8, %v665_v5  ;;  %v766_v10 = vpop.eup %765  ;;  %v458_v11 = vmul.f32 0.70710677, %v376_v6  ;;  %v236_v12 = vadd.f32 %v587_v7, %v1204_v33  ;;  %v588_v13 = vpop.f32.mrb[10].mxu0  ;;  %v442_v54 = vmul.f32 0.5, %v376_v6 }
 0x10c   :  { %v487_v15 = vadd.f32 1.0, %v766_v10  ;;  %v589_v16 = vpop.f32.mrb[11].mxu0 }
 0x10d   :  { %v668_v17 = vpop.f32.mrb[10].mxu1  ;;  %771 = verf.f32 %v458_v11  ;;  %v381_v18 = vadd.f32 %v667_v9, %v236_v12  ;;  %v590_v19 = vadd.f32 %v589_v16, %v588_v13 }
 0x10e   :  { %v669_v20 = vpop.f32.mrb[11].mxu1  ;;  %v503_v21 = vmul.f32 %v487_v15, %v439_v14 }
 0x10f   :  { %v670_v22 = vadd.f32 %v669_v20, %v668_v17  ;;  %v768_v23 = vpop.eup %767  ;;  %v459_v24 = vmul.f32 0.70710677, %v381_v18  ;;  %v241_v25 = vadd.f32 %v590_v19, %v1204_v33  ;;  %v591_v26 = vpop.f32.mrb[12].mxu0  ;;  %v443_v3 = vmul.f32 0.5, %v381_v18 }
 0x110   :  { %520 = vst.msk [vmem:[%s1289_s3] sm:$0xff] %vm519_vm0, %v503_v21  ;;  %v488_v28 = vadd.f32 1.0, %v768_v23  ;;  %v592_v29 = vpop.f32.mrb[13].mxu0 }
 0x111   :  { %v671_v30 = vpop.f32.mrb[12].mxu1  ;;  %773 = verf.f32 %v459_v24  ;;  %v386_v31 = vadd.f32 %v670_v22, %v241_v25  ;;  %v593_v32 = vadd.f32 %v592_v29, %v591_v26 }
 0x112   :  { %v672_v34 = vpop.f32.mrb[13].mxu1  ;;  %v504_v35 = vmul.f32 %v488_v28, %v440_v27 }
 0x113   :  { %v673_v36 = vadd.f32 %v672_v34, %v671_v30  ;;  %v770_v37 = vpop.eup %769  ;;  %v460_v38 = vmul.f32 0.70710677, %v386_v31  ;;  %v246_v39 = vadd.f32 %v593_v32, %v1204_v33  ;;  %v594_v40 = vpop.f32.mrb[14].mxu0  ;;  %v444_v16 = vmul.f32 0.5, %v386_v31 }
 0x114   :  { %521 = vst.msk [vmem:[%s1289_s3 + $0x8] sm:$0xff] %vm519_vm0, %v504_v35  ;;  %v489_v42 = vadd.f32 1.0, %v770_v37  ;;  %v595_v43 = vpop.f32.mrb[15].mxu0 }
 0x115   :  { %v674_v44 = vpop.f32.mrb[14].mxu1  ;;  %775 = verf.f32 %v460_v38  ;;  %v391_v45 = vadd.f32 %v673_v36, %v246_v39  ;;  %v596_v46 = vadd.f32 %v595_v43, %v594_v40 }
 0x116   :  { %v675_v47 = vpop.f32.mrb[15].mxu1  ;;  %v505_v48 = vmul.f32 %v489_v42, %v441_v41 }
 0x117   :  { %v676_v49 = vadd.f32 %v675_v47, %v674_v44  ;;  %v772_v50 = vpop.eup %771  ;;  %v461_v51 = vmul.f32 0.70710677, %v391_v45  ;;  %v251_v52 = vadd.f32 %v596_v46, %v1204_v33  ;;  %v597_v53 = vpop.f32.mrb[16].mxu0  ;;  %v445_v29 = vmul.f32 0.5, %v391_v45 }
 0x118   :  { %522 = vst.msk [vmem:[%s1289_s3 + $0x10] sm:$0xff] %vm519_vm0, %v505_v48  ;;  %v490_v55 = vadd.f32 1.0, %v772_v50  ;;  %v598_v56 = vpop.f32.mrb[17].mxu0 }
 0x119   :  { %v677_v57 = vpop.f32.mrb[16].mxu1  ;;  %777 = verf.f32 %v461_v51  ;;  %v396_v58 = vadd.f32 %v676_v49, %v251_v52  ;;  %v599_v59 = vadd.f32 %v598_v56, %v597_v53 }
 0x11a   :  { %v678_v60 = vpop.f32.mrb[17].mxu1  ;;  %v506_v61 = vmul.f32 %v490_v55, %v442_v54 }
 0x11b   :  { %v679_v62 = vadd.f32 %v678_v60, %v677_v57  ;;  %v774_v63 = vpop.eup %773  ;;  %v462_v0 = vmul.f32 0.70710677, %v396_v58  ;;  %v256_v1 = vadd.f32 %v599_v59, %v1204_v33  ;;  %v600_v2 = vpop.f32.mrb[18].mxu0  ;;  %v446_v43 = vmul.f32 0.5, %v396_v58 }
 0x11c   :  { %523 = vst.msk [vmem:[%s1289_s3 + $0x18] sm:$0xff] %vm519_vm0, %v506_v61  ;;  %v491_v4 = vadd.f32 1.0, %v774_v63  ;;  %v601_v5 = vpop.f32.mrb[19].mxu0 }
 0x11d   :  { %v680_v6 = vpop.f32.mrb[18].mxu1  ;;  %779 = verf.f32 %v462_v0  ;;  %v401_v7 = vadd.f32 %v679_v62, %v256_v1  ;;  %v602_v8 = vadd.f32 %v601_v5, %v600_v2 }
 0x11e   :  { %v681_v9 = vpop.f32.mrb[19].mxu1  ;;  %v507_v10 = vmul.f32 %v491_v4, %v443_v3 }
 0x11f   :  { %v682_v11 = vadd.f32 %v681_v9, %v680_v6  ;;  %v776_v12 = vpop.eup %775  ;;  %v463_v13 = vmul.f32 0.70710677, %v401_v7  ;;  %v261_v14 = vadd.f32 %v602_v8, %v1204_v33  ;;  %v603_v15 = vpop.f32.mrb[20].mxu0  ;;  %v447_v56 = vmul.f32 0.5, %v401_v7 }
 0x120   :  { %524 = vst.msk [vmem:[%s1289_s3 + $0x20] sm:$0xff] %vm519_vm0, %v507_v10  ;;  %v492_v17 = vadd.f32 1.0, %v776_v12  ;;  %v604_v18 = vpop.f32.mrb[21].mxu0 }
 0x121   :  { %v683_v19 = vpop.f32.mrb[20].mxu1  ;;  %781 = verf.f32 %v463_v13  ;;  %v406_v20 = vadd.f32 %v682_v11, %v261_v14  ;;  %v605_v21 = vadd.f32 %v604_v18, %v603_v15 }
 0x122   :  { %v684_v22 = vpop.f32.mrb[21].mxu1  ;;  %v508_v23 = vmul.f32 %v492_v17, %v444_v16 }
 0x123   :  { %v685_v24 = vadd.f32 %v684_v22, %v683_v19  ;;  %v778_v25 = vpop.eup %777  ;;  %v464_v26 = vmul.f32 0.70710677, %v406_v20  ;;  %v266_v27 = vadd.f32 %v605_v21, %v1204_v33  ;;  %v606_v28 = vpop.f32.mrb[22].mxu0  ;;  %v448_v5 = vmul.f32 0.5, %v406_v20 }
 0x124   :  { %525 = vst.msk [vmem:[%s1289_s3 + $0x28] sm:$0xff] %vm519_vm0, %v508_v23  ;;  %v493_v30 = vadd.f32 1.0, %v778_v25  ;;  %v607_v31 = vpop.f32.mrb[23].mxu0 }
 0x125   :  { %v686_v32 = vpop.f32.mrb[22].mxu1  ;;  %783 = verf.f32 %v464_v26  ;;  %v411_v34 = vadd.f32 %v685_v24, %v266_v27  ;;  %v608_v35 = vadd.f32 %v607_v31, %v606_v28 }
 0x126   :  { %v687_v36 = vpop.f32.mrb[23].mxu1  ;;  %v509_v37 = vmul.f32 %v493_v30, %v445_v29 }
 0x127   :  { %v688_v38 = vadd.f32 %v687_v36, %v686_v32  ;;  %v780_v39 = vpop.eup %779  ;;  %v465_v40 = vmul.f32 0.70710677, %v411_v34  ;;  %v271_v41 = vadd.f32 %v608_v35, %v1204_v33  ;;  %v609_v42 = vpop.f32.mrb[24].mxu0  ;;  %v449_v18 = vmul.f32 0.5, %v411_v34 }
 0x128   :  { %526 = vst.msk [vmem:[%s1289_s3 + $0x30] sm:$0xff] %vm519_vm0, %v509_v37  ;;  %v494_v44 = vadd.f32 1.0, %v780_v39  ;;  %v610_v45 = vpop.f32.mrb[25].mxu0 }
 0x129   :  { %v689_v46 = vpop.f32.mrb[24].mxu1  ;;  %785 = verf.f32 %v465_v40  ;;  %v416_v47 = vadd.f32 %v688_v38, %v271_v41  ;;  %v611_v48 = vadd.f32 %v610_v45, %v609_v42 }
 0x12a   :  { %v690_v49 = vpop.f32.mrb[25].mxu1  ;;  %v510_v50 = vmul.f32 %v494_v44, %v446_v43 }
 0x12b   :  { %v691_v51 = vadd.f32 %v690_v49, %v689_v46  ;;  %v782_v52 = vpop.eup %781  ;;  %v466_v53 = vmul.f32 0.70710677, %v416_v47  ;;  %v276_v54 = vadd.f32 %v611_v48, %v1204_v33  ;;  %v612_v55 = vpop.f32.mrb[26].mxu0  ;;  %v450_v30 = vmul.f32 0.5, %v416_v47 }
 0x12c   :  { %527 = vst.msk [vmem:[%s1289_s3 + $0x38] sm:$0xff] %vm519_vm0, %v510_v50  ;;  %v495_v57 = vadd.f32 1.0, %v782_v52  ;;  %v613_v58 = vpop.f32.mrb[27].mxu0 }
 0x12d   :  { %v692_v59 = vpop.f32.mrb[26].mxu1  ;;  %787 = verf.f32 %v466_v53  ;;  %v421_v60 = vadd.f32 %v691_v51, %v276_v54  ;;  %v614_v61 = vadd.f32 %v613_v58, %v612_v55 }
 0x12e   :  { %v693_v62 = vpop.f32.mrb[27].mxu1  ;;  %v511_v63 = vmul.f32 %v495_v57, %v447_v56 }
 0x12f   :  { %v694_v0 = vadd.f32 %v693_v62, %v692_v59  ;;  %v784_v1 = vpop.eup %783  ;;  %v467_v2 = vmul.f32 0.70710677, %v421_v60  ;;  %v281_v3 = vadd.f32 %v614_v61, %v1204_v33  ;;  %v615_v4 = vpop.f32.mrb[28].mxu0  ;;  %v451_v37 = vmul.f32 0.5, %v421_v60 }
 0x130   :  { %528 = vst.msk [vmem:[%s1289_s3 + $0x40] sm:$0xff] %vm519_vm0, %v511_v63  ;;  %v496_v6 = vadd.f32 1.0, %v784_v1  ;;  %v616_v7 = vpop.f32.mrb[29].mxu0 }
 0x131   :  { %v695_v8 = vpop.f32.mrb[28].mxu1  ;;  %789 = verf.f32 %v467_v2  ;;  %v426_v9 = vadd.f32 %v694_v0, %v281_v3  ;;  %v617_v10 = vadd.f32 %v616_v7, %v615_v4 }
 0x132   :  { %v696_v11 = vpop.f32.mrb[29].mxu1  ;;  %v512_v12 = vmul.f32 %v496_v6, %v448_v5 }
 0x133   :  { %v697_v13 = vadd.f32 %v696_v11, %v695_v8  ;;  %v786_v14 = vpop.eup %785  ;;  %v468_v15 = vmul.f32 0.70710677, %v426_v9  ;;  %v286_v16 = vadd.f32 %v617_v10, %v1204_v33  ;;  %v618_v17 = vpop.f32.mrb[30].mxu0  ;;  %v452_v40 = vmul.f32 0.5, %v426_v9 }
 0x134   :  { %529 = vst.msk [vmem:[%s1289_s3 + $0x48] sm:$0xff] %vm519_vm0, %v512_v12  ;;  %v497_v19 = vadd.f32 1.0, %v786_v14  ;;  %v619_v20 = vpop.f32.mrb[31].mxu0 }
 0x135   :  { %v698_v21 = vpop.f32.mrb[30].mxu1  ;;  %791 = verf.f32 %v468_v15  ;;  %v431_v22 = vadd.f32 %v697_v13, %v286_v16  ;;  %v620_v23 = vadd.f32 %v619_v20, %v618_v17 }
 0x136   :  { %v699_v24 = vpop.f32.mrb[31].mxu1  ;;  %v513_v25 = vmul.f32 %v497_v19, %v449_v18 }
 0x137   :  { %v700_v26 = vadd.f32 %v699_v24, %v698_v21  ;;  %v788_v27 = vpop.eup %787  ;;  %v469_v28 = vmul.f32 0.70710677, %v431_v22  ;;  %v291_v29 = vadd.f32 %v620_v23, %v1204_v33  ;;  %v453_v44 = vmul.f32 0.5, %v431_v22 }
 0x138   :  { %530 = vst.msk [vmem:[%s1289_s3 + $0x50] sm:$0xff] %vm519_vm0, %v513_v25  ;;  %v498_v31 = vadd.f32 1.0, %v788_v27 }
 0x139   :  { %793 = verf.f32 %v469_v28  ;;  %v436_v32 = vadd.f32 %v700_v26, %v291_v29 }
 0x13a   :  { %v514_v34 = vmul.f32 %v498_v31, %v450_v30 }
 0x13b   :  { %v790_v35 = vpop.eup %789  ;;  %v470_v36 = vmul.f32 0.70710677, %v436_v32  ;;  %v454_v48 = vmul.f32 0.5, %v436_v32 }
 0x13c   :  { %531 = vst.msk [vmem:[%s1289_s3 + $0x58] sm:$0xff] %vm519_vm0, %v514_v34  ;;  %v499_v38 = vadd.f32 1.0, %v790_v35 }
 0x13d   :  { %795 = verf.f32 %v470_v36 }
 0x13e   :  { %v515_v33 = vmul.f32 %v499_v38, %v451_v37 }
 0x13f   :  { %v792_v39 = vpop.eup %791 }
 0x140   :  { %532 = vst.msk [vmem:[%s1289_s3 + $0x60] sm:$0xff] %vm519_vm0, %v515_v33  ;;  %v500_v41 = vadd.f32 1.0, %v792_v39 }
 0x142   :  { %v516_v42 = vmul.f32 %v500_v41, %v452_v40 }
 0x143   :  { %v794_v43 = vpop.eup %793 }
 0x144   :  { %533 = vst.msk [vmem:[%s1289_s3 + $0x68] sm:$0xff] %vm519_vm0, %v516_v42  ;;  %v501_v45 = vadd.f32 1.0, %v794_v43 }
 0x146   :  { %v517_v46 = vmul.f32 %v501_v45, %v453_v44 }
 0x147   :  { %v796_v47 = vpop.eup %795 }
 0x148   :  { %534 = vst.msk [vmem:[%s1289_s3 + $0x70] sm:$0xff] %vm519_vm0, %v517_v46  ;;  %v502_v49 = vadd.f32 1.0, %v796_v47 }
 0x14a   :  { %v518_v50 = vmul.f32 %v502_v49, %v454_v48 }
 0x14c   :  { %535 = vst.msk [vmem:[%s1289_s3 + $0x78] sm:$0xff] %vm519_vm0, %v518_v50 }

// kernel: encoder_forward.8
= control target key start
LH: loop header
LB: loop body
LE: loop exit
PB: predicated region body
PF: predicated region fallthrough
CT: control target
= control target key end

     0   :  { %s1377_s1 = inlined_call_operand.vmem [shape: f32[1024,128], index: 1, kind: input, shape index: {}]   ;;  %s1378_s0 = inlined_call_operand.vmem [shape: f32[32,1024], index: 0, kind: input, shape index: {}]   ;;  %s1379_s2 = inlined_call_operand.vmem [shape: f32[1,128], index: 2, kind: input, shape index: {}]   ;;  %s1380_s3 = inlined_call_operand.vmem [shape: f32[32,128], index: 3, kind: output, shape index: {}]  }
   0x1   :  { %v62_v0 = vld [vmem:[%s1377_s1 + $0x80] sm:$0xff]  ;;  %v63_v1 = vld [vmem:[%s1377_s1 + $0x88] sm:$0xff]  ;;  %v64_v11 = vld [vmem:[%s1377_s1 + $0x90] sm:$0xff] }
   0x2   :  { %v46_v2 = vld [vmem:[%s1377_s1] sm:$0xff]  ;;  %v726_v3 = vpack.c.bf16 %v63_v1, %v62_v0  ;;  %v47_v4 = vld [vmem:[%s1377_s1 + $0x8] sm:$0xff]  ;;  %v65_v13 = vld [vmem:[%s1377_s1 + $0x98] sm:$0xff] }
   0x3   :  { %v94_v5 = vld [vmem:[%s1377_s1 + $0x180] sm:$0xff]  ;;  %v95_v6 = vld [vmem:[%s1377_s1 + $0x188] sm:$0xff]  ;;  %v728_v7 = vpack.c.bf16 %v47_v4, %v46_v2  ;;  %v48_v14 = vld [vmem:[%s1377_s1 + $0x10] sm:$0xff]  ;;  %v730_v16 = vpack.c.bf16 %v65_v13, %v64_v11 }
   0x4   :  { %v758_v8 = vpack.c.bf16 %v95_v6, %v94_v5  ;;  %v78_v9 = vld [vmem:[%s1377_s1 + $0x100] sm:$0xff]  ;;  %v79_v10 = vld [vmem:[%s1377_s1 + $0x108] sm:$0xff]  ;;  %727 = vmatprep.subr.bf16.mxu0 %v726_v3  ;;  %v49_v15 = vld [vmem:[%s1377_s1 + $0x18] sm:$0xff] }
   0x5   :  { %v760_v12 = vpack.c.bf16 %v79_v10, %v78_v9  ;;  %729 = vmatpush3.bf16.msra.mxu0 %v728_v7  ;;  %v732_v17 = vpack.c.bf16 %v49_v15, %v48_v14  ;;  %v96_v18 = vld [vmem:[%s1377_s1 + $0x190] sm:$0xff]  ;;  %v97_v19 = vld [vmem:[%s1377_s1 + $0x198] sm:$0xff]  ;;  %v66_v23 = vld [vmem:[%s1377_s1 + $0xa0] sm:$0xff] }
   0x6   :  { %759 = vmatprep.subr.bf16.mxu1 %v758_v8  ;;  %v80_v20 = vld [vmem:[%s1377_s1 + $0x110] sm:$0xff]  ;;  %v762_v21 = vpack.c.bf16 %v97_v19, %v96_v18  ;;  %v81_v22 = vld [vmem:[%s1377_s1 + $0x118] sm:$0xff]  ;;  %v67_v24 = vld [vmem:[%s1377_s1 + $0xa8] sm:$0xff]  ;;  %731 = vmatprep.subr.bf16.mxu0 %v730_v16 }
   0x7   :  { %761 = vmatpush3.bf16.msra.mxu1 %v760_v12  ;;  %v764_v25 = vpack.c.bf16 %v81_v22, %v80_v20  ;;  %v734_v26 = vpack.c.bf16 %v67_v24, %v66_v23  ;;  %v50_v27 = vld [vmem:[%s1377_s1 + $0x20] sm:$0xff]  ;;  %v51_v28 = vld [vmem:[%s1377_s1 + $0x28] sm:$0xff]  ;;  %v68_v35 = vld [vmem:[%s1377_s1 + $0xb0] sm:$0xff] }
   0x8   :  { %v98_v29 = vld [vmem:[%s1377_s1 + $0x1a0] sm:$0xff]  ;;  %763 = vmatprep.subr.bf16.mxu1 %v762_v21  ;;  %v99_v30 = vld [vmem:[%s1377_s1 + $0x1a8] sm:$0xff]  ;;  %v736_v33 = vpack.c.bf16 %v51_v28, %v50_v27  ;;  %v69_v36 = vld [vmem:[%s1377_s1 + $0xb8] sm:$0xff] }
   0x9   :  { %v82_v31 = vld [vmem:[%s1377_s1 + $0x120] sm:$0xff]  ;;  %v83_v32 = vld [vmem:[%s1377_s1 + $0x128] sm:$0xff]  ;;  %733 = vmatpush3.bf16.msra.mxu0 %v732_v17  ;;  %v766_v34 = vpack.c.bf16 %v99_v30, %v98_v29  ;;  %v52_v37 = vld [vmem:[%s1377_s1 + $0x30] sm:$0xff]  ;;  %v738_v39 = vpack.c.bf16 %v69_v36, %v68_v35 }
   0xa   :  { %735 = vmatprep.subr.bf16.mxu0 %v734_v26  ;;  %v768_v38 = vpack.c.bf16 %v83_v32, %v82_v31  ;;  %v53_v40 = vld [vmem:[%s1377_s1 + $0x38] sm:$0xff]  ;;  %v100_v41 = vld [vmem:[%s1377_s1 + $0x1b0] sm:$0xff]  ;;  %v70_v46 = vld [vmem:[%s1377_s1 + $0xc0] sm:$0xff] }
   0xb   :  { %765 = vmatpush3.bf16.msra.mxu1 %v764_v25  ;;  %v101_v42 = vld [vmem:[%s1377_s1 + $0x1b8] sm:$0xff]  ;;  %v84_v44 = vld [vmem:[%s1377_s1 + $0x130] sm:$0xff]  ;;  %v71_v47 = vld [vmem:[%s1377_s1 + $0xc8] sm:$0xff]  ;;  %v740_v48 = vpack.c.bf16 %v53_v40, %v52_v37 }
   0xc   :  { %767 = vmatprep.subr.bf16.mxu1 %v766_v34  ;;  %v770_v43 = vpack.c.bf16 %v101_v42, %v100_v41  ;;  %v85_v45 = vld [vmem:[%s1377_s1 + $0x138] sm:$0xff]  ;;  %v102_v49 = vld [vmem:[%s1377_s1 + $0x1c0] sm:$0xff]  ;;  %v103_v50 = vld [vmem:[%s1377_s1 + $0x1c8] sm:$0xff]  ;;  %v742_v52 = vpack.c.bf16 %v71_v47, %v70_v46 }
   0xd   :  { %737 = vmatpush3.bf16.msra.mxu0 %v736_v33  ;;  %v772_v51 = vpack.c.bf16 %v85_v45, %v84_v44  ;;  %v54_v53 = vld [vmem:[%s1377_s1 + $0x40] sm:$0xff]  ;;  %v55_v54 = vld [vmem:[%s1377_s1 + $0x48] sm:$0xff]  ;;  %v774_v56 = vpack.c.bf16 %v103_v50, %v102_v49  ;;  %v72_v58 = vld [vmem:[%s1377_s1 + $0xd0] sm:$0xff] }
   0xe   :  { %739 = vmatprep.subr.bf16.mxu0 %v738_v39  ;;  %v86_v55 = vld [vmem:[%s1377_s1 + $0x140] sm:$0xff]  ;;  %v87_v57 = vld [vmem:[%s1377_s1 + $0x148] sm:$0xff]  ;;  %v73_v59 = vld [vmem:[%s1377_s1 + $0xd8] sm:$0xff]  ;;  %v744_v62 = vpack.c.bf16 %v55_v54, %v54_v53 }
   0xf   :  { %769 = vmatpush3.bf16.msra.mxu1 %v768_v38  ;;  %v104_v60 = vld [vmem:[%s1377_s1 + $0x1d0] sm:$0xff]  ;;  %v105_v61 = vld [vmem:[%s1377_s1 + $0x1d8] sm:$0xff]  ;;  %v776_v63 = vpack.c.bf16 %v87_v57, %v86_v55  ;;  %v746_v0 = vpack.c.bf16 %v73_v59, %v72_v58  ;;  %v74_v6 = vld [vmem:[%s1377_s1 + $0xe0] sm:$0xff] }
  0x10   :  { %771 = vmatprep.subr.bf16.mxu1 %v770_v43  ;;  %v56_v1 = vld [vmem:[%s1377_s1 + $0x50] sm:$0xff]  ;;  %v57_v2 = vld [vmem:[%s1377_s1 + $0x58] sm:$0xff]  ;;  %v778_v4 = vpack.c.bf16 %v105_v61, %v104_v60  ;;  %v75_v7 = vld [vmem:[%s1377_s1 + $0xe8] sm:$0xff] }
  0x11   :  { %741 = vmatpush3.bf16.msra.mxu0 %v740_v48  ;;  %v88_v3 = vld [vmem:[%s1377_s1 + $0x150] sm:$0xff]  ;;  %v89_v5 = vld [vmem:[%s1377_s1 + $0x158] sm:$0xff]  ;;  %v106_v8 = vld [vmem:[%s1377_s1 + $0x1e0] sm:$0xff]  ;;  %v748_v10 = vpack.c.bf16 %v57_v2, %v56_v1  ;;  %v750_v14 = vpack.c.bf16 %v75_v7, %v74_v6 }
  0x12   :  { %743 = vmatprep.subr.bf16.mxu0 %v742_v52  ;;  %v107_v9 = vld [vmem:[%s1377_s1 + $0x1e8] sm:$0xff]  ;;  %v58_v11 = vld [vmem:[%s1377_s1 + $0x60] sm:$0xff]  ;;  %v780_v13 = vpack.c.bf16 %v89_v5, %v88_v3  ;;  %v76_v19 = vld [vmem:[%s1377_s1 + $0xf0] sm:$0xff] }
  0x13   :  { %773 = vmatpush3.bf16.msra.mxu1 %v772_v51  ;;  %v59_v12 = vld [vmem:[%s1377_s1 + $0x68] sm:$0xff]  ;;  %v90_v15 = vld [vmem:[%s1377_s1 + $0x160] sm:$0xff]  ;;  %v782_v18 = vpack.c.bf16 %v107_v9, %v106_v8  ;;  %v77_v20 = vld [vmem:[%s1377_s1 + $0xf8] sm:$0xff] }
  0x14   :  { %775 = vmatprep.subr.bf16.mxu1 %v774_v56  ;;  %v91_v16 = vld [vmem:[%s1377_s1 + $0x168] sm:$0xff]  ;;  %v17_v21 = vld [vmem:[%s1378_s0 + $0x18] sm:$0xff]  ;;  %v108_v22 = vld [vmem:[%s1377_s1 + $0x1f0] sm:$0xff]  ;;  %v752_v24 = vpack.c.bf16 %v59_v12, %v58_v11  ;;  %v754_v26 = vpack.c.bf16 %v77_v20, %v76_v19 }
  0x15   :  { %745 = vmatpush3.bf16.msra.mxu0 %v744_v62  ;;  %v15_v17 = vld [vmem:[%s1378_s0 + $0x8] sm:$0xff]  ;;  %v109_v23 = vld [vmem:[%s1377_s1 + $0x1f8] sm:$0xff]  ;;  %330 = vmatprep.mubr.f32.mxu1 %v17_v21  ;;  %v784_v25 = vpack.c.bf16 %v91_v16, %v90_v15  ;;  %v60_v27 = vld [vmem:[%s1377_s1 + $0x70] sm:$0xff] }
  0x16   :  { %747 = vmatprep.subr.bf16.mxu0 %v746_v0  ;;  %245 = vmatprep.mubr.f32.mxu0 %v15_v17  ;;  %v61_v28 = vld [vmem:[%s1377_s1 + $0x78] sm:$0xff]  ;;  %v92_v29 = vld [vmem:[%s1377_s1 + $0x170] sm:$0xff]  ;;  %v786_v30 = vpack.c.bf16 %v109_v23, %v108_v22  ;;  %v126_v32 = vld [vmem:[%s1377_s1 + $0x280] sm:$0xff] }
  0x17   :  { %777 = vmatpush3.bf16.msra.mxu1 %v776_v63  ;;  %v93_v31 = vld [vmem:[%s1377_s1 + $0x178] sm:$0xff]  ;;  %v127_v33 = vld [vmem:[%s1377_s1 + $0x288] sm:$0xff]  ;;  %v158_v34 = vld [vmem:[%s1377_s1 + $0x380] sm:$0xff]  ;;  %v756_v36 = vpack.c.bf16 %v61_v28, %v60_v27 }
  0x18   :  { %779 = vmatprep.subr.bf16.mxu1 %v778_v4  ;;  %v159_v35 = vld [vmem:[%s1377_s1 + $0x388] sm:$0xff]  ;;  %v788_v37 = vpack.c.bf16 %v93_v31, %v92_v29  ;;  %v790_v38 = vpack.c.bf16 %v127_v33, %v126_v32  ;;  %v110_v39 = vld [vmem:[%s1377_s1 + $0x200] sm:$0xff]  ;;  %v128_v44 = vld [vmem:[%s1377_s1 + $0x290] sm:$0xff] }
  0x19   :  { %749 = vmatpush3.bf16.msra.mxu0 %v748_v10  ;;  %v111_v40 = vld [vmem:[%s1377_s1 + $0x208] sm:$0xff]  ;;  %v142_v41 = vld [vmem:[%s1377_s1 + $0x300] sm:$0xff]  ;;  %v822_v42 = vpack.c.bf16 %v159_v35, %v158_v34  ;;  %v129_v45 = vld [vmem:[%s1377_s1 + $0x298] sm:$0xff] }
  0x1a   :  { %751 = vmatprep.subr.bf16.mxu0 %v750_v14  ;;  %v143_v43 = vld [vmem:[%s1377_s1 + $0x308] sm:$0xff]  ;;  %v160_v46 = vld [vmem:[%s1377_s1 + $0x390] sm:$0xff]  ;;  %v161_v47 = vld [vmem:[%s1377_s1 + $0x398] sm:$0xff]  ;;  %v792_v49 = vpack.c.bf16 %v111_v40, %v110_v39  ;;  %v794_v52 = vpack.c.bf16 %v129_v45, %v128_v44 }
  0x1b   :  { %781 = vmatpush3.bf16.msra.mxu1 %v780_v13  ;;  %v14_v48 = vld [vmem:[%s1378_s0] sm:$0xff]  ;;  %v16_v50 = vld [vmem:[%s1378_s0 + $0x10] sm:$0xff]  ;;  %v824_v51 = vpack.c.bf16 %v143_v43, %v142_v41  ;;  %v113_v54 = vld [vmem:[%s1377_s1 + $0x218] sm:$0xff]  ;;  %v826_v56 = vpack.c.bf16 %v161_v47, %v160_v46 }
  0x1c   :  { %783 = vmatprep.subr.bf16.mxu1 %v782_v18  ;;  %v112_v53 = vld [vmem:[%s1377_s1 + $0x210] sm:$0xff]  ;;  %v145_v57 = vld [vmem:[%s1377_s1 + $0x318] sm:$0xff]  ;;  %v130_v58 = vld [vmem:[%s1377_s1 + $0x2a0] sm:$0xff] }
  0x1d   :  { %753 = vmatpush3.bf16.msra.mxu0 %v752_v24  ;;  %v144_v55 = vld [vmem:[%s1377_s1 + $0x310] sm:$0xff]  ;;  %v131_v59 = vld [vmem:[%s1377_s1 + $0x2a8] sm:$0xff]  ;;  %v162_v60 = vld [vmem:[%s1377_s1 + $0x3a0] sm:$0xff]  ;;  %v796_v63 = vpack.c.bf16 %v113_v54, %v112_v53 }
  0x1e   :  { %755 = vmatprep.subr.bf16.mxu0 %v754_v26  ;;  %v163_v61 = vld [vmem:[%s1377_s1 + $0x3a8] sm:$0xff]  ;;  %v114_v0 = vld [vmem:[%s1377_s1 + $0x220] sm:$0xff]  ;;  %v25_v2 = vld [vmem:[%s1378_s0 + $0x58] sm:$0xff]  ;;  %v828_v3 = vpack.c.bf16 %v145_v57, %v144_v55  ;;  %v798_v4 = vpack.c.bf16 %v131_v59, %v130_v58 }
  0x1f   :  { %785 = vmatpush3.bf16.msra.mxu1 %v784_v25  ;;  %v23_v62 = vld [vmem:[%s1378_s0 + $0x48] sm:$0xff]  ;;  %v22_v1 = vld [vmem:[%s1378_s0 + $0x40] sm:$0xff]  ;;  %v24_v7 = vld [vmem:[%s1378_s0 + $0x50] sm:$0xff]  ;;  %v830_v8 = vpack.c.bf16 %v163_v61, %v162_v60 }
  0x20   :  { %787 = vmatprep.subr.bf16.mxu1 %v786_v30  ;;  %v115_v5 = vld [vmem:[%s1377_s1 + $0x228] sm:$0xff]  ;;  %v146_v6 = vld [vmem:[%s1377_s1 + $0x320] sm:$0xff]  ;;  %v132_v10 = vld [vmem:[%s1377_s1 + $0x2b0] sm:$0xff] }
  0x21   :  { %757 = vmatpush3.bf16.msra.mxu0 %v756_v36  ;;  %v147_v9 = vld [vmem:[%s1377_s1 + $0x328] sm:$0xff]  ;;  %v133_v11 = vld [vmem:[%s1377_s1 + $0x2b8] sm:$0xff]  ;;  %v164_v12 = vld [vmem:[%s1377_s1 + $0x3b0] sm:$0xff]  ;;  %v800_v15 = vpack.c.bf16 %v115_v5, %v114_v0 }
  0x22   :  { %791 = vmatprep.subr.bf16.mxu0 %v790_v38  ;;  %v165_v13 = vld [vmem:[%s1377_s1 + $0x3b8] sm:$0xff]  ;;  %v31_v14 = vld [vmem:[%s1378_s0 + $0x88] sm:$0xff]  ;;  %v116_v16 = vld [vmem:[%s1377_s1 + $0x230] sm:$0xff]  ;;  %v832_v19 = vpack.c.bf16 %v147_v9, %v146_v6  ;;  %v802_v20 = vpack.c.bf16 %v133_v11, %v132_v10 }
  0x23   :  { %789 = vmatpush3.bf16.msra.mxu1 %v788_v37  ;;  %v30_v17 = vld [vmem:[%s1378_s0 + $0x80] sm:$0xff]  ;;  %v33_v18 = vld [vmem:[%s1378_s0 + $0x98] sm:$0xff]  ;;  %v148_v22 = vld [vmem:[%s1377_s1 + $0x330] sm:$0xff]  ;;  %v834_v24 = vpack.c.bf16 %v165_v13, %v164_v12 }
  0x24   :  { %823 = vmatprep.subr.bf16.mxu1 %v822_v42  ;;  %246 = vmatmul.mubr.f32.vlgmr.msra.gmra.mrb[0].mxu0 %v14_v48  ;;  %v117_v21 = vld [vmem:[%s1377_s1 + $0x238] sm:$0xff]  ;;  %v32_v23 = vld [vmem:[%s1378_s0 + $0x90] sm:$0xff]  ;;  %v134_v26 = vld [vmem:[%s1377_s1 + $0x2c0] sm:$0xff] }
  0x25   :  { %793 = vmatpush3.bf16.msra.mxu0 %v792_v49  ;;  %250 = vmatprep.mubr.f32.mxu0 %v23_v62  ;;  %v149_v25 = vld [vmem:[%s1377_s1 + $0x338] sm:$0xff]  ;;  %v135_v27 = vld [vmem:[%s1377_s1 + $0x2c8] sm:$0xff]  ;;  %v166_v28 = vld [vmem:[%s1377_s1 + $0x3c0] sm:$0xff]  ;;  %v804_v31 = vpack.c.bf16 %v117_v21, %v116_v16 }
  0x26   :  { %331 = vmatmul.mubr.f32.vlgmr.msra.gmra.mrb[0].mxu1 %v16_v50  ;;  %795 = vmatprep.subr.bf16.mxu0 %v794_v52  ;;  %v167_v29 = vld [vmem:[%s1377_s1 + $0x3c8] sm:$0xff]  ;;  %v118_v32 = vld [vmem:[%s1377_s1 + $0x240] sm:$0xff]  ;;  %v41_v34 = vld [vmem:[%s1378_s0 + $0xd8] sm:$0xff]  ;;  %v836_v35 = vpack.c.bf16 %v149_v25, %v148_v22  ;;  %v806_v36 = vpack.c.bf16 %v135_v27, %v134_v26 }
  0x27   :  { %825 = vmatpush3.bf16.msra.mxu1 %v824_v51  ;;  %335 = vmatprep.mubr.f32.mxu1 %v25_v2  ;;  %v39_v30 = vld [vmem:[%s1378_s0 + $0xc8] sm:$0xff]  ;;  %v38_v33 = vld [vmem:[%s1378_s0 + $0xc0] sm:$0xff]  ;;  %v40_v39 = vld [vmem:[%s1378_s0 + $0xd0] sm:$0xff]  ;;  %v838_v40 = vpack.c.bf16 %v167_v29, %v166_v28 }
  0x28   :  { %827 = vmatprep.subr.bf16.mxu1 %v826_v56  ;;  %251 = vmatmul.mubr.f32.gmra.mrb[2].mxu0 %v22_v1  ;;  %v119_v37 = vld [vmem:[%s1377_s1 + $0x248] sm:$0xff]  ;;  %v150_v38 = vld [vmem:[%s1377_s1 + $0x340] sm:$0xff]  ;;  %v136_v42 = vld [vmem:[%s1377_s1 + $0x2d0] sm:$0xff] }
  0x29   :  { %797 = vmatpush3.bf16.msra.mxu0 %v796_v63  ;;  %255 = vmatprep.mubr.f32.mxu0 %v31_v14  ;;  %v151_v41 = vld [vmem:[%s1377_s1 + $0x348] sm:$0xff]  ;;  %v137_v43 = vld [vmem:[%s1377_s1 + $0x2d8] sm:$0xff]  ;;  %v168_v44 = vld [vmem:[%s1377_s1 + $0x3d0] sm:$0xff]  ;;  %v808_v46 = vpack.c.bf16 %v119_v37, %v118_v32 }
  0x2a   :  { %336 = vmatmul.mubr.f32.gmra.mrb[2].mxu1 %v24_v7  ;;  %799 = vmatprep.subr.bf16.mxu0 %v798_v4  ;;  %v169_v45 = vld [vmem:[%s1377_s1 + $0x3d8] sm:$0xff]  ;;  %v19_v47 = vld [vmem:[%s1378_s0 + $0x28] sm:$0xff]  ;;  %v840_v49 = vpack.c.bf16 %v151_v41, %v150_v38  ;;  %v810_v50 = vpack.c.bf16 %v137_v43, %v136_v42  ;;  %v120_v51 = vld [vmem:[%s1377_s1 + $0x250] sm:$0xff] }
  0x2b   :  { %829 = vmatpush3.bf16.msra.mxu1 %v828_v3  ;;  %340 = vmatprep.mubr.f32.mxu1 %v33_v18  ;;  %v21_v48 = vld [vmem:[%s1378_s0 + $0x38] sm:$0xff]  ;;  %v152_v53 = vld [vmem:[%s1377_s1 + $0x350] sm:$0xff]  ;;  %v842_v54 = vpack.c.bf16 %v169_v45, %v168_v44  ;;  %v138_v56 = vld [vmem:[%s1377_s1 + $0x2e0] sm:$0xff] }
  0x2c   :  { %831 = vmatprep.subr.bf16.mxu1 %v830_v8  ;;  %256 = vmatmul.mubr.f32.gmra.mrb[4].mxu0 %v30_v17  ;;  %v121_v52 = vld [vmem:[%s1377_s1 + $0x258] sm:$0xff]  ;;  %v139_v57 = vld [vmem:[%s1377_s1 + $0x2e8] sm:$0xff]  ;;  %v170_v58 = vld [vmem:[%s1377_s1 + $0x3e0] sm:$0xff] }
  0x2d   :  { %801 = vmatpush3.bf16.msra.mxu0 %v800_v15  ;;  %260 = vmatprep.mubr.f32.mxu0 %v39_v30  ;;  %v153_v55 = vld [vmem:[%s1377_s1 + $0x358] sm:$0xff]  ;;  %v171_v59 = vld [vmem:[%s1377_s1 + $0x3e8] sm:$0xff]  ;;  %v812_v60 = vpack.c.bf16 %v121_v52, %v120_v51  ;;  %v814_v62 = vpack.c.bf16 %v139_v57, %v138_v56  ;;  %v122_v63 = vld [vmem:[%s1377_s1 + $0x260] sm:$0xff] }
  0x2e   :  { %341 = vmatmul.mubr.f32.gmra.mrb[4].mxu1 %v32_v23  ;;  %803 = vmatprep.subr.bf16.mxu0 %v802_v20  ;;  %v844_v61 = vpack.c.bf16 %v153_v55, %v152_v53  ;;  %v123_v0 = vld [vmem:[%s1377_s1 + $0x268] sm:$0xff]  ;;  %v154_v1 = vld [vmem:[%s1377_s1 + $0x360] sm:$0xff]  ;;  %v846_v2 = vpack.c.bf16 %v171_v59, %v170_v58  ;;  %v140_v4 = vld [vmem:[%s1377_s1 + $0x2f0] sm:$0xff] }
  0x2f   :  { %833 = vmatpush3.bf16.msra.mxu1 %v832_v19  ;;  %345 = vmatprep.mubr.f32.mxu1 %v41_v34  ;;  %v155_v3 = vld [vmem:[%s1377_s1 + $0x368] sm:$0xff]  ;;  %v141_v5 = vld [vmem:[%s1377_s1 + $0x2f8] sm:$0xff]  ;;  %v172_v6 = vld [vmem:[%s1377_s1 + $0x3f0] sm:$0xff]  ;;  %v816_v8 = vpack.c.bf16 %v123_v0, %v122_v63 }
  0x30   :  { %835 = vmatprep.subr.bf16.mxu1 %v834_v24  ;;  %261 = vmatmul.mubr.f32.gmra.mrb[6].mxu0 %v38_v33  ;;  %v173_v7 = vld [vmem:[%s1377_s1 + $0x3f8] sm:$0xff]  ;;  %v848_v9 = vpack.c.bf16 %v155_v3, %v154_v1  ;;  %v818_v10 = vpack.c.bf16 %v141_v5, %v140_v4  ;;  %v124_v11 = vld [vmem:[%s1377_s1 + $0x270] sm:$0xff]  ;;  %v18_v18 = vld [vmem:[%s1378_s0 + $0x20] sm:$0xff] }
  0x31   :  { %805 = vmatpush3.bf16.msra.mxu0 %v804_v31  ;;  %415 = vmatprep.mubr.f32.mxu0 %v19_v47  ;;  %v125_v12 = vld [vmem:[%s1377_s1 + $0x278] sm:$0xff]  ;;  %v850_v13 = vpack.c.bf16 %v173_v7, %v172_v6  ;;  %v156_v14 = vld [vmem:[%s1377_s1 + $0x370] sm:$0xff]  ;;  %v27_v20 = vld [vmem:[%s1378_s0 + $0x68] sm:$0xff] }
  0x32   :  { %346 = vmatmul.mubr.f32.gmra.mrb[6].mxu1 %v40_v39  ;;  %807 = vmatprep.subr.bf16.mxu0 %v806_v36  ;;  %v157_v15 = vld [vmem:[%s1377_s1 + $0x378] sm:$0xff]  ;;  %v820_v16 = vpack.c.bf16 %v125_v12, %v124_v11  ;;  %v20_v19 = vld [vmem:[%s1378_s0 + $0x30] sm:$0xff]  ;;  %v26_v22 = vld [vmem:[%s1378_s0 + $0x60] sm:$0xff] }
  0x33   :  { %837 = vmatpush3.bf16.msra.mxu1 %v836_v35  ;;  %500 = vmatprep.mubr.f32.mxu1 %v21_v48  ;;  %v852_v17 = vpack.c.bf16 %v157_v15, %v156_v14  ;;  %v29_v21 = vld [vmem:[%s1378_s0 + $0x78] sm:$0xff]  ;;  %v28_v23 = vld [vmem:[%s1378_s0 + $0x70] sm:$0xff]  ;;  %v35_v24 = vld [vmem:[%s1378_s0 + $0xa8] sm:$0xff] }
  0x34   :  { %839 = vmatprep.subr.bf16.mxu1 %v838_v40  ;;  %v37_v25 = vld [vmem:[%s1378_s0 + $0xb8] sm:$0xff]  ;;  %v34_v26 = vld [vmem:[%s1378_s0 + $0xa0] sm:$0xff]  ;;  %v36_v27 = vld [vmem:[%s1378_s0 + $0xb0] sm:$0xff] }
  0x35   :  { %809 = vmatpush3.bf16.msra.mxu0 %v808_v46  ;;  %v43_v28 = vld [vmem:[%s1378_s0 + $0xe8] sm:$0xff]  ;;  %v45_v29 = vld [vmem:[%s1378_s0 + $0xf8] sm:$0xff]  ;;  %v42_v30 = vld [vmem:[%s1378_s0 + $0xe0] sm:$0xff] }
  0x36   :  { %811 = vmatprep.subr.bf16.mxu0 %v810_v50  ;;  %v44_v31 = vld [vmem:[%s1378_s0 + $0xf0] sm:$0xff]  ;;  %v549_v33 = vld [vmem:[%s1379_s2] ss:$0 sm:$0xff] }
  0x37   :  { %841 = vmatpush3.bf16.msra.mxu1 %v840_v49 }
  0x38   :  { %843 = vmatprep.subr.bf16.mxu1 %v842_v54 }
  0x39   :  { %813 = vmatpush3.bf16.msra.mxu0 %v812_v60 }
  0x3a   :  { %815 = vmatprep.subr.bf16.mxu0 %v814_v62 }
  0x3b   :  { %845 = vmatpush3.bf16.msra.mxu1 %v844_v61 }
  0x3c   :  { %847 = vmatprep.subr.bf16.mxu1 %v846_v2 }
  0x3d   :  { %817 = vmatpush3.bf16.msra.mxu0 %v816_v8 }
  0x3e   :  { %819 = vmatprep.subr.bf16.mxu0 %v818_v10 }
  0x3f   :  { %849 = vmatpush3.bf16.msra.mxu1 %v848_v9 }
  0x40   :  { %851 = vmatprep.subr.bf16.mxu1 %v850_v13 }
  0x41   :  { %821 = vmatpush3.bf16.msra.mxu0 %v820_v16 }
  0x43   :  { %853 = vmatpush3.bf16.msra.mxu1 %v852_v17 }
  0x44   :  { %416 = vmatmul.mubr.f32.vlgmr.msra.gmra.mrb[8].mxu0 %v18_v18 }
  0x45   :  { %420 = vmatprep.mubr.f32.mxu0 %v27_v20 }
  0x46   :  { %501 = vmatmul.mubr.f32.vlgmr.msra.gmra.mrb[8].mxu1 %v20_v19 }
  0x47   :  { %505 = vmatprep.mubr.f32.mxu1 %v29_v21 }
  0x48   :  { %421 = vmatmul.mubr.f32.gmra.mrb[10].mxu0 %v26_v22 }
  0x49   :  { %425 = vmatprep.mubr.f32.mxu0 %v35_v24 }
  0x4a   :  { %506 = vmatmul.mubr.f32.gmra.mrb[10].mxu1 %v28_v23 }
  0x4b   :  { %510 = vmatprep.mubr.f32.mxu1 %v37_v25 }
  0x4c   :  { %426 = vmatmul.mubr.f32.gmra.mrb[12].mxu0 %v34_v26 }
  0x4d   :  { %430 = vmatprep.mubr.f32.mxu0 %v43_v28 }
  0x4e   :  { %511 = vmatmul.mubr.f32.gmra.mrb[12].mxu1 %v36_v27 }
  0x4f   :  { %515 = vmatprep.mubr.f32.mxu1 %v45_v29 }
  0x50   :  { %431 = vmatmul.mubr.f32.gmra.mrb[14].mxu0 %v42_v30 }
  0x52   :  { %516 = vmatmul.mubr.f32.gmra.mrb[14].mxu1 %v44_v31 }
  0xf7   :  { %v582_v32 = vpop.f32.mrb[0].mxu0 }
  0xf8   :  { %v583_v34 = vpop.f32.mrb[1].mxu0 }
  0xf9   :  { %v626_v35 = vpop.f32.mrb[0].mxu1  ;;  %v584_v36 = vadd.f32 %v583_v34, %v582_v32 }
  0xfa   :  { %v627_v37 = vpop.f32.mrb[1].mxu1 }
  0xfb   :  { %v628_v38 = vadd.f32 %v627_v37, %v626_v35  ;;  %v248_v39 = vadd.f32 %v584_v36, %v549_v33  ;;  %v585_v40 = vpop.f32.mrb[2].mxu0 }
  0xfc   :  { %v586_v41 = vpop.f32.mrb[3].mxu0 }
  0xfd   :  { %v629_v42 = vpop.f32.mrb[2].mxu1  ;;  %v333_v43 = vadd.f32 %v628_v38, %v248_v39  ;;  %v587_v44 = vadd.f32 %v586_v41, %v585_v40 }
  0xfe   :  { %v630_v45 = vpop.f32.mrb[3].mxu1 }
  0xff   :  { %v631_v46 = vadd.f32 %v630_v45, %v629_v42  ;;  %v253_v47 = vadd.f32 %v587_v44, %v549_v33  ;;  %v588_v48 = vpop.f32.mrb[4].mxu0 }
 0x100   :  { %v589_v49 = vpop.f32.mrb[5].mxu0 }
 0x101   :  { %v632_v50 = vpop.f32.mrb[4].mxu1  ;;  %v338_v51 = vadd.f32 %v631_v46, %v253_v47  ;;  %v590_v52 = vadd.f32 %v589_v49, %v588_v48 }
 0x102   :  { %v633_v53 = vpop.f32.mrb[5].mxu1 }
 0x103   :  { %v634_v54 = vadd.f32 %v633_v53, %v632_v50  ;;  %v258_v55 = vadd.f32 %v590_v52, %v549_v33  ;;  %v591_v56 = vpop.f32.mrb[6].mxu0 }
 0x104   :  { %v592_v57 = vpop.f32.mrb[7].mxu0 }
 0x105   :  { %v635_v58 = vpop.f32.mrb[6].mxu1  ;;  %v343_v59 = vadd.f32 %v634_v54, %v258_v55  ;;  %v593_v60 = vadd.f32 %v592_v57, %v591_v56 }
 0x106   :  { %v636_v61 = vpop.f32.mrb[7].mxu1 }
 0x107   :  { %v637_v62 = vadd.f32 %v636_v61, %v635_v58  ;;  %v263_v63 = vadd.f32 %v593_v60, %v549_v33 }
 0x109   :  { %v348_v0 = vadd.f32 %v637_v62, %v263_v63 }
 0x117   :  { %v670_v1 = vpop.f32.mrb[8].mxu0 }
 0x118   :  { %v671_v2 = vpop.f32.mrb[9].mxu0 }
 0x119   :  { %v714_v3 = vpop.f32.mrb[8].mxu1  ;;  %v672_v4 = vadd.f32 %v671_v2, %v670_v1 }
 0x11a   :  { %v715_v5 = vpop.f32.mrb[9].mxu1 }
 0x11b   :  { %v716_v6 = vadd.f32 %v715_v5, %v714_v3  ;;  %v418_v7 = vadd.f32 %v672_v4, %v333_v43  ;;  %v673_v8 = vpop.f32.mrb[10].mxu0 }
 0x11c   :  { %v674_v9 = vpop.f32.mrb[11].mxu0 }
 0x11d   :  { %v717_v10 = vpop.f32.mrb[10].mxu1  ;;  %v503_v11 = vadd.f32 %v716_v6, %v418_v7  ;;  %v675_v12 = vadd.f32 %v674_v9, %v673_v8 }
 0x11e   :  { %v718_v13 = vpop.f32.mrb[11].mxu1 }
 0x11f   :  { %v719_v14 = vadd.f32 %v718_v13, %v717_v10  ;;  %v525_v15 = vmul.f32 0.70710677, %v503_v11  ;;  %v423_v16 = vadd.f32 %v675_v12, %v338_v51  ;;  %v676_v17 = vpop.f32.mrb[12].mxu0  ;;  %v521_v38 = vmul.f32 0.5, %v503_v11 }
 0x120   :  { %v677_v18 = vpop.f32.mrb[13].mxu0 }
 0x121   :  { %v720_v19 = vpop.f32.mrb[12].mxu1  ;;  %854 = verf.f32 %v525_v15  ;;  %v508_v20 = vadd.f32 %v719_v14, %v423_v16  ;;  %v678_v21 = vadd.f32 %v677_v18, %v676_v17 }
 0x122   :  { %v721_v22 = vpop.f32.mrb[13].mxu1 }
 0x123   :  { %v722_v23 = vadd.f32 %v721_v22, %v720_v19  ;;  %v526_v24 = vmul.f32 0.70710677, %v508_v20  ;;  %v428_v25 = vadd.f32 %v678_v21, %v343_v59  ;;  %v679_v26 = vpop.f32.mrb[14].mxu0  ;;  %v522_v42 = vmul.f32 0.5, %v508_v20 }
 0x124   :  { %v680_v27 = vpop.f32.mrb[15].mxu0 }
 0x125   :  { %v723_v28 = vpop.f32.mrb[14].mxu1  ;;  %856 = verf.f32 %v526_v24  ;;  %v513_v29 = vadd.f32 %v722_v23, %v428_v25  ;;  %v681_v30 = vadd.f32 %v680_v27, %v679_v26 }
 0x126   :  { %v724_v31 = vpop.f32.mrb[15].mxu1 }
 0x127   :  { %v725_v32 = vadd.f32 %v724_v31, %v723_v28  ;;  %v527_v33 = vmul.f32 0.70710677, %v513_v29  ;;  %v433_v34 = vadd.f32 %v681_v30, %v348_v0  ;;  %v523_v46 = vmul.f32 0.5, %v513_v29 }
 0x129   :  { %858 = verf.f32 %v527_v33  ;;  %v518_v35 = vadd.f32 %v725_v32, %v433_v34 }
 0x12b   :  { %v855_v36 = vpop.eup %854  ;;  %v528_v37 = vmul.f32 0.70710677, %v518_v35  ;;  %v524_v50 = vmul.f32 0.5, %v518_v35 }
 0x12c   :  { %v533_v39 = vadd.f32 1.0, %v855_v36 }
 0x12d   :  { %860 = verf.f32 %v528_v37 }
 0x12e   :  { %v537_v40 = vmul.f32 %v533_v39, %v521_v38 }
 0x12f   :  { %v857_v41 = vpop.eup %856 }
 0x130   :  { %541 = vst [vmem:[%s1380_s3] sm:$0xff] %v537_v40  ;;  %v534_v43 = vadd.f32 1.0, %v857_v41 }
 0x132   :  { %v538_v44 = vmul.f32 %v534_v43, %v522_v42 }
 0x133   :  { %v859_v45 = vpop.eup %858 }
 0x134   :  { %542 = vst [vmem:[%s1380_s3 + $0x8] sm:$0xff] %v538_v44  ;;  %v535_v47 = vadd.f32 1.0, %v859_v45 }
 0x136   :  { %v539_v48 = vmul.f32 %v535_v47, %v523_v46 }
 0x137   :  { %v861_v49 = vpop.eup %860 }
 0x138   :  { %543 = vst [vmem:[%s1380_s3 + $0x10] sm:$0xff] %v539_v48  ;;  %v536_v51 = vadd.f32 1.0, %v861_v49 }
 0x13a   :  { %v540_v52 = vmul.f32 %v536_v51, %v524_v50 }
 0x13c   :  { %544 = vst [vmem:[%s1380_s3 + $0x18] sm:$0xff] %v540_v52 }

// kernel: encoder_forward.9
= control target key start
LH: loop header
LB: loop body
LE: loop exit
PB: predicated region body
PF: predicated region fallthrough
CT: control target
= control target key end

     0   :  { %10 = vsyncpa [#allocation4], 0  ;;  %s5842_s18 = smov 0   ;;  %s6715_s0 = inlined_call_operand.vmem [shape: f32[2,2048], index: 0, kind: input, shape index: {}]   ;;  %s6716_s1 = inlined_call_operand.vmem [shape: bf16[2048,1024], index: 1, kind: input, shape index: {}]   ;;  %s6717_s2 = inlined_call_operand.vmem [shape: f32[1,1024], index: 2, kind: input, shape index: {}]   ;;  %s6718_s3 = inlined_call_operand.vmem [shape: bf16[1024,128], index: 3, kind: input, shape index: {}]   ;;  %s6719_s4 = inlined_call_operand.vmem [shape: f32[1,128], index: 4, kind: input, shape index: {}]   ;;  %s6720_s5 = inlined_call_operand.hbm [shape: f32[2,128], index: 5, kind: output, shape index: {}]  }
   0x1 LB: > { %s5848_s19 = sadd.s32 4294967295, %s5807_s18   ;;  %p4958_p0 = scmp.ge.s32.totalorder %s5807_s18, 1  ;;  %s5807_s18 = sphi %s5842_s18, %s16_s18  }
   0x2   : > { %p196_p1 = scmp.lt.s32.totalorder %s5807_s18, 3 }
   0x4   : > { %p197_p2 = pnand %p4958_p0, %p196_p1 }
   0x5   : > { %s4959_s20 = sshll.u32 (!%p197_p2), %s5848_s19, 3  ;;  %s4961_s21 = sshll.u32 (!%p197_p2), %s5848_s19, 7 }
   0x6   : > { %200 = sbr.rel (%p197_p2) target bundleno = 1057 (0x421), region = 40  ;;  %p226_p3 = scmp.lt.s32.totalorder (!%p197_p2), %s4959_s20, 15 }
   0x7   : > { %p232_p4 = scmp.lt.s32.totalorder (!%p197_p2), %s4961_s21, 255  ;;  %p4964_p5 = scmp.ne.s32.totalorder (!%p197_p2), %s5848_s19, 0 }
   0xd   : > { %s6722_s20 = smov (!%p226_p3, %s4959_s20), 15  ;;  %s6724_s21 = smov (!%p232_p4, %s4961_s21), 255 }
   0xe   : > { %s4960_s22 = sshll.u32 %s6722_s20, 1  ;;  %s5547_s26 = sshll.u32 %s6724_s21, 5  ;;  %v5809_v0 = vmov (!%p4964_p5), 0.0  }
   0xf   : > { %s5857_s25 = scalar_lea.vmem %s6715_s0, %s4960_s22  ;;  %s5862_s29 = scalar_lea.vmem %s6716_s1, %s5547_s26  ;;  %243 = vst [vmem:[#allocation2] sm:$0xff] (!%p4964_p5), %v5809_v0  ;;  %244 = vst [vmem:[#allocation2 + $0x8] sm:$0xff] (!%p4964_p5), %v5809_v0 }
  0x10   : > { %242 = sbr.rel (%p4964_p5) target bundleno = 23 (0x17), region = 44 }
  0x17 PF: > { %v301_v1 = vld [vmem:[%s5862_s29] sm:$0xff]  ;;  %v302_v3 = vld [vmem:[%s5862_s29 + $0x8] sm:$0xff]  ;;  %v5810_v33 = vmov 1983009808   ;;  %v253_v35 = vlaneseq  ;;  %p5477_p6 = scmp.ne.s32.totalorder %s5848_s19, 1 }
  0x18   : > { %v305_v2 = vld [vmem:[%s5862_s29 + $0x20] sm:$0xff]  ;;  %v306_v5 = vld [vmem:[%s5862_s29 + $0x28] sm:$0xff]  ;;  %v251_v34 = vunpack.c.l.s4 %v5810_v33 }
  0x19   : > { %v4966_v4 = vcombine.high %v301_v1, %v305_v2  ;;  %v4965_v6 = vcombine.low %v301_v1, %v305_v2  ;;  %v309_v7 = vld [vmem:[%s5862_s29 + $0x40] sm:$0xff]  ;;  %v4968_v9 = vcombine.high %v302_v3, %v306_v5  ;;  %v4967_v10 = vcombine.low %v302_v3, %v306_v5  ;;  %v310_v12 = vld [vmem:[%s5862_s29 + $0x48] sm:$0xff] }
  0x1a   : > { %v313_v8 = vld [vmem:[%s5862_s29 + $0x60] sm:$0xff]  ;;  %v314_v13 = vld [vmem:[%s5862_s29 + $0x68] sm:$0xff]  ;;  %v252_v44 = vunpack.c.0.s8 %v251_v34  ;;  %v5887_v45 = vshrl.u32 %v253_v35, 7 }
  0x1b   : > { %v4974_v11 = vcombine.high %v309_v7, %v313_v8  ;;  %v317_v14 = vld [vmem:[%s5862_s29 + $0x80] sm:$0xff]  ;;  %3373 = vmatprep.subr.bf16.mxu0 %v4966_v4  ;;  %v4976_v15 = vcombine.high %v310_v12, %v314_v13  ;;  %v318_v17 = vld [vmem:[%s5862_s29 + $0x88] sm:$0xff]  ;;  %3537 = vmatprep.subr.bf16.mxu1 %v4968_v9  ;;  %v4973_v19 = vcombine.low %v309_v7, %v313_v8 }
  0x1c   : > { %v321_v16 = vld [vmem:[%s5862_s29 + $0xa0] sm:$0xff]  ;;  %v322_v18 = vld [vmem:[%s5862_s29 + $0xa8] sm:$0xff]  ;;  %3374 = vmatpush1.bf16.msra.mxu0 %v4965_v6  ;;  %3538 = vmatpush1.bf16.msra.mxu1 %v4967_v10  ;;  %v4975_v20 = vcombine.low %v310_v12, %v314_v13  ;;  %v5894_v54 = vsub.s32 %v252_v44, %v5887_v45 }
  0x1d   : > { %3375 = vmatprep.subr.bf16.mxu0 %v4974_v11  ;;  %v4982_v21 = vcombine.high %v317_v14, %v321_v16  ;;  %3539 = vmatprep.subr.bf16.mxu1 %v4976_v15  ;;  %v4984_v22 = vcombine.high %v318_v17, %v322_v18  ;;  %v325_v23 = vld [vmem:[%s5862_s29 + $0xc0] sm:$0xff]  ;;  %v326_v25 = vld [vmem:[%s5862_s29 + $0xc8] sm:$0xff]  ;;  %v4981_v27 = vcombine.low %v317_v14, %v321_v16 }
  0x1e   : > { %v329_v24 = vld [vmem:[%s5862_s29 + $0xe0] sm:$0xff]  ;;  %v330_v26 = vld [vmem:[%s5862_s29 + $0xe8] sm:$0xff]  ;;  %v4983_v28 = vcombine.low %v318_v17, %v322_v18 }
  0x1f   : > { %v4990_v29 = vcombine.high %v325_v23, %v329_v24  ;;  %v4992_v30 = vcombine.high %v326_v25, %v330_v26  ;;  %v333_v31 = vld [vmem:[%s5862_s29 + $0x100] sm:$0xff]  ;;  %v334_v36 = vld [vmem:[%s5862_s29 + $0x108] sm:$0xff]  ;;  %v4989_v38 = vcombine.low %v325_v23, %v329_v24  ;;  %v4991_v39 = vcombine.low %v326_v25, %v330_v26 }
  0x20   : > { %3376 = vmatpush1.bf16.msra.mxu0 %v4973_v19  ;;  %3540 = vmatpush1.bf16.msra.mxu1 %v4975_v20  ;;  %v337_v32 = vld [vmem:[%s5862_s29 + $0x120] sm:$0xff]  ;;  %v338_v37 = vld [vmem:[%s5862_s29 + $0x128] sm:$0xff] }
  0x21   : > { %3377 = vmatprep.subr.bf16.mxu0 %v4982_v21  ;;  %3541 = vmatprep.subr.bf16.mxu1 %v4984_v22  ;;  %v4998_v40 = vcombine.high %v333_v31, %v337_v32  ;;  %v5000_v41 = vcombine.high %v334_v36, %v338_v37  ;;  %v341_v42 = vld [vmem:[%s5862_s29 + $0x140] sm:$0xff]  ;;  %v342_v46 = vld [vmem:[%s5862_s29 + $0x148] sm:$0xff]  ;;  %v4997_v48 = vcombine.low %v333_v31, %v337_v32 }
  0x22   : > { %v345_v43 = vld [vmem:[%s5862_s29 + $0x160] sm:$0xff]  ;;  %v346_v47 = vld [vmem:[%s5862_s29 + $0x168] sm:$0xff]  ;;  %v4999_v49 = vcombine.low %v334_v36, %v338_v37 }
  0x23   : > { %v5006_v50 = vcombine.high %v341_v42, %v345_v43  ;;  %v5008_v51 = vcombine.high %v342_v46, %v346_v47  ;;  %v349_v52 = vld [vmem:[%s5862_s29 + $0x180] sm:$0xff]  ;;  %v350_v55 = vld [vmem:[%s5862_s29 + $0x188] sm:$0xff]  ;;  %v5005_v57 = vcombine.low %v341_v42, %v345_v43  ;;  %v5007_v58 = vcombine.low %v342_v46, %v346_v47 }
  0x24   : > { %3378 = vmatpush1.bf16.msra.mxu0 %v4981_v27  ;;  %3542 = vmatpush1.bf16.msra.mxu1 %v4983_v28  ;;  %v353_v53 = vld [vmem:[%s5862_s29 + $0x1a0] sm:$0xff]  ;;  %v354_v56 = vld [vmem:[%s5862_s29 + $0x1a8] sm:$0xff] }
  0x25   : > { %3379 = vmatprep.subr.bf16.mxu0 %v4990_v29  ;;  %3543 = vmatprep.subr.bf16.mxu1 %v4992_v30  ;;  %v5014_v59 = vcombine.high %v349_v52, %v353_v53  ;;  %v5899_v60 = vld [vmem:[%s5857_s25] sm:$0xff]  ;;  %v5016_v61 = vcombine.high %v350_v55, %v354_v56  ;;  %v358_v1 = vld [vmem:[%s5862_s29 + $0x1c8] sm:$0xff]  ;;  %v5013_v3 = vcombine.low %v349_v52, %v353_v53 }
  0x26   : > { %v357_v62 = vld [vmem:[%s5862_s29 + $0x1c0] sm:$0xff]  ;;  %v5905_v0 = vrot.slane %v5899_v60, %v5894_v54  ;;  %v362_v2 = vld [vmem:[%s5862_s29 + $0x1e8] sm:$0xff]  ;;  %v5015_v5 = vcombine.low %v350_v55, %v354_v56 }
  0x27   : > { %v361_v63 = vld [vmem:[%s5862_s29 + $0x1e0] sm:$0xff]  ;;  %v5024_v7 = vcombine.high %v358_v1, %v362_v2  ;;  %v366_v11 = vld [vmem:[%s5862_s29 + $0x208] sm:$0xff]  ;;  %v5023_v14 = vcombine.low %v358_v1, %v362_v2 }
  0x28   : > { %3380 = vmatpush1.bf16.msra.mxu0 %v4989_v38  ;;  %3544 = vmatpush1.bf16.msra.mxu1 %v4991_v39  ;;  %v264_v4 = vcombine.high %v5905_v0, %v5905_v0  ;;  %v5022_v6 = vcombine.high %v357_v62, %v361_v63  ;;  %v365_v8 = vld [vmem:[%s5862_s29 + $0x200] sm:$0xff]  ;;  %v370_v12 = vld [vmem:[%s5862_s29 + $0x228] sm:$0xff]  ;;  %v5021_v13 = vcombine.low %v357_v62, %v361_v63 }
  0x29   : > { %3381 = vmatprep.subr.bf16.mxu0 %v4998_v40  ;;  %3545 = vmatprep.subr.bf16.mxu1 %v5000_v41  ;;  %v369_v9 = vld [vmem:[%s5862_s29 + $0x220] sm:$0xff]  ;;  %v5032_v16 = vcombine.high %v366_v11, %v370_v12  ;;  %v374_v19 = vld [vmem:[%s5862_s29 + $0x248] sm:$0xff]  ;;  %v5031_v22 = vcombine.low %v366_v11, %v370_v12 }
  0x2a   : > { %v5913_v10 = vpack.c.bf16 %v264_v4, %v264_v4  ;;  %v5030_v15 = vcombine.high %v365_v8, %v369_v9  ;;  %v373_v17 = vld [vmem:[%s5862_s29 + $0x240] sm:$0xff]  ;;  %v378_v20 = vld [vmem:[%s5862_s29 + $0x268] sm:$0xff]  ;;  %v5029_v21 = vcombine.low %v365_v8, %v369_v9 }
  0x2b   : > { %v377_v18 = vld [vmem:[%s5862_s29 + $0x260] sm:$0xff]  ;;  %v5040_v24 = vcombine.high %v374_v19, %v378_v20  ;;  %v382_v27 = vld [vmem:[%s5862_s29 + $0x288] sm:$0xff]  ;;  %v5039_v30 = vcombine.low %v374_v19, %v378_v20 }
  0x2c   : > { %3382 = vmatpush1.bf16.msra.mxu0 %v4997_v48  ;;  %3546 = vmatpush1.bf16.msra.mxu1 %v4999_v49  ;;  %v5038_v23 = vcombine.high %v373_v17, %v377_v18  ;;  %v381_v25 = vld [vmem:[%s5862_s29 + $0x280] sm:$0xff]  ;;  %v386_v28 = vld [vmem:[%s5862_s29 + $0x2a8] sm:$0xff]  ;;  %v5037_v29 = vcombine.low %v373_v17, %v377_v18 }
  0x2d   : > { %3383 = vmatprep.subr.bf16.mxu0 %v5006_v50  ;;  %3547 = vmatprep.subr.bf16.mxu1 %v5008_v51  ;;  %v385_v26 = vld [vmem:[%s5862_s29 + $0x2a0] sm:$0xff]  ;;  %v5048_v32 = vcombine.high %v382_v27, %v386_v28  ;;  %v390_v35 = vld [vmem:[%s5862_s29 + $0x2c8] sm:$0xff]  ;;  %v5047_v38 = vcombine.low %v382_v27, %v386_v28 }
  0x2e   : > { %3405 = vmatprep.mubr.bf16.mxu0 %v5913_v10  ;;  %3569 = vmatprep.mubr.bf16.mxu1 %v5913_v10  ;;  %v5046_v31 = vcombine.high %v381_v25, %v385_v26  ;;  %v389_v33 = vld [vmem:[%s5862_s29 + $0x2c0] sm:$0xff]  ;;  %v394_v36 = vld [vmem:[%s5862_s29 + $0x2e8] sm:$0xff]  ;;  %v5045_v37 = vcombine.low %v381_v25, %v385_v26  ;;  %v5962_v26 = vpack.c.bf16 %v5905_v0, %v5905_v0 }
  0x2f   : > { %v393_v34 = vld [vmem:[%s5862_s29 + $0x2e0] sm:$0xff]  ;;  %v5056_v40 = vcombine.high %v390_v35, %v394_v36  ;;  %v398_v43 = vld [vmem:[%s5862_s29 + $0x308] sm:$0xff]  ;;  %v5055_v47 = vcombine.low %v390_v35, %v394_v36 }
  0x30   : > { %3384 = vmatpush1.bf16.msra.mxu0 %v5005_v57  ;;  %3548 = vmatpush1.bf16.msra.mxu1 %v5007_v58  ;;  %v5054_v39 = vcombine.high %v389_v33, %v393_v34  ;;  %v397_v41 = vld [vmem:[%s5862_s29 + $0x300] sm:$0xff]  ;;  %v402_v44 = vld [vmem:[%s5862_s29 + $0x328] sm:$0xff]  ;;  %v5053_v46 = vcombine.low %v389_v33, %v393_v34 }
  0x31   : > { %3385 = vmatprep.subr.bf16.mxu0 %v5014_v59  ;;  %3549 = vmatprep.subr.bf16.mxu1 %v5016_v61  ;;  %v401_v42 = vld [vmem:[%s5862_s29 + $0x320] sm:$0xff]  ;;  %v5064_v49 = vcombine.high %v398_v43, %v402_v44  ;;  %v406_v52 = vld [vmem:[%s5862_s29 + $0x348] sm:$0xff]  ;;  %v5063_v56 = vcombine.low %v398_v43, %v402_v44 }
  0x32   : > { %v5062_v48 = vcombine.high %v397_v41, %v401_v42  ;;  %v405_v50 = vld [vmem:[%s5862_s29 + $0x340] sm:$0xff]  ;;  %v410_v53 = vld [vmem:[%s5862_s29 + $0x368] sm:$0xff]  ;;  %v5061_v55 = vcombine.low %v397_v41, %v401_v42 }
  0x33   : > { %v409_v51 = vld [vmem:[%s5862_s29 + $0x360] sm:$0xff]  ;;  %v5072_v58 = vcombine.high %v406_v52, %v410_v53  ;;  %v414_v62 = vld [vmem:[%s5862_s29 + $0x388] sm:$0xff]  ;;  %v5071_v2 = vcombine.low %v406_v52, %v410_v53 }
  0x34   : > { %3386 = vmatpush1.bf16.msra.mxu0 %v5013_v3  ;;  %3550 = vmatpush1.bf16.msra.mxu1 %v5015_v5  ;;  %v5070_v57 = vcombine.high %v405_v50, %v409_v51  ;;  %v413_v59 = vld [vmem:[%s5862_s29 + $0x380] sm:$0xff]  ;;  %v418_v63 = vld [vmem:[%s5862_s29 + $0x3a8] sm:$0xff]  ;;  %v5069_v1 = vcombine.low %v405_v50, %v409_v51 }
  0x35   : > { %3387 = vmatprep.subr.bf16.mxu0 %v5022_v6  ;;  %3551 = vmatprep.subr.bf16.mxu1 %v5024_v7  ;;  %v417_v61 = vld [vmem:[%s5862_s29 + $0x3a0] sm:$0xff]  ;;  %v5080_v4 = vcombine.high %v414_v62, %v418_v63  ;;  %v249_v7 = vcombine.high %v5899_v60, %v5899_v60  ;;  %v422_v8 = vld [vmem:[%s5862_s29 + $0x3c8] sm:$0xff]  ;;  %v5079_v12 = vcombine.low %v414_v62, %v418_v63 }
  0x36   : > { %v5078_v3 = vcombine.high %v413_v59, %v417_v61  ;;  %v421_v5 = vld [vmem:[%s5862_s29 + $0x3c0] sm:$0xff]  ;;  %v426_v9 = vld [vmem:[%s5862_s29 + $0x3e8] sm:$0xff]  ;;  %v5077_v11 = vcombine.low %v413_v59, %v417_v61 }
  0x37   : > { %v425_v6 = vld [vmem:[%s5862_s29 + $0x3e0] sm:$0xff]  ;;  %v5952_v17 = vrot.slane %v249_v7, %v5894_v54  ;;  %v430_v60 = vld [vmem:[%s5862_s29 + $0x408] sm:$0xff]  ;;  %v5087_v20 = vcombine.low %v422_v8, %v426_v9 }
  0x38   : > { %3388 = vmatpush1.bf16.msra.mxu0 %v5021_v13  ;;  %3552 = vmatpush1.bf16.msra.mxu1 %v5023_v14  ;;  %v5086_v13 = vcombine.high %v421_v5, %v425_v6  ;;  %v5088_v14 = vcombine.high %v422_v8, %v426_v9  ;;  %v434_v18 = vld [vmem:[%s5862_s29 + $0x428] sm:$0xff]  ;;  %v5085_v19 = vcombine.low %v421_v5, %v425_v6  ;;  %v445_v33 = vld [vmem:[%s5862_s29 + $0x480] sm:$0xff] }
  0x39   : > { %3389 = vmatprep.subr.bf16.mxu0 %v5030_v15  ;;  %3553 = vmatprep.subr.bf16.mxu1 %v5032_v16  ;;  %v429_v15 = vld [vmem:[%s5862_s29 + $0x400] sm:$0xff]  ;;  %v265_v25 = vcombine.high %v5952_v17, %v5952_v17  ;;  %v438_v27 = vld [vmem:[%s5862_s29 + $0x448] sm:$0xff] }
  0x3a   : > { %v433_v16 = vld [vmem:[%s5862_s29 + $0x420] sm:$0xff]  ;;  %v442_v28 = vld [vmem:[%s5862_s29 + $0x468] sm:$0xff] }
  0x3b   : > { %v449_v34 = vld [vmem:[%s5862_s29 + $0x4a0] sm:$0xff]  ;;  %v5968_v35 = vpack.c.bf16 %v265_v25, %v265_v25  ;;  %v446_v0 = vld [vmem:[%s5862_s29 + $0x488] sm:$0xff] }
  0x3c   : > { %3390 = vmatpush1.bf16.msra.mxu0 %v5029_v21  ;;  %3554 = vmatpush1.bf16.msra.mxu1 %v5031_v22  ;;  %v5094_v21 = vcombine.high %v429_v15, %v433_v16  ;;  %v5096_v22 = vcombine.high %v430_v60, %v434_v18  ;;  %v450_v36 = vld [vmem:[%s5862_s29 + $0x4a8] sm:$0xff]  ;;  %v453_v41 = vld [vmem:[%s5862_s29 + $0x4c0] sm:$0xff] }
  0x3d   : > { %3391 = vmatprep.subr.bf16.mxu0 %v5038_v23  ;;  %3555 = vmatprep.subr.bf16.mxu1 %v5040_v24  ;;  %v437_v23 = vld [vmem:[%s5862_s29 + $0x440] sm:$0xff]  ;;  %v454_v43 = vld [vmem:[%s5862_s29 + $0x4c8] sm:$0xff] }
  0x3e   : > { %v441_v24 = vld [vmem:[%s5862_s29 + $0x460] sm:$0xff]  ;;  %v458_v44 = vld [vmem:[%s5862_s29 + $0x4e8] sm:$0xff] }
  0x3f   : > { %v457_v42 = vld [vmem:[%s5862_s29 + $0x4e0] sm:$0xff]  ;;  %v462_v52 = vld [vmem:[%s5862_s29 + $0x508] sm:$0xff] }
  0x40   : > { %3392 = vmatpush1.bf16.msra.mxu0 %v5037_v29  ;;  %3556 = vmatpush1.bf16.msra.mxu1 %v5039_v30  ;;  %v5093_v29 = vcombine.low %v429_v15, %v433_v16  ;;  %v5095_v30 = vcombine.low %v430_v60, %v434_v18  ;;  %v461_v50 = vld [vmem:[%s5862_s29 + $0x500] sm:$0xff]  ;;  %v466_v53 = vld [vmem:[%s5862_s29 + $0x528] sm:$0xff] }
  0x41   : > { %3393 = vmatprep.subr.bf16.mxu0 %v5046_v31  ;;  %3557 = vmatprep.subr.bf16.mxu1 %v5048_v32  ;;  %v5102_v31 = vcombine.high %v437_v23, %v441_v24  ;;  %v5104_v32 = vcombine.high %v438_v27, %v442_v28  ;;  %v465_v51 = vld [vmem:[%s5862_s29 + $0x520] sm:$0xff]  ;;  %v470_v62 = vld [vmem:[%s5862_s29 + $0x548] sm:$0xff] }
  0x42   : > { %v469_v59 = vld [vmem:[%s5862_s29 + $0x540] sm:$0xff]  ;;  %v474_v63 = vld [vmem:[%s5862_s29 + $0x568] sm:$0xff] }
  0x43   : > { %v473_v61 = vld [vmem:[%s5862_s29 + $0x560] sm:$0xff]  ;;  %v478_v7 = vld [vmem:[%s5862_s29 + $0x588] sm:$0xff] }
  0x44   : > { %3394 = vmatpush1.bf16.msra.mxu0 %v5045_v37  ;;  %3558 = vmatpush1.bf16.msra.mxu1 %v5047_v38  ;;  %v5101_v37 = vcombine.low %v437_v23, %v441_v24  ;;  %v5103_v38 = vcombine.low %v438_v27, %v442_v28  ;;  %v477_v5 = vld [vmem:[%s5862_s29 + $0x580] sm:$0xff]  ;;  %v482_v8 = vld [vmem:[%s5862_s29 + $0x5a8] sm:$0xff]  ;;  %v5133_v9 = vcombine.low %v469_v59, %v473_v61 }
  0x45   : > { %3395 = vmatprep.subr.bf16.mxu0 %v5054_v39  ;;  %3559 = vmatprep.subr.bf16.mxu1 %v5056_v40  ;;  %v5110_v39 = vcombine.high %v445_v33, %v449_v34  ;;  %v5112_v40 = vcombine.high %v446_v0, %v450_v36  ;;  %v481_v6 = vld [vmem:[%s5862_s29 + $0x5a0] sm:$0xff]  ;;  %v486_v16 = vld [vmem:[%s5862_s29 + $0x5c8] sm:$0xff] }
  0x46   : > { %v489_v15 = vld [vmem:[%s5862_s29 + $0x5e0] sm:$0xff]  ;;  %v490_v60 = vld [vmem:[%s5862_s29 + $0x5e8] sm:$0xff]  ;;  %v5141_v18 = vcombine.low %v477_v5, %v481_v6 }
  0x47   : > { %v497_v23 = vld [vmem:[%s5862_s29 + $0x620] sm:$0xff]  ;;  %v494_v24 = vld [vmem:[%s5862_s29 + $0x608] sm:$0xff]  ;;  %v5151_v28 = vcombine.low %v486_v16, %v490_v60 }
  0x48   : > { %3396 = vmatpush1.bf16.msra.mxu0 %v5053_v46  ;;  %3560 = vmatpush1.bf16.msra.mxu1 %v5055_v47  ;;  %v5109_v46 = vcombine.low %v445_v33, %v449_v34  ;;  %v5111_v47 = vcombine.low %v446_v0, %v450_v36  ;;  %v498_v25 = vld [vmem:[%s5862_s29 + $0x628] sm:$0xff] }
  0x49   : > { %3397 = vmatprep.subr.bf16.mxu0 %v5062_v48  ;;  %3561 = vmatprep.subr.bf16.mxu1 %v5064_v49  ;;  %v5118_v48 = vcombine.high %v453_v41, %v457_v42  ;;  %v5120_v49 = vcombine.high %v454_v43, %v458_v44  ;;  %v502_v33 = vld [vmem:[%s5862_s29 + $0x648] sm:$0xff]  ;;  %v5159_v36 = vcombine.low %v494_v24, %v498_v25 }
  0x4a   : > { %v506_v34 = vld [vmem:[%s5862_s29 + $0x668] sm:$0xff] }
  0x4c   : > { %3398 = vmatpush1.bf16.msra.mxu0 %v5061_v55  ;;  %3562 = vmatpush1.bf16.msra.mxu1 %v5063_v56  ;;  %v5117_v55 = vcombine.low %v453_v41, %v457_v42  ;;  %v5119_v56 = vcombine.low %v454_v43, %v458_v44  ;;  %v510_v41 = vld [vmem:[%s5862_s29 + $0x688] sm:$0xff]  ;;  %v5167_v44 = vcombine.low %v502_v33, %v506_v34 }
  0x4d   : > { %3399 = vmatprep.subr.bf16.mxu0 %v5070_v57  ;;  %3563 = vmatprep.subr.bf16.mxu1 %v5072_v58  ;;  %v5126_v57 = vcombine.high %v461_v50, %v465_v51  ;;  %v5128_v58 = vcombine.high %v462_v52, %v466_v53  ;;  %v514_v42 = vld [vmem:[%s5862_s29 + $0x6a8] sm:$0xff] }
  0x50   : > { %3400 = vmatpush1.bf16.msra.mxu0 %v5069_v1  ;;  %3564 = vmatpush1.bf16.msra.mxu1 %v5071_v2  ;;  %v5125_v1 = vcombine.low %v461_v50, %v465_v51  ;;  %v5127_v2 = vcombine.low %v462_v52, %v466_v53  ;;  %v518_v50 = vld [vmem:[%s5862_s29 + $0x6c8] sm:$0xff]  ;;  %v5175_v53 = vcombine.low %v510_v41, %v514_v42 }
  0x51   : > { %3401 = vmatprep.subr.bf16.mxu0 %v5078_v3  ;;  %3565 = vmatprep.subr.bf16.mxu1 %v5080_v4  ;;  %v5134_v3 = vcombine.high %v469_v59, %v473_v61  ;;  %v5136_v4 = vcombine.high %v470_v62, %v474_v63  ;;  %v522_v51 = vld [vmem:[%s5862_s29 + $0x6e8] sm:$0xff] }
  0x52   : > { %v526_v59 = vld [vmem:[%s5862_s29 + $0x708] sm:$0xff] }
  0x53   : > { %v530_v61 = vld [vmem:[%s5862_s29 + $0x728] sm:$0xff] }
  0x54   : > { %3402 = vmatpush1.bf16.msra.mxu0 %v5077_v11  ;;  %3566 = vmatpush1.bf16.msra.mxu1 %v5079_v12  ;;  %v5135_v11 = vcombine.low %v470_v62, %v474_v63  ;;  %v5142_v12 = vcombine.high %v477_v5, %v481_v6  ;;  %v5183_v63 = vcombine.low %v518_v50, %v522_v51  ;;  %v534_v5 = vld [vmem:[%s5862_s29 + $0x748] sm:$0xff] }
  0x55   : > { %3403 = vmatprep.subr.bf16.mxu0 %v5086_v13  ;;  %3567 = vmatprep.subr.bf16.mxu1 %v5088_v14  ;;  %v5144_v13 = vcombine.high %v478_v7, %v482_v8  ;;  %v485_v14 = vld [vmem:[%s5862_s29 + $0x5c0] sm:$0xff]  ;;  %v538_v6 = vld [vmem:[%s5862_s29 + $0x768] sm:$0xff] }
  0x56   : > { %v5149_v27 = vcombine.low %v485_v14, %v489_v15 }
  0x58   : > { %3404 = vmatpush1.bf16.msra.mxu0 %v5085_v19  ;;  %3568 = vmatpush1.bf16.msra.mxu1 %v5087_v20  ;;  %v5143_v19 = vcombine.low %v478_v7, %v482_v8  ;;  %v5150_v20 = vcombine.high %v485_v14, %v489_v15  ;;  %v5191_v8 = vcombine.low %v526_v59, %v530_v61  ;;  %v542_v14 = vld [vmem:[%s5862_s29 + $0x788] sm:$0xff] }
  0x59   : > { %3414 = vmatprep.subr.bf16.mxu0 %v5094_v21  ;;  %3578 = vmatprep.subr.bf16.mxu1 %v5096_v22  ;;  %v5152_v21 = vcombine.high %v486_v16, %v490_v60  ;;  %v493_v22 = vld [vmem:[%s5862_s29 + $0x600] sm:$0xff]  ;;  %v546_v15 = vld [vmem:[%s5862_s29 + $0x7a8] sm:$0xff]  ;;  %v5199_v60 = vcombine.low %v534_v5, %v538_v6 }
  0x5a   : > { %v5157_v0 = vcombine.low %v493_v22, %v497_v23 }
  0x5b   : > { %3406 = vmatmul.mubr.bf16.vlgmr.msra.gmra.mrb[0].mxu0 %v5962_v26  ;;  %3570 = vmatmul.mubr.bf16.vlgmr.msra.gmra.mrb[0].mxu1 %v5962_v26 }
  0x5c   : > { %3415 = vmatpush1.bf16.msra.mxu0 %v5093_v29  ;;  %3579 = vmatpush1.bf16.msra.mxu1 %v5095_v30  ;;  %v5158_v29 = vcombine.high %v493_v22, %v497_v23  ;;  %v5160_v30 = vcombine.high %v494_v24, %v498_v25  ;;  %v550_v22 = vld [vmem:[%s5862_s29 + $0x7c8] sm:$0xff] }
  0x5d   : > { %3416 = vmatprep.subr.bf16.mxu0 %v5102_v31  ;;  %3580 = vmatprep.subr.bf16.mxu1 %v5104_v32  ;;  %v501_v31 = vld [vmem:[%s5862_s29 + $0x640] sm:$0xff]  ;;  %v554_v23 = vld [vmem:[%s5862_s29 + $0x7e8] sm:$0xff] }
  0x5e   : > { %3446 = vmatprep.mubr.bf16.mxu0 %v5968_v35  ;;  %3610 = vmatprep.mubr.bf16.mxu1 %v5968_v35  ;;  %v505_v32 = vld [vmem:[%s5862_s29 + $0x660] sm:$0xff]  ;;  %v6029_v24 = vld [vmem:[%s5857_s25 + $0x8] sm:$0xff] }
  0x5f   : > { %v5165_v43 = vcombine.low %v501_v31, %v505_v32 }
  0x60   : > { %3417 = vmatpush1.bf16.msra.mxu0 %v5101_v37  ;;  %3581 = vmatpush1.bf16.msra.mxu1 %v5103_v38  ;;  %v5166_v37 = vcombine.high %v501_v31, %v505_v32  ;;  %v5168_v38 = vcombine.high %v502_v33, %v506_v34  ;;  %v561_v31 = vld [vmem:[%s5862_s29 + $0x820] sm:$0xff]  ;;  %v6035_v32 = vrot.slane %v6029_v24, %v5894_v54  ;;  %v558_v33 = vld [vmem:[%s5862_s29 + $0x808] sm:$0xff] }
  0x61   : > { %3418 = vmatprep.subr.bf16.mxu0 %v5110_v39  ;;  %3582 = vmatprep.subr.bf16.mxu1 %v5112_v40  ;;  %v509_v39 = vld [vmem:[%s5862_s29 + $0x680] sm:$0xff]  ;;  %v562_v34 = vld [vmem:[%s5862_s29 + $0x828] sm:$0xff] }
  0x62   : > { %v513_v40 = vld [vmem:[%s5862_s29 + $0x6a0] sm:$0xff] }
  0x63   : > { %v5173_v52 = vcombine.low %v509_v39, %v513_v40 }
  0x64   : > { %3419 = vmatpush1.bf16.msra.mxu0 %v5109_v46  ;;  %3583 = vmatpush1.bf16.msra.mxu1 %v5111_v47  ;;  %v5174_v46 = vcombine.high %v509_v39, %v513_v40  ;;  %v5176_v47 = vcombine.high %v510_v41, %v514_v42  ;;  %v565_v39 = vld [vmem:[%s5862_s29 + $0x840] sm:$0xff]  ;;  %v281_v41 = vcombine.high %v6035_v32, %v6035_v32 }
  0x65   : > { %3420 = vmatprep.subr.bf16.mxu0 %v5118_v48  ;;  %3584 = vmatprep.subr.bf16.mxu1 %v5120_v49  ;;  %v517_v48 = vld [vmem:[%s5862_s29 + $0x6c0] sm:$0xff]  ;;  %v6045_v42 = vpack.c.bf16 %v5952_v17, %v5952_v17  ;;  %v574_v17 = vld [vmem:[%s5862_s29 + $0x888] sm:$0xff] }
  0x66   : > { %v521_v49 = vld [vmem:[%s5862_s29 + $0x6e0] sm:$0xff] }
  0x67   : > { %v5181_v62 = vcombine.low %v517_v48, %v521_v49  ;;  %v569_v40 = vld [vmem:[%s5862_s29 + $0x860] sm:$0xff] }
  0x68   : > { %3421 = vmatpush1.bf16.msra.mxu0 %v5117_v55  ;;  %3585 = vmatpush1.bf16.msra.mxu1 %v5119_v56  ;;  %v5182_v55 = vcombine.high %v517_v48, %v521_v49  ;;  %v5184_v56 = vcombine.high %v518_v50, %v522_v51  ;;  %v5230_v48 = vcombine.high %v565_v39, %v569_v40  ;;  %v573_v50 = vld [vmem:[%s5862_s29 + $0x880] sm:$0xff] }
  0x69   : > { %3422 = vmatprep.subr.bf16.mxu0 %v5126_v57  ;;  %3586 = vmatprep.subr.bf16.mxu1 %v5128_v58  ;;  %v525_v57 = vld [vmem:[%s5862_s29 + $0x700] sm:$0xff] }
  0x6a   : > { %v529_v58 = vld [vmem:[%s5862_s29 + $0x720] sm:$0xff] }
  0x6b   : > { %v5189_v7 = vcombine.low %v525_v57, %v529_v58  ;;  %v577_v51 = vld [vmem:[%s5862_s29 + $0x8a0] sm:$0xff] }
  0x6c   : > { %3423 = vmatpush1.bf16.msra.mxu0 %v5125_v1  ;;  %3587 = vmatpush1.bf16.msra.mxu1 %v5127_v2  ;;  %v5190_v1 = vcombine.high %v525_v57, %v529_v58  ;;  %v5192_v2 = vcombine.high %v526_v59, %v530_v61  ;;  %v5238_v57 = vcombine.high %v573_v50, %v577_v51  ;;  %v581_v59 = vld [vmem:[%s5862_s29 + $0x8c0] sm:$0xff] }
  0x6d   : > { %3424 = vmatprep.subr.bf16.mxu0 %v5134_v3  ;;  %3588 = vmatprep.subr.bf16.mxu1 %v5136_v4  ;;  %v533_v3 = vld [vmem:[%s5862_s29 + $0x740] sm:$0xff] }
  0x6e   : > { %v537_v4 = vld [vmem:[%s5862_s29 + $0x760] sm:$0xff] }
  0x6f   : > { %v5197_v16 = vcombine.low %v533_v3, %v537_v4  ;;  %v585_v61 = vld [vmem:[%s5862_s29 + $0x8e0] sm:$0xff] }
  0x70   : > { %3425 = vmatpush1.bf16.msra.mxu0 %v5133_v9  ;;  %3589 = vmatpush1.bf16.msra.mxu1 %v5135_v11  ;;  %v5198_v9 = vcombine.high %v533_v3, %v537_v4  ;;  %v5200_v11 = vcombine.high %v534_v5, %v538_v6  ;;  %v5246_v3 = vcombine.high %v581_v59, %v585_v61  ;;  %v589_v5 = vld [vmem:[%s5862_s29 + $0x900] sm:$0xff] }
  0x71   : > { %3426 = vmatprep.subr.bf16.mxu0 %v5142_v12  ;;  %3590 = vmatprep.subr.bf16.mxu1 %v5144_v13  ;;  %v541_v12 = vld [vmem:[%s5862_s29 + $0x780] sm:$0xff] }
  0x72   : > { %v545_v13 = vld [vmem:[%s5862_s29 + $0x7a0] sm:$0xff] }
  0x73   : > { %v5205_v25 = vcombine.low %v541_v12, %v545_v13  ;;  %v593_v6 = vld [vmem:[%s5862_s29 + $0x920] sm:$0xff] }
  0x74   : > { %3427 = vmatpush1.bf16.msra.mxu0 %v5141_v18  ;;  %3591 = vmatpush1.bf16.msra.mxu1 %v5143_v19  ;;  %v5206_v18 = vcombine.high %v541_v12, %v545_v13  ;;  %v5208_v19 = vcombine.high %v542_v14, %v546_v15  ;;  %v5254_v12 = vcombine.high %v589_v5, %v593_v6 }
  0x75   : > { %3428 = vmatprep.subr.bf16.mxu0 %v5150_v20  ;;  %3592 = vmatprep.subr.bf16.mxu1 %v5152_v21  ;;  %v549_v20 = vld [vmem:[%s5862_s29 + $0x7c0] sm:$0xff] }
  0x76   : > { %v553_v21 = vld [vmem:[%s5862_s29 + $0x7e0] sm:$0xff] }
  0x78   : > { %3429 = vmatpush1.bf16.msra.mxu0 %v5149_v27  ;;  %3593 = vmatpush1.bf16.msra.mxu1 %v5151_v28  ;;  %v5207_v27 = vcombine.low %v542_v14, %v546_v15  ;;  %v5214_v28 = vcombine.high %v549_v20, %v553_v21  ;;  %v597_v14 = vld [vmem:[%s5862_s29 + $0x940] sm:$0xff] }
  0x79   : > { %3430 = vmatprep.subr.bf16.mxu0 %v5158_v29  ;;  %3594 = vmatprep.subr.bf16.mxu1 %v5160_v30  ;;  %v5216_v29 = vcombine.high %v550_v22, %v554_v23  ;;  %v557_v30 = vld [vmem:[%s5862_s29 + $0x800] sm:$0xff] }
  0x7a   : > { %v601_v15 = vld [vmem:[%s5862_s29 + $0x960] sm:$0xff] }
  0x7c   : > { %3431 = vmatpush1.bf16.msra.mxu0 %v5157_v0  ;;  %3595 = vmatpush1.bf16.msra.mxu1 %v5159_v36  ;;  %v5213_v0 = vcombine.low %v549_v20, %v553_v21  ;;  %v5215_v36 = vcombine.low %v550_v22, %v554_v23  ;;  %v5262_v20 = vcombine.high %v597_v14, %v601_v15  ;;  %v605_v22 = vld [vmem:[%s5862_s29 + $0x980] sm:$0xff] }
  0x7d   : > { %3432 = vmatprep.subr.bf16.mxu0 %v5166_v37  ;;  %3596 = vmatprep.subr.bf16.mxu1 %v5168_v38  ;;  %v5222_v37 = vcombine.high %v557_v30, %v561_v31  ;;  %v5224_v38 = vcombine.high %v558_v33, %v562_v34  ;;  %v609_v23 = vld [vmem:[%s5862_s29 + $0x9a0] sm:$0xff] }
  0x80   : > { %3433 = vmatpush1.bf16.msra.mxu0 %v5165_v43  ;;  %3597 = vmatpush1.bf16.msra.mxu1 %v5167_v44  ;;  %v566_v43 = vld [vmem:[%s5862_s29 + $0x848] sm:$0xff] }
  0x81   : > { %3434 = vmatprep.subr.bf16.mxu0 %v5174_v46  ;;  %3598 = vmatprep.subr.bf16.mxu1 %v5176_v47  ;;  %v570_v44 = vld [vmem:[%s5862_s29 + $0x868] sm:$0xff]  ;;  %v5221_v46 = vcombine.low %v557_v30, %v561_v31  ;;  %v5223_v47 = vcombine.low %v558_v33, %v562_v34  ;;  %v5270_v30 = vcombine.high %v605_v22, %v609_v23  ;;  %v613_v33 = vld [vmem:[%s5862_s29 + $0x9c0] sm:$0xff] }
  0x82   : > { %v5232_v49 = vcombine.high %v566_v43, %v570_v44  ;;  %v617_v34 = vld [vmem:[%s5862_s29 + $0x9e0] sm:$0xff] }
  0x84   : > { %3435 = vmatpush1.bf16.msra.mxu0 %v5173_v52  ;;  %3599 = vmatpush1.bf16.msra.mxu1 %v5175_v53  ;;  %v6051_v52 = vpack.c.bf16 %v281_v41, %v281_v41  ;;  %v578_v53 = vld [vmem:[%s5862_s29 + $0x8a8] sm:$0xff]  ;;  %v621_v41 = vld [vmem:[%s5862_s29 + $0xa00] sm:$0xff] }
  0x85   : > { %3436 = vmatprep.subr.bf16.mxu0 %v5182_v55  ;;  %3600 = vmatprep.subr.bf16.mxu1 %v5184_v56  ;;  %v5229_v55 = vcombine.low %v565_v39, %v569_v40  ;;  %v5231_v56 = vcombine.low %v566_v43, %v570_v44  ;;  %v5240_v58 = vcombine.high %v574_v17, %v578_v53  ;;  %v625_v43 = vld [vmem:[%s5862_s29 + $0xa20] sm:$0xff]  ;;  %v622_v44 = vld [vmem:[%s5862_s29 + $0xa08] sm:$0xff] }
  0x86   : > { %v5278_v39 = vcombine.high %v613_v33, %v617_v34 }
  0x88   : > { %3437 = vmatpush1.bf16.msra.mxu0 %v5181_v62  ;;  %3601 = vmatpush1.bf16.msra.mxu1 %v5183_v63  ;;  %v582_v62 = vld [vmem:[%s5862_s29 + $0x8c8] sm:$0xff] }
  0x89   : > { %3438 = vmatprep.subr.bf16.mxu0 %v5190_v1  ;;  %3602 = vmatprep.subr.bf16.mxu1 %v5192_v2  ;;  %v586_v63 = vld [vmem:[%s5862_s29 + $0x8e8] sm:$0xff]  ;;  %v5237_v1 = vcombine.low %v573_v50, %v577_v51  ;;  %v5239_v2 = vcombine.low %v574_v17, %v578_v53  ;;  %v629_v51 = vld [vmem:[%s5862_s29 + $0xa40] sm:$0xff] }
  0x8a   : > { %v5248_v4 = vcombine.high %v582_v62, %v586_v63  ;;  %v633_v17 = vld [vmem:[%s5862_s29 + $0xa60] sm:$0xff]  ;;  %v630_v53 = vld [vmem:[%s5862_s29 + $0xa48] sm:$0xff] }
  0x8c   : > { %3439 = vmatpush1.bf16.msra.mxu0 %v5189_v7  ;;  %3603 = vmatpush1.bf16.msra.mxu1 %v5191_v8  ;;  %v590_v7 = vld [vmem:[%s5862_s29 + $0x908] sm:$0xff] }
  0x8d   : > { %3440 = vmatprep.subr.bf16.mxu0 %v5198_v9  ;;  %3604 = vmatprep.subr.bf16.mxu1 %v5200_v11  ;;  %v594_v8 = vld [vmem:[%s5862_s29 + $0x928] sm:$0xff]  ;;  %v5245_v9 = vcombine.low %v581_v59, %v585_v61  ;;  %v5247_v11 = vcombine.low %v582_v62, %v586_v63  ;;  %v637_v61 = vld [vmem:[%s5862_s29 + $0xa80] sm:$0xff] }
  0x8e   : > { %v5256_v13 = vcombine.high %v590_v7, %v594_v8  ;;  %v641_v62 = vld [vmem:[%s5862_s29 + $0xaa0] sm:$0xff]  ;;  %v638_v63 = vld [vmem:[%s5862_s29 + $0xa88] sm:$0xff] }
  0x90   : > { %3441 = vmatpush1.bf16.msra.mxu0 %v5197_v16  ;;  %3605 = vmatpush1.bf16.msra.mxu1 %v5199_v60  ;;  %v598_v16 = vld [vmem:[%s5862_s29 + $0x948] sm:$0xff] }
  0x91   : > { %3442 = vmatprep.subr.bf16.mxu0 %v5206_v18  ;;  %3606 = vmatprep.subr.bf16.mxu1 %v5208_v19  ;;  %v602_v60 = vld [vmem:[%s5862_s29 + $0x968] sm:$0xff]  ;;  %v5253_v18 = vcombine.low %v589_v5, %v593_v6  ;;  %v5255_v19 = vcombine.low %v590_v7, %v594_v8  ;;  %v645_v6 = vld [vmem:[%s5862_s29 + $0xac0] sm:$0xff] }
  0x92   : > { %v5264_v21 = vcombine.high %v598_v16, %v602_v60  ;;  %v649_v7 = vld [vmem:[%s5862_s29 + $0xae0] sm:$0xff]  ;;  %v646_v8 = vld [vmem:[%s5862_s29 + $0xac8] sm:$0xff] }
  0x94   : > { %3443 = vmatpush1.bf16.msra.mxu0 %v5205_v25  ;;  %3607 = vmatpush1.bf16.msra.mxu1 %v5207_v27  ;;  %v606_v25 = vld [vmem:[%s5862_s29 + $0x988] sm:$0xff] }
  0x95   : > { %3444 = vmatprep.subr.bf16.mxu0 %v5214_v28  ;;  %3608 = vmatprep.subr.bf16.mxu1 %v5216_v29  ;;  %v610_v27 = vld [vmem:[%s5862_s29 + $0x9a8] sm:$0xff]  ;;  %v5261_v28 = vcombine.low %v597_v14, %v601_v15  ;;  %v5263_v29 = vcombine.low %v598_v16, %v602_v60  ;;  %v653_v15 = vld [vmem:[%s5862_s29 + $0xb00] sm:$0xff] }
  0x96   : > { %v5272_v31 = vcombine.high %v606_v25, %v610_v27  ;;  %v657_v16 = vld [vmem:[%s5862_s29 + $0xb20] sm:$0xff]  ;;  %v654_v60 = vld [vmem:[%s5862_s29 + $0xb08] sm:$0xff] }
  0x98   : > { %3445 = vmatpush1.bf16.msra.mxu0 %v5213_v0  ;;  %3609 = vmatpush1.bf16.msra.mxu1 %v5215_v36  ;;  %v614_v0 = vld [vmem:[%s5862_s29 + $0x9c8] sm:$0xff] }
  0x99   : > { %3455 = vmatprep.subr.bf16.mxu0 %v5222_v37  ;;  %3619 = vmatprep.subr.bf16.mxu1 %v5224_v38  ;;  %v618_v36 = vld [vmem:[%s5862_s29 + $0x9e8] sm:$0xff]  ;;  %v5269_v37 = vcombine.low %v605_v22, %v609_v23  ;;  %v5271_v38 = vcombine.low %v606_v25, %v610_v27  ;;  %v661_v23 = vld [vmem:[%s5862_s29 + $0xb40] sm:$0xff] }
  0x9a   : > { %v5280_v40 = vcombine.high %v614_v0, %v618_v36  ;;  %v665_v25 = vld [vmem:[%s5862_s29 + $0xb60] sm:$0xff]  ;;  %v662_v27 = vld [vmem:[%s5862_s29 + $0xb48] sm:$0xff] }
  0x9b   : > { %3447 = vmatmul.mubr.bf16.vlgmr.msra.gmra.mrb[0].mxu0 %v6045_v42  ;;  %3611 = vmatmul.mubr.bf16.vlgmr.msra.gmra.mrb[0].mxu1 %v6045_v42 }
  0x9c   : > { %3456 = vmatpush1.bf16.msra.mxu0 %v5221_v46  ;;  %3620 = vmatpush1.bf16.msra.mxu1 %v5223_v47  ;;  %v626_v46 = vld [vmem:[%s5862_s29 + $0xa28] sm:$0xff]  ;;  %v5277_v47 = vcombine.low %v613_v33, %v617_v34  ;;  %v669_v34 = vld [vmem:[%s5862_s29 + $0xb80] sm:$0xff] }
  0x9d   : > { %3457 = vmatprep.subr.bf16.mxu0 %v5230_v48  ;;  %3621 = vmatprep.subr.bf16.mxu1 %v5232_v49  ;;  %v5279_v48 = vcombine.low %v614_v0, %v618_v36  ;;  %v5286_v49 = vcombine.high %v621_v41, %v625_v43  ;;  %v5288_v50 = vcombine.high %v622_v44, %v626_v46  ;;  %v673_v0 = vld [vmem:[%s5862_s29 + $0xba0] sm:$0xff]  ;;  %v670_v36 = vld [vmem:[%s5862_s29 + $0xb88] sm:$0xff] }
  0x9e   : > { %3487 = vmatprep.mubr.bf16.mxu0 %v6051_v52  ;;  %3651 = vmatprep.mubr.bf16.mxu1 %v6051_v52 }
  0xa0   : > { %3458 = vmatpush1.bf16.msra.mxu0 %v5229_v55  ;;  %3622 = vmatpush1.bf16.msra.mxu1 %v5231_v56  ;;  %v634_v55 = vld [vmem:[%s5862_s29 + $0xa68] sm:$0xff]  ;;  %v5285_v56 = vcombine.low %v621_v41, %v625_v43  ;;  %v677_v43 = vld [vmem:[%s5862_s29 + $0xbc0] sm:$0xff] }
  0xa1   : > { %3459 = vmatprep.subr.bf16.mxu0 %v5238_v57  ;;  %3623 = vmatprep.subr.bf16.mxu1 %v5240_v58  ;;  %v5287_v57 = vcombine.low %v622_v44, %v626_v46  ;;  %v5294_v58 = vcombine.high %v629_v51, %v633_v17  ;;  %v5296_v59 = vcombine.high %v630_v53, %v634_v55  ;;  %v681_v44 = vld [vmem:[%s5862_s29 + $0xbe0] sm:$0xff] }
  0xa2   : > { %v266_v46 = vcombine.high %v6029_v24, %v6029_v24  ;;  %v686_v24 = vld [vmem:[%s5862_s29 + $0xc08] sm:$0xff] }
  0xa4   : > { %3460 = vmatpush1.bf16.msra.mxu0 %v5237_v1  ;;  %3624 = vmatpush1.bf16.msra.mxu1 %v5239_v2  ;;  %v642_v1 = vld [vmem:[%s5862_s29 + $0xaa8] sm:$0xff]  ;;  %v5293_v2 = vcombine.low %v629_v51, %v633_v17  ;;  %v5342_v51 = vcombine.high %v677_v43, %v681_v44 }
  0xa5   : > { %3461 = vmatprep.subr.bf16.mxu0 %v5246_v3  ;;  %3625 = vmatprep.subr.bf16.mxu1 %v5248_v4  ;;  %v5295_v3 = vcombine.low %v630_v53, %v634_v55  ;;  %v5302_v4 = vcombine.high %v637_v61, %v641_v62  ;;  %v5304_v5 = vcombine.high %v638_v63, %v642_v1  ;;  %v685_v53 = vld [vmem:[%s5862_s29 + $0xc00] sm:$0xff] }
  0xa6   : > { %v689_v55 = vld [vmem:[%s5862_s29 + $0xc20] sm:$0xff] }
  0xa8   : > { %3462 = vmatpush1.bf16.msra.mxu0 %v5245_v9  ;;  %3626 = vmatpush1.bf16.msra.mxu1 %v5247_v11  ;;  %v650_v9 = vld [vmem:[%s5862_s29 + $0xae8] sm:$0xff]  ;;  %v5301_v11 = vcombine.low %v637_v61, %v641_v62  ;;  %v5350_v61 = vcombine.high %v685_v53, %v689_v55 }
  0xa9   : > { %3463 = vmatprep.subr.bf16.mxu0 %v5254_v12  ;;  %3627 = vmatprep.subr.bf16.mxu1 %v5256_v13  ;;  %v5303_v12 = vcombine.low %v638_v63, %v642_v1  ;;  %v5310_v13 = vcombine.high %v645_v6, %v649_v7  ;;  %v5312_v14 = vcombine.high %v646_v8, %v650_v9  ;;  %v693_v63 = vld [vmem:[%s5862_s29 + $0xc40] sm:$0xff] }
  0xaa   : > { %v697_v1 = vld [vmem:[%s5862_s29 + $0xc60] sm:$0xff] }
  0xac   : > { %3464 = vmatpush1.bf16.msra.mxu0 %v5253_v18  ;;  %3628 = vmatpush1.bf16.msra.mxu1 %v5255_v19  ;;  %v658_v18 = vld [vmem:[%s5862_s29 + $0xb28] sm:$0xff]  ;;  %v5309_v19 = vcombine.low %v645_v6, %v649_v7  ;;  %v5349_v6 = vcombine.low %v685_v53, %v689_v55 }
  0xad   : > { %3465 = vmatprep.subr.bf16.mxu0 %v5262_v20  ;;  %3629 = vmatprep.subr.bf16.mxu1 %v5264_v21  ;;  %v5311_v20 = vcombine.low %v646_v8, %v650_v9  ;;  %v5318_v21 = vcombine.high %v653_v15, %v657_v16  ;;  %v5320_v22 = vcombine.high %v654_v60, %v658_v18 }
  0xae   : > { %v5358_v8 = vcombine.high %v693_v63, %v697_v1 }
  0xb0   : > { %3466 = vmatpush1.bf16.msra.mxu0 %v5261_v28  ;;  %3630 = vmatpush1.bf16.msra.mxu1 %v5263_v29  ;;  %v666_v28 = vld [vmem:[%s5862_s29 + $0xb68] sm:$0xff]  ;;  %v5317_v29 = vcombine.low %v653_v15, %v657_v16  ;;  %v5357_v15 = vcombine.low %v693_v63, %v697_v1 }
  0xb1   : > { %3467 = vmatprep.subr.bf16.mxu0 %v5270_v30  ;;  %3631 = vmatprep.subr.bf16.mxu1 %v5272_v31  ;;  %v5319_v30 = vcombine.low %v654_v60, %v658_v18  ;;  %v5326_v31 = vcombine.high %v661_v23, %v665_v25  ;;  %v5328_v33 = vcombine.high %v662_v27, %v666_v28 }
  0xb4   : > { %3468 = vmatpush1.bf16.msra.mxu0 %v5269_v37  ;;  %3632 = vmatpush1.bf16.msra.mxu1 %v5271_v38  ;;  %v674_v37 = vld [vmem:[%s5862_s29 + $0xba8] sm:$0xff]  ;;  %v5325_v38 = vcombine.low %v661_v23, %v665_v25 }
  0xb5   : > { %3469 = vmatprep.subr.bf16.mxu0 %v5278_v39  ;;  %3633 = vmatprep.subr.bf16.mxu1 %v5280_v40  ;;  %v5327_v39 = vcombine.low %v662_v27, %v666_v28  ;;  %v5334_v40 = vcombine.high %v669_v34, %v673_v0  ;;  %v5336_v41 = vcombine.high %v670_v36, %v674_v37 }
  0xb8   : > { %3470 = vmatpush1.bf16.msra.mxu0 %v5277_v47  ;;  %3634 = vmatpush1.bf16.msra.mxu1 %v5279_v48  ;;  %v678_v47 = vld [vmem:[%s5862_s29 + $0xbc8] sm:$0xff] }
  0xb9   : > { %3471 = vmatprep.subr.bf16.mxu0 %v5286_v49  ;;  %3635 = vmatprep.subr.bf16.mxu1 %v5288_v50  ;;  %v682_v48 = vld [vmem:[%s5862_s29 + $0xbe8] sm:$0xff]  ;;  %v5333_v49 = vcombine.low %v669_v34, %v673_v0  ;;  %v5335_v50 = vcombine.low %v670_v36, %v674_v37 }
  0xba   : > { %v5344_v17 = vcombine.high %v678_v47, %v682_v48 }
  0xbc   : > { %3472 = vmatpush1.bf16.msra.mxu0 %v5285_v56  ;;  %3636 = vmatpush1.bf16.msra.mxu1 %v5287_v57  ;;  %v6116_v56 = vrot.slane %v266_v46, %v5894_v54  ;;  %v690_v57 = vld [vmem:[%s5862_s29 + $0xc28] sm:$0xff] }
  0xbd   : > { %3473 = vmatprep.subr.bf16.mxu0 %v5294_v58  ;;  %3637 = vmatprep.subr.bf16.mxu1 %v5296_v59  ;;  %v5341_v58 = vcombine.low %v677_v43, %v681_v44  ;;  %v5343_v59 = vcombine.low %v678_v47, %v682_v48  ;;  %v5352_v62 = vcombine.high %v686_v24, %v690_v57  ;;  %v733_v48 = vld [vmem:[%s5862_s29 + $0xd80] sm:$0xff] }
  0xbe   : > { %v5351_v7 = vcombine.low %v686_v24, %v690_v57  ;;  %v741_v57 = vld [vmem:[%s5862_s29 + $0xdc0] sm:$0xff] }
  0xc0   : > { %3474 = vmatpush1.bf16.msra.mxu0 %v5293_v2  ;;  %3638 = vmatpush1.bf16.msra.mxu1 %v5295_v3  ;;  %v282_v2 = vcombine.high %v6116_v56, %v6116_v56  ;;  %v6126_v3 = vpack.c.bf16 %v6035_v32, %v6035_v32  ;;  %v702_v32 = vld [vmem:[%s5862_s29 + $0xc88] sm:$0xff] }
  0xc1   : > { %3475 = vmatprep.subr.bf16.mxu0 %v5302_v4  ;;  %3639 = vmatprep.subr.bf16.mxu1 %v5304_v5  ;;  %v694_v4 = vld [vmem:[%s5862_s29 + $0xc48] sm:$0xff] }
  0xc2   : > { %v698_v5 = vld [vmem:[%s5862_s29 + $0xc68] sm:$0xff] }
  0xc3   : > { %v5360_v9 = vcombine.high %v694_v4, %v698_v5  ;;  %v5359_v16 = vcombine.low %v694_v4, %v698_v5  ;;  %v749_v4 = vld [vmem:[%s5862_s29 + $0xe00] sm:$0xff] }
  0xc4   : > { %3476 = vmatpush1.bf16.msra.mxu0 %v5301_v11  ;;  %3640 = vmatpush1.bf16.msra.mxu1 %v5303_v12  ;;  %v701_v11 = vld [vmem:[%s5862_s29 + $0xc80] sm:$0xff] }
  0xc5   : > { %3477 = vmatprep.subr.bf16.mxu0 %v5310_v13  ;;  %3641 = vmatprep.subr.bf16.mxu1 %v5312_v14  ;;  %v705_v12 = vld [vmem:[%s5862_s29 + $0xca0] sm:$0xff]  ;;  %v6132_v13 = vpack.c.bf16 %v282_v2, %v282_v2  ;;  %v706_v14 = vld [vmem:[%s5862_s29 + $0xca8] sm:$0xff] }
  0xc6   : > { %v5366_v60 = vcombine.high %v701_v11, %v705_v12  ;;  %v5368_v18 = vcombine.high %v702_v32, %v706_v14  ;;  %v5365_v23 = vcombine.low %v701_v11, %v705_v12  ;;  %v5367_v25 = vcombine.low %v702_v32, %v706_v14  ;;  %v753_v5 = vld [vmem:[%s5862_s29 + $0xe20] sm:$0xff] }
  0xc7   : > { %v5414_v11 = vcombine.high %v749_v4, %v753_v5  ;;  %v757_v32 = vld [vmem:[%s5862_s29 + $0xe40] sm:$0xff] }
  0xc8   : > { %3478 = vmatpush1.bf16.msra.mxu0 %v5309_v19  ;;  %3642 = vmatpush1.bf16.msra.mxu1 %v5311_v20  ;;  %v709_v19 = vld [vmem:[%s5862_s29 + $0xcc0] sm:$0xff] }
  0xc9   : > { %3479 = vmatprep.subr.bf16.mxu0 %v5318_v21  ;;  %3643 = vmatprep.subr.bf16.mxu1 %v5320_v22  ;;  %v713_v20 = vld [vmem:[%s5862_s29 + $0xce0] sm:$0xff]  ;;  %v710_v21 = vld [vmem:[%s5862_s29 + $0xcc8] sm:$0xff] }
  0xca   : > { %v714_v22 = vld [vmem:[%s5862_s29 + $0xce8] sm:$0xff]  ;;  %v5374_v27 = vcombine.high %v709_v19, %v713_v20  ;;  %v5373_v34 = vcombine.low %v709_v19, %v713_v20  ;;  %v761_v14 = vld [vmem:[%s5862_s29 + $0xe60] sm:$0xff] }
  0xcb   : > { %v5376_v28 = vcombine.high %v710_v21, %v714_v22  ;;  %v5375_v0 = vcombine.low %v710_v21, %v714_v22  ;;  %v5422_v19 = vcombine.high %v757_v32, %v761_v14  ;;  %v765_v21 = vld [vmem:[%s5862_s29 + $0xe80] sm:$0xff] }
  0xcc   : > { %3480 = vmatpush1.bf16.msra.mxu0 %v5317_v29  ;;  %3644 = vmatpush1.bf16.msra.mxu1 %v5319_v30  ;;  %v717_v29 = vld [vmem:[%s5862_s29 + $0xd00] sm:$0xff] }
  0xcd   : > { %3481 = vmatprep.subr.bf16.mxu0 %v5326_v31  ;;  %3645 = vmatprep.subr.bf16.mxu1 %v5328_v33  ;;  %v721_v30 = vld [vmem:[%s5862_s29 + $0xd20] sm:$0xff]  ;;  %v718_v31 = vld [vmem:[%s5862_s29 + $0xd08] sm:$0xff] }
  0xce   : > { %v722_v33 = vld [vmem:[%s5862_s29 + $0xd28] sm:$0xff]  ;;  %v5382_v36 = vcombine.high %v717_v29, %v721_v30  ;;  %v5381_v43 = vcombine.low %v717_v29, %v721_v30  ;;  %v769_v22 = vld [vmem:[%s5862_s29 + $0xea0] sm:$0xff] }
  0xcf   : > { %v5384_v37 = vcombine.high %v718_v31, %v722_v33  ;;  %v5383_v44 = vcombine.low %v718_v31, %v722_v33  ;;  %v5430_v29 = vcombine.high %v765_v21, %v769_v22  ;;  %v773_v31 = vld [vmem:[%s5862_s29 + $0xec0] sm:$0xff] }
  0xd0   : > { %3482 = vmatpush1.bf16.msra.mxu0 %v5325_v38  ;;  %3646 = vmatpush1.bf16.msra.mxu1 %v5327_v39  ;;  %v725_v38 = vld [vmem:[%s5862_s29 + $0xd40] sm:$0xff] }
  0xd1   : > { %3483 = vmatprep.subr.bf16.mxu0 %v5334_v40  ;;  %3647 = vmatprep.subr.bf16.mxu1 %v5336_v41  ;;  %v729_v39 = vld [vmem:[%s5862_s29 + $0xd60] sm:$0xff]  ;;  %v726_v40 = vld [vmem:[%s5862_s29 + $0xd48] sm:$0xff] }
  0xd2   : > { %v730_v41 = vld [vmem:[%s5862_s29 + $0xd68] sm:$0xff]  ;;  %v5390_v46 = vcombine.high %v725_v38, %v729_v39  ;;  %v777_v33 = vld [vmem:[%s5862_s29 + $0xee0] sm:$0xff] }
  0xd3   : > { %v5392_v47 = vcombine.high %v726_v40, %v730_v41  ;;  %v5391_v53 = vcombine.low %v726_v40, %v730_v41  ;;  %v781_v40 = vld [vmem:[%s5862_s29 + $0xf00] sm:$0xff] }
  0xd4   : > { %3484 = vmatpush1.bf16.msra.mxu0 %v5333_v49  ;;  %3648 = vmatpush1.bf16.msra.mxu1 %v5335_v50  ;;  %v737_v49 = vld [vmem:[%s5862_s29 + $0xda0] sm:$0xff]  ;;  %v734_v50 = vld [vmem:[%s5862_s29 + $0xd88] sm:$0xff] }
  0xd5   : > { %3485 = vmatprep.subr.bf16.mxu0 %v5342_v51  ;;  %3649 = vmatprep.subr.bf16.mxu1 %v5344_v17  ;;  %v738_v51 = vld [vmem:[%s5862_s29 + $0xda8] sm:$0xff]  ;;  %v5389_v17 = vcombine.low %v725_v38, %v729_v39  ;;  %v5398_v55 = vcombine.high %v733_v48, %v737_v49  ;;  %v5438_v38 = vcombine.high %v773_v31, %v777_v33  ;;  %v785_v41 = vld [vmem:[%s5862_s29 + $0xf20] sm:$0xff] }
  0xd6   : > { %v5400_v24 = vcombine.high %v734_v50, %v738_v51  ;;  %v5399_v63 = vcombine.low %v734_v50, %v738_v51  ;;  %v789_v50 = vld [vmem:[%s5862_s29 + $0xf40] sm:$0xff] }
  0xd7   : > { %v793_v51 = vld [vmem:[%s5862_s29 + $0xf60] sm:$0xff] }
  0xd8   : > { %3486 = vmatpush1.bf16.msra.mxu0 %v5341_v58  ;;  %3650 = vmatpush1.bf16.msra.mxu1 %v5343_v59  ;;  %v745_v58 = vld [vmem:[%s5862_s29 + $0xde0] sm:$0xff]  ;;  %v742_v59 = vld [vmem:[%s5862_s29 + $0xdc8] sm:$0xff] }
  0xd9   : > { %3496 = vmatprep.subr.bf16.mxu0 %v5350_v61  ;;  %3660 = vmatprep.subr.bf16.mxu1 %v5352_v62  ;;  %v746_v61 = vld [vmem:[%s5862_s29 + $0xde8] sm:$0xff]  ;;  %v5397_v62 = vcombine.low %v733_v48, %v737_v49  ;;  %v5406_v1 = vcombine.high %v741_v57, %v745_v58  ;;  %v5446_v48 = vcombine.high %v781_v40, %v785_v41 }
  0xda   : > { %v5408_v2 = vcombine.high %v742_v59, %v746_v61 }
  0xdb   : > { %3488 = vmatmul.mubr.bf16.vlgmr.msra.gmra.mrb[0].mxu0 %v6126_v3  ;;  %3652 = vmatmul.mubr.bf16.vlgmr.msra.gmra.mrb[0].mxu1 %v6126_v3 }
  0xdc   : > { %3497 = vmatpush1.bf16.msra.mxu0 %v5349_v6  ;;  %3661 = vmatpush1.bf16.msra.mxu1 %v5351_v7  ;;  %v750_v6 = vld [vmem:[%s5862_s29 + $0xe08] sm:$0xff] }
  0xdd   : > { %3498 = vmatprep.subr.bf16.mxu0 %v5358_v8  ;;  %3662 = vmatprep.subr.bf16.mxu1 %v5360_v9  ;;  %v754_v7 = vld [vmem:[%s5862_s29 + $0xe28] sm:$0xff]  ;;  %v5405_v8 = vcombine.low %v741_v57, %v745_v58  ;;  %v5407_v9 = vcombine.low %v742_v59, %v746_v61  ;;  %v5454_v57 = vcombine.high %v789_v50, %v793_v51  ;;  %v797_v59 = vld [vmem:[%s5862_s29 + $0xf80] sm:$0xff] }
  0xde   : > { %3528 = vmatprep.mubr.bf16.mxu0 %v6132_v13  ;;  %3692 = vmatprep.mubr.bf16.mxu1 %v6132_v13  ;;  %v5416_v12 = vcombine.high %v750_v6, %v754_v7  ;;  %v801_v61 = vld [vmem:[%s5862_s29 + $0xfa0] sm:$0xff] }
  0xe0   : > { %3499 = vmatpush1.bf16.msra.mxu0 %v5357_v15  ;;  %3663 = vmatpush1.bf16.msra.mxu1 %v5359_v16  ;;  %v758_v15 = vld [vmem:[%s5862_s29 + $0xe48] sm:$0xff] }
  0xe1   : > { %3500 = vmatprep.subr.bf16.mxu0 %v5366_v60  ;;  %3664 = vmatprep.subr.bf16.mxu1 %v5368_v18  ;;  %v762_v16 = vld [vmem:[%s5862_s29 + $0xe68] sm:$0xff]  ;;  %v5413_v60 = vcombine.low %v749_v4, %v753_v5  ;;  %v5415_v18 = vcombine.low %v750_v6, %v754_v7  ;;  %v5462_v4 = vcombine.high %v797_v59, %v801_v61  ;;  %v805_v6 = vld [vmem:[%s5862_s29 + $0xfc0] sm:$0xff] }
  0xe2   : > { %v5424_v20 = vcombine.high %v758_v15, %v762_v16  ;;  %v809_v7 = vld [vmem:[%s5862_s29 + $0xfe0] sm:$0xff] }
  0xe4   : > { %3501 = vmatpush1.bf16.msra.mxu0 %v5365_v23  ;;  %3665 = vmatpush1.bf16.msra.mxu1 %v5367_v25  ;;  %v766_v23 = vld [vmem:[%s5862_s29 + $0xe88] sm:$0xff] }
  0xe5   : > { %3502 = vmatprep.subr.bf16.mxu0 %v5374_v27  ;;  %3666 = vmatprep.subr.bf16.mxu1 %v5376_v28  ;;  %v770_v25 = vld [vmem:[%s5862_s29 + $0xea8] sm:$0xff]  ;;  %v5421_v27 = vcombine.low %v757_v32, %v761_v14  ;;  %v5423_v28 = vcombine.low %v758_v15, %v762_v16  ;;  %v5470_v32 = vcombine.high %v805_v6, %v809_v7  ;;  %v303_v15 = vld [vmem:[%s5862_s29 + $0x10] sm:$0xff] }
  0xe6   : > { %v5432_v30 = vcombine.high %v766_v23, %v770_v25  ;;  %v307_v16 = vld [vmem:[%s5862_s29 + $0x30] sm:$0xff] }
  0xe8   : > { %3503 = vmatpush1.bf16.msra.mxu0 %v5373_v34  ;;  %3667 = vmatpush1.bf16.msra.mxu1 %v5375_v0  ;;  %v774_v34 = vld [vmem:[%s5862_s29 + $0xec8] sm:$0xff] }
  0xe9   : > { %3504 = vmatprep.subr.bf16.mxu0 %v5382_v36  ;;  %3668 = vmatprep.subr.bf16.mxu1 %v5384_v37  ;;  %v778_v0 = vld [vmem:[%s5862_s29 + $0xee8] sm:$0xff]  ;;  %v5429_v36 = vcombine.low %v765_v21, %v769_v22  ;;  %v5431_v37 = vcombine.low %v766_v23, %v770_v25  ;;  %v4970_v21 = vcombine.high %v303_v15, %v307_v16  ;;  %v311_v23 = vld [vmem:[%s5862_s29 + $0x50] sm:$0xff] }
  0xea   : > { %v5440_v39 = vcombine.high %v774_v34, %v778_v0  ;;  %v315_v25 = vld [vmem:[%s5862_s29 + $0x70] sm:$0xff] }
  0xec   : > { %3505 = vmatpush1.bf16.msra.mxu0 %v5381_v43  ;;  %3669 = vmatpush1.bf16.msra.mxu1 %v5383_v44  ;;  %v782_v43 = vld [vmem:[%s5862_s29 + $0xf08] sm:$0xff] }
  0xed   : > { %3506 = vmatprep.subr.bf16.mxu0 %v5390_v46  ;;  %3670 = vmatprep.subr.bf16.mxu1 %v5392_v47  ;;  %v786_v44 = vld [vmem:[%s5862_s29 + $0xf28] sm:$0xff]  ;;  %v5437_v46 = vcombine.low %v773_v31, %v777_v33  ;;  %v5439_v47 = vcombine.low %v774_v34, %v778_v0  ;;  %v4978_v33 = vcombine.high %v311_v23, %v315_v25  ;;  %v319_v0 = vld [vmem:[%s5862_s29 + $0x90] sm:$0xff] }
  0xee   : > { %v5448_v49 = vcombine.high %v782_v43, %v786_v44 }
  0xf0   : > { %3507 = vmatpush1.bf16.msra.mxu0 %v5389_v17  ;;  %3671 = vmatpush1.bf16.msra.mxu1 %v5391_v53  ;;  %v790_v17 = vld [vmem:[%s5862_s29 + $0xf48] sm:$0xff] }
  0xf1   : > { %3508 = vmatprep.subr.bf16.mxu0 %v5398_v55  ;;  %3672 = vmatprep.subr.bf16.mxu1 %v5400_v24  ;;  %v794_v53 = vld [vmem:[%s5862_s29 + $0xf68] sm:$0xff]  ;;  %v5445_v55 = vcombine.low %v781_v40, %v785_v41  ;;  %v5447_v24 = vcombine.low %v782_v43, %v786_v44  ;;  %v327_v43 = vld [vmem:[%s5862_s29 + $0xd0] sm:$0xff] }
  0xf2   : > { %v5456_v58 = vcombine.high %v790_v17, %v794_v53  ;;  %v331_v44 = vld [vmem:[%s5862_s29 + $0xf0] sm:$0xff] }
  0xf4   : > { %3509 = vmatpush1.bf16.msra.mxu0 %v5397_v62  ;;  %3673 = vmatpush1.bf16.msra.mxu1 %v5399_v63  ;;  %v798_v62 = vld [vmem:[%s5862_s29 + $0xf88] sm:$0xff] }
  0xf5   : > { %3510 = vmatprep.subr.bf16.mxu0 %v5406_v1  ;;  %3674 = vmatprep.subr.bf16.mxu1 %v5408_v2  ;;  %v802_v63 = vld [vmem:[%s5862_s29 + $0xfa8] sm:$0xff]  ;;  %v5453_v1 = vcombine.low %v789_v50, %v793_v51  ;;  %v5455_v2 = vcombine.low %v790_v17, %v794_v53  ;;  %v4994_v50 = vcombine.high %v327_v43, %v331_v44  ;;  %v335_v17 = vld [vmem:[%s5862_s29 + $0x110] sm:$0xff] }
  0xf6   : > { %v5464_v5 = vcombine.high %v798_v62, %v802_v63  ;;  %v339_v53 = vld [vmem:[%s5862_s29 + $0x130] sm:$0xff] }
  0xf8   : > { %3511 = vmatpush1.bf16.msra.mxu0 %v5405_v8  ;;  %3675 = vmatpush1.bf16.msra.mxu1 %v5407_v9  ;;  %v806_v8 = vld [vmem:[%s5862_s29 + $0xfc8] sm:$0xff] }
  0xf9   : > { %3512 = vmatprep.subr.bf16.mxu0 %v5414_v11  ;;  %3676 = vmatprep.subr.bf16.mxu1 %v5416_v12  ;;  %v810_v9 = vld [vmem:[%s5862_s29 + $0xfe8] sm:$0xff]  ;;  %v5461_v11 = vcombine.low %v797_v59, %v801_v61  ;;  %v5463_v12 = vcombine.low %v798_v62, %v802_v63  ;;  %v343_v61 = vld [vmem:[%s5862_s29 + $0x150] sm:$0xff]  ;;  %v344_v63 = vld [vmem:[%s5862_s29 + $0x158] sm:$0xff] }
  0xfa   : > { %v5472_v14 = vcombine.high %v806_v8, %v810_v9  ;;  %v347_v62 = vld [vmem:[%s5862_s29 + $0x170] sm:$0xff] }
  0xfc   : > { %3513 = vmatpush1.bf16.msra.mxu0 %v5413_v60  ;;  %3677 = vmatpush1.bf16.msra.mxu1 %v5415_v18  ;;  %v304_v60 = vld [vmem:[%s5862_s29 + $0x18] sm:$0xff] }
  0xfd   : > { %3514 = vmatprep.subr.bf16.mxu0 %v5422_v19  ;;  %3678 = vmatprep.subr.bf16.mxu1 %v5424_v20  ;;  %v308_v18 = vld [vmem:[%s5862_s29 + $0x38] sm:$0xff]  ;;  %v5469_v19 = vcombine.low %v805_v6, %v809_v7  ;;  %v5471_v20 = vcombine.low %v806_v8, %v810_v9  ;;  %v351_v7 = vld [vmem:[%s5862_s29 + $0x190] sm:$0xff] }
  0xfe   : > { %v4972_v22 = vcombine.high %v304_v60, %v308_v18  ;;  %v4971_v31 = vcombine.low %v304_v60, %v308_v18  ;;  %v355_v8 = vld [vmem:[%s5862_s29 + $0x1b0] sm:$0xff]  ;;  %v352_v9 = vld [vmem:[%s5862_s29 + $0x198] sm:$0xff] }
  0xff   : > { %v363_v60 = vld [vmem:[%s5862_s29 + $0x1f0] sm:$0xff]  ;;  %v360_v18 = vld [vmem:[%s5862_s29 + $0x1d8] sm:$0xff] }
 0x100   : > { %3515 = vmatpush1.bf16.msra.mxu0 %v5421_v27  ;;  %3679 = vmatpush1.bf16.msra.mxu1 %v5423_v28  ;;  %v6200_v27 = vpack.c.bf16 %v6116_v56, %v6116_v56  ;;  %v312_v28 = vld [vmem:[%s5862_s29 + $0x58] sm:$0xff] }
 0x101   : > { %3516 = vmatprep.subr.bf16.mxu0 %v5430_v29  ;;  %3680 = vmatprep.subr.bf16.mxu1 %v5432_v30  ;;  %v316_v29 = vld [vmem:[%s5862_s29 + $0x78] sm:$0xff]  ;;  %v4969_v30 = vcombine.low %v303_v15, %v307_v16  ;;  %v359_v16 = vld [vmem:[%s5862_s29 + $0x1d0] sm:$0xff] }
 0x102   : > { %v4980_v34 = vcombine.high %v312_v28, %v316_v29  ;;  %v320_v56 = vld [vmem:[%s5862_s29 + $0x98] sm:$0xff] }
 0x104   : > { %3517 = vmatpush1.bf16.msra.mxu0 %v5429_v36  ;;  %3681 = vmatpush1.bf16.msra.mxu1 %v5431_v37  ;;  %v323_v36 = vld [vmem:[%s5862_s29 + $0xb0] sm:$0xff]  ;;  %v324_v37 = vld [vmem:[%s5862_s29 + $0xb8] sm:$0xff] }
 0x105   : > { %3518 = vmatprep.subr.bf16.mxu0 %v5438_v38  ;;  %3682 = vmatprep.subr.bf16.mxu1 %v5440_v39  ;;  %v4977_v38 = vcombine.low %v311_v23, %v315_v25  ;;  %v4979_v39 = vcombine.low %v312_v28, %v316_v29  ;;  %v4986_v40 = vcombine.high %v319_v0, %v323_v36  ;;  %v367_v25 = vld [vmem:[%s5862_s29 + $0x210] sm:$0xff]  ;;  %v368_v29 = vld [vmem:[%s5862_s29 + $0x218] sm:$0xff] }
 0x106   : > { %v4988_v41 = vcombine.high %v320_v56, %v324_v37  ;;  %v371_v28 = vld [vmem:[%s5862_s29 + $0x230] sm:$0xff] }
 0x108   : > { %3519 = vmatpush1.bf16.msra.mxu0 %v5437_v46  ;;  %3683 = vmatpush1.bf16.msra.mxu1 %v5439_v47  ;;  %v328_v46 = vld [vmem:[%s5862_s29 + $0xd8] sm:$0xff] }
 0x109   : > { %3520 = vmatprep.subr.bf16.mxu0 %v5446_v48  ;;  %3684 = vmatprep.subr.bf16.mxu1 %v5448_v49  ;;  %v332_v47 = vld [vmem:[%s5862_s29 + $0xf8] sm:$0xff]  ;;  %v4985_v48 = vcombine.low %v319_v0, %v323_v36  ;;  %v4987_v49 = vcombine.low %v320_v56, %v324_v37  ;;  %v375_v36 = vld [vmem:[%s5862_s29 + $0x250] sm:$0xff] }
 0x10a   : > { %v4996_v51 = vcombine.high %v328_v46, %v332_v47  ;;  %v379_v56 = vld [vmem:[%s5862_s29 + $0x270] sm:$0xff]  ;;  %v376_v37 = vld [vmem:[%s5862_s29 + $0x258] sm:$0xff] }
 0x10c   : > { %3521 = vmatpush1.bf16.msra.mxu0 %v5445_v55  ;;  %3685 = vmatpush1.bf16.msra.mxu1 %v5447_v24  ;;  %v336_v55 = vld [vmem:[%s5862_s29 + $0x118] sm:$0xff] }
 0x10d   : > { %3522 = vmatprep.subr.bf16.mxu0 %v5454_v57  ;;  %3686 = vmatprep.subr.bf16.mxu1 %v5456_v58  ;;  %v340_v24 = vld [vmem:[%s5862_s29 + $0x138] sm:$0xff]  ;;  %v4993_v57 = vcombine.low %v327_v43, %v331_v44  ;;  %v5002_v58 = vcombine.high %v335_v17, %v339_v53  ;;  %v383_v44 = vld [vmem:[%s5862_s29 + $0x290] sm:$0xff] }
 0x10e   : > { %v5004_v59 = vcombine.high %v336_v55, %v340_v24 }
 0x110   : > { %3523 = vmatpush1.bf16.msra.mxu0 %v5453_v1  ;;  %3687 = vmatpush1.bf16.msra.mxu1 %v5455_v2  ;;  %v348_v1 = vld [vmem:[%s5862_s29 + $0x178] sm:$0xff]  ;;  %v5001_v2 = vcombine.low %v335_v17, %v339_v53  ;;  %v391_v53 = vld [vmem:[%s5862_s29 + $0x2d0] sm:$0xff] }
 0x111   : > { %3524 = vmatprep.subr.bf16.mxu0 %v5462_v4  ;;  %3688 = vmatprep.subr.bf16.mxu1 %v5464_v5  ;;  %v5003_v4 = vcombine.low %v336_v55, %v340_v24  ;;  %v5010_v5 = vcombine.high %v343_v61, %v347_v62  ;;  %v5012_v6 = vcombine.high %v344_v63, %v348_v1  ;;  %v395_v55 = vld [vmem:[%s5862_s29 + $0x2f0] sm:$0xff]  ;;  %v392_v24 = vld [vmem:[%s5862_s29 + $0x2d8] sm:$0xff] }
 0x114   : > { %3525 = vmatpush1.bf16.msra.mxu0 %v5461_v11  ;;  %3689 = vmatpush1.bf16.msra.mxu1 %v5463_v12  ;;  %v356_v11 = vld [vmem:[%s5862_s29 + $0x1b8] sm:$0xff]  ;;  %v5009_v12 = vcombine.low %v343_v61, %v347_v62  ;;  %v399_v62 = vld [vmem:[%s5862_s29 + $0x310] sm:$0xff] }
 0x115   : > { %3526 = vmatprep.subr.bf16.mxu0 %v5470_v32  ;;  %3690 = vmatprep.subr.bf16.mxu1 %v5472_v14  ;;  %v5011_v32 = vcombine.low %v344_v63, %v348_v1  ;;  %v5018_v14 = vcombine.high %v351_v7, %v355_v8  ;;  %v5020_v15 = vcombine.high %v352_v9, %v356_v11  ;;  %v403_v63 = vld [vmem:[%s5862_s29 + $0x330] sm:$0xff]  ;;  %v400_v1 = vld [vmem:[%s5862_s29 + $0x318] sm:$0xff] }
 0x118   : > { %3527 = vmatpush1.bf16.msra.mxu0 %v5469_v19  ;;  %3691 = vmatpush1.bf16.msra.mxu1 %v5471_v20  ;;  %v364_v19 = vld [vmem:[%s5862_s29 + $0x1f8] sm:$0xff]  ;;  %v5017_v20 = vcombine.low %v351_v7, %v355_v8  ;;  %v407_v8 = vld [vmem:[%s5862_s29 + $0x350] sm:$0xff] }
 0x119   : > { %3701 = vmatprep.subr.bf16.mxu0 %v4970_v21  ;;  %3865 = vmatprep.subr.bf16.mxu1 %v4972_v22  ;;  %v5019_v21 = vcombine.low %v352_v9, %v356_v11  ;;  %v5026_v22 = vcombine.high %v359_v16, %v363_v60  ;;  %v5028_v23 = vcombine.high %v360_v18, %v364_v19  ;;  %v411_v9 = vld [vmem:[%s5862_s29 + $0x370] sm:$0xff]  ;;  %v408_v11 = vld [vmem:[%s5862_s29 + $0x358] sm:$0xff] }
 0x11b   : > { %3529 = vmatmul.mubr.bf16.vlgmr.msra.gmra.mrb[0].mxu0 %v6200_v27  ;;  %3693 = vmatmul.mubr.bf16.vlgmr.msra.gmra.mrb[0].mxu1 %v6200_v27 }
 0x11c   : > { %3702 = vmatpush1.bf16.msra.mxu0 %v4969_v30  ;;  %3866 = vmatpush1.bf16.msra.mxu1 %v4971_v31  ;;  %v372_v30 = vld [vmem:[%s5862_s29 + $0x238] sm:$0xff]  ;;  %v5025_v31 = vcombine.low %v359_v16, %v363_v60  ;;  %v415_v60 = vld [vmem:[%s5862_s29 + $0x390] sm:$0xff] }
 0x11d   : > { %3703 = vmatprep.subr.bf16.mxu0 %v4978_v33  ;;  %3867 = vmatprep.subr.bf16.mxu1 %v4980_v34  ;;  %v5027_v33 = vcombine.low %v360_v18, %v364_v19  ;;  %v5034_v34 = vcombine.high %v367_v25, %v371_v28  ;;  %v5036_v0 = vcombine.high %v368_v29, %v372_v30  ;;  %v419_v18 = vld [vmem:[%s5862_s29 + $0x3b0] sm:$0xff]  ;;  %v416_v19 = vld [vmem:[%s5862_s29 + $0x398] sm:$0xff] }
 0x11e   : > { %3733 = vmatprep.mubr.bf16.mxu0 %v5913_v10  ;;  %3897 = vmatprep.mubr.bf16.mxu1 %v5913_v10  ;;  %v4995_v10 = vcombine.low %v328_v46, %v332_v47  ;;  %v387_v46 = vld [vmem:[%s5862_s29 + $0x2b0] sm:$0xff]  ;;  %v384_v47 = vld [vmem:[%s5862_s29 + $0x298] sm:$0xff] }
 0x120   : > { %3704 = vmatpush1.bf16.msra.mxu0 %v4977_v38  ;;  %3868 = vmatpush1.bf16.msra.mxu1 %v4979_v39  ;;  %v380_v38 = vld [vmem:[%s5862_s29 + $0x278] sm:$0xff]  ;;  %v5033_v39 = vcombine.low %v367_v25, %v371_v28  ;;  %v423_v28 = vld [vmem:[%s5862_s29 + $0x3d0] sm:$0xff] }
 0x121   : > { %3705 = vmatprep.subr.bf16.mxu0 %v4986_v40  ;;  %3869 = vmatprep.subr.bf16.mxu1 %v4988_v41  ;;  %v5035_v40 = vcombine.low %v368_v29, %v372_v30  ;;  %v5042_v41 = vcombine.high %v375_v36, %v379_v56  ;;  %v5044_v43 = vcombine.high %v376_v37, %v380_v38  ;;  %v427_v29 = vld [vmem:[%s5862_s29 + $0x3f0] sm:$0xff]  ;;  %v424_v30 = vld [vmem:[%s5862_s29 + $0x3d8] sm:$0xff] }
 0x124   : > { %3706 = vmatpush1.bf16.msra.mxu0 %v4985_v48  ;;  %3870 = vmatpush1.bf16.msra.mxu1 %v4987_v49  ;;  %v388_v48 = vld [vmem:[%s5862_s29 + $0x2b8] sm:$0xff]  ;;  %v5041_v49 = vcombine.low %v375_v36, %v379_v56  ;;  %v431_v56 = vld [vmem:[%s5862_s29 + $0x410] sm:$0xff] }
 0x125   : > { %3707 = vmatprep.subr.bf16.mxu0 %v4994_v50  ;;  %3871 = vmatprep.subr.bf16.mxu1 %v4996_v51  ;;  %v5043_v50 = vcombine.low %v376_v37, %v380_v38  ;;  %v5050_v51 = vcombine.high %v383_v44, %v387_v46  ;;  %v5052_v17 = vcombine.high %v384_v47, %v388_v48  ;;  %v435_v37 = vld [vmem:[%s5862_s29 + $0x430] sm:$0xff]  ;;  %v432_v38 = vld [vmem:[%s5862_s29 + $0x418] sm:$0xff] }
 0x128   : > { %3708 = vmatpush1.bf16.msra.mxu0 %v4993_v57  ;;  %3872 = vmatpush1.bf16.msra.mxu1 %v4995_v10  ;;  %v396_v57 = vld [vmem:[%s5862_s29 + $0x2f8] sm:$0xff]  ;;  %v5049_v10 = vcombine.low %v383_v44, %v387_v46  ;;  %v439_v46 = vld [vmem:[%s5862_s29 + $0x450] sm:$0xff] }
 0x129   : > { %3709 = vmatprep.subr.bf16.mxu0 %v5002_v58  ;;  %3873 = vmatprep.subr.bf16.mxu1 %v5004_v59  ;;  %v5051_v58 = vcombine.low %v384_v47, %v388_v48  ;;  %v5058_v59 = vcombine.high %v391_v53, %v395_v55  ;;  %v5060_v61 = vcombine.high %v392_v24, %v396_v57  ;;  %v443_v47 = vld [vmem:[%s5862_s29 + $0x470] sm:$0xff]  ;;  %v440_v48 = vld [vmem:[%s5862_s29 + $0x458] sm:$0xff] }
 0x12c   : > { %3710 = vmatpush1.bf16.msra.mxu0 %v5001_v2  ;;  %3874 = vmatpush1.bf16.msra.mxu1 %v5003_v4  ;;  %v404_v2 = vld [vmem:[%s5862_s29 + $0x338] sm:$0xff]  ;;  %v5057_v4 = vcombine.low %v391_v53, %v395_v55  ;;  %v447_v55 = vld [vmem:[%s5862_s29 + $0x490] sm:$0xff] }
 0x12d   : > { %3711 = vmatprep.subr.bf16.mxu0 %v5010_v5  ;;  %3875 = vmatprep.subr.bf16.mxu1 %v5012_v6  ;;  %v5059_v5 = vcombine.low %v392_v24, %v396_v57  ;;  %v5066_v6 = vcombine.high %v399_v62, %v403_v63  ;;  %v5068_v7 = vcombine.high %v400_v1, %v404_v2  ;;  %v451_v24 = vld [vmem:[%s5862_s29 + $0x4b0] sm:$0xff]  ;;  %v448_v57 = vld [vmem:[%s5862_s29 + $0x498] sm:$0xff] }
 0x130   : > { %3712 = vmatpush1.bf16.msra.mxu0 %v5009_v12  ;;  %3876 = vmatpush1.bf16.msra.mxu1 %v5011_v32  ;;  %v412_v12 = vld [vmem:[%s5862_s29 + $0x378] sm:$0xff]  ;;  %v5065_v32 = vcombine.low %v399_v62, %v403_v63  ;;  %v455_v63 = vld [vmem:[%s5862_s29 + $0x4d0] sm:$0xff] }
 0x131   : > { %3713 = vmatprep.subr.bf16.mxu0 %v5018_v14  ;;  %3877 = vmatprep.subr.bf16.mxu1 %v5020_v15  ;;  %v5067_v14 = vcombine.low %v400_v1, %v404_v2  ;;  %v5074_v15 = vcombine.high %v407_v8, %v411_v9  ;;  %v5076_v16 = vcombine.high %v408_v11, %v412_v12  ;;  %v459_v1 = vld [vmem:[%s5862_s29 + $0x4f0] sm:$0xff]  ;;  %v456_v2 = vld [vmem:[%s5862_s29 + $0x4d8] sm:$0xff] }
 0x134   : > { %3714 = vmatpush1.bf16.msra.mxu0 %v5017_v20  ;;  %3878 = vmatpush1.bf16.msra.mxu1 %v5019_v21  ;;  %v420_v20 = vld [vmem:[%s5862_s29 + $0x3b8] sm:$0xff]  ;;  %v5073_v21 = vcombine.low %v407_v8, %v411_v9  ;;  %v463_v8 = vld [vmem:[%s5862_s29 + $0x510] sm:$0xff] }
 0x135   : > { %3715 = vmatprep.subr.bf16.mxu0 %v5026_v22  ;;  %3879 = vmatprep.subr.bf16.mxu1 %v5028_v23  ;;  %v5075_v22 = vcombine.low %v408_v11, %v412_v12  ;;  %v5082_v23 = vcombine.high %v415_v60, %v419_v18  ;;  %v5084_v25 = vcombine.high %v416_v19, %v420_v20  ;;  %v467_v9 = vld [vmem:[%s5862_s29 + $0x530] sm:$0xff]  ;;  %v464_v11 = vld [vmem:[%s5862_s29 + $0x518] sm:$0xff] }
 0x136   : > { %v468_v12 = vld [vmem:[%s5862_s29 + $0x538] sm:$0xff] }
 0x138   : > { %3716 = vmatpush1.bf16.msra.mxu0 %v5025_v31  ;;  %3880 = vmatpush1.bf16.msra.mxu1 %v5027_v33  ;;  %v428_v31 = vld [vmem:[%s5862_s29 + $0x3f8] sm:$0xff]  ;;  %v5081_v33 = vcombine.low %v415_v60, %v419_v18  ;;  %v475_v60 = vld [vmem:[%s5862_s29 + $0x570] sm:$0xff] }
 0x139   : > { %3717 = vmatprep.subr.bf16.mxu0 %v5034_v34  ;;  %3881 = vmatprep.subr.bf16.mxu1 %v5036_v0  ;;  %v5083_v34 = vcombine.low %v416_v19, %v420_v20  ;;  %v5090_v0 = vcombine.high %v423_v28, %v427_v29  ;;  %v5092_v36 = vcombine.high %v424_v30, %v428_v31  ;;  %v472_v18 = vld [vmem:[%s5862_s29 + $0x558] sm:$0xff] }
 0x13a   : > { %v476_v19 = vld [vmem:[%s5862_s29 + $0x578] sm:$0xff]  ;;  %v5129_v20 = vcombine.low %v463_v8, %v467_v9 }
 0x13c   : > { %3718 = vmatpush1.bf16.msra.mxu0 %v5033_v39  ;;  %3882 = vmatpush1.bf16.msra.mxu1 %v5035_v40  ;;  %v436_v39 = vld [vmem:[%s5862_s29 + $0x438] sm:$0xff]  ;;  %v5089_v40 = vcombine.low %v423_v28, %v427_v29  ;;  %v483_v28 = vld [vmem:[%s5862_s29 + $0x5b0] sm:$0xff] }
 0x13d   : > { %3719 = vmatprep.subr.bf16.mxu0 %v5042_v41  ;;  %3883 = vmatprep.subr.bf16.mxu1 %v5044_v43  ;;  %v5091_v41 = vcombine.low %v424_v30, %v428_v31  ;;  %v5098_v43 = vcombine.high %v431_v56, %v435_v37  ;;  %v5100_v44 = vcombine.high %v432_v38, %v436_v39  ;;  %v480_v29 = vld [vmem:[%s5862_s29 + $0x598] sm:$0xff] }
 0x13e   : > { %v484_v30 = vld [vmem:[%s5862_s29 + $0x5b8] sm:$0xff] }
 0x140   : > { %3720 = vmatpush1.bf16.msra.mxu0 %v5041_v49  ;;  %3884 = vmatpush1.bf16.msra.mxu1 %v5043_v50  ;;  %v444_v49 = vld [vmem:[%s5862_s29 + $0x478] sm:$0xff]  ;;  %v5097_v50 = vcombine.low %v431_v56, %v435_v37  ;;  %v491_v56 = vld [vmem:[%s5862_s29 + $0x5f0] sm:$0xff] }
 0x141   : > { %3721 = vmatprep.subr.bf16.mxu0 %v5050_v51  ;;  %3885 = vmatprep.subr.bf16.mxu1 %v5052_v17  ;;  %v5099_v51 = vcombine.low %v432_v38, %v436_v39  ;;  %v5106_v17 = vcombine.high %v439_v46, %v443_v47  ;;  %v5108_v53 = vcombine.high %v440_v48, %v444_v49  ;;  %v488_v37 = vld [vmem:[%s5862_s29 + $0x5d8] sm:$0xff] }
 0x142   : > { %v492_v38 = vld [vmem:[%s5862_s29 + $0x5f8] sm:$0xff] }
 0x144   : > { %3722 = vmatpush1.bf16.msra.mxu0 %v5049_v10  ;;  %3886 = vmatpush1.bf16.msra.mxu1 %v5051_v58  ;;  %v452_v10 = vld [vmem:[%s5862_s29 + $0x4b8] sm:$0xff]  ;;  %v5105_v58 = vcombine.low %v439_v46, %v443_v47  ;;  %v499_v46 = vld [vmem:[%s5862_s29 + $0x630] sm:$0xff] }
 0x145   : > { %3723 = vmatprep.subr.bf16.mxu0 %v5058_v59  ;;  %3887 = vmatprep.subr.bf16.mxu1 %v5060_v61  ;;  %v5107_v59 = vcombine.low %v440_v48, %v444_v49  ;;  %v5114_v61 = vcombine.high %v447_v55, %v451_v24  ;;  %v5116_v62 = vcombine.high %v448_v57, %v452_v10  ;;  %v496_v47 = vld [vmem:[%s5862_s29 + $0x618] sm:$0xff] }
 0x146   : > { %v500_v48 = vld [vmem:[%s5862_s29 + $0x638] sm:$0xff] }
 0x148   : > { %3724 = vmatpush1.bf16.msra.mxu0 %v5057_v4  ;;  %3888 = vmatpush1.bf16.msra.mxu1 %v5059_v5  ;;  %v460_v4 = vld [vmem:[%s5862_s29 + $0x4f8] sm:$0xff]  ;;  %v5115_v5 = vcombine.low %v448_v57, %v452_v10 }
 0x149   : > { %3725 = vmatprep.subr.bf16.mxu0 %v5066_v6  ;;  %3889 = vmatprep.subr.bf16.mxu1 %v5068_v7  ;;  %v5122_v6 = vcombine.high %v455_v63, %v459_v1  ;;  %v5124_v7 = vcombine.high %v456_v2, %v460_v4  ;;  %v508_v57 = vld [vmem:[%s5862_s29 + $0x678] sm:$0xff] }
 0x14c   : > { %3726 = vmatpush1.bf16.msra.mxu0 %v5065_v32  ;;  %3890 = vmatpush1.bf16.msra.mxu1 %v5067_v14  ;;  %v5121_v32 = vcombine.low %v455_v63, %v459_v1  ;;  %v5130_v14 = vcombine.high %v463_v8, %v467_v9  ;;  %v515_v63 = vld [vmem:[%s5862_s29 + $0x6b0] sm:$0xff]  ;;  %v512_v1 = vld [vmem:[%s5862_s29 + $0x698] sm:$0xff] }
 0x14d   : > { %3727 = vmatprep.subr.bf16.mxu0 %v5074_v15  ;;  %3891 = vmatprep.subr.bf16.mxu1 %v5076_v16  ;;  %v5132_v15 = vcombine.high %v464_v11, %v468_v12  ;;  %v471_v16 = vld [vmem:[%s5862_s29 + $0x550] sm:$0xff]  ;;  %v520_v9 = vld [vmem:[%s5862_s29 + $0x6d8] sm:$0xff] }
 0x14e   : > { %v5137_v31 = vcombine.low %v471_v16, %v475_v60  ;;  %v523_v8 = vld [vmem:[%s5862_s29 + $0x6f0] sm:$0xff] }
 0x150   : > { %3728 = vmatpush1.bf16.msra.mxu0 %v5073_v21  ;;  %3892 = vmatpush1.bf16.msra.mxu1 %v5075_v22  ;;  %v5131_v21 = vcombine.low %v464_v11, %v468_v12  ;;  %v5138_v22 = vcombine.high %v471_v16, %v475_v60  ;;  %v524_v11 = vld [vmem:[%s5862_s29 + $0x6f8] sm:$0xff]  ;;  %v531_v16 = vld [vmem:[%s5862_s29 + $0x730] sm:$0xff] }
 0x151   : > { %3729 = vmatprep.subr.bf16.mxu0 %v5082_v23  ;;  %3893 = vmatprep.subr.bf16.mxu1 %v5084_v25  ;;  %v5140_v23 = vcombine.high %v472_v18, %v476_v19  ;;  %v479_v25 = vld [vmem:[%s5862_s29 + $0x590] sm:$0xff]  ;;  %v528_v60 = vld [vmem:[%s5862_s29 + $0x718] sm:$0xff] }
 0x152   : > { %v5145_v39 = vcombine.low %v479_v25, %v483_v28 }
 0x154   : > { %3730 = vmatpush1.bf16.msra.mxu0 %v5081_v33  ;;  %3894 = vmatpush1.bf16.msra.mxu1 %v5083_v34  ;;  %v5139_v33 = vcombine.low %v472_v18, %v476_v19  ;;  %v5146_v34 = vcombine.high %v479_v25, %v483_v28  ;;  %v532_v18 = vld [vmem:[%s5862_s29 + $0x738] sm:$0xff]  ;;  %v539_v25 = vld [vmem:[%s5862_s29 + $0x770] sm:$0xff] }
 0x155   : > { %3731 = vmatprep.subr.bf16.mxu0 %v5090_v0  ;;  %3895 = vmatprep.subr.bf16.mxu1 %v5092_v36  ;;  %v5148_v0 = vcombine.high %v480_v29, %v484_v30  ;;  %v487_v36 = vld [vmem:[%s5862_s29 + $0x5d0] sm:$0xff]  ;;  %v536_v28 = vld [vmem:[%s5862_s29 + $0x758] sm:$0xff] }
 0x156   : > { %v5153_v49 = vcombine.low %v487_v36, %v491_v56 }
 0x158   : > { %3732 = vmatpush1.bf16.msra.mxu0 %v5089_v40  ;;  %3896 = vmatpush1.bf16.msra.mxu1 %v5091_v41  ;;  %v5147_v40 = vcombine.low %v480_v29, %v484_v30  ;;  %v5154_v41 = vcombine.high %v487_v36, %v491_v56  ;;  %v540_v29 = vld [vmem:[%s5862_s29 + $0x778] sm:$0xff]  ;;  %v547_v36 = vld [vmem:[%s5862_s29 + $0x7b0] sm:$0xff] }
 0x159   : > { %3742 = vmatprep.subr.bf16.mxu0 %v5098_v43  ;;  %3906 = vmatprep.subr.bf16.mxu1 %v5100_v44  ;;  %v5156_v43 = vcombine.high %v488_v37, %v492_v38  ;;  %v495_v44 = vld [vmem:[%s5862_s29 + $0x610] sm:$0xff]  ;;  %v544_v56 = vld [vmem:[%s5862_s29 + $0x798] sm:$0xff] }
 0x15a   : > { %v5161_v10 = vcombine.low %v495_v44, %v499_v46 }
 0x15b   : > { %3734 = vmatmul.mubr.bf16.vlgmr.msra.gmra.mrb[4].mxu0 %v5962_v26  ;;  %3898 = vmatmul.mubr.bf16.vlgmr.msra.gmra.mrb[4].mxu1 %v5962_v26  ;;  %v5113_v26 = vcombine.low %v447_v55, %v451_v24  ;;  %v507_v55 = vld [vmem:[%s5862_s29 + $0x670] sm:$0xff]  ;;  %v504_v24 = vld [vmem:[%s5862_s29 + $0x658] sm:$0xff] }
 0x15c   : > { %3743 = vmatpush1.bf16.msra.mxu0 %v5097_v50  ;;  %3907 = vmatpush1.bf16.msra.mxu1 %v5099_v51  ;;  %v5155_v50 = vcombine.low %v488_v37, %v492_v38  ;;  %v5162_v51 = vcombine.high %v495_v44, %v499_v46  ;;  %v548_v37 = vld [vmem:[%s5862_s29 + $0x7b8] sm:$0xff]  ;;  %v555_v44 = vld [vmem:[%s5862_s29 + $0x7f0] sm:$0xff] }
 0x15d   : > { %3744 = vmatprep.subr.bf16.mxu0 %v5106_v17  ;;  %3908 = vmatprep.subr.bf16.mxu1 %v5108_v53  ;;  %v5164_v17 = vcombine.high %v496_v47, %v500_v48  ;;  %v503_v53 = vld [vmem:[%s5862_s29 + $0x650] sm:$0xff]  ;;  %v552_v46 = vld [vmem:[%s5862_s29 + $0x7d8] sm:$0xff] }
 0x15e   : > { %3774 = vmatprep.mubr.bf16.mxu0 %v5968_v35  ;;  %3938 = vmatprep.mubr.bf16.mxu1 %v5968_v35  ;;  %v5123_v35 = vcombine.low %v456_v2, %v460_v4  ;;  %v516_v2 = vld [vmem:[%s5862_s29 + $0x6b8] sm:$0xff]  ;;  %v5169_v4 = vcombine.low %v503_v53, %v507_v55 }
 0x160   : > { %3745 = vmatpush1.bf16.msra.mxu0 %v5105_v58  ;;  %3909 = vmatpush1.bf16.msra.mxu1 %v5107_v59  ;;  %v5163_v58 = vcombine.low %v496_v47, %v500_v48  ;;  %v5170_v59 = vcombine.high %v503_v53, %v507_v55  ;;  %v556_v47 = vld [vmem:[%s5862_s29 + $0x7f8] sm:$0xff]  ;;  %v563_v53 = vld [vmem:[%s5862_s29 + $0x830] sm:$0xff] }
 0x161   : > { %3746 = vmatprep.subr.bf16.mxu0 %v5114_v61  ;;  %3910 = vmatprep.subr.bf16.mxu1 %v5116_v62  ;;  %v5172_v61 = vcombine.high %v504_v24, %v508_v57  ;;  %v511_v62 = vld [vmem:[%s5862_s29 + $0x690] sm:$0xff]  ;;  %v560_v55 = vld [vmem:[%s5862_s29 + $0x818] sm:$0xff] }
 0x162   : > { %v5177_v12 = vcombine.low %v511_v62, %v515_v63 }
 0x164   : > { %3747 = vmatpush1.bf16.msra.mxu0 %v5113_v26  ;;  %3911 = vmatpush1.bf16.msra.mxu1 %v5115_v5  ;;  %v5171_v26 = vcombine.low %v504_v24, %v508_v57  ;;  %v5178_v5 = vcombine.high %v511_v62, %v515_v63  ;;  %v564_v24 = vld [vmem:[%s5862_s29 + $0x838] sm:$0xff]  ;;  %v571_v62 = vld [vmem:[%s5862_s29 + $0x870] sm:$0xff] }
 0x165   : > { %3748 = vmatprep.subr.bf16.mxu0 %v5122_v6  ;;  %3912 = vmatprep.subr.bf16.mxu1 %v5124_v7  ;;  %v5180_v6 = vcombine.high %v512_v1, %v516_v2  ;;  %v519_v7 = vld [vmem:[%s5862_s29 + $0x6d0] sm:$0xff]  ;;  %v568_v63 = vld [vmem:[%s5862_s29 + $0x858] sm:$0xff] }
 0x166   : > { %v5185_v19 = vcombine.low %v519_v7, %v523_v8 }
 0x168   : > { %3749 = vmatpush1.bf16.msra.mxu0 %v5121_v32  ;;  %3913 = vmatpush1.bf16.msra.mxu1 %v5123_v35  ;;  %v5179_v32 = vcombine.low %v512_v1, %v516_v2  ;;  %v5186_v35 = vcombine.high %v519_v7, %v523_v8  ;;  %v572_v1 = vld [vmem:[%s5862_s29 + $0x878] sm:$0xff]  ;;  %v579_v7 = vld [vmem:[%s5862_s29 + $0x8b0] sm:$0xff] }
 0x169   : > { %3750 = vmatprep.subr.bf16.mxu0 %v5130_v14  ;;  %3914 = vmatprep.subr.bf16.mxu1 %v5132_v15  ;;  %v5188_v14 = vcombine.high %v520_v9, %v524_v11  ;;  %v527_v15 = vld [vmem:[%s5862_s29 + $0x710] sm:$0xff]  ;;  %v576_v8 = vld [vmem:[%s5862_s29 + $0x898] sm:$0xff] }
 0x16a   : > { %v5193_v30 = vcombine.low %v527_v15, %v531_v16 }
 0x16c   : > { %3751 = vmatpush1.bf16.msra.mxu0 %v5129_v20  ;;  %3915 = vmatpush1.bf16.msra.mxu1 %v5131_v21  ;;  %v5187_v20 = vcombine.low %v520_v9, %v524_v11  ;;  %v5194_v21 = vcombine.high %v527_v15, %v531_v16  ;;  %v580_v9 = vld [vmem:[%s5862_s29 + $0x8b8] sm:$0xff]  ;;  %v587_v15 = vld [vmem:[%s5862_s29 + $0x8f0] sm:$0xff] }
 0x16d   : > { %3752 = vmatprep.subr.bf16.mxu0 %v5138_v22  ;;  %3916 = vmatprep.subr.bf16.mxu1 %v5140_v23  ;;  %v5196_v22 = vcombine.high %v528_v60, %v532_v18  ;;  %v535_v23 = vld [vmem:[%s5862_s29 + $0x750] sm:$0xff]  ;;  %v584_v16 = vld [vmem:[%s5862_s29 + $0x8d8] sm:$0xff] }
 0x16e   : > { %v5201_v38 = vcombine.low %v535_v23, %v539_v25 }
 0x170   : > { %3753 = vmatpush1.bf16.msra.mxu0 %v5137_v31  ;;  %3917 = vmatpush1.bf16.msra.mxu1 %v5139_v33  ;;  %v5195_v31 = vcombine.low %v528_v60, %v532_v18  ;;  %v5202_v33 = vcombine.high %v535_v23, %v539_v25  ;;  %v588_v60 = vld [vmem:[%s5862_s29 + $0x8f8] sm:$0xff]  ;;  %v5243_v18 = vcombine.low %v576_v8, %v580_v9 }
 0x171   : > { %3754 = vmatprep.subr.bf16.mxu0 %v5146_v34  ;;  %3918 = vmatprep.subr.bf16.mxu1 %v5148_v0  ;;  %v5204_v34 = vcombine.high %v536_v28, %v540_v29  ;;  %v543_v0 = vld [vmem:[%s5862_s29 + $0x790] sm:$0xff]  ;;  %v592_v23 = vld [vmem:[%s5862_s29 + $0x918] sm:$0xff] }
 0x172   : > { %v5209_v48 = vcombine.low %v543_v0, %v547_v36  ;;  %v596_v25 = vld [vmem:[%s5862_s29 + $0x938] sm:$0xff] }
 0x174   : > { %3755 = vmatpush1.bf16.msra.mxu0 %v5145_v39  ;;  %3919 = vmatpush1.bf16.msra.mxu1 %v5147_v40  ;;  %v5203_v39 = vcombine.low %v536_v28, %v540_v29  ;;  %v5210_v40 = vcombine.high %v543_v0, %v547_v36  ;;  %v604_v0 = vld [vmem:[%s5862_s29 + $0x978] sm:$0xff] }
 0x175   : > { %3756 = vmatprep.subr.bf16.mxu0 %v5154_v41  ;;  %3920 = vmatprep.subr.bf16.mxu1 %v5156_v43  ;;  %v5212_v41 = vcombine.high %v544_v56, %v548_v37  ;;  %v551_v43 = vld [vmem:[%s5862_s29 + $0x7d0] sm:$0xff] }
 0x176   : > { %v5217_v57 = vcombine.low %v551_v43, %v555_v44 }
 0x178   : > { %3757 = vmatpush1.bf16.msra.mxu0 %v5153_v49  ;;  %3921 = vmatpush1.bf16.msra.mxu1 %v5155_v50  ;;  %v5211_v49 = vcombine.low %v544_v56, %v548_v37  ;;  %v5218_v50 = vcombine.high %v551_v43, %v555_v44  ;;  %v5259_v56 = vcombine.low %v592_v23, %v596_v25  ;;  %v612_v43 = vld [vmem:[%s5862_s29 + $0x9b8] sm:$0xff] }
 0x179   : > { %3758 = vmatprep.subr.bf16.mxu0 %v5162_v51  ;;  %3922 = vmatprep.subr.bf16.mxu1 %v5164_v17  ;;  %v5220_v51 = vcombine.high %v552_v46, %v556_v47  ;;  %v559_v17 = vld [vmem:[%s5862_s29 + $0x810] sm:$0xff] }
 0x17a   : > { %v5225_v2 = vcombine.low %v559_v17, %v563_v53 }
 0x17c   : > { %3759 = vmatpush1.bf16.msra.mxu0 %v5161_v10  ;;  %3923 = vmatpush1.bf16.msra.mxu1 %v5163_v58  ;;  %v5219_v10 = vcombine.low %v552_v46, %v556_v47  ;;  %v5226_v58 = vcombine.high %v559_v17, %v563_v53  ;;  %v620_v17 = vld [vmem:[%s5862_s29 + $0x9f8] sm:$0xff] }
 0x17d   : > { %3760 = vmatprep.subr.bf16.mxu0 %v5170_v59  ;;  %3924 = vmatprep.subr.bf16.mxu1 %v5172_v61  ;;  %v5228_v59 = vcombine.high %v560_v55, %v564_v24  ;;  %v567_v61 = vld [vmem:[%s5862_s29 + $0x850] sm:$0xff] }
 0x17e   : > { %v5233_v11 = vcombine.low %v567_v61, %v571_v62 }
 0x180   : > { %3761 = vmatpush1.bf16.msra.mxu0 %v5169_v4  ;;  %3925 = vmatpush1.bf16.msra.mxu1 %v5171_v26  ;;  %v5227_v4 = vcombine.low %v560_v55, %v564_v24  ;;  %v5234_v26 = vcombine.high %v567_v61, %v571_v62  ;;  %v628_v61 = vld [vmem:[%s5862_s29 + $0xa38] sm:$0xff] }
 0x181   : > { %3762 = vmatprep.subr.bf16.mxu0 %v5178_v5  ;;  %3926 = vmatprep.subr.bf16.mxu1 %v5180_v6  ;;  %v5236_v5 = vcombine.high %v568_v63, %v572_v1  ;;  %v575_v6 = vld [vmem:[%s5862_s29 + $0x890] sm:$0xff] }
 0x184   : > { %3763 = vmatpush1.bf16.msra.mxu0 %v5177_v12  ;;  %3927 = vmatpush1.bf16.msra.mxu1 %v5179_v32  ;;  %v5235_v12 = vcombine.low %v568_v63, %v572_v1  ;;  %v5242_v32 = vcombine.high %v575_v6, %v579_v7 }
 0x185   : > { %3764 = vmatprep.subr.bf16.mxu0 %v5186_v35  ;;  %3928 = vmatprep.subr.bf16.mxu1 %v5188_v14  ;;  %v5244_v35 = vcombine.high %v576_v8, %v580_v9  ;;  %v583_v14 = vld [vmem:[%s5862_s29 + $0x8d0] sm:$0xff] }
 0x186   : > { %v5249_v28 = vcombine.low %v583_v14, %v587_v15 }
 0x188   : > { %3765 = vmatpush1.bf16.msra.mxu0 %v5185_v19  ;;  %3929 = vmatpush1.bf16.msra.mxu1 %v5187_v20  ;;  %v5250_v19 = vcombine.high %v583_v14, %v587_v15  ;;  %v5252_v20 = vcombine.high %v584_v16, %v588_v60  ;;  %v644_v14 = vld [vmem:[%s5862_s29 + $0xab8] sm:$0xff] }
 0x189   : > { %3766 = vmatprep.subr.bf16.mxu0 %v5194_v21  ;;  %3930 = vmatprep.subr.bf16.mxu1 %v5196_v22  ;;  %v591_v21 = vld [vmem:[%s5862_s29 + $0x910] sm:$0xff] }
 0x18a   : > { %v595_v22 = vld [vmem:[%s5862_s29 + $0x930] sm:$0xff] }
 0x18b   : > { %v5258_v29 = vcombine.high %v591_v21, %v595_v22  ;;  %v5257_v36 = vcombine.low %v591_v21, %v595_v22  ;;  %v652_v21 = vld [vmem:[%s5862_s29 + $0xaf8] sm:$0xff] }
 0x18c   : > { %3767 = vmatpush1.bf16.msra.mxu0 %v5193_v30  ;;  %3931 = vmatpush1.bf16.msra.mxu1 %v5195_v31  ;;  %v5260_v30 = vcombine.high %v592_v23, %v596_v25  ;;  %v599_v31 = vld [vmem:[%s5862_s29 + $0x950] sm:$0xff] }
 0x18d   : > { %3768 = vmatprep.subr.bf16.mxu0 %v5202_v33  ;;  %3932 = vmatprep.subr.bf16.mxu1 %v5204_v34  ;;  %v603_v33 = vld [vmem:[%s5862_s29 + $0x970] sm:$0xff]  ;;  %v600_v34 = vld [vmem:[%s5862_s29 + $0x958] sm:$0xff] }
 0x18e   : > { %v5266_v37 = vcombine.high %v599_v31, %v603_v33  ;;  %v5265_v44 = vcombine.low %v599_v31, %v603_v33  ;;  %v5267_v46 = vcombine.low %v600_v34, %v604_v0  ;;  %v660_v31 = vld [vmem:[%s5862_s29 + $0xb38] sm:$0xff] }
 0x190   : > { %3769 = vmatpush1.bf16.msra.mxu0 %v5201_v38  ;;  %3933 = vmatpush1.bf16.msra.mxu1 %v5203_v39  ;;  %v5268_v38 = vcombine.high %v600_v34, %v604_v0  ;;  %v607_v39 = vld [vmem:[%s5862_s29 + $0x990] sm:$0xff] }
 0x191   : > { %3770 = vmatprep.subr.bf16.mxu0 %v5210_v40  ;;  %3934 = vmatprep.subr.bf16.mxu1 %v5212_v41  ;;  %v611_v40 = vld [vmem:[%s5862_s29 + $0x9b0] sm:$0xff]  ;;  %v608_v41 = vld [vmem:[%s5862_s29 + $0x998] sm:$0xff] }
 0x192   : > { %v5274_v47 = vcombine.high %v607_v39, %v611_v40  ;;  %v5273_v53 = vcombine.low %v607_v39, %v611_v40  ;;  %v5275_v55 = vcombine.low %v608_v41, %v612_v43  ;;  %v668_v39 = vld [vmem:[%s5862_s29 + $0xb78] sm:$0xff] }
 0x194   : > { %3771 = vmatpush1.bf16.msra.mxu0 %v5209_v48  ;;  %3935 = vmatpush1.bf16.msra.mxu1 %v5211_v49  ;;  %v5276_v48 = vcombine.high %v608_v41, %v612_v43  ;;  %v615_v49 = vld [vmem:[%s5862_s29 + $0x9d0] sm:$0xff] }
 0x195   : > { %3772 = vmatprep.subr.bf16.mxu0 %v5218_v50  ;;  %3936 = vmatprep.subr.bf16.mxu1 %v5220_v51  ;;  %v619_v50 = vld [vmem:[%s5862_s29 + $0x9f0] sm:$0xff]  ;;  %v616_v51 = vld [vmem:[%s5862_s29 + $0x9d8] sm:$0xff] }
 0x196   : > { %v5282_v24 = vcombine.high %v615_v49, %v619_v50  ;;  %v5281_v62 = vcombine.low %v615_v49, %v619_v50  ;;  %v5283_v63 = vcombine.low %v616_v51, %v620_v17  ;;  %v676_v49 = vld [vmem:[%s5862_s29 + $0xbb8] sm:$0xff] }
 0x198   : > { %3773 = vmatpush1.bf16.msra.mxu0 %v5217_v57  ;;  %3937 = vmatpush1.bf16.msra.mxu1 %v5219_v10  ;;  %v5284_v57 = vcombine.high %v616_v51, %v620_v17  ;;  %v623_v10 = vld [vmem:[%s5862_s29 + $0xa10] sm:$0xff] }
 0x199   : > { %3783 = vmatprep.subr.bf16.mxu0 %v5226_v58  ;;  %3947 = vmatprep.subr.bf16.mxu1 %v5228_v59  ;;  %v627_v58 = vld [vmem:[%s5862_s29 + $0xa30] sm:$0xff]  ;;  %v624_v59 = vld [vmem:[%s5862_s29 + $0xa18] sm:$0xff] }
 0x19a   : > { %v5290_v1 = vcombine.high %v623_v10, %v627_v58  ;;  %v5291_v8 = vcombine.low %v624_v59, %v628_v61 }
 0x19b   : > { %3775 = vmatmul.mubr.bf16.vlgmr.msra.gmra.mrb[4].mxu0 %v6045_v42  ;;  %3939 = vmatmul.mubr.bf16.vlgmr.msra.gmra.mrb[4].mxu1 %v6045_v42  ;;  %v5241_v42 = vcombine.low %v575_v6, %v579_v7  ;;  %v636_v6 = vld [vmem:[%s5862_s29 + $0xa78] sm:$0xff]  ;;  %v5289_v7 = vcombine.low %v623_v10, %v627_v58 }
 0x19c   : > { %3784 = vmatpush1.bf16.msra.mxu0 %v5225_v2  ;;  %3948 = vmatpush1.bf16.msra.mxu1 %v5227_v4  ;;  %v5292_v2 = vcombine.high %v624_v59, %v628_v61  ;;  %v631_v4 = vld [vmem:[%s5862_s29 + $0xa50] sm:$0xff]  ;;  %v684_v10 = vld [vmem:[%s5862_s29 + $0xbf8] sm:$0xff] }
 0x19d   : > { %3785 = vmatprep.subr.bf16.mxu0 %v5234_v26  ;;  %3949 = vmatprep.subr.bf16.mxu1 %v5236_v5  ;;  %v635_v26 = vld [vmem:[%s5862_s29 + $0xa70] sm:$0xff]  ;;  %v632_v5 = vld [vmem:[%s5862_s29 + $0xa58] sm:$0xff] }
 0x19e   : > { %3815 = vmatprep.mubr.bf16.mxu0 %v6051_v52  ;;  %3979 = vmatprep.mubr.bf16.mxu1 %v6051_v52  ;;  %v5251_v52 = vcombine.low %v584_v16, %v588_v60  ;;  %v5298_v9 = vcombine.high %v631_v4, %v635_v26  ;;  %v5297_v15 = vcombine.low %v631_v4, %v635_v26  ;;  %v692_v4 = vld [vmem:[%s5862_s29 + $0xc38] sm:$0xff] }
 0x19f   : > { %v5299_v16 = vcombine.low %v632_v5, %v636_v6 }
 0x1a0   : > { %3786 = vmatpush1.bf16.msra.mxu0 %v5233_v11  ;;  %3950 = vmatpush1.bf16.msra.mxu1 %v5235_v12  ;;  %v5300_v11 = vcombine.high %v632_v5, %v636_v6  ;;  %v639_v12 = vld [vmem:[%s5862_s29 + $0xa90] sm:$0xff] }
 0x1a1   : > { %3787 = vmatprep.subr.bf16.mxu0 %v5242_v32  ;;  %3951 = vmatprep.subr.bf16.mxu1 %v5244_v35  ;;  %v643_v32 = vld [vmem:[%s5862_s29 + $0xab0] sm:$0xff]  ;;  %v640_v35 = vld [vmem:[%s5862_s29 + $0xa98] sm:$0xff] }
 0x1a2   : > { %v5306_v60 = vcombine.high %v639_v12, %v643_v32  ;;  %v5305_v22 = vcombine.low %v639_v12, %v643_v32  ;;  %v5307_v23 = vcombine.low %v640_v35, %v644_v14  ;;  %v700_v12 = vld [vmem:[%s5862_s29 + $0xc78] sm:$0xff] }
 0x1a4   : > { %3788 = vmatpush1.bf16.msra.mxu0 %v5241_v42  ;;  %3952 = vmatpush1.bf16.msra.mxu1 %v5243_v18  ;;  %v5308_v42 = vcombine.high %v640_v35, %v644_v14  ;;  %v647_v18 = vld [vmem:[%s5862_s29 + $0xad0] sm:$0xff] }
 0x1a5   : > { %3789 = vmatprep.subr.bf16.mxu0 %v5250_v19  ;;  %3953 = vmatprep.subr.bf16.mxu1 %v5252_v20  ;;  %v651_v19 = vld [vmem:[%s5862_s29 + $0xaf0] sm:$0xff]  ;;  %v648_v20 = vld [vmem:[%s5862_s29 + $0xad8] sm:$0xff] }
 0x1a6   : > { %v5314_v25 = vcombine.high %v647_v18, %v651_v19  ;;  %v5313_v33 = vcombine.low %v647_v18, %v651_v19  ;;  %v5315_v34 = vcombine.low %v648_v20, %v652_v21  ;;  %v708_v18 = vld [vmem:[%s5862_s29 + $0xcb8] sm:$0xff] }
 0x1a8   : > { %3790 = vmatpush1.bf16.msra.mxu0 %v5249_v28  ;;  %3954 = vmatpush1.bf16.msra.mxu1 %v5251_v52  ;;  %v5316_v28 = vcombine.high %v648_v20, %v652_v21  ;;  %v655_v52 = vld [vmem:[%s5862_s29 + $0xb10] sm:$0xff] }
 0x1a9   : > { %3791 = vmatprep.subr.bf16.mxu0 %v5258_v29  ;;  %3955 = vmatprep.subr.bf16.mxu1 %v5260_v30  ;;  %v659_v29 = vld [vmem:[%s5862_s29 + $0xb30] sm:$0xff]  ;;  %v656_v30 = vld [vmem:[%s5862_s29 + $0xb18] sm:$0xff] }
 0x1aa   : > { %v5322_v0 = vcombine.high %v655_v52, %v659_v29  ;;  %v5321_v40 = vcombine.low %v655_v52, %v659_v29  ;;  %v5323_v41 = vcombine.low %v656_v30, %v660_v31  ;;  %v716_v52 = vld [vmem:[%s5862_s29 + $0xcf8] sm:$0xff] }
 0x1ac   : > { %3792 = vmatpush1.bf16.msra.mxu0 %v5257_v36  ;;  %3956 = vmatpush1.bf16.msra.mxu1 %v5259_v56  ;;  %v5324_v36 = vcombine.high %v656_v30, %v660_v31  ;;  %v663_v56 = vld [vmem:[%s5862_s29 + $0xb50] sm:$0xff] }
 0x1ad   : > { %3793 = vmatprep.subr.bf16.mxu0 %v5266_v37  ;;  %3957 = vmatprep.subr.bf16.mxu1 %v5268_v38  ;;  %v667_v37 = vld [vmem:[%s5862_s29 + $0xb70] sm:$0xff]  ;;  %v664_v38 = vld [vmem:[%s5862_s29 + $0xb58] sm:$0xff] }
 0x1ae   : > { %v5330_v43 = vcombine.high %v663_v56, %v667_v37  ;;  %v5329_v50 = vcombine.low %v663_v56, %v667_v37  ;;  %v5331_v51 = vcombine.low %v664_v38, %v668_v39 }
 0x1b0   : > { %3794 = vmatpush1.bf16.msra.mxu0 %v5265_v44  ;;  %3958 = vmatpush1.bf16.msra.mxu1 %v5267_v46  ;;  %v5332_v44 = vcombine.high %v664_v38, %v668_v39  ;;  %v671_v46 = vld [vmem:[%s5862_s29 + $0xb90] sm:$0xff] }
 0x1b1   : > { %3795 = vmatprep.subr.bf16.mxu0 %v5274_v47  ;;  %3959 = vmatprep.subr.bf16.mxu1 %v5276_v48  ;;  %v675_v47 = vld [vmem:[%s5862_s29 + $0xbb0] sm:$0xff]  ;;  %v672_v48 = vld [vmem:[%s5862_s29 + $0xb98] sm:$0xff] }
 0x1b2   : > { %v5338_v17 = vcombine.high %v671_v46, %v675_v47  ;;  %v5337_v58 = vcombine.low %v671_v46, %v675_v47  ;;  %v5339_v59 = vcombine.low %v672_v48, %v676_v49  ;;  %v727_v39 = vld [vmem:[%s5862_s29 + $0xd50] sm:$0xff] }
 0x1b4   : > { %3796 = vmatpush1.bf16.msra.mxu0 %v5273_v53  ;;  %3960 = vmatpush1.bf16.msra.mxu1 %v5275_v55  ;;  %v5340_v53 = vcombine.high %v672_v48, %v676_v49  ;;  %v679_v55 = vld [vmem:[%s5862_s29 + $0xbd0] sm:$0xff] }
 0x1b5   : > { %3797 = vmatprep.subr.bf16.mxu0 %v5282_v24  ;;  %3961 = vmatprep.subr.bf16.mxu1 %v5284_v57  ;;  %v683_v24 = vld [vmem:[%s5862_s29 + $0xbf0] sm:$0xff]  ;;  %v680_v57 = vld [vmem:[%s5862_s29 + $0xbd8] sm:$0xff] }
 0x1b6   : > { %v5346_v61 = vcombine.high %v679_v55, %v683_v24  ;;  %v5345_v26 = vcombine.low %v679_v55, %v683_v24  ;;  %v5347_v5 = vcombine.low %v680_v57, %v684_v10  ;;  %v735_v49 = vld [vmem:[%s5862_s29 + $0xd90] sm:$0xff] }
 0x1b8   : > { %3798 = vmatpush1.bf16.msra.mxu0 %v5281_v62  ;;  %3962 = vmatpush1.bf16.msra.mxu1 %v5283_v63  ;;  %v5348_v62 = vcombine.high %v680_v57, %v684_v10  ;;  %v687_v63 = vld [vmem:[%s5862_s29 + $0xc10] sm:$0xff] }
 0x1b9   : > { %3799 = vmatprep.subr.bf16.mxu0 %v5290_v1  ;;  %3963 = vmatprep.subr.bf16.mxu1 %v5292_v2  ;;  %v691_v1 = vld [vmem:[%s5862_s29 + $0xc30] sm:$0xff]  ;;  %v688_v2 = vld [vmem:[%s5862_s29 + $0xc18] sm:$0xff] }
 0x1ba   : > { %v5354_v6 = vcombine.high %v687_v63, %v691_v1  ;;  %v5353_v32 = vcombine.low %v687_v63, %v691_v1  ;;  %v5355_v35 = vcombine.low %v688_v2, %v692_v4  ;;  %v744_v63 = vld [vmem:[%s5862_s29 + $0xdd8] sm:$0xff] }
 0x1bb   : > { %v748_v1 = vld [vmem:[%s5862_s29 + $0xdf8] sm:$0xff] }
 0x1bc   : > { %3800 = vmatpush1.bf16.msra.mxu0 %v5289_v7  ;;  %3964 = vmatpush1.bf16.msra.mxu1 %v5291_v8  ;;  %v5356_v7 = vcombine.high %v688_v2, %v692_v4  ;;  %v695_v8 = vld [vmem:[%s5862_s29 + $0xc50] sm:$0xff] }
 0x1bd   : > { %3801 = vmatprep.subr.bf16.mxu0 %v5298_v9  ;;  %3965 = vmatprep.subr.bf16.mxu1 %v5300_v11  ;;  %v699_v9 = vld [vmem:[%s5862_s29 + $0xc70] sm:$0xff]  ;;  %v696_v11 = vld [vmem:[%s5862_s29 + $0xc58] sm:$0xff] }
 0x1be   : > { %v5362_v14 = vcombine.high %v695_v8, %v699_v9  ;;  %v5361_v19 = vcombine.low %v695_v8, %v699_v9  ;;  %v5363_v20 = vcombine.low %v696_v11, %v700_v12 }
 0x1c0   : > { %3802 = vmatpush1.bf16.msra.mxu0 %v5297_v15  ;;  %3966 = vmatpush1.bf16.msra.mxu1 %v5299_v16  ;;  %v5364_v15 = vcombine.high %v696_v11, %v700_v12  ;;  %v703_v16 = vld [vmem:[%s5862_s29 + $0xc90] sm:$0xff] }
 0x1c1   : > { %3803 = vmatprep.subr.bf16.mxu0 %v5306_v60  ;;  %3967 = vmatprep.subr.bf16.mxu1 %v5308_v42  ;;  %v707_v60 = vld [vmem:[%s5862_s29 + $0xcb0] sm:$0xff]  ;;  %v704_v42 = vld [vmem:[%s5862_s29 + $0xc98] sm:$0xff] }
 0x1c2   : > { %v5370_v21 = vcombine.high %v703_v16, %v707_v60  ;;  %v5371_v29 = vcombine.low %v704_v42, %v708_v18 }
 0x1c4   : > { %3804 = vmatpush1.bf16.msra.mxu0 %v5305_v22  ;;  %3968 = vmatpush1.bf16.msra.mxu1 %v5307_v23  ;;  %v5372_v22 = vcombine.high %v704_v42, %v708_v18  ;;  %v711_v23 = vld [vmem:[%s5862_s29 + $0xcd0] sm:$0xff]  ;;  %v756_v42 = vld [vmem:[%s5862_s29 + $0xe38] sm:$0xff]  ;;  %v299_v18 = vld [vmem:[#allocation2] sm:$0xff] }
 0x1c5   : > { %3805 = vmatprep.subr.bf16.mxu0 %v5314_v25  ;;  %3969 = vmatprep.subr.bf16.mxu1 %v5316_v28  ;;  %v715_v25 = vld [vmem:[%s5862_s29 + $0xcf0] sm:$0xff]  ;;  %v712_v28 = vld [vmem:[%s5862_s29 + $0xcd8] sm:$0xff] }
 0x1c6   : > { %v5378_v30 = vcombine.high %v711_v23, %v715_v25  ;;  %v5380_v31 = vcombine.high %v712_v28, %v716_v52  ;;  %v5377_v56 = vcombine.low %v711_v23, %v715_v25  ;;  %v759_v25 = vld [vmem:[%s5862_s29 + $0xe50] sm:$0xff] }
 0x1c8   : > { %3806 = vmatpush1.bf16.msra.mxu0 %v5313_v33  ;;  %3970 = vmatpush1.bf16.msra.mxu1 %v5315_v34  ;;  %v719_v33 = vld [vmem:[%s5862_s29 + $0xd10] sm:$0xff] }
 0x1c9   : > { %3807 = vmatprep.subr.bf16.mxu0 %v5322_v0  ;;  %3971 = vmatprep.subr.bf16.mxu1 %v5324_v36  ;;  %v723_v34 = vld [vmem:[%s5862_s29 + $0xd30] sm:$0xff]  ;;  %v720_v0 = vld [vmem:[%s5862_s29 + $0xd18] sm:$0xff] }
 0x1ca   : > { %v724_v36 = vld [vmem:[%s5862_s29 + $0xd38] sm:$0xff]  ;;  %v5386_v37 = vcombine.high %v719_v33, %v723_v34 }
 0x1cb   : > { %v5388_v38 = vcombine.high %v720_v0, %v724_v36  ;;  %v5387_v46 = vcombine.low %v720_v0, %v724_v36  ;;  %v767_v0 = vld [vmem:[%s5862_s29 + $0xe90] sm:$0xff] }
 0x1cc   : > { %3808 = vmatpush1.bf16.msra.mxu0 %v5321_v40  ;;  %3972 = vmatpush1.bf16.msra.mxu1 %v5323_v41  ;;  %v731_v40 = vld [vmem:[%s5862_s29 + $0xd70] sm:$0xff]  ;;  %v728_v41 = vld [vmem:[%s5862_s29 + $0xd58] sm:$0xff] }
 0x1cd   : > { %3809 = vmatprep.subr.bf16.mxu0 %v5330_v43  ;;  %3973 = vmatprep.subr.bf16.mxu1 %v5332_v44  ;;  %v732_v43 = vld [vmem:[%s5862_s29 + $0xd78] sm:$0xff]  ;;  %v5385_v44 = vcombine.low %v719_v33, %v723_v34  ;;  %v5394_v47 = vcombine.high %v727_v39, %v731_v40  ;;  %v771_v36 = vld [vmem:[%s5862_s29 + $0xeb0] sm:$0xff] }
 0x1ce   : > { %v5396_v48 = vcombine.high %v728_v41, %v732_v43  ;;  %v5395_v55 = vcombine.low %v728_v41, %v732_v43  ;;  %v775_v41 = vld [vmem:[%s5862_s29 + $0xed0] sm:$0xff] }
 0x1cf   : > { %v779_v43 = vld [vmem:[%s5862_s29 + $0xef0] sm:$0xff] }
 0x1d0   : > { %3810 = vmatpush1.bf16.msra.mxu0 %v5329_v50  ;;  %3974 = vmatpush1.bf16.msra.mxu1 %v5331_v51  ;;  %v739_v50 = vld [vmem:[%s5862_s29 + $0xdb0] sm:$0xff]  ;;  %v736_v51 = vld [vmem:[%s5862_s29 + $0xd98] sm:$0xff] }
 0x1d1   : > { %3811 = vmatprep.subr.bf16.mxu0 %v5338_v17  ;;  %3975 = vmatprep.subr.bf16.mxu1 %v5340_v53  ;;  %v740_v17 = vld [vmem:[%s5862_s29 + $0xdb8] sm:$0xff]  ;;  %v5393_v53 = vcombine.low %v727_v39, %v731_v40  ;;  %v5402_v24 = vcombine.high %v735_v49, %v739_v50  ;;  %v5434_v39 = vcombine.high %v767_v0, %v771_v36 }
 0x1d2   : > { %v5404_v10 = vcombine.high %v736_v51, %v740_v17  ;;  %v5403_v9 = vcombine.low %v736_v51, %v740_v17  ;;  %v783_v51 = vld [vmem:[%s5862_s29 + $0xf10] sm:$0xff] }
 0x1d3   : > { %v787_v17 = vld [vmem:[%s5862_s29 + $0xf30] sm:$0xff] }
 0x1d4   : > { %3812 = vmatpush1.bf16.msra.mxu0 %v5337_v58  ;;  %3976 = vmatpush1.bf16.msra.mxu1 %v5339_v59  ;;  %v743_v58 = vld [vmem:[%s5862_s29 + $0xdd0] sm:$0xff] }
 0x1d5   : > { %3813 = vmatprep.subr.bf16.mxu0 %v5346_v61  ;;  %3977 = vmatprep.subr.bf16.mxu1 %v5348_v62  ;;  %v747_v59 = vld [vmem:[%s5862_s29 + $0xdf0] sm:$0xff] }
 0x1d6   : > { %v5410_v11 = vcombine.high %v743_v58, %v747_v59 }
 0x1d8   : > { %3814 = vmatpush1.bf16.msra.mxu0 %v5345_v26  ;;  %3978 = vmatpush1.bf16.msra.mxu1 %v5347_v5  ;;  %v5401_v5 = vcombine.low %v735_v49, %v739_v50  ;;  %v5442_v49 = vcombine.high %v775_v41, %v779_v43 }
 0x1d9   : > { %3824 = vmatprep.subr.bf16.mxu0 %v5354_v6  ;;  %3988 = vmatprep.subr.bf16.mxu1 %v5356_v7 }
 0x1db   : > { %3816 = vmatmul.mubr.bf16.vlgmr.msra.gmra.mrb[4].mxu0 %v6126_v3  ;;  %3980 = vmatmul.mubr.bf16.vlgmr.msra.gmra.mrb[4].mxu1 %v6126_v3  ;;  %v5369_v3 = vcombine.low %v703_v16, %v707_v60  ;;  %v752_v60 = vld [vmem:[%s5862_s29 + $0xe18] sm:$0xff] }
 0x1dc   : > { %3825 = vmatpush1.bf16.msra.mxu0 %v5353_v32  ;;  %3989 = vmatpush1.bf16.msra.mxu1 %v5355_v35  ;;  %v5412_v35 = vcombine.high %v744_v63, %v748_v1  ;;  %v5420_v23 = vcombine.high %v752_v60, %v756_v42 }
 0x1dd   : > { %3826 = vmatprep.subr.bf16.mxu0 %v5362_v14  ;;  %3990 = vmatprep.subr.bf16.mxu1 %v5364_v15  ;;  %v751_v14 = vld [vmem:[%s5862_s29 + $0xe10] sm:$0xff] }
 0x1de   : > { %3856 = vmatprep.mubr.bf16.mxu0 %v6132_v13  ;;  %4020 = vmatprep.mubr.bf16.mxu1 %v6132_v13  ;;  %v5379_v13 = vcombine.low %v712_v28, %v716_v52  ;;  %v755_v15 = vld [vmem:[%s5862_s29 + $0xe30] sm:$0xff] }
 0x1df   : > { %v763_v28 = vld [vmem:[%s5862_s29 + $0xe70] sm:$0xff] }
 0x1e0   : > { %3827 = vmatpush1.bf16.msra.mxu0 %v5361_v19  ;;  %3991 = vmatpush1.bf16.msra.mxu1 %v5363_v20  ;;  %v5409_v19 = vcombine.low %v743_v58, %v747_v59  ;;  %v5426_v33 = vcombine.high %v759_v25, %v763_v28  ;;  %v791_v59 = vld [vmem:[%s5862_s29 + $0xf50] sm:$0xff] }
 0x1e1   : > { %3828 = vmatprep.subr.bf16.mxu0 %v5370_v21  ;;  %3992 = vmatprep.subr.bf16.mxu1 %v5372_v22  ;;  %v5411_v21 = vcombine.low %v744_v63, %v748_v1  ;;  %v5418_v22 = vcombine.high %v751_v14, %v755_v15  ;;  %v796_v63 = vld [vmem:[%s5862_s29 + $0xf78] sm:$0xff]  ;;  %v5449_v1 = vcombine.low %v783_v51, %v787_v17 }
 0x1e4   : > { %3829 = vmatpush1.bf16.msra.mxu0 %v5369_v3  ;;  %3993 = vmatpush1.bf16.msra.mxu1 %v5371_v29  ;;  %v760_v3 = vld [vmem:[%s5862_s29 + $0xe58] sm:$0xff] }
 0x1e5   : > { %3830 = vmatprep.subr.bf16.mxu0 %v5378_v30  ;;  %3994 = vmatprep.subr.bf16.mxu1 %v5380_v31  ;;  %v764_v29 = vld [vmem:[%s5862_s29 + $0xe78] sm:$0xff]  ;;  %v5417_v30 = vcombine.low %v751_v14, %v755_v15  ;;  %v5419_v31 = vcombine.low %v752_v60, %v756_v42  ;;  %v811_v14 = vld [vmem:[%s5862_s29 + $0xff0] sm:$0xff] }
 0x1e6   : > { %v5428_v34 = vcombine.high %v760_v3, %v764_v29  ;;  %v808_v15 = vld [vmem:[%s5862_s29 + $0xfd8] sm:$0xff] }
 0x1e8   : > { %3831 = vmatpush1.bf16.msra.mxu0 %v5377_v56  ;;  %3995 = vmatpush1.bf16.msra.mxu1 %v5379_v13  ;;  %v768_v56 = vld [vmem:[%s5862_s29 + $0xe98] sm:$0xff] }
 0x1e9   : > { %3832 = vmatprep.subr.bf16.mxu0 %v5386_v37  ;;  %3996 = vmatprep.subr.bf16.mxu1 %v5388_v38  ;;  %v772_v13 = vld [vmem:[%s5862_s29 + $0xeb8] sm:$0xff]  ;;  %v5425_v37 = vcombine.low %v759_v25, %v763_v28  ;;  %v5427_v38 = vcombine.low %v760_v3, %v764_v29 }
 0x1ea   : > { %v5436_v40 = vcombine.high %v768_v56, %v772_v13 }
 0x1ec   : > { %3833 = vmatpush1.bf16.msra.mxu0 %v5385_v44  ;;  %3997 = vmatpush1.bf16.msra.mxu1 %v5387_v46  ;;  %v776_v44 = vld [vmem:[%s5862_s29 + $0xed8] sm:$0xff] }
 0x1ed   : > { %3834 = vmatprep.subr.bf16.mxu0 %v5394_v47  ;;  %3998 = vmatprep.subr.bf16.mxu1 %v5396_v48  ;;  %v780_v46 = vld [vmem:[%s5862_s29 + $0xef8] sm:$0xff]  ;;  %v5433_v47 = vcombine.low %v767_v0, %v771_v36  ;;  %v5435_v48 = vcombine.low %v768_v56, %v772_v13  ;;  %v300_v36 = vld [vmem:[#allocation2 + $0x8] sm:$0xff] }
 0x1ee   : > { %v3530_v57 = vpop.f32.mrb[0].mxu0  ;;  %v3694_v61 = vpop.f32.mrb[0].mxu1  ;;  %v5444_v50 = vcombine.high %v776_v44, %v780_v46 }
 0x1ef   : > { %v3532_v62 = vpop.f32.mrb[1].mxu0  ;;  %v3696_v4 = vpop.f32.mrb[1].mxu1 }
 0x1f0   : > { %v4037_v2 = vcombine.low %v3530_v57, %v3532_v62  ;;  %v3534_v26 = vpop.f32.mrb[2].mxu0  ;;  %3835 = vmatpush1.bf16.msra.mxu0 %v5393_v53  ;;  %v4038_v6 = vcombine.low %v3694_v61, %v3696_v4  ;;  %v3698_v7 = vpop.f32.mrb[2].mxu1  ;;  %3999 = vmatpush1.bf16.msra.mxu1 %v5395_v55  ;;  %v784_v53 = vld [vmem:[%s5862_s29 + $0xf18] sm:$0xff]  ;;  %v5443_v57 = vcombine.low %v776_v44, %v780_v46  ;;  %v795_v61 = vld [vmem:[%s5862_s29 + $0xf70] sm:$0xff]  ;;  %v5710_v44 = vld [vmem:[%s6718_s3 + $0x88] sm:$0xff] (!%p5477_p6)  }
 0x1f1   : > { %v3535_v8 = vpop.f32.mrb[3].mxu0  ;;  %3836 = vmatprep.subr.bf16.mxu0 %v5402_v24  ;;  %v3699_v32 = vpop.f32.mrb[3].mxu1  ;;  %4000 = vmatprep.subr.bf16.mxu1 %v5404_v10  ;;  %v788_v55 = vld [vmem:[%s5862_s29 + $0xf38] sm:$0xff]  ;;  %v5441_v24 = vcombine.low %v775_v41, %v779_v43  ;;  %v5450_v10 = vcombine.high %v783_v51, %v787_v17  ;;  %v5458_v4 = vcombine.high %v791_v59, %v795_v61  ;;  %v5708_v41 = vld [vmem:[%s6718_s3 + $0x8] sm:$0xff] (!%p5477_p6)   ;;  %v5711_v46 = vld [vmem:[%s6718_s3 + $0x50] sm:$0xff] (!%p5477_p6)  }
 0x1f2   : > { %v4045_v12 = vrot.slane %v4037_v2, %v5894_v54  ;;  %v4052_v16 = vrot.slane %v4038_v6, %v5894_v54  ;;  %v5452_v58 = vcombine.high %v784_v53, %v788_v55  ;;  %v792_v62 = vld [vmem:[%s5862_s29 + $0xf58] sm:$0xff]  ;;  %v5451_v2 = vcombine.low %v784_v53, %v788_v55  ;;  %v803_v6 = vld [vmem:[%s5862_s29 + $0xfb0] sm:$0xff]  ;;  %v5709_v43 = vld [vmem:[%s6718_s3 + $0xc8] sm:$0xff] (!%p5477_p6)  }
 0x1f3   : > { %v5460_v26 = vcombine.high %v792_v62, %v796_v63  ;;  %v800_v7 = vld [vmem:[%s5862_s29 + $0xf98] sm:$0xff]  ;;  %v5719_v55 = vld [vmem:[%s6718_s3 + $0x60] sm:$0xff] (!%p5477_p6)  }
 0x1f4   : > { %3837 = vmatpush1.bf16.msra.mxu0 %v5401_v5  ;;  %v4053_v20 = vcombine.low %v4045_v12, %v4052_v16  ;;  %4001 = vmatpush1.bf16.msra.mxu1 %v5403_v9  ;;  %v799_v5 = vld [vmem:[%s5862_s29 + $0xf90] sm:$0xff]  ;;  %v804_v8 = vld [vmem:[%s5862_s29 + $0xfb8] sm:$0xff]  ;;  %v5457_v9 = vcombine.low %v791_v59, %v795_v61  ;;  %v5724_v59 = vld [vmem:[%s6718_s3 + $0x28] sm:$0xff] (!%p5477_p6)  }
 0x1f5   : > { %3838 = vmatprep.subr.bf16.mxu0 %v5410_v11  ;;  %4002 = vmatprep.subr.bf16.mxu1 %v5412_v35  ;;  %v5459_v11 = vcombine.low %v792_v62, %v796_v63  ;;  %v5466_v12 = vcombine.high %v799_v5, %v803_v6  ;;  %v5468_v32 = vcombine.high %v800_v7, %v804_v8  ;;  %v807_v35 = vld [vmem:[%s5862_s29 + $0xfd0] sm:$0xff]  ;;  %v812_v16 = vld [vmem:[%s5862_s29 + $0xff8] sm:$0xff]  ;;  %v5725_v61 = vld [vmem:[%s6718_s3 + $0xe8] sm:$0xff] (!%p5477_p6)  }
 0x1f6   : > { %v4073_v52 = vadd.f32 %v4053_v20, %v299_v18  ;;  %v5465_v60 = vcombine.low %v799_v5, %v803_v6  ;;  %v5467_v42 = vcombine.low %v800_v7, %v804_v8  ;;  %v5474_v18 = vcombine.high %v807_v35, %v811_v14  ;;  %v5716_v51 = vld [vmem:[%s6718_s3 + $0x18] sm:$0xff] (!%p5477_p6)   ;;  %v5726_v62 = vld [vmem:[%s6718_s3 + $0xa8] sm:$0xff] (!%p5477_p6)   ;;  %v5727_v63 = vld [vmem:[%s6718_s3 + $0x70] sm:$0xff] (!%p5477_p6)  }
 0x1f7   : > { %v5473_v20 = vcombine.low %v807_v35, %v811_v14  ;;  %v5717_v17 = vld [vmem:[%s6718_s3 + $0xd8] sm:$0xff] (!%p5477_p6)   ;;  %v4091_v5 = vsub.s32 (!%p5477_p6), 1, %v5887_v45  ;;  %v4095_v7 = vsub.s32 (!%p5477_p6), 2, %v5887_v45 }
 0x1f8   : > { %3839 = vmatpush1.bf16.msra.mxu0 %v5409_v19  ;;  %4075 = vst [vmem:[#allocation2] sm:$0xff] %v4073_v52  ;;  %4003 = vmatpush1.bf16.msra.mxu1 %v5411_v21  ;;  %v5476_v19 = vcombine.high %v808_v15, %v812_v16  ;;  %v5475_v21 = vcombine.low %v808_v15, %v812_v16  ;;  %v5718_v53 = vld [vmem:[%s6718_s3 + $0x98] sm:$0xff] (!%p5477_p6)  }
 0x1f9   : > { %3840 = vmatprep.subr.bf16.mxu0 %v5418_v22  ;;  %4004 = vmatprep.subr.bf16.mxu1 %v5420_v23  ;;  %v5731_v6 = vld [vmem:[%s6718_s3 + $0x78] sm:$0xff] (!%p5477_p6)  }
 0x1fa   : > { %v5732_v8 = vld [vmem:[%s6718_s3 + $0x38] sm:$0xff] (!%p5477_p6)  }
 0x1fc   : > { %3841 = vmatpush1.bf16.msra.mxu0 %v5417_v30  ;;  %4005 = vmatpush1.bf16.msra.mxu1 %v5419_v31 }
 0x1fd   : > { %3842 = vmatprep.subr.bf16.mxu0 %v5426_v33  ;;  %4006 = vmatprep.subr.bf16.mxu1 %v5428_v34 }
 0x200   : > { %3843 = vmatpush1.bf16.msra.mxu0 %v5425_v37  ;;  %4007 = vmatpush1.bf16.msra.mxu1 %v5427_v38  ;;  %v5704_v37 = vld [vmem:[%s6718_s3] sm:$0xff] (!%p5477_p6)  }
 0x201   : > { %3844 = vmatprep.subr.bf16.mxu0 %v5434_v39  ;;  %4008 = vmatprep.subr.bf16.mxu1 %v5436_v40  ;;  %v5705_v38 = vld [vmem:[%s6718_s3 + $0xc0] sm:$0xff] (!%p5477_p6)   ;;  %v5707_v40 = vld [vmem:[%s6718_s3 + $0x48] sm:$0xff] (!%p5477_p6)  }
 0x202   : > { %v5706_v39 = vld [vmem:[%s6718_s3 + $0x80] sm:$0xff] (!%p5477_p6)  }
 0x204   : > { %3845 = vmatpush1.bf16.msra.mxu0 %v5433_v47  ;;  %4009 = vmatpush1.bf16.msra.mxu1 %v5435_v48  ;;  %v5712_v47 = vld [vmem:[%s6718_s3 + $0x10] sm:$0xff] (!%p5477_p6)  }
 0x205   : > { %3846 = vmatprep.subr.bf16.mxu0 %v5442_v49  ;;  %4010 = vmatprep.subr.bf16.mxu1 %v5444_v50  ;;  %v5713_v48 = vld [vmem:[%s6718_s3 + $0xd0] sm:$0xff] (!%p5477_p6)   ;;  %v5715_v50 = vld [vmem:[%s6718_s3 + $0x58] sm:$0xff] (!%p5477_p6)  }
 0x206   : > { %v5714_v49 = vld [vmem:[%s6718_s3 + $0x90] sm:$0xff] (!%p5477_p6)  }
 0x208   : > { %3847 = vmatpush1.bf16.msra.mxu0 %v5441_v24  ;;  %4011 = vmatpush1.bf16.msra.mxu1 %v5443_v57  ;;  %v5720_v24 = vld [vmem:[%s6718_s3 + $0x20] sm:$0xff] (!%p5477_p6)  }
 0x209   : > { %3848 = vmatprep.subr.bf16.mxu0 %v5450_v10  ;;  %4012 = vmatprep.subr.bf16.mxu1 %v5452_v58  ;;  %v5721_v57 = vld [vmem:[%s6718_s3 + $0xe0] sm:$0xff] (!%p5477_p6)   ;;  %v5723_v58 = vld [vmem:[%s6718_s3 + $0x68] sm:$0xff] (!%p5477_p6)  }
 0x20a   : > { %v5722_v10 = vld [vmem:[%s6718_s3 + $0xa0] sm:$0xff] (!%p5477_p6)  }
 0x20c   : > { %3849 = vmatpush1.bf16.msra.mxu0 %v5449_v1  ;;  %4013 = vmatpush1.bf16.msra.mxu1 %v5451_v2  ;;  %v5728_v1 = vld [vmem:[%s6718_s3 + $0x30] sm:$0xff] (!%p5477_p6)  }
 0x20d   : > { %3850 = vmatprep.subr.bf16.mxu0 %v5458_v4  ;;  %4014 = vmatprep.subr.bf16.mxu1 %v5460_v26  ;;  %v5729_v2 = vld [vmem:[%s6718_s3 + $0xf0] sm:$0xff] (!%p5477_p6)   ;;  %v4087_v4 = vsub.s32 (!%p5477_p6), 0, %v5887_v45 }
 0x20e   : > { %v5730_v26 = vld [vmem:[%s6718_s3 + $0xb0] sm:$0xff] (!%p5477_p6)  }
 0x210   : > { %3851 = vmatpush1.bf16.msra.mxu0 %v5457_v9  ;;  %4015 = vmatpush1.bf16.msra.mxu1 %v5459_v11  ;;  %v4099_v9 = vsub.s32 (!%p5477_p6), 3, %v5887_v45  ;;  %v5733_v11 = vld [vmem:[%s6718_s3 + $0xf8] sm:$0xff] (!%p5477_p6)  }
 0x211   : > { %3852 = vmatprep.subr.bf16.mxu0 %v5466_v12  ;;  %4016 = vmatprep.subr.bf16.mxu1 %v5468_v32  ;;  %v5734_v12 = vld [vmem:[%s6718_s3 + $0xb8] sm:$0xff] (!%p5477_p6)   ;;  %v4083_v32 = vld [vmem:[%s6717_s2] sm:$0xff] (!%p5477_p6) }
 0x212   : > { %v4088_v35 = vrot.slane (!%p5477_p6), %v4083_v32, %v4087_v4  ;;  %v4092_v14 = vrot.slane (!%p5477_p6), %v4083_v32, %v4091_v5  ;;  %v4096_v15 = vrot.slane (!%p5477_p6), %v4083_v32, %v4095_v7  ;;  %v4100_v16 = vrot.slane (!%p5477_p6), %v4083_v32, %v4099_v9  ;;  %v5746_v4 = vld [vmem:[%s6718_s3 + $0x190] sm:$0xff] (!%p5477_p6)   ;;  %v5748_v5 = vld [vmem:[%s6718_s3 + $0x118] sm:$0xff] (!%p5477_p6)  }
 0x213   : > { %v5750_v7 = vld [vmem:[%s6718_s3 + $0x198] sm:$0xff] (!%p5477_p6)  }
 0x214   : > { %3853 = vmatpush1.bf16.msra.mxu0 %v5465_v60  ;;  %4017 = vmatpush1.bf16.msra.mxu1 %v5467_v42  ;;  %v5735_v60 = vld [vmem:[%s6718_s3 + $0x140] sm:$0xff] (!%p5477_p6)   ;;  %v4117_v42 = vcombine.low (!%p5477_p6), %v4088_v35, %v4092_v14  ;;  %v5755_v35 = vld [vmem:[%s6718_s3 + $0x168] sm:$0xff] (!%p5477_p6)  }
 0x215   : > { %3854 = vmatprep.subr.bf16.mxu0 %v5474_v18  ;;  %4018 = vmatprep.subr.bf16.mxu1 %v5476_v19  ;;  %v4118_v18 = vcombine.low (!%p5477_p6), %v4096_v15, %v4100_v16  ;;  %v5737_v19 = vld [vmem:[%s6718_s3 + $0x1c0] sm:$0xff] (!%p5477_p6)   ;;  %v5757_v16 = vld [vmem:[%s6718_s3 + $0x1e8] sm:$0xff] (!%p5477_p6)  }
 0x216   : > { %v5754_v14 = vld [vmem:[%s6718_s3 + $0x1a0] sm:$0xff] (!%p5477_p6)  }
 0x218   : > { %3855 = vmatpush1.bf16.msra.mxu0 %v5473_v20  ;;  %4019 = vmatpush1.bf16.msra.mxu1 %v5475_v21  ;;  %v4125_v20 = vrot.slane (!%p5477_p6), %v4117_v42, %v5894_v54  ;;  %v4132_v21 = vrot.slane (!%p5477_p6), %v4118_v18, %v5894_v54 }
 0x219   : > { %5570 = vmatprep.subr.bf16.mxu1 (!%p5477_p6), %v5705_v38 }
 0x21b   : > { %3857 = vmatmul.mubr.bf16.vlgmr.msra.gmra.mrb[4].mxu0 %v6200_v27  ;;  %4021 = vmatmul.mubr.bf16.vlgmr.msra.gmra.mrb[4].mxu1 %v6200_v27  ;;  %v5703_v27 = vld [vmem:[%s6718_s3 + $0x40] sm:$0xff] (!%p5477_p6)  }
 0x21c   : > { %5548 = vmatprep.subr.bf16.mxu0 (!%p5477_p6), %v5703_v27  ;;  %5571 = vmatpush3.bf16.msra.mxu1 (!%p5477_p6), %v5706_v39 }
 0x21d   : > { %5549 = vmatpush3.bf16.msra.mxu0 (!%p5477_p6), %v5704_v37  ;;  %5572 = vmatprep.subr.bf16.mxu1 (!%p5477_p6), %v5709_v43 }
 0x21e   : > { %5550 = vmatprep.subr.bf16.mxu0 (!%p5477_p6), %v5707_v40 }
 0x220   : > { %5573 = vmatpush3.bf16.msra.mxu1 (!%p5477_p6), %v5710_v44 }
 0x221   : > { %5551 = vmatpush3.bf16.msra.mxu0 (!%p5477_p6), %v5708_v41  ;;  %5574 = vmatprep.subr.bf16.mxu1 (!%p5477_p6), %v5713_v48  ;;  %v5736_v48 = vld [vmem:[%s6718_s3 + $0x100] sm:$0xff] (!%p5477_p6)  }
 0x222   : > { %5552 = vmatprep.subr.bf16.mxu0 (!%p5477_p6), %v5711_v46 }
 0x224   : > { %5575 = vmatpush3.bf16.msra.mxu1 (!%p5477_p6), %v5714_v49 }
 0x225   : > { %5553 = vmatpush3.bf16.msra.mxu0 (!%p5477_p6), %v5712_v47  ;;  %5576 = vmatprep.subr.bf16.mxu1 (!%p5477_p6), %v5717_v17 }
 0x226   : > { %5554 = vmatprep.subr.bf16.mxu0 (!%p5477_p6), %v5715_v50 }
 0x228   : > { %5577 = vmatpush3.bf16.msra.mxu1 (!%p5477_p6), %v5718_v53  ;;  %v5739_v53 = vld [vmem:[%s6718_s3 + $0x148] sm:$0xff] (!%p5477_p6)  }
 0x229   : > { %5555 = vmatpush3.bf16.msra.mxu0 (!%p5477_p6), %v5716_v51  ;;  %5578 = vmatprep.subr.bf16.mxu1 (!%p5477_p6), %v5721_v57  ;;  %v5738_v57 = vld [vmem:[%s6718_s3 + $0x180] sm:$0xff] (!%p5477_p6)  }
 0x22a   : > { %5556 = vmatprep.subr.bf16.mxu0 (!%p5477_p6), %v5719_v55 }
 0x22c   : > { %5579 = vmatpush3.bf16.msra.mxu1 (!%p5477_p6), %v5722_v10  ;;  %v5741_v10 = vld [vmem:[%s6718_s3 + $0x1c8] sm:$0xff] (!%p5477_p6)  }
 0x22d   : > { %5557 = vmatpush3.bf16.msra.mxu0 (!%p5477_p6), %v5720_v24  ;;  %5580 = vmatprep.subr.bf16.mxu1 (!%p5477_p6), %v5725_v61  ;;  %v5743_v61 = vld [vmem:[%s6718_s3 + $0x150] sm:$0xff] (!%p5477_p6)  }
 0x22e   : > { %5558 = vmatprep.subr.bf16.mxu0 (!%p5477_p6), %v5723_v58 }
 0x230   : > { %5581 = vmatpush3.bf16.msra.mxu1 (!%p5477_p6), %v5726_v62  ;;  %v5742_v62 = vld [vmem:[%s6718_s3 + $0x188] sm:$0xff] (!%p5477_p6)  }
 0x231   : > { %5559 = vmatpush3.bf16.msra.mxu0 (!%p5477_p6), %v5724_v59  ;;  %5582 = vmatprep.subr.bf16.mxu1 (!%p5477_p6), %v5729_v2  ;;  %v5740_v59 = vld [vmem:[%s6718_s3 + $0x108] sm:$0xff] (!%p5477_p6)   ;;  %v5747_v2 = vld [vmem:[%s6718_s3 + $0x158] sm:$0xff] (!%p5477_p6)  }
 0x232   : > { %5560 = vmatprep.subr.bf16.mxu0 (!%p5477_p6), %v5727_v63  ;;  %v5745_v63 = vld [vmem:[%s6718_s3 + $0x1d0] sm:$0xff] (!%p5477_p6)  }
 0x234   : > { %5583 = vmatpush3.bf16.msra.mxu1 (!%p5477_p6), %v5730_v26  ;;  %v5749_v26 = vld [vmem:[%s6718_s3 + $0x1d8] sm:$0xff] (!%p5477_p6)  }
 0x235   : > { %5561 = vmatpush3.bf16.msra.mxu0 (!%p5477_p6), %v5728_v1  ;;  %5584 = vmatprep.subr.bf16.mxu1 (!%p5477_p6), %v5733_v11  ;;  %v5744_v1 = vld [vmem:[%s6718_s3 + $0x110] sm:$0xff] (!%p5477_p6)   ;;  %v5753_v11 = vld [vmem:[%s6718_s3 + $0x1e0] sm:$0xff] (!%p5477_p6)  }
 0x236   : > { %5562 = vmatprep.subr.bf16.mxu0 (!%p5477_p6), %v5731_v6  ;;  %v5751_v6 = vld [vmem:[%s6718_s3 + $0x160] sm:$0xff] (!%p5477_p6)  }
 0x238   : > { %5585 = vmatpush3.bf16.msra.mxu1 (!%p5477_p6), %v5734_v12  ;;  %v5752_v12 = vld [vmem:[%s6718_s3 + $0x120] sm:$0xff] (!%p5477_p6)  }
 0x239   : > { %5563 = vmatpush3.bf16.msra.mxu0 (!%p5477_p6), %v5732_v8  ;;  %5614 = vmatprep.subr.bf16.mxu1 (!%p5477_p6), %v5737_v19  ;;  %v5759_v19 = vld [vmem:[%s6718_s3 + $0x170] sm:$0xff] (!%p5477_p6)  }
 0x23a   : > { %5592 = vmatprep.subr.bf16.mxu0 (!%p5477_p6), %v5735_v60  ;;  %v5756_v60 = vld [vmem:[%s6718_s3 + $0x128] sm:$0xff] (!%p5477_p6)  }
 0x2ee   : > { %v3858_v22 = vpop.f32.mrb[4].mxu0  ;;  %v4022_v23 = vpop.f32.mrb[4].mxu1 }
 0x2ef   : > { %v3860_v25 = vpop.f32.mrb[5].mxu0  ;;  %v4024_v52 = vpop.f32.mrb[5].mxu1 }
 0x2f0   : > { %v4054_v28 = vcombine.low %v3858_v22, %v3860_v25  ;;  %v3862_v3 = vpop.f32.mrb[6].mxu0  ;;  %v4055_v29 = vcombine.low %v4022_v23, %v4024_v52  ;;  %v4026_v30 = vpop.f32.mrb[6].mxu1  ;;  %v4081_v22 = vld [vmem:[#allocation2] sm:$0xff] (!%p5477_p6)  ;;  %v4133_v23 = vcombine.low (!%p5477_p6), %v4125_v20, %v4132_v21  ;;  %v4103_v52 = vsub.s32 (!%p5477_p6), 4, %v5887_v45  ;;  %v5758_v20 = vld [vmem:[%s6718_s3 + $0x1a8] sm:$0xff] (!%p5477_p6)  }
 0x2f1   : > { %v3863_v31 = vpop.f32.mrb[7].mxu0  ;;  %v4027_v34 = vpop.f32.mrb[7].mxu1  ;;  %v4107_v3 = vsub.s32 (!%p5477_p6), 5, %v5887_v45  ;;  %v4115_v30 = vsub.s32 (!%p5477_p6), 7, %v5887_v45 }
 0x2f2   : > { %v4062_v33 = vrot.slane %v4054_v28, %v5894_v54  ;;  %v4069_v0 = vrot.slane %v4055_v29, %v5894_v54  ;;  %4080 = sbr.rel (%p5477_p6) target bundleno = 1032 (0x408), region = 48  ;;  %v4153_v25 = vadd.f32 (!%p5477_p6), %v4133_v23, %v4081_v22  ;;  %v4111_v29 = vsub.s32 (!%p5477_p6), 6, %v5887_v45  ;;  %v5761_v23 = vld [vmem:[%s6718_s3 + $0x1f0] sm:$0xff] (!%p5477_p6)  }
 0x2f3   : > { %v4104_v31 = vrot.slane (!%p5477_p6), %v4083_v32, %v4103_v52 }
 0x2f4   : > { %v4070_v56 = vcombine.low %v4062_v33, %v4069_v0  ;;  %v4157_v28 = vmul.f32 (!%p5477_p6), 0.70710677, %v4153_v25  ;;  %v4108_v33 = vrot.slane (!%p5477_p6), %v4083_v32, %v4107_v3  ;;  %v4112_v34 = vrot.slane (!%p5477_p6), %v4083_v32, %v4111_v29  ;;  %v5763_v3 = vld [vmem:[%s6718_s3 + $0x178] sm:$0xff] (!%p5477_p6)  }
 0x2f5   : > { %v4116_v0 = vrot.slane (!%p5477_p6), %v4083_v32, %v4115_v30  ;;  %v5765_v30 = vld [vmem:[%s6718_s3 + $0x1f8] sm:$0xff] (!%p5477_p6)  }
 0x2f6   : > { %v4074_v13 = vadd.f32 %v4070_v56, %v300_v36  ;;  %5767 = verf.f32 (!%p5477_p6), %v4157_v28  ;;  %v4134_v36 = vcombine.low (!%p5477_p6), %v4104_v31, %v4108_v33  ;;  %v5764_v31 = vld [vmem:[%s6718_s3 + $0x138] sm:$0xff] (!%p5477_p6)  }
 0x2f7   : > { %v4135_v56 = vcombine.low (!%p5477_p6), %v4112_v34, %v4116_v0  ;;  %v5766_v33 = vld [vmem:[%s6718_s3 + $0x1b8] sm:$0xff] (!%p5477_p6)  }
 0x2f8   : > { %4076 = vst [vmem:[#allocation2 + $0x8] sm:$0xff] %v4074_v13  ;;  %v4155_v13 = vmul.f32 (!%p5477_p6), 0.5, %v4153_v25  ;;  %v4142_v38 = vrot.slane (!%p5477_p6), %v4134_v36, %v5894_v54  ;;  %v5760_v25 = vld [vmem:[%s6718_s3 + $0x130] sm:$0xff] (!%p5477_p6)  }
 0x2f9   : > { %v4149_v39 = vrot.slane %v4135_v56, %v5894_v54  ;;  %v5478_v56 = vld [vmem:[%s6719_s4] ss:$0 sm:$0xff] }
 0x2fb   : > { %v4150_v44 = vcombine.low %v4142_v38, %v4149_v39 }
 0x2ff   : > { %v4082_v51 = vld [vmem:[#allocation2 + $0x8] sm:$0xff] }
 0x300   : > { %v5768_v27 = vpop.eup %5767  ;;  %v4154_v55 = vadd.f32 %v4150_v44, %v4082_v51 }
 0x301   : > { %v4161_v37 = vadd.f32 1.0, %v5768_v27 }
 0x302   : > { %v4158_v58 = vmul.f32 0.70710677, %v4154_v55  ;;  %v4156_v8 = vmul.f32 0.5, %v4154_v55 }
 0x303   : > { %v4163_v40 = vmul.f32 %v4161_v37, %v4155_v13 }
 0x304   : > { %5769 = verf.f32 %v4158_v58 }
 0x305   : > { %v4174_v41 = vrot.slane %v4163_v40, %v5894_v54  ;;  %v4167_v43 = vcombine.high %v4163_v40, %v4163_v40 }
 0x307   : > { %v4182_v46 = vcombine.high %v4174_v41, %v4174_v41  ;;  %v4181_v45 = vrot.slane %v4167_v43, %v5894_v54  ;;  %v4209_v47 = vpack.c.bf16 %v4174_v41, %v4174_v41 }
 0x309   : > { %v4210_v49 = vpack.c.bf16 %v4182_v46, %v4182_v46  ;;  %v4183_v50 = vcombine.high %v4181_v45, %v4181_v45  ;;  %v4211_v17 = vpack.c.bf16 %v4181_v45, %v4181_v45 }
 0x30b   : > { %4768 = vmatprep.mubr.bf16.mxu0 %v4210_v49  ;;  %v4212_v24 = vpack.c.bf16 %v4183_v50, %v4183_v50 }
 0x30c   : > { %4769 = vmatmul.mubr.bf16.vlgmr.msra.gmra.mrb[0].mxu0 %v4209_v47 }
 0x30d   : > { %5593 = vmatpush3.bf16.msra.mxu0 %v5736_v48  ;;  %4808 = vmatprep.mubr.bf16.mxu1 %v4212_v24 }
 0x30e   : > { %4809 = vmatmul.mubr.bf16.vlgmr.msra.gmra.mrb[0].mxu1 %v4211_v17  ;;  %5594 = vmatprep.subr.bf16.mxu0 %v5739_v53  ;;  %v5770_v9 = vpop.eup %5769 }
 0x30f   : > { %5615 = vmatpush3.bf16.msra.mxu1 %v5738_v57  ;;  %v4162_v32 = vadd.f32 1.0, %v5770_v9 }
 0x310   : > { %5616 = vmatprep.subr.bf16.mxu1 %v5741_v10 }
 0x311   : > { %5595 = vmatpush3.bf16.msra.mxu0 %v5740_v59  ;;  %v4164_v15 = vmul.f32 %v4162_v32, %v4156_v8 }
 0x312   : > { %5596 = vmatprep.subr.bf16.mxu0 %v5743_v61 }
 0x313   : > { %5617 = vmatpush3.bf16.msra.mxu1 %v5742_v62  ;;  %v4191_v42 = vrot.slane %v4164_v15, %v5894_v54  ;;  %v4184_v18 = vcombine.high %v4164_v15, %v4164_v15 }
 0x314   : > { %5618 = vmatprep.subr.bf16.mxu1 %v5745_v63 }
 0x315   : > { %5597 = vmatpush3.bf16.msra.mxu0 %v5744_v1  ;;  %v4199_v21 = vcombine.high %v4191_v42, %v4191_v42  ;;  %v4198_v22 = vrot.slane %v4184_v18, %v5894_v54  ;;  %v5762_v54 = vld [vmem:[%s6718_s3 + $0x1b0] sm:$0xff]   ;;  %v4213_v34 = vpack.c.bf16 %v4191_v42, %v4191_v42 }
 0x316   : > { %5598 = vmatprep.subr.bf16.mxu0 %v5747_v2 }
 0x317   : > { %5619 = vmatpush3.bf16.msra.mxu1 %v5746_v4  ;;  %v4214_v28 = vpack.c.bf16 %v4199_v21, %v4199_v21  ;;  %v4200_v52 = vcombine.high %v4198_v22, %v4198_v22  ;;  %v4215_v0 = vpack.c.bf16 %v4198_v22, %v4198_v22 }
 0x318   : > { %5620 = vmatprep.subr.bf16.mxu1 %v5749_v26 }
 0x319   : > { %5599 = vmatpush3.bf16.msra.mxu0 %v5748_v5  ;;  %4848 = vmatprep.mubr.bf16.mxu0 %v4214_v28  ;;  %v4216_v29 = vpack.c.bf16 %v4200_v52, %v4200_v52 }
 0x31a   : > { %5600 = vmatprep.subr.bf16.mxu0 %v5751_v6 }
 0x31b   : > { %5621 = vmatpush3.bf16.msra.mxu1 %v5750_v7  ;;  %4888 = vmatprep.mubr.bf16.mxu1 %v4216_v29 }
 0x31c   : > { %5622 = vmatprep.subr.bf16.mxu1 %v5753_v11 }
 0x31d   : > { %5601 = vmatpush3.bf16.msra.mxu0 %v5752_v12 }
 0x31e   : > { %5602 = vmatprep.subr.bf16.mxu0 %v5755_v35 }
 0x31f   : > { %5623 = vmatpush3.bf16.msra.mxu1 %v5754_v14 }
 0x320   : > { %5624 = vmatprep.subr.bf16.mxu1 %v5757_v16 }
 0x321   : > { %5603 = vmatpush3.bf16.msra.mxu0 %v5756_v60 }
 0x322   : > { %5604 = vmatprep.subr.bf16.mxu0 %v5759_v19 }
 0x323   : > { %5625 = vmatpush3.bf16.msra.mxu1 %v5758_v20 }
 0x324   : > { %5626 = vmatprep.subr.bf16.mxu1 %v5761_v23 }
 0x325   : > { %5605 = vmatpush3.bf16.msra.mxu0 %v5760_v25 }
 0x326   : > { %5606 = vmatprep.subr.bf16.mxu0 %v5763_v3 }
 0x327   : > { %5627 = vmatpush3.bf16.msra.mxu1 %v5762_v54 }
 0x328   : > { %5628 = vmatprep.subr.bf16.mxu1 %v5765_v30 }
 0x329   : > { %5607 = vmatpush3.bf16.msra.mxu0 %v5764_v31 }
 0x32b   : > { %5629 = vmatpush3.bf16.msra.mxu1 %v5766_v33 }
 0x32c   : > { %4849 = vmatmul.mubr.bf16.vlgmr.msra.gmra.mrb[4].mxu0 %v4213_v34 }
 0x32e   : > { %4889 = vmatmul.mubr.bf16.vlgmr.msra.gmra.mrb[4].mxu1 %v4215_v0 }
 0x3df   : > { %v5564_v36 = vpop.f32.mrb[0].mxu0 }
 0x3e0   : > { %v5565_v13 = vpop.f32.mrb[1].mxu0 }
 0x3e1   : > { %v5566_v27 = vadd.f32 %v5565_v13, %v5564_v36  ;;  %v5567_v37 = vpop.f32.mrb[2].mxu0  ;;  %v5586_v38 = vpop.f32.mrb[0].mxu1 }
 0x3e2   : > { %v5568_v39 = vpop.f32.mrb[3].mxu0  ;;  %v5587_v40 = vpop.f32.mrb[1].mxu1 }
 0x3e3   : > { %v4771_v41 = vadd.f32 %v5566_v27, %v5478_v56  ;;  %v5588_v43 = vadd.f32 %v5587_v40, %v5586_v38  ;;  %v5589_v44 = vpop.f32.mrb[2].mxu1 }
 0x3e4   : > { %v5590_v46 = vpop.f32.mrb[3].mxu1 }
 0x3e5   : > { %v4811_v45 = vadd.f32 %v5588_v43, %v4771_v41 }
 0x3ff   : > { %v5608_v47 = vpop.f32.mrb[4].mxu0 }
 0x400   : > { %v5609_v48 = vpop.f32.mrb[5].mxu0 }
 0x401   : > { %v5610_v49 = vadd.f32 %v5609_v48, %v5608_v47  ;;  %v5611_v50 = vpop.f32.mrb[6].mxu0  ;;  %v5630_v51 = vpop.f32.mrb[4].mxu1 }
 0x402   : > { %v5612_v17 = vpop.f32.mrb[7].mxu0  ;;  %v5631_v53 = vpop.f32.mrb[5].mxu1 }
 0x403   : > { %v4851_v55 = vadd.f32 %v5610_v49, %v4811_v45  ;;  %v5632_v24 = vadd.f32 %v5631_v53, %v5630_v51  ;;  %v5633_v57 = vpop.f32.mrb[6].mxu1 }
 0x404   : > { %v5634_v10 = vpop.f32.mrb[7].mxu1 }
 0x405   : > { %v4891_v58 = vadd.f32 %v5632_v24, %v4851_v55 }
 0x407   : > { %4896 = vst [vmem:[#allocation3] sm:$0x3] %v4891_v58 }
 0x408 PF: > { %p5688_p7 = scmp.eq.s32.totalorder %s5848_s19, 1  ;;  %s5811_s24 = smov [#allocation3]  }
 0x409   : > { %s4904_s25 = sshll.u32 %s5811_s24, 4  ;;  %s4905_s25 = int_to_ptr.vmem [resolvable:$true] %s4904_s25 }
 0x40a   : > { %s5771_s26 = scalar_lea.vmem %s4905_s25, 32  ;;  %p5778_p11 = scmp.lt.s32.totalorder %s4905_s25, %s4905_s25 }
 0x40b   : > { %p5772_p8 = scmp.ne.s32.totalorder %s4905_s25, %s5771_s26  ;;  %p5779_p12 = scmp.lt.s32.totalorder %s5771_s26, %s5771_s26 }
 0x40d   : > { %p5773_p9 = pnand %p5772_p8, %p5688_p7  ;;  %p5780_p13 = por %p5779_p12, %p5778_p11 }
 0x40f   : > { %p5774_p10 = pneg %p5773_p9 }
 0x411   : > { %p5781_p0 = pnand %p5780_p13, %p5774_p10 }
 0x413   : > { %5784 = shalt.err (!%p5781_p0)
}
 0x414   : > { %s5785_s29 = scalar_lea.hbm %s6720_s5, 32 }
 0x415   : > { %p5786_p1 = scmp.ne.s32.totalorder %s6720_s5, %s5785_s29  ;;  %p5791_p4 = scmp.lt.u32.totalorder %s5785_s29, %s6720_s5 }
 0x417   : > { %p5787_p2 = pnand %p5786_p1, %p5688_p7 }
 0x419   : > { %p5788_p3 = pneg %p5787_p2 }
 0x41b   : > { %p5793_p5 = pnand %p5791_p4, %p5788_p3 }
 0x41d   : > { %5796 = shalt.err (!%p5793_p5)
}
 0x41e   : > { %5685 = dma.vmem_to_hbm [thread:$0]  (%p5688_p7), %s4905_s25, 32, %s6720_s5, [#allocation4]  }
 0x41f   : > { %5802 = dma.done.wait (%p5688_p7), [#allocation4], 32  }
 0x420   : > { %5804 = vsyncadd (%p5688_p7), [#allocation4], 4294967264 }
 0x421 PF: > { %s16_s18 = sadd.s32 1, %s5807_s18  }
 0x422   : > { %p13_p6 = scmp.ge.s32.totalorder %s16_s18, 4  }
 0x424   :  { %15 = sbr.rel (!%p13_p6) target bundleno = 1 (0x1), region = 78 }
 0x42b   :  { %4917 = vsyncpa [#allocation4], 1 }
 0x42c   :  { %4919 = vsyncpa [#allocation4 + $0x1], 1 }

</bundles_post_ra>
